<compile_context>
chip_gen: v6e
topology: v6e:2x2x1
jax: 0.10.0
libtpu: 0.0.40
codegen_flags: <defaults>
</compile_context>

<pallas_src>
import functools

import jax
import jax.numpy as jnp
from jax import lax
from jax.experimental import pallas as pl
from jax.experimental.pallas import tpu as pltpu


def _bottleneck_kernel(x_ref, w1_ref, b1_ref, w3_ref, b3_ref, w2_ref, b2_ref,
                       o_ref, h1pad_ref, col_ref, *, shortcut: bool, padl: int):
    # x_ref:     (1, H, W, Cin)        bf16  one image
    # w1_ref:    (Cin, Cm)             bf16  pwConv1 (BN folded)
    # b1_ref:    (1, Cm)               f32
    # w3_ref:    (9*Cm, Cm)            bf16  3x3 conv, im2col layout (ky,kx,ci)
    # b3_ref:    (1, Cm)               f32
    # w2_ref:    (Cm, Cout)            bf16  pwConv2 (BN folded)
    # b2_ref:    (1, Cout)             f32
    # o_ref:     (1, H, W, Cout)       f32
    # h1pad_ref: (H+2, padl+W+1, Cm)   bf16  padded pwConv1 activation
    # col_ref:   (H, W, 9*Cm)          bf16  im2col slab
    _, H, W, Cin = x_ref.shape
    Cm = w1_ref.shape[1]
    Cout = w2_ref.shape[1]
    PADW = h1pad_ref.shape[1]

    # ---- Stage 0: zero only the 4 halo strips actually read by the 3x3 taps.
    # The interior (rows 1..H, cols padl..padl+W-1) is fully overwritten below;
    # columns < padl-1 and > padl+W are never read.
    zrow = jnp.zeros((1, PADW, Cm), h1pad_ref.dtype)
    h1pad_ref[0:1, :, :] = zrow                       # top halo row
    h1pad_ref[H + 1:H + 2, :, :] = zrow               # bottom halo row
    zcol = jnp.zeros((H + 2, 1, Cm), h1pad_ref.dtype)
    h1pad_ref[:, padl - 1:padl, :] = zcol             # left halo column
    h1pad_ref[:, padl + W:padl + W + 1, :] = zcol     # right halo column

    # ---- Stage 1: pwConv1 (1x1) + folded BN + ReLU as one MXU matmul.
    # Interior is stored at a sublane-aligned column (padl) of the bf16 buffer.
    x_full = x_ref[0].reshape(H * W, Cin)                              # bf16
    h1 = jnp.dot(x_full, w1_ref[...], preferred_element_type=jnp.float32)
    h1 = jnp.maximum(h1 + b1_ref[...], 0.0)
    h1pad_ref[1:H + 1, padl:padl + W, :] = (
        h1.reshape(H, W, Cm).astype(h1pad_ref.dtype))

    # ---- Stage 2: im2col (9 static shifted copies, lane-dense Cm-wide stores)
    # then ONE MXU matmul with K = 9*Cm.
    for ky in range(3):
        for kx in range(3):
            tap = ky * 3 + kx
            c0 = padl - 1 + kx
            col_ref[:, :, tap * Cm:(tap + 1) * Cm] = \
                h1pad_ref[ky:ky + H, c0:c0 + W, :]
    col = col_ref[...].reshape(H * W, 9 * Cm)
    h2 = jnp.dot(col, w3_ref[...], preferred_element_type=jnp.float32)
    h2 = jnp.maximum(h2 + b3_ref[...], 0.0)

    # ---- Stage 3: pwConv2 (1x1) + folded BN (+ residual, kept in f32).
    out = jnp.dot(h2.astype(jnp.bfloat16), w2_ref[...],
                  preferred_element_type=jnp.float32) + b2_ref[...]
    if shortcut:
        out = out + x_full.astype(jnp.float32)   # bf16-rounded x, f32 add
    o_ref[0] = out.reshape(H, W, Cout).astype(o_ref.dtype)


def _fold_bn(w, gamma, beta, mean, var, eps=1e-5):
    """Fold BN (inference form) into a conv whose out-channels are the LAST axis of w."""
    scale = gamma / jnp.sqrt(var + eps)
    w_eff = w * scale                      # broadcast over last (out-channel) axis
    b_eff = beta - mean * scale
    return w_eff.astype(jnp.float32), b_eff.reshape(1, -1).astype(jnp.float32)


def bottleneck_pallas_nhwc(x_nhwc, params, *, stride=1):
    """Fused bottleneck, channels-last. x_nhwc: (N, H, W, Cin) float."""
    assert stride == 1, "kernel implements stride=1 (the residual/shortcut case)"
    N, H, W, Cin = x_nhwc.shape

    w1, b1 = _fold_bn(params["w1"], *params["bn1"])   # (Cin, Cm), (1, Cm)
    w3, b3 = _fold_bn(params["w3"], *params["bn3"])   # (3,3,Cm,Cm), (1, Cm)
    w2, b2 = _fold_bn(params["w2"], *params["bn2"])   # (Cm, Cout), (1, Cout)
    Cm = w1.shape[1]
    Cout = w2.shape[1]
    shortcut = (stride == 1) and (Cin == Cout)

    # bf16 MXU operands (f32 accumulation inside the kernel); biases stay f32.
    w1_bf = w1.astype(jnp.bfloat16)
    w3_bf = w3.reshape(9 * Cm, Cm).astype(jnp.bfloat16)  # im2col weight layout
    w2_bf = w2.astype(jnp.bfloat16)
    x_bf = x_nhwc.astype(jnp.bfloat16)                    # halves HBM read / VMEM

    PADL = 8                 # sublane-aligned interior column of the padded buffer
    PADW = PADL + W + 1

    def full(a):
        return pl.BlockSpec(a.shape, lambda n: (0,) * a.ndim)

    out = pl.pallas_call(
        functools.partial(_bottleneck_kernel, shortcut=shortcut, padl=PADL),
        out_shape=jax.ShapeDtypeStruct((N, H, W, Cout), jnp.float32),
        grid_spec=pltpu.PrefetchScalarGridSpec(
            num_scalar_prefetch=0,
            grid=(N,),                       # one image per grid step
            in_specs=[
                pl.BlockSpec((1, H, W, Cin), lambda n: (n, 0, 0, 0)),
                full(w1_bf), full(b1), full(w3_bf), full(b3), full(w2_bf), full(b2),
            ],
            out_specs=pl.BlockSpec((1, H, W, Cout), lambda n: (n, 0, 0, 0)),
            scratch_shapes=[
                pltpu.VMEM((H + 2, PADW, Cm), jnp.bfloat16),   # padded pwConv1 act
                pltpu.VMEM((H, W, 9 * Cm), jnp.bfloat16),      # im2col slab
            ],
        ),
        compiler_params=pltpu.CompilerParams(
            # Single independent batch axis -> megacore sharding on v7x.
            dimension_semantics=("parallel",)),
    )(x_bf, w1_bf, b1, w3_bf, b3, w2_bf, b2)
    return out


def bottleneck_pallas(x_nchw, params, *, stride=1):
    """Drop-in NCHW wrapper (PyTorch layout). Prefer the NHWC entry point."""
    x_nhwc = jnp.transpose(x_nchw, (0, 2, 3, 1))
    out = bottleneck_pallas_nhwc(x_nhwc, params, stride=stride)
    return jnp.transpose(out, (0, 3, 1, 2))


def bottleneck_ref_nhwc(x_nhwc, params, *, stride=1, mxu_dtype=jnp.float32):
    """Pure-JAX NHWC reference mirroring the PyTorch forward.

    mxu_dtype=jnp.bfloat16 mimics the kernel's bf16 operands (x is rounded to
    bf16 once, as the kernel DMAs it) with f32 accumulation, so the comparison
    isolates structural correctness.
    """
    w1, b1 = _fold_bn(params["w1"], *params["bn1"])
    w3, b3 = _fold_bn(params["w3"], *params["bn3"])
    w2, b2 = _fold_bn(params["w2"], *params["bn2"])
    x = x_nhwc.astype(mxu_dtype).astype(jnp.float32)
    cast = lambda a: a.astype(mxu_dtype)

    h1 = jax.nn.relu(jnp.einsum("nhwc,cd->nhwd", cast(x), cast(w1),
                                preferred_element_type=jnp.float32) + b1[0])
    h2 = lax.conv_general_dilated(
        cast(h1), cast(w3), window_strides=(stride, stride), padding="SAME",
        dimension_numbers=("NHWC", "HWIO", "NHWC"),
        preferred_element_type=jnp.float32)
    h2 = jax.nn.relu(h2 + b3[0])
    out = jnp.einsum("nhwc,cd->nhwd", cast(h2), cast(w2),
                     preferred_element_type=jnp.float32) + b2[0]
    if stride == 1 and x.shape[-1] == out.shape[-1]:
        out = out + x
    return out


def make_params(key, in_channels, out_channels, scale=4):
    Cm = out_channels // scale
    ks = jax.random.split(key, 6)
    mk_bn = lambda k, c: (
        1.0 + 0.1 * jax.random.normal(jax.random.fold_in(k, 0), (c,), jnp.float32),  # gamma
        0.05 * jax.random.normal(jax.random.fold_in(k, 1), (c,), jnp.float32),       # beta
        0.05 * jax.random.normal(jax.random.fold_in(k, 2), (c,), jnp.float32),       # running_mean
        0.5 + jax.random.uniform(jax.random.fold_in(k, 3), (c,), jnp.float32),       # running_var
    )
    return {
        "w1": 0.1 * jax.random.normal(ks[0], (in_channels, Cm), jnp.float32),
        "bn1": mk_bn(ks[1], Cm),
        "w3": 0.1 * jax.random.normal(ks[2], (3, 3, Cm, Cm), jnp.float32),
        "bn3": mk_bn(ks[3], Cm),
        "w2": 0.1 * jax.random.normal(ks[4], (Cm, out_channels), jnp.float32),
        "bn2": mk_bn(ks[5], out_channels),
    }


if __name__ == "__main__":
    key = jax.random.PRNGKey(0)
    # Realistic bottleneck width so every matmul / store is lane-dense:
    # Cin = Cout = 512, scale=4 -> Cm = 128 (im2col K = 9*Cm = 1152 = 9*128).
    # stride=1 with in==out channels -> residual shortcut, like the PyTorch module.
    N, C, H, W = 2, 512, 16, 16
    kx_, kp = jax.random.split(key)
    # Channels-last input (the NCHW wrapper above gives PyTorch-layout parity).
    x = jax.random.normal(kx_, (N, H, W, C), jnp.float32)
    params = make_params(kp, in_channels=C, out_channels=C, scale=4)

    out = jax.block_until_ready(bottleneck_pallas_nhwc(x, params, stride=1))

    # Reference with matched bf16 MXU precision (f32 accumulation).
    ref = jax.block_until_ready(
        bottleneck_ref_nhwc(x, params, stride=1, mxu_dtype=jnp.bfloat16))

    assert out.shape == (N, H, W, C)
    max_err = float(jnp.max(jnp.abs(out - ref)))
    assert jnp.allclose(out, ref, rtol=1e-2, atol=1e-2), max_err
    print("KERNEL_OK")
</pallas_src>

<mosaic_0001>
module attributes {stable_mosaic.version = 11 : i64} {
  func.func @_bottleneck_kernel(%arg0: i32, %arg1: memref<1x16x16x512xbf16, #tpu.memory_space<vmem>>, %arg2: memref<512x128xbf16, #tpu.memory_space<vmem>>, %arg3: memref<1x128xf32, #tpu.memory_space<vmem>>, %arg4: memref<1152x128xbf16, #tpu.memory_space<vmem>>, %arg5: memref<1x128xf32, #tpu.memory_space<vmem>>, %arg6: memref<128x512xbf16, #tpu.memory_space<vmem>>, %arg7: memref<1x512xf32, #tpu.memory_space<vmem>>, %arg8: memref<1x16x16x512xf32, #tpu.memory_space<vmem>>, %arg9: memref<18x25x128xbf16, #tpu.memory_space<vmem>>, %arg10: memref<16x16x1152xbf16, #tpu.memory_space<vmem>>) attributes {dimension_semantics = [#tpu.dimension_semantics<parallel>], iteration_bounds = array<i64: 2>, scalar_prefetch = 0 : i64, scratch_operands = 2 : i64, tpu.core_type = #tpu.core_type<tc>, window_params = [{transform_indices = @transform_0, window_bounds = array<i64: 1, 16, 16, 512>}, {pipeline_mode = #tpu.pipeline_mode<synchronous>, transform_indices = @transform_1, window_bounds = array<i64: 512, 128>}, {pipeline_mode = #tpu.pipeline_mode<synchronous>, transform_indices = @transform_2, window_bounds = array<i64: 1, 128>}, {pipeline_mode = #tpu.pipeline_mode<synchronous>, transform_indices = @transform_3, window_bounds = array<i64: 1152, 128>}, {pipeline_mode = #tpu.pipeline_mode<synchronous>, transform_indices = @transform_4, window_bounds = array<i64: 1, 128>}, {pipeline_mode = #tpu.pipeline_mode<synchronous>, transform_indices = @transform_5, window_bounds = array<i64: 128, 512>}, {pipeline_mode = #tpu.pipeline_mode<synchronous>, transform_indices = @transform_6, window_bounds = array<i64: 1, 512>}, {transform_indices = @transform_7, window_bounds = array<i64: 1, 16, 16, 512>}]} {
    %cst = arith.constant 0.000000e+00 : bf16
    %0 = vector.broadcast %cst : bf16 to vector<1x25x128xbf16>
    %c0 = arith.constant 0 : index
    %c0_0 = arith.constant 0 : index
    %c0_1 = arith.constant 0 : index
    %1 = vector.load %arg9[%c0, %c0_0, %c0_1] : memref<18x25x128xbf16, #tpu.memory_space<vmem>>, vector<1x25x128xbf16>
    tpu.vector_store %arg9[%c0, %c0_0, %c0_1], %0 {strides = array<i32>} : memref<18x25x128xbf16, #tpu.memory_space<vmem>>, vector<1x25x128xbf16>,
    %c17 = arith.constant 17 : index
    %c0_2 = arith.constant 0 : index
    %c0_3 = arith.constant 0 : index
    %2 = vector.load %arg9[%c17, %c0_2, %c0_3] : memref<18x25x128xbf16, #tpu.memory_space<vmem>>, vector<1x25x128xbf16>
    tpu.vector_store %arg9[%c17, %c0_2, %c0_3], %0 {strides = array<i32>} : memref<18x25x128xbf16, #tpu.memory_space<vmem>>, vector<1x25x128xbf16>,
    %cst_4 = arith.constant 0.000000e+00 : bf16
    %3 = vector.broadcast %cst_4 : bf16 to vector<18x1x128xbf16>
    %c0_5 = arith.constant 0 : index
    %c7 = arith.constant 7 : index
    %c0_6 = arith.constant 0 : index
    %4 = vector.load %arg9[%c0_5, %c7, %c0_6] : memref<18x25x128xbf16, #tpu.memory_space<vmem>>, vector<18x1x128xbf16>
    tpu.vector_store %arg9[%c0_5, %c7, %c0_6], %3 {strides = array<i32>} : memref<18x25x128xbf16, #tpu.memory_space<vmem>>, vector<18x1x128xbf16>,
    %c0_7 = arith.constant 0 : index
    %c24 = arith.constant 24 : index
    %c0_8 = arith.constant 0 : index
    %5 = vector.load %arg9[%c0_7, %c24, %c0_8] : memref<18x25x128xbf16, #tpu.memory_space<vmem>>, vector<18x1x128xbf16>
    tpu.vector_store %arg9[%c0_7, %c24, %c0_8], %3 {strides = array<i32>} : memref<18x25x128xbf16, #tpu.memory_space<vmem>>, vector<18x1x128xbf16>,
    %c0_9 = arith.constant 0 : index
    %c0_10 = arith.constant 0 : index
    %c0_11 = arith.constant 0 : index
    %c0_12 = arith.constant 0 : index
    %6 = vector.load %arg1[%c0_9, %c0_10, %c0_11, %c0_12] : memref<1x16x16x512xbf16, #tpu.memory_space<vmem>>, vector<1x16x16x512xbf16>
    %7 = vector.shape_cast %6 : vector<1x16x16x512xbf16> to vector<16x16x512xbf16>
    %8 = vector.shape_cast %7 : vector<16x16x512xbf16> to vector<256x512xbf16>
    %c0_13 = arith.constant 0 : index
    %c0_14 = arith.constant 0 : index
    %9 = vector.load %arg2[%c0_13, %c0_14] : memref<512x128xbf16, #tpu.memory_space<vmem>>, vector<512x128xbf16>
    %cst_15 = arith.constant dense<0.000000e+00> : vector<256x128xf32>
    %10 = tpu.matmul %8, %9, %cst_15 {dimension_numbers = #tpu.dot_dimension_numbers<[1], [0], [0], [1], [0, 0, 1, 1], [], []>} : vector<256x512xbf16>, vector<512x128xbf16>, vector<256x128xf32> -> vector<256x128xf32>
    %c0_16 = arith.constant 0 : index
    %c0_17 = arith.constant 0 : index
    %11 = vector.load %arg3[%c0_16, %c0_17] : memref<1x128xf32, #tpu.memory_space<vmem>>, vector<1x128xf32>
    %12 = vector.broadcast %11 : vector<1x128xf32> to vector<256x128xf32>
    %13 = arith.addf %10, %12 : vector<256x128xf32>
    %cst_18 = arith.constant 0.000000e+00 : f32
    %14 = vector.broadcast %cst_18 : f32 to vector<256x128xf32>
    %15 = arith.maximumf %13, %14 : vector<256x128xf32>
    %16 = vector.shape_cast %15 : vector<256x128xf32> to vector<16x16x128xf32>
    %17 = arith.truncf %16 : vector<16x16x128xf32> to vector<16x16x128xbf16>
    %c1 = arith.constant 1 : index
    %c8 = arith.constant 8 : index
    %c0_19 = arith.constant 0 : index
    %18 = vector.load %arg9[%c1, %c8, %c0_19] : memref<18x25x128xbf16, #tpu.memory_space<vmem>>, vector<16x16x128xbf16>
    tpu.vector_store %arg9[%c1, %c8, %c0_19], %17 {strides = array<i32>} : memref<18x25x128xbf16, #tpu.memory_space<vmem>>, vector<16x16x128xbf16>,
    %c0_20 = arith.constant 0 : index
    %c7_21 = arith.constant 7 : index
    %c0_22 = arith.constant 0 : index
    %19 = vector.load %arg9[%c0_20, %c7_21, %c0_22] : memref<18x25x128xbf16, #tpu.memory_space<vmem>>, vector<16x16x128xbf16>
    %c0_23 = arith.constant 0 : index
    %c0_24 = arith.constant 0 : index
    %c0_25 = arith.constant 0 : index
    %20 = vector.load %arg10[%c0_23, %c0_24, %c0_25] : memref<16x16x1152xbf16, #tpu.memory_space<vmem>>, vector<16x16x128xbf16>
    tpu.vector_store %arg10[%c0_23, %c0_24, %c0_25], %19 {strides = array<i32>} : memref<16x16x1152xbf16, #tpu.memory_space<vmem>>, vector<16x16x128xbf16>,
    %c0_26 = arith.constant 0 : index
    %c8_27 = arith.constant 8 : index
    %c0_28 = arith.constant 0 : index
    %21 = vector.load %arg9[%c0_26, %c8_27, %c0_28] : memref<18x25x128xbf16, #tpu.memory_space<vmem>>, vector<16x16x128xbf16>
    %c0_29 = arith.constant 0 : index
    %c0_30 = arith.constant 0 : index
    %c128 = arith.constant 128 : index
    %22 = vector.load %arg10[%c0_29, %c0_30, %c128] : memref<16x16x1152xbf16, #tpu.memory_space<vmem>>, vector<16x16x128xbf16>
    tpu.vector_store %arg10[%c0_29, %c0_30, %c128], %21 {strides = array<i32>} : memref<16x16x1152xbf16, #tpu.memory_space<vmem>>, vector<16x16x128xbf16>,
    %c0_31 = arith.constant 0 : index
    %c9 = arith.constant 9 : index
    %c0_32 = arith.constant 0 : index
    %23 = vector.load %arg9[%c0_31, %c9, %c0_32] : memref<18x25x128xbf16, #tpu.memory_space<vmem>>, vector<16x16x128xbf16>
    %c0_33 = arith.constant 0 : index
    %c0_34 = arith.constant 0 : index
    %c256 = arith.constant 256 : index
    %24 = vector.load %arg10[%c0_33, %c0_34, %c256] : memref<16x16x1152xbf16, #tpu.memory_space<vmem>>, vector<16x16x128xbf16>
    tpu.vector_store %arg10[%c0_33, %c0_34, %c256], %23 {strides = array<i32>} : memref<16x16x1152xbf16, #tpu.memory_space<vmem>>, vector<16x16x128xbf16>,
    %c1_35 = arith.constant 1 : index
    %c7_36 = arith.constant 7 : index
    %c0_37 = arith.constant 0 : index
    %25 = vector.load %arg9[%c1_35, %c7_36, %c0_37] : memref<18x25x128xbf16, #tpu.memory_space<vmem>>, vector<16x16x128xbf16>
    %c0_38 = arith.constant 0 : index
    %c0_39 = arith.constant 0 : index
    %c384 = arith.constant 384 : index
    %26 = vector.load %arg10[%c0_38, %c0_39, %c384] : memref<16x16x1152xbf16, #tpu.memory_space<vmem>>, vector<16x16x128xbf16>
    tpu.vector_store %arg10[%c0_38, %c0_39, %c384], %25 {strides = array<i32>} : memref<16x16x1152xbf16, #tpu.memory_space<vmem>>, vector<16x16x128xbf16>,
    %c1_40 = arith.constant 1 : index
    %c8_41 = arith.constant 8 : index
    %c0_42 = arith.constant 0 : index
    %27 = vector.load %arg9[%c1_40, %c8_41, %c0_42] : memref<18x25x128xbf16, #tpu.memory_space<vmem>>, vector<16x16x128xbf16>
    %c0_43 = arith.constant 0 : index
    %c0_44 = arith.constant 0 : index
    %c512 = arith.constant 512 : index
    %28 = vector.load %arg10[%c0_43, %c0_44, %c512] : memref<16x16x1152xbf16, #tpu.memory_space<vmem>>, vector<16x16x128xbf16>
    tpu.vector_store %arg10[%c0_43, %c0_44, %c512], %27 {strides = array<i32>} : memref<16x16x1152xbf16, #tpu.memory_space<vmem>>, vector<16x16x128xbf16>,
    %c1_45 = arith.constant 1 : index
    %c9_46 = arith.constant 9 : index
    %c0_47 = arith.constant 0 : index
    %29 = vector.load %arg9[%c1_45, %c9_46, %c0_47] : memref<18x25x128xbf16, #tpu.memory_space<vmem>>, vector<16x16x128xbf16>
    %c0_48 = arith.constant 0 : index
    %c0_49 = arith.constant 0 : index
    %c640 = arith.constant 640 : index
    %30 = vector.load %arg10[%c0_48, %c0_49, %c640] : memref<16x16x1152xbf16, #tpu.memory_space<vmem>>, vector<16x16x128xbf16>
    tpu.vector_store %arg10[%c0_48, %c0_49, %c640], %29 {strides = array<i32>} : memref<16x16x1152xbf16, #tpu.memory_space<vmem>>, vector<16x16x128xbf16>,
    %c2 = arith.constant 2 : index
    %c7_50 = arith.constant 7 : index
    %c0_51 = arith.constant 0 : index
    %31 = vector.load %arg9[%c2, %c7_50, %c0_51] : memref<18x25x128xbf16, #tpu.memory_space<vmem>>, vector<16x16x128xbf16>
    %c0_52 = arith.constant 0 : index
    %c0_53 = arith.constant 0 : index
    %c768 = arith.constant 768 : index
    %32 = vector.load %arg10[%c0_52, %c0_53, %c768] : memref<16x16x1152xbf16, #tpu.memory_space<vmem>>, vector<16x16x128xbf16>
    tpu.vector_store %arg10[%c0_52, %c0_53, %c768], %31 {strides = array<i32>} : memref<16x16x1152xbf16, #tpu.memory_space<vmem>>, vector<16x16x128xbf16>,
    %c2_54 = arith.constant 2 : index
    %c8_55 = arith.constant 8 : index
    %c0_56 = arith.constant 0 : index
    %33 = vector.load %arg9[%c2_54, %c8_55, %c0_56] : memref<18x25x128xbf16, #tpu.memory_space<vmem>>, vector<16x16x128xbf16>
    %c0_57 = arith.constant 0 : index
    %c0_58 = arith.constant 0 : index
    %c896 = arith.constant 896 : index
    %34 = vector.load %arg10[%c0_57, %c0_58, %c896] : memref<16x16x1152xbf16, #tpu.memory_space<vmem>>, vector<16x16x128xbf16>
    tpu.vector_store %arg10[%c0_57, %c0_58, %c896], %33 {strides = array<i32>} : memref<16x16x1152xbf16, #tpu.memory_space<vmem>>, vector<16x16x128xbf16>,
    %c2_59 = arith.constant 2 : index
    %c9_60 = arith.constant 9 : index
    %c0_61 = arith.constant 0 : index
    %35 = vector.load %arg9[%c2_59, %c9_60, %c0_61] : memref<18x25x128xbf16, #tpu.memory_space<vmem>>, vector<16x16x128xbf16>
    %c0_62 = arith.constant 0 : index
    %c0_63 = arith.constant 0 : index
    %c1024 = arith.constant 1024 : index
    %36 = vector.load %arg10[%c0_62, %c0_63, %c1024] : memref<16x16x1152xbf16, #tpu.memory_space<vmem>>, vector<16x16x128xbf16>
    tpu.vector_store %arg10[%c0_62, %c0_63, %c1024], %35 {strides = array<i32>} : memref<16x16x1152xbf16, #tpu.memory_space<vmem>>, vector<16x16x128xbf16>,
    %c0_64 = arith.constant 0 : index
    %c0_65 = arith.constant 0 : index
    %c0_66 = arith.constant 0 : index
    %37 = vector.load %arg10[%c0_64, %c0_65, %c0_66] : memref<16x16x1152xbf16, #tpu.memory_space<vmem>>, vector<16x16x1152xbf16>
    %38 = vector.shape_cast %37 : vector<16x16x1152xbf16> to vector<256x1152xbf16>
    %c0_67 = arith.constant 0 : index
    %c0_68 = arith.constant 0 : index
    %39 = vector.load %arg4[%c0_67, %c0_68] : memref<1152x128xbf16, #tpu.memory_space<vmem>>, vector<1152x128xbf16>
    %cst_69 = arith.constant dense<0.000000e+00> : vector<256x128xf32>
    %40 = tpu.matmul %38, %39, %cst_69 {dimension_numbers = #tpu.dot_dimension_numbers<[1], [0], [0], [1], [0, 0, 1, 1], [], []>} : vector<256x1152xbf16>, vector<1152x128xbf16>, vector<256x128xf32> -> vector<256x128xf32>
    %c0_70 = arith.constant 0 : index
    %c0_71 = arith.constant 0 : index
    %41 = vector.load %arg5[%c0_70, %c0_71] : memref<1x128xf32, #tpu.memory_space<vmem>>, vector<1x128xf32>
    %42 = vector.broadcast %41 : vector<1x128xf32> to vector<256x128xf32>
    %43 = arith.addf %40, %42 : vector<256x128xf32>
    %cst_72 = arith.constant 0.000000e+00 : f32
    %44 = vector.broadcast %cst_72 : f32 to vector<256x128xf32>
    %45 = arith.maximumf %43, %44 : vector<256x128xf32>
    %46 = arith.truncf %45 : vector<256x128xf32> to vector<256x128xbf16>
    %c0_73 = arith.constant 0 : index
    %c0_74 = arith.constant 0 : index
    %47 = vector.load %arg6[%c0_73, %c0_74] : memref<128x512xbf16, #tpu.memory_space<vmem>>, vector<128x512xbf16>
    %cst_75 = arith.constant dense<0.000000e+00> : vector<256x512xf32>
    %48 = tpu.matmul %46, %47, %cst_75 {dimension_numbers = #tpu.dot_dimension_numbers<[1], [0], [0], [1], [0, 0, 1, 1], [], []>} : vector<256x128xbf16>, vector<128x512xbf16>, vector<256x512xf32> -> vector<256x512xf32>
    %c0_76 = arith.constant 0 : index
    %c0_77 = arith.constant 0 : index
    %49 = vector.load %arg7[%c0_76, %c0_77] : memref<1x512xf32, #tpu.memory_space<vmem>>, vector<1x512xf32>
    %50 = vector.broadcast %49 : vector<1x512xf32> to vector<256x512xf32>
    %51 = arith.addf %48, %50 : vector<256x512xf32>
    %52 = arith.extf %8 : vector<256x512xbf16> to vector<256x512xf32>
    %53 = arith.addf %51, %52 : vector<256x512xf32>
    %54 = vector.shape_cast %53 : vector<256x512xf32> to vector<16x16x512xf32>
    %c0_78 = arith.constant 0 : index
    %c0_79 = arith.constant 0 : index
    %c0_80 = arith.constant 0 : index
    %c0_81 = arith.constant 0 : index
    %55 = vector.load %arg8[%c0_78, %c0_79, %c0_80, %c0_81] : memref<1x16x16x512xf32, #tpu.memory_space<vmem>>, vector<1x16x16x512xf32>
    %56 = vector.shape_cast %55 : vector<1x16x16x512xf32> to vector<16x16x512xf32>
    %57 = vector.shape_cast %54 : vector<16x16x512xf32> to vector<1x16x16x512xf32>
    tpu.vector_store %arg8[%c0_78, %c0_79, %c0_80, %c0_81], %57 {strides = array<i32>} : memref<1x16x16x512xf32, #tpu.memory_space<vmem>>, vector<1x16x16x512xf32>,
    return
  }
  func.func @transform_0(%arg0: i32) -> (i32, i32, i32, i32) {
    %c0_i32 = arith.constant 0 : i32
    %c0_i32_0 = arith.constant 0 : i32
    %c0_i32_1 = arith.constant 0 : i32
    %c0_i32_2 = arith.constant 0 : i32
    return %arg0, %c0_i32, %c0_i32_0, %c0_i32_1 : i32, i32, i32, i32
  }
  func.func @transform_1(%arg0: i32) -> (i32, i32) {
    %c0_i32 = arith.constant 0 : i32
    %c0_i32_0 = arith.constant 0 : i32
    %c0_i32_1 = arith.constant 0 : i32
    return %c0_i32, %c0_i32_0 : i32, i32
  }
  func.func @transform_2(%arg0: i32) -> (i32, i32) {
    %c0_i32 = arith.constant 0 : i32
    %c0_i32_0 = arith.constant 0 : i32
    %c0_i32_1 = arith.constant 0 : i32
    return %c0_i32, %c0_i32_0 : i32, i32
  }
  func.func @transform_3(%arg0: i32) -> (i32, i32) {
    %c0_i32 = arith.constant 0 : i32
    %c0_i32_0 = arith.constant 0 : i32
    %c0_i32_1 = arith.constant 0 : i32
    return %c0_i32, %c0_i32_0 : i32, i32
  }
  func.func @transform_4(%arg0: i32) -> (i32, i32) {
    %c0_i32 = arith.constant 0 : i32
    %c0_i32_0 = arith.constant 0 : i32
    %c0_i32_1 = arith.constant 0 : i32
    return %c0_i32, %c0_i32_0 : i32, i32
  }
  func.func @transform_5(%arg0: i32) -> (i32, i32) {
    %c0_i32 = arith.constant 0 : i32
    %c0_i32_0 = arith.constant 0 : i32
    %c0_i32_1 = arith.constant 0 : i32
    return %c0_i32, %c0_i32_0 : i32, i32
  }
  func.func @transform_6(%arg0: i32) -> (i32, i32) {
    %c0_i32 = arith.constant 0 : i32
    %c0_i32_0 = arith.constant 0 : i32
    %c0_i32_1 = arith.constant 0 : i32
    return %c0_i32, %c0_i32_0 : i32, i32
  }
  func.func @transform_7(%arg0: i32) -> (i32, i32, i32, i32) {
    %c0_i32 = arith.constant 0 : i32
    %c0_i32_0 = arith.constant 0 : i32
    %c0_i32_1 = arith.constant 0 : i32
    %c0_i32_2 = arith.constant 0 : i32
    return %arg0, %c0_i32, %c0_i32_0, %c0_i32_1 : i32, i32, i32, i32
  }
}

</mosaic_0001>

<bundles_post_ra>
// kernel: tpu_custom_call.1
= control target key start
LH: loop header
LB: loop body
LE: loop exit
PB: predicated region body
PF: predicated region fallthrough
CT: control target
= control target key end

     0   :  { %s14052_s0 = inlined_call_operand.hbm [shape: bf16[2,16,16,512], index: 0, kind: input, shape index: {}]   ;;  %s14053_s1 = inlined_call_operand.hbm [shape: bf16[512,128], index: 1, kind: input, shape index: {}]   ;;  %s14054_s2 = inlined_call_operand.vmem [shape: f32[1,128], index: 2, kind: input, shape index: {}]   ;;  %s14055_s3 = inlined_call_operand.hbm [shape: bf16[1152,128], index: 3, kind: input, shape index: {}]   ;;  %s14056_s4 = inlined_call_operand.vmem [shape: f32[1,128], index: 4, kind: input, shape index: {}]   ;;  %s14057_s5 = inlined_call_operand.hbm [shape: bf16[128,512], index: 5, kind: input, shape index: {}]   ;;  %s14058_s6 = inlined_call_operand.vmem [shape: f32[1,512], index: 6, kind: input, shape index: {}]   ;;  %s14059_s7 = inlined_call_operand.hbm [shape: f32[2,16,16,512], index: 7, kind: output, shape index: {}]  }
   0x1   :  { %14190 = sst [smem:[#allocation140_spill]] %s14053_s1 }
   0x2   :  { %12 = vsyncpa [#allocation5], 0 }
   0x3   :  { %14 = vsyncpa [#allocation5 + $0x1], 0 }
   0x4   :  { %15 = vsyncpa [#allocation8], 0 }
   0x5   :  { %16 = vsyncpa [#allocation11], 0 }
   0x6   :  { %17 = vsyncpa [#allocation6], 0 }
   0x7   :  { %19 = vsyncpa [#allocation6 + $0x1], 0  ;;  %s10196_s24 = smov 0   ;;  %s10198_s25 = smov 0  }
   0x8   :  { %s10200_s26 = smov 0   ;;  %s10202_s27 = smov 0  }
   0x9 LB: > { %s10217_s28 = sadd.s32 4294967295, %s10142_s27   ;;  %s8141_s29 = sadd.s32 4294967294, %s10142_s27   ;;  %s10142_s27 = sphi %s10202_s27, %s14886_s27   ;;  %s10138_s26 = sphi %s10200_s26, %s14885_s26   ;;  %s10134_s25 = sphi %s10198_s25, %s14884_s25   ;;  %s10130_s24 = sphi %s10196_s24, %s14883_s24  }
   0xa   : > { %p45_p0 = scmp.ne.s32.totalorder %s10134_s25, %s10130_s24  ;;  %p14060_p1 = scmp.eq.s32.totalorder %s10217_s28, 0 }
   0xb   : > { %p201_p3 = scmp.eq.s32.totalorder %s8141_s29, 1  ;;  %p8142_p5 = scmp.ge.s32.totalorder %s10142_s27, 1 }
   0xc   : > { %p10226_p4 = por %p14060_p1, %p45_p0  ;;  %p208_p7 = scmp.lt.s32.totalorder %s10142_s27, 3 }
   0xd   : > { %p10231_p6 = por %p201_p3, %p45_p0  ;;  %s10144_s10 = smov [#allocation7]  }
   0xe   : > { %s14191_s30 = scalar_select %p10226_p4, 1, 0 }
   0xf   : > { %s14192_s8 = scalar_select %p10231_p6, 1, 0 }
  0x10   : > { %p10236_p8 = pnand %p8142_p5, %p208_p7  ;;  %s220_s11 = sshll.u32 %s10144_s10, 4  ;;  %s221_s11 = int_to_ptr.vmem [resolvable:$true] %s220_s11 }
  0x11   : > { %s10145_s13 = smov [#allocation9]   ;;  %s10146_s15 = smov [#allocation10]  }
  0x12   : > { %s14193_s9 = scalar_select %p10236_p8, 1, 0 }
  0x13   : > { %p9397_p9 = pneg %p10236_p8  ;;  %s236_s14 = sshll.u32 %s10145_s13, 4  ;;  %s237_s14 = int_to_ptr.vmem [resolvable:$true] %s236_s14 }
  0x14   : > { %s252_s16 = sshll.u32 %s10146_s15, 4  ;;  %s9975_s17 = scalar_lea.vmem %s221_s11, 4096  ;;  %s253_s16 = int_to_ptr.vmem [resolvable:$true] %s252_s16 }
  0x15   : > { %p10245_p11 = pnand %p9397_p9, %p14060_p1  ;;  %p9976_p13 = scmp.ne.s32.totalorder %s221_s11, %s9975_s17 }
  0x16   : > { %p9983_p5 = scmp.lt.s32.totalorder %s221_s11, %s221_s11  ;;  %p9984_p7 = scmp.lt.s32.totalorder %s9975_s17, %s9975_s17 }
  0x17   : > { %p9966_p12 = pneg %p10245_p11 }
  0x18   : > { %p9985_p9 = por %p9984_p7, %p9983_p5 }
  0x19   : > { %p9978_p0 = pnand %p9976_p13, %p9966_p12 }
  0x1b   : > { %p9979_p3 = pneg %p9978_p0 }
  0x1d   : > { %p9986_p10 = pnand %p9985_p9, %p9979_p3 }
  0x1f   : > { %9989 = shalt.err (!%p9986_p10)
}
  0x20   : > { %s10147_s18 = smov 64   ;;  %s10148_s19 = smov 4  }
  0x21   : > { %s14195_s1 = sld [smem:[#allocation140_spill]]  ;;  %s10001_s22 = scalar_lea.vmem %s237_s14, 9216 }
  0x22   : > { %p10002_p1 = scmp.ne.s32.totalorder %s237_s14, %s10001_s22  ;;  %p10009_p2 = scmp.lt.s32.totalorder %s237_s14, %s237_s14 }
  0x23   : > { %p10010_p6 = scmp.lt.s32.totalorder %s10001_s22, %s10001_s22 }
  0x24   : > { %p10004_p13 = pnand %p10002_p1, %p9966_p12 }
  0x25   : > { %p10011_p5 = por %p10010_p6, %p10009_p2 }
  0x26   : > { %p10005_p0 = pneg %p10004_p13 }
  0x27   : > { %9400 = dma.hbm_to_vmem [thread:$0]  (!%p10245_p11), %s14195_s1, 4096, %s221_s11, [#allocation8], %s10147_s18, %s10147_s18, %s10148_s19  }
  0x28   : > { %p10012_p3 = pnand %p10011_p5, %p10005_p0 }
  0x2a   : > { %10015 = shalt.err (!%p10012_p3)
}
  0x2b   : > { %9403 = dma.hbm_to_vmem [thread:$0]  (!%p10245_p11), %s14055_s3, 9216, %s237_s14, [#allocation8], %s10147_s18, %s10147_s18, %s10148_s19  }
  0x2c   : > { %s10027_s10 = scalar_lea.vmem %s253_s16, 4096  ;;  %p10035_p9 = scmp.lt.s32.totalorder %s253_s16, %s253_s16 }
  0x2d   : > { %p10028_p10 = scmp.ne.s32.totalorder %s253_s16, %s10027_s10  ;;  %p10036_p13 = scmp.lt.s32.totalorder %s10027_s10, %s10027_s10 }
  0x2f   : > { %p10030_p7 = pnand %p10028_p10, %p9966_p12  ;;  %p10037_p4 = por %p10036_p13, %p10035_p9 }
  0x31   : > { %p10031_p1 = pneg %p10030_p7 }
  0x33   : > { %p10038_p2 = pnand %p10037_p4, %p10031_p1 }
  0x35   : > { %10041 = shalt.err (!%p10038_p2)
}
  0x36   : > { %s14062_s11 = smov 256   ;;  %s14063_s13 = smov 16  }
  0x37   : > { %9406 = dma.hbm_to_vmem [thread:$0]  (!%p10245_p11), %s14057_s5, 4096, %s253_s16, [#allocation11], %s14062_s11, %s14062_s11, %s14063_s13  }
  0x38   : > { %s10279_s17 = sadd.s32 1, %s10142_s27   ;;  %s32_s19 = sadd.s32 1, %s10138_s26 }
  0x39   : > { %s29_s18 = ssub.s32 %s10142_s27, %s10279_s17  ;;  %p39_p6 = scmp.ne.s32.totalorder %s10138_s26, %s10134_s25 }
  0x3a   : > { %p30_p4 = scmp.eq.s32.totalorder %s29_s18, 0  ;;  %p40_p12 = scmp.eq.s32.totalorder %s10142_s27, 0 }
  0x3b   : > { %p9418_p0 = scmp.lt.s32.totalorder %s10142_s27, 2  ;;  %p14196_p3 = scmp.eq.s32.totalorder %s10217_s28, 1 }
  0x3c   : > { %s10289_s20 = scalar_select %p30_p4, %s10138_s26, %s32_s19  }
  0x3d   : > { %p41_p5 = por %p40_p12, %p39_p6  ;;  %p10293_p10 = por %p14196_p3, %p39_p6 }
  0x3e   : > { %s269_s21 = sand.u32 1, %s10138_s26   ;;  %s8587_s22 = sshll.u32 %s10142_s27, 13 }
  0x3f   : > { %s14197_s12 = scalar_select %p10293_p10, 1, 0 }
  0x40   : > { %s8147_s16 = sshll.u32 %s269_s21, 9  ;;  %s10302_s10 = scalar_lea.hbm %s14052_s0, %s8587_s22 }
  0x41   : > { %s273_s14 = scalar_lea.vmem [#allocation4], %s8147_s16  ;;  %p10304_p11 = pnand %p9418_p0, %p41_p5 }
  0x42   : > { %s280_s15 = sshll.u32 %s273_s14, 4  ;;  %s10310_s19 = scalar_lea.sflag [#allocation5], %s269_s21  ;;  %s10308_s15 = int_to_ptr.vmem [resolvable:$true] %s280_s15 }
  0x43   : > { %s10042_s11 = scalar_lea.hbm %s10302_s10, 8192  ;;  %p10044_p1 = pneg %p10304_p11 }
  0x44   : > { %p10043_p7 = scmp.ne.s32.totalorder %s10302_s10, %s10042_s11  ;;  %s10047_s16 = scalar_lea.hbm %s14052_s0, 16384 }
  0x45   : > { %p10048_p2 = scmp.lt.s32.totalorder %s10302_s10, %s14052_s0  ;;  %p10049_p4 = scmp.lt.s32.totalorder %s10047_s16, %s10042_s11 }
  0x46   : > { %p10045_p9 = pnand %p10044_p1, %p10043_p7 }
  0x47   : > { %p10050_p6 = por %p10049_p4, %p10048_p2 }
  0x48   : > { %p10046_p13 = pneg %p10045_p9 }
  0x4a   : > { %p10051_p12 = pnand %p10050_p6, %p10046_p13 }
  0x4c   : > { %10054 = shalt.err (!%p10051_p12)
}
  0x4d   : > { %s10055_s21 = scalar_lea.vmem %s10308_s15, 8192  ;;  %s10151_s13 = smov [#allocation4]  }
  0x4e   : > { %p10056_p0 = scmp.ne.s32.totalorder %s10308_s15, %s10055_s21  ;;  %s10060_s1 = sshll.u32 %s10151_s13, 4  ;;  %s10061_s1 = int_to_ptr.vmem [resolvable:$false] %s10060_s1 }
  0x4f   : > { %s10062_s22 = scalar_lea.vmem %s10061_s1, 16384  ;;  %p10063_p7 = scmp.lt.s32.totalorder %s10308_s15, %s10061_s1 }
  0x50   : > { %p10058_p5 = pnand %p10056_p0, %p10044_p1  ;;  %p10064_p9 = scmp.lt.s32.totalorder %s10062_s22, %s10055_s21 }
  0x52   : > { %p10059_p3 = pneg %p10058_p5  ;;  %p10065_p10 = por %p10064_p9, %p10063_p7 }
  0x54   : > { %p10066_p8 = pnand %p10065_p10, %p10059_p3 }
  0x56   : > { %10069 = shalt.err (!%p10066_p8)
}
  0x57   : > { %s14199_s11 = smov 16   ;;  %s14200_s23 = smov 256  }
  0x58   : > { %9410 = dma.hbm_to_vmem [thread:$0]  (!%p10304_p11), %s10302_s10, 8192, %s10308_s15, %s10310_s19, %s14200_s23, %s14200_s23, %s14199_s11  }
  0x59   : > { %p14201_p1 = scmp.ne.s32.totalorder %s14193_s9, 0 }
  0x5b   : > { %292 = sbr.rel (%p14201_p1) target bundleno = 1528 (0x5f8), region = 48 }
  0x60   : > { %s10337_s13 = sand.u32 1, %s10134_s25   ;;  %p14202_p8 = scmp.ne.s32.totalorder %s14191_s30, 0 }
  0x61   : > { %s8151_s1 = sshll.u32 %s10337_s13, 9  ;;  %s295_s16 = scalar_lea.sflag [#allocation5], %s10337_s13 }
  0x62   : > { %s10341_s29 = scalar_lea.vmem [#allocation4], %s8151_s1 }
  0x63   : > { %10113 = dma.done.wait (%p14202_p8), %s295_s16, 8192  }
  0x64   : > { %10115 = vsyncadd (%p14202_p8), %s295_s16, 4294959104  ;;  %p14203_p10 = scmp.eq.s32.totalorder %s10217_s28, 0 }
  0x66   : > { %10117 = dma.done.wait (%p14203_p10), [#allocation8], 13312   ;;  %p14204_p11 = pmov %p14203_p10 }
  0x67   : > { %p14205_p13 = pmov %p14203_p10 }
  0x68   : > { %10119 = vsyncadd (%p14204_p11), [#allocation8], 4294953984 }
  0x69   : > { %10121 = dma.done.wait (%p14205_p13), [#allocation11], 4096   ;;  %p14206_p2 = pmov %p14203_p10 }
  0x6a   : > { %v9465_v0 = vld [vmem:[#allocation7 + $0x78] sm:$0xff]   ;;  %v9467_v2 = vld [vmem:[#allocation7 + $0x70] sm:$0xff]   ;;  %v9469_v4 = vld [vmem:[#allocation7 + $0x68] sm:$0xff]   ;;  %vm358_vm0 = vcmask 1043459   ;;  %vm359_vm1 = vsmask.f32 7950 }
  0x6b   : > { %10123 = vsyncadd (%p14206_p2), [#allocation11], 4294963200  ;;  %v9466_v1 = vld [vmem:[#allocation7 + $0x38] sm:$0xff]   ;;  %9365 = vmatprep.subr.bf16.mxu1 %v9465_v0  ;;  %8621 = vmatprep.subr.bf16.mxu0 %v9465_v0  ;;  %v9468_v3 = vld [vmem:[#allocation7 + $0x30] sm:$0xff]   ;;  %vm1679_vm3 = vsmask.f32 4368 }
  0x6c   : > { %9373 = vmatpush3.bf16.msra.mxu1 %v9466_v1  ;;  %8622 = vmatpush3.bf16.msra.mxu0 %v9466_v1  ;;  %v9470_v5 = vld [vmem:[#allocation7 + $0x28] sm:$0xff]   ;;  %v9471_v6 = vld [vmem:[#allocation7 + $0x60] sm:$0xff]   ;;  %v9473_v8 = vld [vmem:[#allocation7 + $0x58] sm:$0xff]   ;;  %vm346_vm4 = vsmask.f32 256  ;;  %vm345_vm6 = vcmask 1040384  }
  0x6d   : > { %9366 = vmatprep.subr.bf16.mxu1 %v9467_v2  ;;  %8623 = vmatprep.subr.bf16.mxu0 %v9467_v2  ;;  %v9472_v7 = vld [vmem:[#allocation7 + $0x20] sm:$0xff]   ;;  %v9474_v9 = vld [vmem:[#allocation7 + $0x18] sm:$0xff]   ;;  %v9475_v10 = vld [vmem:[#allocation7 + $0x50] sm:$0xff]   ;;  %vm2209_vm8 = vsmask.f32 3328  ;;  %s8155_s16 = sshll.u32 %s10337_s13, 10 }
  0x6e   : > { %v517_v11 = vld [vmem:[%s10341_s29 + $0x180] sm:$0xff]  ;;  %v519_v12 = vld [vmem:[%s10341_s29 + $0x190] sm:$0xff]  ;;  %v9477_v15 = vld [vmem:[#allocation7 + $0x48] sm:$0xff]   ;;  %vm2210_vm9 = vsmask.f32 7440  ;;  %s13688_s30 = scalar_lea.vmem [#allocation12], %s8155_s16 }
  0x6f   : > { %v8206_v13 = vcombine.high %v517_v11, %v519_v12  ;;  %v9476_v14 = vld [vmem:[#allocation7 + $0x10] sm:$0xff]   ;;  %v9478_v16 = vld [vmem:[#allocation7 + $0x8] sm:$0xff]   ;;  %v9479_v17 = vld [vmem:[#allocation7 + $0x40] sm:$0xff]   ;;  %v8205_v22 = vcombine.low %v517_v11, %v519_v12  ;;  %s8039_s9 = sshll.u32 %s13688_s30, 4  ;;  %p14880_p6 = scmp.ne.s32.totalorder %s14197_s12, 0  ;;  %s14005_s9 = int_to_ptr.vmem [resolvable:$true] %s8039_s9 }
  0x70   : > { %9374 = vmatpush3.bf16.msra.mxu1 %v9468_v3  ;;  %8624 = vmatpush3.bf16.msra.mxu0 %v9468_v3  ;;  %v9480_v18 = vld [vmem:[#allocation7] sm:$0xff]   ;;  %v9483_v19 = vld [vmem:[#allocation7 + $0xf8] sm:$0xff]   ;;  %v523_v21 = vld [vmem:[%s10341_s29 + $0x1b0] sm:$0xff]  ;;  %s10070_s19 = scalar_lea.vmem %s14005_s9, 16384  ;;  %s10153_s14 = smov [#allocation12]  }
  0x71   : > { %9367 = vmatprep.subr.bf16.mxu1 %v9469_v4  ;;  %8625 = vmatprep.subr.bf16.mxu0 %v9469_v4  ;;  %v521_v20 = vld [vmem:[%s10341_s29 + $0x1a0] sm:$0xff]  ;;  %v9484_v23 = vld [vmem:[#allocation7 + $0xb8] sm:$0xff]   ;;  %v471_v26 = vld [vmem:[%s10341_s29 + $0x10] sm:$0xff]  ;;  %p10071_p4 = scmp.ne.s32.totalorder %s14005_s9, %s10070_s19  ;;  %s10074_s21 = sshll.u32 %s10153_s14, 4  ;;  %s10075_s21 = int_to_ptr.vmem [resolvable:$false] %s10074_s21 }
  0x72   : > { %1244 = vmatprep.mubr.bf16.mxu1 %v8206_v13  ;;  %v469_v24 = vld [vmem:[%s10341_s29] sm:$0xff]  ;;  %v8210_v25 = vcombine.high %v521_v20, %v523_v21  ;;  %v9485_v27 = vld [vmem:[#allocation7 + $0xf0] sm:$0xff]   ;;  %v9489_v31 = vld [vmem:[#allocation7 + $0xe8] sm:$0xff]   ;;  %v8209_v37 = vcombine.low %v521_v20, %v523_v21  ;;  %s10076_s22 = scalar_lea.vmem %s10075_s21, 32768  ;;  %p10077_p5 = scmp.lt.s32.totalorder %s14005_s9, %s10075_s21 }
  0x73   : > { %v8158_v28 = vcombine.high %v469_v24, %v471_v26  ;;  %v8157_v29 = vcombine.low %v469_v24, %v471_v26  ;;  %v9486_v30 = vld [vmem:[#allocation7 + $0xb0] sm:$0xff]   ;;  %v525_v32 = vld [vmem:[%s10341_s29 + $0x1c0] sm:$0xff]  ;;  %v9490_v40 = vld [vmem:[#allocation7 + $0xa8] sm:$0xff]   ;;  %p10072_p12 = pnand %p10071_p4, %p14880_p6  ;;  %p10078_p3 = scmp.lt.s32.totalorder %s10076_s22, %s10070_s19 }
  0x74   : > { %9375 = vmatpush3.bf16.msra.mxu1 %v9470_v5  ;;  %8626 = vmatpush3.bf16.msra.mxu0 %v9470_v5  ;;  %v527_v33 = vld [vmem:[%s10341_s29 + $0x1d0] sm:$0xff]  ;;  %v473_v34 = vld [vmem:[%s10341_s29 + $0x20] sm:$0xff]  ;;  %v9495_v46 = vld [vmem:[#allocation7 + $0xd8] sm:$0xff]  }
  0x75   : > { %9368 = vmatprep.subr.bf16.mxu1 %v9471_v6  ;;  %8627 = vmatprep.subr.bf16.mxu0 %v9471_v6  ;;  %v475_v35 = vld [vmem:[%s10341_s29 + $0x30] sm:$0xff]  ;;  %v477_v38 = vld [vmem:[%s10341_s29 + $0x40] sm:$0xff]  ;;  %v8214_v41 = vcombine.high %v525_v32, %v527_v33  ;;  %v8213_v49 = vcombine.low %v525_v32, %v527_v33  ;;  %v9496_v52 = vld [vmem:[#allocation7 + $0x98] sm:$0xff]   ;;  %p10073_p0 = pneg %p10072_p12  ;;  %p10079_p7 = por %p10078_p3, %p10077_p5 }
  0x76   : > { %1148 = vmatprep.mubr.bf16.mxu0 %v8158_v28  ;;  %v8162_v36 = vcombine.high %v473_v34, %v475_v35  ;;  %v479_v39 = vld [vmem:[%s10341_s29 + $0x50] sm:$0xff]  ;;  %v9491_v42 = vld [vmem:[#allocation7 + $0xe0] sm:$0xff]   ;;  %v8161_v43 = vcombine.low %v473_v34, %v475_v35  ;;  %v9502_v58 = vld [vmem:[#allocation7 + $0xc8] sm:$0xff]  }
  0x77   : > { %v8166_v44 = vcombine.high %v477_v38, %v479_v39  ;;  %v9492_v45 = vld [vmem:[#allocation7 + $0xa0] sm:$0xff]   ;;  %v531_v48 = vld [vmem:[%s10341_s29 + $0x1f0] sm:$0xff]  ;;  %v8165_v55 = vcombine.low %v477_v38, %v479_v39  ;;  %v470_v59 = vld [vmem:[%s10341_s29 + $0x8] sm:$0xff]  ;;  %p10080_p9 = pnand %p10079_p7, %p10073_p0 }
  0x78   : > { %9376 = vmatpush3.bf16.msra.mxu1 %v9472_v7  ;;  %8628 = vmatpush3.bf16.msra.mxu0 %v9472_v7  ;;  %v529_v47 = vld [vmem:[%s10341_s29 + $0x1e0] sm:$0xff]  ;;  %v483_v51 = vld [vmem:[%s10341_s29 + $0x70] sm:$0xff]  ;;  %v472_v60 = vld [vmem:[%s10341_s29 + $0x18] sm:$0xff] }
  0x79   : > { %9369 = vmatprep.subr.bf16.mxu1 %v9473_v8  ;;  %8629 = vmatprep.subr.bf16.mxu0 %v9473_v8  ;;  %v481_v50 = vld [vmem:[%s10341_s29 + $0x60] sm:$0xff]  ;;  %v8218_v53 = vcombine.high %v529_v47, %v531_v48  ;;  %v9497_v54 = vld [vmem:[#allocation7 + $0xd0] sm:$0xff]   ;;  %v9504_v62 = vld [vmem:[#allocation7 + $0x88] sm:$0xff]   ;;  %v8217_v0 = vcombine.low %v529_v47, %v531_v48  ;;  %v8160_v2 = vcombine.high %v470_v59, %v472_v60 }
  0x7a   : > { %v8170_v56 = vcombine.high %v481_v50, %v483_v51  ;;  %v9498_v57 = vld [vmem:[#allocation7 + $0x90] sm:$0xff]   ;;  %v485_v61 = vld [vmem:[%s10341_s29 + $0x80] sm:$0xff]  ;;  %v8169_v3 = vcombine.low %v481_v50, %v483_v51  ;;  %v9561_v6 = vld [vmem:[#allocation9 + $0x78] sm:$0xff]  }
  0x7b   : > { %v487_v63 = vld [vmem:[%s10341_s29 + $0x90] sm:$0xff]  ;;  %v9505_v1 = vld [vmem:[#allocation7 + $0xc0] sm:$0xff]   ;;  %v9562_v7 = vld [vmem:[#allocation9 + $0x38] sm:$0xff]  }
  0x7c   : > { %9377 = vmatpush3.bf16.msra.mxu1 %v9474_v9  ;;  %8630 = vmatpush3.bf16.msra.mxu0 %v9474_v9  ;;  %v8174_v4 = vcombine.high %v485_v61, %v487_v63  ;;  %v9506_v5 = vld [vmem:[#allocation7 + $0x80] sm:$0xff]   ;;  %v474_v8 = vld [vmem:[%s10341_s29 + $0x28] sm:$0xff]  ;;  %v476_v9 = vld [vmem:[%s10341_s29 + $0x38] sm:$0xff] }
  0x7d   : > { %9370 = vmatprep.subr.bf16.mxu1 %v9475_v10  ;;  %8631 = vmatprep.subr.bf16.mxu0 %v9475_v10  ;;  %v9563_v10 = vld [vmem:[#allocation9 + $0x70] sm:$0xff]   ;;  %v489_v11 = vld [vmem:[%s10341_s29 + $0xa0] sm:$0xff]  ;;  %v478_v20 = vld [vmem:[%s10341_s29 + $0x48] sm:$0xff]  ;;  %v8163_v24 = vcombine.low %v474_v8, %v476_v9 }
  0x7e   : > { %v491_v12 = vld [vmem:[%s10341_s29 + $0xb0] sm:$0xff]  ;;  %v480_v21 = vld [vmem:[%s10341_s29 + $0x58] sm:$0xff]  ;;  %v482_v28 = vld [vmem:[%s10341_s29 + $0x68] sm:$0xff] }
  0x7f   : > { %v9564_v13 = vld [vmem:[#allocation9 + $0x30] sm:$0xff]   ;;  %v8177_v26 = vcombine.low %v489_v11, %v491_v12  ;;  %v8167_v32 = vcombine.low %v478_v20, %v480_v21  ;;  %v501_v38 = vld [vmem:[%s10341_s29 + $0x100] sm:$0xff]  ;;  %vm10423_vm2 = vmand %vm358_vm0, %vm359_vm1 }
  0x80   : > { %9378 = vmatpush3.bf16.msra.mxu1 %v9476_v14  ;;  %8632 = vmatpush3.bf16.msra.mxu0 %v9476_v14  ;;  %v9565_v14 = vld [vmem:[#allocation9 + $0x68] sm:$0xff]   ;;  %v503_v39 = vld [vmem:[%s10341_s29 + $0x110] sm:$0xff]  ;;  %vm10432_vm5 = vmor %vm346_vm4, %vm1679_vm3 }
  0x81   : > { %9371 = vmatprep.subr.bf16.mxu1 %v9477_v15  ;;  %8633 = vmatprep.subr.bf16.mxu0 %v9477_v15  ;;  %v8159_v15 = vcombine.low %v470_v59, %v472_v60  ;;  %v507_v47 = vld [vmem:[%s10341_s29 + $0x130] sm:$0xff]  ;;  %v8189_v50 = vcombine.low %v501_v38, %v503_v39  ;;  %vm10441_vm7 = vmand %vm345_vm6, %vm346_vm4 }
  0x82   : > { %vm10453_vm10 = vmor %vm2209_vm8, %vm2210_vm9 }
  0x84   : > { %9379 = vmatpush3.bf16.msra.mxu1 %v9478_v16  ;;  %8634 = vmatpush3.bf16.msra.mxu0 %v9478_v16  ;;  %v8164_v16 = vcombine.high %v474_v8, %v476_v9  ;;  %v504_v8 = vld [vmem:[%s10341_s29 + $0x118] sm:$0xff] }
  0x85   : > { %9372 = vmatprep.subr.bf16.mxu1 %v9479_v17  ;;  %8635 = vmatprep.subr.bf16.mxu0 %v9479_v17  ;;  %v8173_v17 = vcombine.low %v485_v61, %v487_v63  ;;  %v498_v61 = vld [vmem:[%s10341_s29 + $0xe8] sm:$0xff]  ;;  %v9568_v63 = vld [vmem:[#allocation9 + $0x20] sm:$0xff]  }
  0x88   : > { %9380 = vmatpush3.bf16.msra.mxu1 %v9480_v18  ;;  %8636 = vmatpush3.bf16.msra.mxu0 %v9480_v18  ;;  %v9566_v18 = vld [vmem:[#allocation9 + $0x28] sm:$0xff]  }
  0x89   : > { %8733 = vmatprep.subr.bf16.mxu1 %v9483_v19  ;;  %8845 = vmatprep.subr.bf16.mxu0 %v9561_v6  ;;  %v8178_v19 = vcombine.high %v489_v11, %v491_v12  ;;  %v9569_v6 = vld [vmem:[#allocation9 + $0x58] sm:$0xff]  }
  0x8a   : > { %v9570_v11 = vld [vmem:[#allocation9 + $0x18] sm:$0xff]  }
  0x8b   : > { %1245 = vmatmul.mubr.bf16.vlgmr.msra.gmra.mxu1 %v8205_v22  ;;  %1149 = vmatmul.mubr.bf16.vlgmr.msra.gmra.mxu0 %v8157_v29  ;;  %v493_v22 = vld [vmem:[%s10341_s29 + $0xc0] sm:$0xff]  ;;  %v484_v29 = vld [vmem:[%s10341_s29 + $0x78] sm:$0xff] }
  0x8c   : > { %8734 = vmatpush3.bf16.msra.mxu1 %v9484_v23  ;;  %1252 = vmatprep.mubr.bf16.mxu1 %v8210_v25  ;;  %v495_v23 = vld [vmem:[%s10341_s29 + $0xd0] sm:$0xff]  ;;  %v8168_v25 = vcombine.high %v478_v20, %v480_v21  ;;  %v8172_v33 = vcombine.high %v482_v28, %v484_v29  ;;  %v512_v20 = vld [vmem:[%s10341_s29 + $0x158] sm:$0xff] }
  0x8d   : > { %8735 = vmatprep.subr.bf16.mxu1 %v9485_v27  ;;  %1156 = vmatprep.mubr.bf16.mxu0 %v8162_v36  ;;  %v8182_v27 = vcombine.high %v493_v22, %v495_v23  ;;  %v8181_v34 = vcombine.low %v493_v22, %v495_v23  ;;  %v486_v36 = vld [vmem:[%s10341_s29 + $0x88] sm:$0xff] }
  0x8e   : > { %8846 = vmatpush3.bf16.msra.mxu0 %v9562_v7  ;;  %v502_v7 = vld [vmem:[%s10341_s29 + $0x108] sm:$0xff] }
  0x8f   : > { %8847 = vmatprep.subr.bf16.mxu0 %v9563_v10  ;;  %v8192_v10 = vcombine.high %v502_v7, %v504_v8  ;;  %v514_v23 = vld [vmem:[%s10341_s29 + $0x168] sm:$0xff] }
  0x90   : > { %8736 = vmatpush3.bf16.msra.mxu1 %v9486_v30  ;;  %v497_v30 = vld [vmem:[%s10341_s29 + $0xe0] sm:$0xff] }
  0x91   : > { %8737 = vmatprep.subr.bf16.mxu1 %v9489_v31  ;;  %v499_v31 = vld [vmem:[%s10341_s29 + $0xf0] sm:$0xff] }
  0x92   : > { %8848 = vmatpush3.bf16.msra.mxu0 %v9564_v13  ;;  %v8186_v35 = vcombine.high %v497_v30, %v499_v31  ;;  %v506_v13 = vld [vmem:[%s10341_s29 + $0x128] sm:$0xff] }
  0x93   : > { %1253 = vmatmul.mubr.bf16.gmra.mxu1 %v8209_v37  ;;  %1157 = vmatmul.mubr.bf16.gmra.mxu0 %v8161_v43  ;;  %v488_v37 = vld [vmem:[%s10341_s29 + $0x98] sm:$0xff]  ;;  %v8190_v43 = vcombine.high %v501_v38, %v503_v39  ;;  %v14066_v39 = vmov 0  }
  0x94   : > { %8738 = vmatpush3.bf16.msra.mxu1 %v9490_v40  ;;  %1260 = vmatprep.mubr.bf16.mxu1 %v8214_v41  ;;  %v8171_v40 = vcombine.low %v482_v28, %v484_v29  ;;  %v8176_v41 = vcombine.high %v486_v36, %v488_v37  ;;  %v8175_v48 = vcombine.low %v486_v36, %v488_v37  ;;  %v9576_v28 = vld [vmem:[#allocation9 + $0xb8] sm:$0xff]   ;;  %v9577_v29 = vld [vmem:[#allocation9 + $0xf0] sm:$0xff]   ;;  %v522_v36 = vld [vmem:[%s10341_s29 + $0x1a8] sm:$0xff] }
  0x95   : > { %8739 = vmatprep.subr.bf16.mxu1 %v9491_v42  ;;  %1164 = vmatprep.mubr.bf16.mxu0 %v8166_v44  ;;  %v8185_v42 = vcombine.low %v497_v30, %v499_v31  ;;  %v490_v44 = vld [vmem:[%s10341_s29 + $0xa8] sm:$0xff]  ;;  %v520_v31 = vld [vmem:[%s10341_s29 + $0x198] sm:$0xff]  ;;  %342 = vst [vmem:[#allocation2] sm:$0xf] %v14066_v39  ;;  %343 = vst [vmem:[#allocation2 + $0x4] sm:$0xf] %v14066_v39 }
  0x96   : > { %8849 = vmatprep.subr.bf16.mxu0 %v9565_v14  ;;  %v508_v14 = vld [vmem:[%s10341_s29 + $0x138] sm:$0xff]  ;;  %v518_v30 = vld [vmem:[%s10341_s29 + $0x188] sm:$0xff]  ;;  %344 = vst [vmem:[#allocation2 + $0x8] sm:$0xf] %v14066_v39  ;;  %352 = vst [vmem:[#allocation2 + $0x110] sm:$0xf] %v14066_v39 }
  0x97   : > { %8850 = vmatpush3.bf16.msra.mxu0 %v9566_v18  ;;  %v9572_v18 = vld [vmem:[#allocation9 + $0x10] sm:$0xff]   ;;  %v8195_v21 = vcombine.low %v506_v13, %v508_v14  ;;  %v524_v37 = vld [vmem:[%s10341_s29 + $0x1b8] sm:$0xff]  ;;  %v8207_v38 = vcombine.low %v518_v30, %v520_v31  ;;  %353 = vst [vmem:[#allocation2 + $0x114] sm:$0xf] %v14066_v39  ;;  %354 = vst [vmem:[#allocation2 + $0x118] sm:$0xf] %v14066_v39 }
  0x98   : > { %8740 = vmatpush3.bf16.msra.mxu1 %v9492_v45  ;;  %v492_v45 = vld [vmem:[%s10341_s29 + $0xb8] sm:$0xff] }
  0x99   : > { %8741 = vmatprep.subr.bf16.mxu1 %v9495_v46  ;;  %v505_v46 = vld [vmem:[%s10341_s29 + $0x120] sm:$0xff] }
  0x9a   : > { %v8194_v51 = vcombine.high %v505_v46, %v507_v47  ;;  %v8193_v59 = vcombine.low %v505_v46, %v507_v47  ;;  %v8211_v46 = vcombine.low %v522_v36, %v524_v37 }
  0x9b   : > { %1261 = vmatmul.mubr.bf16.gmra.mxu1 %v8213_v49  ;;  %1165 = vmatmul.mubr.bf16.gmra.mxu0 %v8165_v55  ;;  %v8180_v49 = vcombine.high %v490_v44, %v492_v45  ;;  %v511_v55 = vld [vmem:[%s10341_s29 + $0x150] sm:$0xff] }
  0x9c   : > { %8742 = vmatpush3.bf16.msra.mxu1 %v9496_v52  ;;  %1268 = vmatprep.mubr.bf16.mxu1 %v8218_v53  ;;  %v494_v52 = vld [vmem:[%s10341_s29 + $0xc8] sm:$0xff]  ;;  %v496_v53 = vld [vmem:[%s10341_s29 + $0xd8] sm:$0xff] }
  0x9d   : > { %8743 = vmatprep.subr.bf16.mxu1 %v9497_v54  ;;  %1172 = vmatprep.mubr.bf16.mxu0 %v8170_v56  ;;  %v509_v54 = vld [vmem:[%s10341_s29 + $0x140] sm:$0xff]  ;;  %v8179_v56 = vcombine.low %v490_v44, %v492_v45  ;;  %v14207_v44 = vmov 0 }
  0x9e   : > { %v8198_v60 = vcombine.high %v509_v54, %v511_v55  ;;  %v14208_v44 = vsel %vm10423_vm2, 4294967295, %v14207_v44  ;;  %v361_v45 = vld [vmem:[#allocation2] sm:$0x8] }
  0x9f   : > { %14209 = vst [vmem:[#allocation17_spill] sm:$0xff] %v14208_v44  ;;  %v362_v47 = vsel %vm10423_vm2, 0, %v361_v45 }
  0xa0   : > { %8744 = vmatpush3.bf16.msra.mxu1 %v9498_v57  ;;  %v8184_v57 = vcombine.high %v494_v52, %v496_v53  ;;  %363 = vst [vmem:[#allocation2] sm:$0x8] %v362_v47 }
  0xa1   : > { %8745 = vmatprep.subr.bf16.mxu1 %v9502_v58  ;;  %v9567_v58 = vld [vmem:[#allocation9 + $0x60] sm:$0xff]  }
  0xa2   : > { %8851 = vmatprep.subr.bf16.mxu0 %v9567_v58 }
  0xa3   : > { %1269 = vmatmul.mubr.bf16.gmra.mxu1 %v8217_v0  ;;  %1173 = vmatmul.mubr.bf16.gmra.mxu0 %v8169_v3  ;;  %v513_v0 = vld [vmem:[%s10341_s29 + $0x160] sm:$0xff] }
  0xa4   : > { %8746 = vmatpush3.bf16.msra.mxu1 %v9504_v62  ;;  %1309 = vmatprep.mubr.bf16.mxu1 %v8160_v2  ;;  %v500_v62 = vld [vmem:[%s10341_s29 + $0xf8] sm:$0xff]  ;;  %v8183_v2 = vcombine.low %v494_v52, %v496_v53  ;;  %v1632_v53 = vld [vmem:[#allocation2 + $0x4] sm:$0xf] }
  0xa5   : > { %8747 = vmatprep.subr.bf16.mxu1 %v9505_v1  ;;  %1180 = vmatprep.mubr.bf16.mxu0 %v8174_v4  ;;  %v515_v1 = vld [vmem:[%s10341_s29 + $0x170] sm:$0xff]  ;;  %v8188_v3 = vcombine.high %v498_v61, %v500_v62  ;;  %v8197_v4 = vcombine.low %v509_v54, %v511_v55  ;;  %v8187_v9 = vcombine.low %v498_v61, %v500_v62  ;;  %v532_v52 = vld [vmem:[%s10341_s29 + $0x1f8] sm:$0xff]  ;;  %v1633_v54 = vld [vmem:[#allocation2 + $0x8] sm:$0xf] }
  0xa6   : > { %8852 = vmatpush3.bf16.msra.mxu0 %v9568_v63  ;;  %v8201_v12 = vcombine.low %v513_v0, %v515_v1  ;;  %v9582_v55 = vld [vmem:[#allocation9 + $0xe0] sm:$0xff]  }
  0xa7   : > { %8853 = vmatprep.subr.bf16.mxu0 %v9569_v6  ;;  %v9581_v61 = vld [vmem:[#allocation9 + $0x40] sm:$0xff]  }
  0xa8   : > { %8748 = vmatpush3.bf16.msra.mxu1 %v9506_v5  ;;  %v8202_v5 = vcombine.high %v513_v0, %v515_v1  ;;  %v1690_v0 = vshll.u32 %v1632_v53, 16 }
  0xaa   : > { %8854 = vmatpush3.bf16.msra.mxu0 %v9570_v11  ;;  %v2098_v11 = vld [vmem:[#allocation2 + $0x8] sm:$0xf] }
  0xab   : > { %1310 = vmatmul.mubr.bf16.vlgmr.msra.gmra.mxu1 %v8159_v15  ;;  %1181 = vmatmul.mubr.bf16.gmra.mxu0 %v8173_v17  ;;  %v8191_v15 = vcombine.low %v502_v7, %v504_v8  ;;  %v9571_v17 = vld [vmem:[#allocation9 + $0x50] sm:$0xff]   ;;  %v9584_v7 = vld [vmem:[#allocation9 + $0xa0] sm:$0xff]   ;;  %2130 = vst [vmem:[#allocation3 + $0x28] sm:$0xf] %v2098_v11 }
  0xac   : > { %1317 = vmatprep.mubr.bf16.mxu1 %v8164_v16  ;;  %1188 = vmatprep.mubr.bf16.mxu0 %v8178_v19  ;;  %v8196_v16 = vcombine.high %v506_v13, %v508_v14  ;;  %v510_v19 = vld [vmem:[%s10341_s29 + $0x148] sm:$0xff]  ;;  %v9585_v14 = vld [vmem:[#allocation9 + $0xd8] sm:$0xff]  }
  0xad   : > { %8855 = vmatprep.subr.bf16.mxu0 %v9571_v17  ;;  %v8200_v22 = vcombine.high %v510_v19, %v512_v20  ;;  %v348_v17 = vld [vmem:[#allocation2 + $0xc] sm:$0x1] }
  0xae   : > { %8856 = vmatpush3.bf16.msra.mxu0 %v9572_v18  ;;  %v364_v18 = vld [vmem:[#allocation2 + $0x10] sm:$0x8] }
  0xb3   : > { %1318 = vmatmul.mubr.bf16.gmra.mxu1 %v8163_v24  ;;  %1189 = vmatmul.mubr.bf16.gmra.mxu0 %v8177_v26  ;;  %v516_v24 = vld [vmem:[%s10341_s29 + $0x178] sm:$0xff]  ;;  %v8199_v26 = vcombine.low %v510_v19, %v512_v20  ;;  %v349_v19 = vsel %vm10441_vm7, 0, %v348_v17 }
  0xb4   : > { %1325 = vmatprep.mubr.bf16.mxu1 %v8168_v25  ;;  %1196 = vmatprep.mubr.bf16.mxu0 %v8182_v27  ;;  %v9574_v25 = vld [vmem:[#allocation9 + $0xf8] sm:$0xff]   ;;  %v8204_v27 = vcombine.high %v514_v23, %v516_v24  ;;  %350 = vst [vmem:[#allocation2 + $0xc] sm:$0x1] %v349_v19 }
  0xb5   : > { %8957 = vmatprep.subr.bf16.mxu1 %v9574_v25  ;;  %v9586_v20 = vld [vmem:[#allocation9 + $0x98] sm:$0xff]  }
  0xb6   : > { %8958 = vmatpush3.bf16.msra.mxu1 %v9576_v28  ;;  %v9591_v28 = vld [vmem:[#allocation9 + $0x90] sm:$0xff]  }
  0xb7   : > { %8959 = vmatprep.subr.bf16.mxu1 %v9577_v29 }
  0xbb   : > { %1326 = vmatmul.mubr.bf16.gmra.mxu1 %v8167_v32  ;;  %1197 = vmatmul.mubr.bf16.gmra.mxu0 %v8181_v34  ;;  %v8203_v32 = vcombine.low %v514_v23, %v516_v24  ;;  %v8208_v34 = vcombine.high %v518_v30, %v520_v31  ;;  %v2161_v30 = vld [vmem:[#allocation2 + $0x4] sm:$0xf] }
  0xbc   : > { %1333 = vmatprep.mubr.bf16.mxu1 %v8172_v33  ;;  %1204 = vmatprep.mubr.bf16.mxu0 %v8186_v35  ;;  %v9573_v33 = vld [vmem:[#allocation9 + $0x48] sm:$0xff]   ;;  %v2213_v31 = vshrl.u32 %v2161_v30, 16 }
  0xbd   : > { %8857 = vmatprep.subr.bf16.mxu0 %v9573_v33  ;;  %v9575_v35 = vld [vmem:[#allocation9 + $0x8] sm:$0xff]  }
  0xbe   : > { %8858 = vmatpush3.bf16.msra.mxu0 %v9575_v35  ;;  %v9592_v33 = vld [vmem:[#allocation9 + $0xc8] sm:$0xff]  }
  0xbf   : > { %8859 = vmatprep.subr.bf16.mxu0 %v9581_v61 }
  0xc3   : > { %1334 = vmatmul.mubr.bf16.gmra.mxu1 %v8171_v40  ;;  %1205 = vmatmul.mubr.bf16.gmra.mxu0 %v8185_v42  ;;  %v8212_v40 = vcombine.high %v522_v36, %v524_v37  ;;  %v528_v42 = vld [vmem:[%s10341_s29 + $0x1d8] sm:$0xff]  ;;  %v2162_v36 = vld [vmem:[#allocation2 + $0x8] sm:$0xf] }
  0xc4   : > { %1341 = vmatprep.mubr.bf16.mxu1 %v8176_v41  ;;  %1212 = vmatprep.mubr.bf16.mxu0 %v8190_v43  ;;  %v526_v41 = vld [vmem:[%s10341_s29 + $0x1c8] sm:$0xff]  ;;  %v9578_v43 = vld [vmem:[#allocation9 + $0xb0] sm:$0xff]  }
  0xc5   : > { %8960 = vmatpush3.bf16.msra.mxu1 %v9578_v43  ;;  %v8215_v58 = vcombine.low %v526_v41, %v528_v42 }
  0xcb   : > { %1342 = vmatmul.mubr.bf16.gmra.mxu1 %v8175_v48  ;;  %1213 = vmatmul.mubr.bf16.gmra.mxu0 %v8189_v50  ;;  %v8216_v48 = vcombine.high %v526_v41, %v528_v42  ;;  %v9580_v50 = vld [vmem:[#allocation9 + $0xa8] sm:$0xff]  }
  0xcc   : > { %1349 = vmatprep.mubr.bf16.mxu1 %v8180_v49  ;;  %1220 = vmatprep.mubr.bf16.mxu0 %v8194_v51  ;;  %v9579_v49 = vld [vmem:[#allocation9 + $0xe8] sm:$0xff]  }
  0xcd   : > { %8961 = vmatprep.subr.bf16.mxu1 %v9579_v49  ;;  %v530_v51 = vld [vmem:[%s10341_s29 + $0x1e8] sm:$0xff] }
  0xce   : > { %8962 = vmatpush3.bf16.msra.mxu1 %v9580_v50  ;;  %v9594_v42 = vld [vmem:[#allocation9 + $0x88] sm:$0xff]  }
  0xcf   : > { %8963 = vmatprep.subr.bf16.mxu1 %v9582_v55  ;;  %v9597_v55 = vld [vmem:[#allocation9 + $0x80] sm:$0xff]  }
  0xd2   : > { %8964 = vmatpush3.bf16.msra.mxu1 %v9584_v7 }
  0xd3   : > { %1350 = vmatmul.mubr.bf16.gmra.mxu1 %v8179_v56  ;;  %1221 = vmatmul.mubr.bf16.gmra.mxu0 %v8193_v59  ;;  %v1687_v56 = vshrl.u32 %v1632_v53, 16  ;;  %v8220_v59 = vcombine.high %v530_v51, %v532_v52 }
  0xd4   : > { %1357 = vmatprep.mubr.bf16.mxu1 %v8184_v57  ;;  %1228 = vmatprep.mubr.bf16.mxu0 %v8198_v60  ;;  %v1696_v57 = vshrl.u32 %v1633_v54, 16  ;;  %v1631_v60 = vld [vmem:[#allocation2] sm:$0x8] }
  0xd5   : > { %v1682_v62 = vshrl.u32 %v1631_v60, 16  ;;  %v1689_v63 = vrot.slane %v1687_v56, 7  ;;  %8965 = vmatprep.subr.bf16.mxu1 %v9585_v14  ;;  %v367_v56 = vld [vmem:[#allocation2 + $0x20] sm:$0x8]  ;;  %v421_v14 = vld [vmem:[#allocation2 + $0x2c] sm:$0x1] }
  0xd6   : > { %v1698_v1 = vrot.slane %v1696_v57, 7  ;;  %8966 = vmatpush3.bf16.msra.mxu1 %v9586_v20  ;;  %v368_v57 = vsel %vm10423_vm2, 0, %v367_v56 }
  0xd7   : > { %v1694_v6 = vrot.slane %v1689_v63, 4  ;;  %369 = vst [vmem:[#allocation2 + $0x20] sm:$0x8] %v368_v57 }
  0xdb   : > { %1358 = vmatmul.mubr.bf16.gmra.mxu1 %v8183_v2  ;;  %1229 = vmatmul.mubr.bf16.gmra.mxu0 %v8197_v4  ;;  %v8285_v4 = vrot.slane %v1682_v62, 11 }
  0xdc   : > { %1365 = vmatprep.mubr.bf16.mxu1 %v8188_v3  ;;  %1236 = vmatprep.mubr.bf16.mxu0 %v8202_v5  ;;  %v1699_v3 = vshll.u32 %v1633_v54, 16  ;;  %v1692_v5 = vor.u32 %v1690_v0, %v1689_v63  ;;  %v9595_v0 = vld [vmem:[#allocation9 + $0x138] sm:$0xff]  }
  0xde   : > { %v1701_v8 = vor.u32 %v1699_v3, %v1698_v1 }
  0xe0   : > { %v1702_v13 = vsel %vm10432_vm5, %v1694_v6, %v1701_v8 }
  0xe1   : > { %2066 = vst [vmem:[#allocation3 + $0x24] sm:$0xf] %v1702_v13 }
  0xe3   : > { %1366 = vmatmul.mubr.bf16.gmra.mxu1 %v8187_v9  ;;  %1237 = vmatmul.mubr.bf16.gmra.mxu0 %v8201_v12  ;;  %v1693_v9 = vsel %vm10432_vm5, %v8285_v4, %v1692_v5  ;;  %v9583_v12 = vld [vmem:[#allocation9] sm:$0xff]  }
  0xe4   : > { %1373 = vmatprep.mubr.bf16.mxu1 %v8192_v10  ;;  %v2097_v10 = vld [vmem:[#allocation2 + $0x4] sm:$0xf]  ;;  %2065 = vst [vmem:[#allocation3] sm:$0xf] %v1693_v9  ;;  %8860 = vmatpush3.bf16.msra.mxu0 %v9583_v12  ;;  %v370_v9 = vld [vmem:[#allocation2 + $0x30] sm:$0x8] }
  0xe5   : > { %2129 = vst [vmem:[#allocation3 + $0x4] sm:$0xf] %v2097_v10  ;;  %v371_v10 = vsel %vm10423_vm2, 0, %v370_v9 }
  0xe6   : > { %372 = vst [vmem:[#allocation2 + $0x30] sm:$0x8] %v371_v10 }
  0xeb   : > { %1374 = vmatmul.mubr.bf16.gmra.mxu1 %v8191_v15  ;;  %v8219_v15 = vcombine.low %v530_v51, %v532_v52  ;;  %v9587_v23 = vld [vmem:[#allocation3] ss:$36 sps:$4 sm:$0xff]  }
  0xec   : > { %1381 = vmatprep.mubr.bf16.mxu1 %v8196_v16  ;;  %v14212_v16 = vmov 0  ;;  %v9589_v25 = vld [vmem:[#allocation3 + $0x4] ss:$36 sps:$4 sm:$0xff]  }
  0xed   : > { %v14213_v16 = vsel %vm10441_vm7, 4294967295, %v14212_v16  ;;  %6220 = vmatprep.mubr.bf16.mxu0 %v9589_v25  ;;  %v9596_v51 = vld [vmem:[#allocation9 + $0xc0] sm:$0xff]  }
  0xee   : > { %14214 = vst [vmem:[#allocation18_spill] sm:$0xff] %v14213_v16  ;;  %6221 = vmatmul.mubr.bf16.vlgmr.msra.gmra.mxu0 %v9587_v23 }
  0xf3   : > { %1382 = vmatmul.mubr.bf16.gmra.mxu1 %v8195_v21  ;;  %v365_v21 = vsel %vm10423_vm2, 0, %v364_v18  ;;  %v422_v18 = vsel %vm10441_vm7, 0, %v421_v14 }
  0xf4   : > { %1389 = vmatprep.mubr.bf16.mxu1 %v8200_v22  ;;  %v424_v22 = vld [vmem:[#allocation2 + $0x3c] sm:$0x1]  ;;  %366 = vst [vmem:[#allocation2 + $0x10] sm:$0x8] %v365_v21  ;;  %423 = vst [vmem:[#allocation2 + $0x2c] sm:$0x1] %v422_v18 }
  0xf5   : > { %v425_v24 = vsel %vm10441_vm7, 0, %v424_v22 }
  0xf6   : > { %426 = vst [vmem:[#allocation2 + $0x3c] sm:$0x1] %v425_v24 }
  0xfb   : > { %1390 = vmatmul.mubr.bf16.gmra.mxu1 %v8199_v26  ;;  %v9590_v26 = vld [vmem:[#allocation9 + $0xd0] sm:$0xff]  }
  0xfc   : > { %1397 = vmatprep.mubr.bf16.mxu1 %v8204_v27  ;;  %8967 = vmatprep.subr.bf16.mxu1 %v9590_v26  ;;  %v415_v27 = vld [vmem:[#allocation2 + $0xc] sm:$0x1] }
  0xfd   : > { %v416_v29 = vsel %vm10441_vm7, 0, %v415_v27  ;;  %8968 = vmatpush3.bf16.msra.mxu1 %v9591_v28  ;;  %v4218_v9 = vld [vmem:[#allocation2 + $0x3c] sm:$0x1] }
  0xfe   : > { %417 = vst [vmem:[#allocation2 + $0xc] sm:$0x1] %v416_v29  ;;  %8969 = vmatprep.subr.bf16.mxu1 %v9592_v33 }
 0x101   : > { %8970 = vmatpush3.bf16.msra.mxu1 %v9594_v42 }
 0x102   : > { %8971 = vmatprep.subr.bf16.mxu1 %v9596_v51 }
 0x103   : > { %1398 = vmatmul.mubr.bf16.gmra.mxu1 %v8203_v32  ;;  %v2216_v32 = vshll.u32 %v2161_v30, 16 }
 0x104   : > { %1405 = vmatprep.mubr.bf16.mxu1 %v8208_v34  ;;  %v2215_v34 = vrot.slane %v2213_v31, 4 }
 0x105   : > { %v2218_v35 = vrot.slane %v2216_v32, 5  ;;  %v2163_v47 = vld [vmem:[#allocation2 + $0xc] sm:$0x1]  ;;  %8972 = vmatpush3.bf16.msra.mxu1 %v9597_v55  ;;  %v373_v32 = vld [vmem:[#allocation2 + $0x40] sm:$0x8] }
 0x106   : > { %v2232_v50 = vshll.u32 %v2163_v47, 16  ;;  %v10516_v47 = vld [vmem:[%s14054_s2] ss:$0 sm:$0xff] }
 0x107   : > { %v2219_v37 = vor.u32 %v2218_v35, %v2215_v34  ;;  %v374_v35 = vsel %vm10423_vm2, 0, %v373_v32  ;;  %v4305_v32 = vshll.u32 %v4218_v9, 16 }
 0x108   : > { %v2234_v53 = vrot.slane %v2232_v50, 5  ;;  %375 = vst [vmem:[#allocation2 + $0x40] sm:$0x8] %v374_v35 }
 0x109   : > { %v2220_v43 = vrot.slane %v2219_v37, 4 }
 0x10b   : > { %1406 = vmatmul.mubr.bf16.gmra.mxu1 %v8207_v38  ;;  %v2222_v38 = vshll.u32 %v2162_v36, 16 }
 0x10c   : > { %1413 = vmatprep.mubr.bf16.mxu1 %v8212_v40  ;;  %v2226_v40 = vshrl.u32 %v2162_v36, 16 }
 0x10d   : > { %v2224_v45 = vrot.slane %v2222_v38, 5 }
 0x113   : > { %1414 = vmatmul.mubr.bf16.gmra.mxu1 %v8211_v46  ;;  %v2228_v46 = vrot.slane %v2226_v40, 4 }
 0x114   : > { %1421 = vmatprep.mubr.bf16.mxu1 %v8216_v48  ;;  %v2225_v48 = vsel %vm10453_vm10, %v2220_v43, %v2224_v45 }
 0x115   : > { %v2229_v49 = vor.u32 %v2228_v46, %v2224_v45  ;;  %2628 = vst [vmem:[#allocation3 + $0x8] sm:$0xf] %v2225_v48  ;;  %v9610_v46 = vld [vmem:[#allocation9 + $0x170] sm:$0xff]  }
 0x117   : > { %v2230_v52 = vrot.slane %v2229_v49, 4 }
 0x119   : > { %v2235_v54 = vsel %vm10453_vm10, %v2230_v52, %v2234_v53 }
 0x11a   : > { %2629 = vst [vmem:[#allocation3 + $0x2c] sm:$0xf] %v2235_v54 }
 0x11b   : > { %1422 = vmatmul.mubr.bf16.gmra.mxu1 %v8215_v58  ;;  %v9593_v58 = vld [vmem:[#allocation9 + $0x178] sm:$0xff]  }
 0x11c   : > { %1429 = vmatprep.mubr.bf16.mxu1 %v8220_v59  ;;  %9069 = vmatprep.subr.bf16.mxu0 %v9593_v58  ;;  %v418_v59 = vld [vmem:[#allocation2 + $0x1c] sm:$0x1] }
 0x11d   : > { %v419_v60 = vsel %vm10441_vm7, 0, %v418_v59  ;;  %9070 = vmatpush3.bf16.msra.mxu0 %v9595_v0  ;;  %v1634_v0 = vld [vmem:[#allocation2 + $0x10] sm:$0x8] }
 0x11e   : > { %420 = vst [vmem:[#allocation2 + $0x1c] sm:$0x1] %v419_v60  ;;  %9071 = vmatprep.subr.bf16.mxu0 %v9610_v46 }
 0x123   : > { %1430 = vmatmul.mubr.bf16.gmra.mxu1 %v8219_v15 }
 0x14b   : > { %v8709_v61 = vpop.f32.mrf.mxu1  ;;  %v8637_v63 = vpop.f32.mrf.mxu0 }
 0x14d   : > { %v8710_v62 = vpop.f32.mrf.mxu1  ;;  %v8638_v4 = vpop.f32.mrf.mxu0 }
 0x14e   : > { %v10465_v1 = vadd.f32 %v8710_v62, %v8709_v61  ;;  %v8639_v43 = vadd.f32 %v8638_v4, %v8637_v63  ;;  %v9611_v4 = vld [vmem:[#allocation9 + $0x130] sm:$0xff]  }
 0x14f   : > { %v10467_v3 = vpop.f32.mrf.mxu1  ;;  %v8640_v6 = vpop.f32.mrf.mxu0  ;;  %9072 = vmatpush3.bf16.msra.mxu0 %v9611_v4  ;;  %v10541_v4 = vld [vmem:[#allocation2 + $0x2c] sm:$0x1] }
 0x150   : > { %14217 = vst [vmem:[#allocation19_spill] sm:$0xff] %v10465_v1  ;;  %14218 = vst [vmem:[#allocation20_spill] sm:$0xff] %v10467_v3  ;;  %v1151_v50 = vadd.f32 %v8639_v43, %v10516_v47 }
 0x151   : > { %v10469_v5 = vpop.f32.mrf.mxu1  ;;  %v8641_v8 = vpop.f32.mrf.mxu0 }
 0x152   : > { %14219 = vst [vmem:[#allocation21_spill] sm:$0xff] %v10469_v5  ;;  %v8642_v51 = vadd.f32 %v8641_v8, %v8640_v6 }
 0x153   : > { %v8715_v7 = vpop.f32.mrf.mxu1  ;;  %v8643_v12 = vpop.f32.mrf.mxu0 }
 0x154   : > { %v1154_v57 = vadd.f32 %v8642_v51, %v10516_v47  ;;  %v376_v51 = vld [vmem:[#allocation2 + $0x50] sm:$0x8] }
 0x155   : > { %v8716_v11 = vpop.f32.mrf.mxu1  ;;  %v8644_v17 = vpop.f32.mrf.mxu0 }
 0x156   : > { %v10473_v13 = vadd.f32 %v8716_v11, %v8715_v7  ;;  %v8645_v59 = vadd.f32 %v8644_v17, %v8643_v12  ;;  %v2660_v11 = vld [vmem:[#allocation2 + $0x10] sm:$0x8]  ;;  %v1637_v12 = vld [vmem:[#allocation2 + $0x20] sm:$0x8]  ;;  %v2166_v17 = vld [vmem:[#allocation2 + $0x1c] sm:$0x1] }
 0x157   : > { %v10475_v15 = vpop.f32.mrf.mxu1  ;;  %v10481_v20 = vpop.f32.mrf.mxu0 }
 0x158   : > { %14220 = vst [vmem:[#allocation22_spill] sm:$0xff] %v10473_v13  ;;  %14221 = vst [vmem:[#allocation23_spill] sm:$0xff] %v10475_v15  ;;  %v1159_v6 = vadd.f32 %v8645_v59, %v10516_v47 }
 0x159   : > { %v10479_v19 = vpop.f32.mrf.mxu1  ;;  %v10483_v22 = vpop.f32.mrf.mxu0 }
 0x15a   : > { %14222 = vst [vmem:[#allocation24_spill] sm:$0xff] %v10479_v19 }
 0x15b   : > { %v8721_v21 = vpop.f32.mrf.mxu1  ;;  %v10485_v24 = vpop.f32.mrf.mxu0 }
 0x15d   : > { %v8722_v23 = vpop.f32.mrf.mxu1  ;;  %v10491_v27 = vpop.f32.mrf.mxu0 }
 0x15e   : > { %v10487_v25 = vadd.f32 %v8722_v23, %v8721_v21  ;;  %v1704_v21 = vshrl.u32 %v1634_v0, 16  ;;  %v10539_v0 = vld [vmem:[#allocation2 + $0x30] sm:$0x8] }
 0x15f   : > { %v10489_v26 = vpop.f32.mrf.mxu1  ;;  %v10495_v29 = vpop.f32.mrf.mxu0 }
 0x160   : > { %14223 = vst [vmem:[#allocation25_spill] sm:$0xff] %v10487_v25  ;;  %14224 = vst [vmem:[#allocation26_spill] sm:$0xff] %v10489_v26 }
 0x161   : > { %v10493_v28 = vpop.f32.mrf.mxu1  ;;  %v10497_v31 = vpop.f32.mrf.mxu0 }
 0x162   : > { %14225 = vst [vmem:[#allocation27_spill] sm:$0xff] %v10493_v28 }
 0x163   : > { %v8727_v30 = vpop.f32.mrf.mxu1  ;;  %v10499_v34 = vpop.f32.mrf.mxu0 }
 0x165   : > { %v8728_v33 = vpop.f32.mrf.mxu1  ;;  %v10507_v38 = vpop.f32.mrf.mxu0 }
 0x166   : > { %v10503_v36 = vadd.f32 %v8728_v33, %v8727_v30  ;;  %v2709_v33 = vshrl.u32 %v2660_v11, 16  ;;  %v8651_v11 = vadd.f32 %v10491_v27, %v10485_v24  ;;  %v10561_v24 = vld [vmem:[#allocation2 + $0x40] sm:$0x8] }
 0x167   : > { %v10505_v37 = vpop.f32.mrf.mxu1  ;;  %v10511_v42 = vpop.f32.mrf.mxu0 }
 0x168   : > { %14226 = vst [vmem:[#allocation28_spill] sm:$0xff] %v10503_v36  ;;  %14227 = vst [vmem:[#allocation29_spill] sm:$0xff] %v10505_v37 }
 0x169   : > { %v10509_v40 = vpop.f32.mrf.mxu1  ;;  %v10518_v49 = vpop.f32.mrf.mxu0 }
 0x16a   : > { %14228 = vst [vmem:[#allocation30_spill] sm:$0xff] %v10509_v40 }
 0x16b   : > { %v8749_v45 = vpop.f32.mrf.mxu1  ;;  %v8661_v56 = vpop.f32.mrf.mxu0 }
 0x16d   : > { %v8750_v48 = vpop.f32.mrf.mxu1  ;;  %v8662_v10 = vpop.f32.mrf.mxu0 }
 0x16e   : > { %v8751_v52 = vadd.f32 %v8750_v48, %v8749_v45  ;;  %v2663_v45 = vld [vmem:[#allocation2 + $0x20] sm:$0x8]  ;;  %v1726_v48 = vshrl.u32 %v1637_v12, 16  ;;  %v8660_v12 = vadd.f32 %v10518_v49, %v10511_v42 }
 0x16f   : > { %v8752_v53 = vpop.f32.mrf.mxu1  ;;  %v8664_v43 = vpop.f32.mrf.mxu0  ;;  %v2731_v59 = vshrl.u32 %v2663_v45, 16 }
 0x170   : > { %v1312_v54 = vadd.f32 %v8751_v52, %v1151_v50  ;;  %v2256_v50 = vshll.u32 %v2166_v17, 16  ;;  %v8663_v17 = vadd.f32 %v8662_v10, %v8661_v56  ;;  %v10573_v56 = vld [vmem:[#allocation2 + $0x3c] sm:$0x1] }
 0x171   : > { %v8753_v55 = vpop.f32.mrf.mxu1 }
 0x172   : > { %v1438_v58 = vmax.f32 %v1312_v54, 0.0  ;;  %v8754_v60 = vadd.f32 %v8753_v55, %v8752_v53  ;;  %v10529_v53 = vrot.slane %v1704_v21, 11  ;;  %v377_v54 = vsel %vm10423_vm2, 0, %v376_v51 }
 0x173   : > { %v8755_v61 = vpop.f32.mrf.mxu1  ;;  %378 = vst [vmem:[#allocation2 + $0x50] sm:$0x8] %v377_v54 }
 0x174   : > { %v8588_v62 = vpack.c.bf16 %v1438_v58, %v1438_v58  ;;  %v1315_v63 = vadd.f32 %v8754_v60, %v1154_v57  ;;  %v10533_v57 = vrot.slane %v4305_v32, 5  ;;  %v10535_v58 = vrot.slane %v2709_v33, 11 }
 0x175   : > { %v8756_v7 = vpop.f32.mrf.mxu1  ;;  %v1167_v33 = vadd.f32 %v8651_v11, %v10516_v47 }
 0x176   : > { %1599 = vst [vmem:[#allocation2 + $0x14] sm:$0xf] %v8588_v62  ;;  %v1439_v8 = vmax.f32 %v1315_v63, 0.0  ;;  %v8757_v14 = vadd.f32 %v8756_v7, %v8755_v61  ;;  %14229 = vst [vmem:[#allocation31_spill] sm:$0xff] %v10533_v57  ;;  %v8648_v61 = vadd.f32 %v10483_v22, %v10481_v20  ;;  %v8665_v63 = vpop.f32.mrf.mxu0  ;;  %v8654_v20 = vadd.f32 %v10497_v31, %v10495_v29 }
 0x177   : > { %v10523_v18 = vpop.f32.mrf.mxu1  ;;  %v8657_v22 = vadd.f32 %v10507_v38, %v10499_v34  ;;  %v8666_v27 = vadd.f32 %v8665_v63, %v8664_v43 }
 0x178   : > { %v8589_v23 = vpack.c.bf16 %v1439_v8, %v1439_v8  ;;  %v1320_v30 = vadd.f32 %v8757_v14, %v1159_v6  ;;  %v10547_v6 = vrot.slane %v1726_v48, 11  ;;  %v10549_v8 = vrot.slane %v2256_v50, 5 }
 0x179   : > { %v10525_v35 = vpop.f32.mrf.mxu1  ;;  %v1162_v42 = vadd.f32 %v8648_v61, %v10516_v47  ;;  %v10583_v51 = vadd.f32 %v8654_v20, %v10516_v47  ;;  %v10586_v54 = vadd.f32 %v8657_v22, %v10516_v47  ;;  %v8667_v61 = vpop.f32.mrf.mxu0  ;;  %v10600_v22 = vadd.f32 %v8666_v27, %v10516_v47 }
 0x17a   : > { %1600 = vst [vmem:[#allocation2 + $0x18] sm:$0xf] %v8589_v23  ;;  %v1440_v46 = vmax.f32 %v1320_v30, 0.0  ;;  %v10559_v23 = vld [vmem:[#allocation2 + $0x30] sm:$0x8]  ;;  %v10563_v30 = vrot.slane %v2731_v59, 11  ;;  %v8760_v20 = vadd.f32 %v10525_v35, %v10523_v18 }
 0x17b   : > { %v10527_v52 = vpop.f32.mrf.mxu1  ;;  %v8668_v57 = vpop.f32.mrf.mxu0 }
 0x17c   : > { %v8590_v55 = vpack.c.bf16 %v1440_v46, %v1440_v46  ;;  %v10578_v46 = vld [vmem:[#allocation2 + $0x40] sm:$0x8]  ;;  %v1323_v32 = vadd.f32 %v8760_v20, %v1162_v42 }
 0x17d   : > { %v2099_v60 = vld [vmem:[#allocation2 + $0x14] sm:$0xf]  ;;  %v8762_v62 = vpop.f32.mrf.mxu1 }
 0x17e   : > { %v10543_v7 = vld [vmem:[#allocation2 + $0x14] sm:$0xf]  ;;  %2131 = vst [vmem:[#allocation3 + $0x4c] sm:$0xf] %v2099_v60  ;;  %1601 = vst [vmem:[#allocation2 + $0x24] sm:$0xf] %v8590_v55  ;;  %v10589_v55 = vadd.f32 %v8660_v12, %v10516_v47  ;;  %v10594_v60 = vadd.f32 %v8663_v17, %v10516_v47  ;;  %v8763_v43 = vadd.f32 %v8762_v62, %v10527_v52 }
 0x17f   : > { %v2164_v9 = vld [vmem:[#allocation2 + $0x14] sm:$0xf]  ;;  %v10555_v21 = vpop.f32.mrf.mxu1  ;;  %v1709_v31 = vshrl.u32 %v10543_v7, 16 }
 0x180   : > { %v3124_v14 = vld [vmem:[#allocation2 + $0x14] sm:$0xf]  ;;  %v2237_v34 = vshrl.u32 %v2164_v9, 16  ;;  %v2240_v10 = vshll.u32 %v2164_v9, 16  ;;  %v1328_v13 = vadd.f32 %v8763_v43, %v1167_v33 }
 0x181   : > { %3156 = vst [vmem:[#allocation3 + $0x10] sm:$0xf] %v3124_v14  ;;  %v10568_v38 = vld [vmem:[#allocation2 + $0x14] sm:$0xf]  ;;  %v10571_v49 = vpop.f32.mrf.mxu1  ;;  %v10580_v48 = vld [vmem:[#allocation2 + $0x18] sm:$0xf] }
 0x182   : > { %v2165_v50 = vld [vmem:[#allocation2 + $0x18] sm:$0xf]  ;;  %v2714_v9 = vshrl.u32 %v10568_v38, 16  ;;  %v3188_v11 = vld [vmem:[#allocation2 + $0x14] sm:$0xf]  ;;  %v10603_v39 = vrot.slane %v1709_v31, 7  ;;  %v8766_v43 = vadd.f32 %v10571_v49, %v10555_v21 }
 0x183   : > { %v10591_v59 = vpop.f32.mrf.mxu1  ;;  %v2100_v63 = vld [vmem:[#allocation2 + $0x18] sm:$0xf]  ;;  %v2239_v45 = vrot.slane %v2237_v34, 4  ;;  %v2242_v44 = vrot.slane %v2240_v10, 5  ;;  %v1718_v16 = vshrl.u32 %v10580_v48, 16  ;;  %v2246_v18 = vshll.u32 %v2165_v50, 16 }
 0x184   : > { %v2662_v14 = vld [vmem:[#allocation2 + $0x18] sm:$0xf]  ;;  %2132 = vst [vmem:[#allocation3 + $0x70] sm:$0xf] %v2100_v63  ;;  %v2250_v35 = vshrl.u32 %v2165_v50, 16  ;;  %v1712_v63 = vshll.u32 %v10543_v7, 16  ;;  %v10614_v10 = vadd.f32 %v8668_v57, %v8667_v61 }
 0x185   : > { %v1638_v17 = vld [vmem:[#allocation2 + $0x24] sm:$0xf]  ;;  %v10606_v29 = vpop.f32.mrf.mxu1  ;;  %v3237_v36 = vshrl.u32 %v3188_v11, 16  ;;  %v2723_v12 = vshrl.u32 %v2662_v14, 16  ;;  %v10611_v40 = vrot.slane %v2714_v9, 7  ;;  %v2717_v52 = vshll.u32 %v10568_v38, 16 }
 0x186   : > { %v2101_v27 = vld [vmem:[#allocation2 + $0x24] sm:$0xf]  ;;  %v1731_v31 = vshrl.u32 %v1638_v17, 16  ;;  %v10617_v37 = vor.u32 %v1712_v63, %v10603_v39  ;;  %v3240_v7 = vshll.u32 %v3188_v11, 16  ;;  %v1720_v28 = vrot.slane %v1718_v16, 7 }
 0x187   : > { %2133 = vst [vmem:[#allocation3 + $0x94] sm:$0xf] %v2101_v27  ;;  %v8770_v34 = vpop.f32.mrf.mxu1  ;;  %v2167_v62 = vld [vmem:[#allocation2 + $0x24] sm:$0xf]  ;;  %v2243_v27 = vor.u32 %v2242_v44, %v2239_v45  ;;  %v10620_v26 = vrot.slane %v2246_v18, 5  ;;  %v10622_v9 = vrot.slane %v2250_v35, 4  ;;  %v2719_v33 = vor.u32 %v2717_v52, %v10611_v40 }
 0x188   : > { %v3126_v25 = vld [vmem:[#allocation2 + $0x24] sm:$0xf]  ;;  %v10626_v57 = vrot.slane %v3237_v36, 4  ;;  %v2725_v42 = vrot.slane %v2723_v12, 7  ;;  %v10628_v61 = vrot.slane %v1731_v31, 7  ;;  %v2261_v20 = vshrl.u32 %v2167_v62, 16 }
 0x189   : > { %v8771_v1 = vpop.f32.mrf.mxu1  ;;  %v10624_v38 = vld [vmem:[#allocation2 + $0x24] sm:$0xf]  ;;  %3158 = vst [vmem:[#allocation3 + $0x58] sm:$0xf] %v3126_v25  ;;  %v1721_v44 = vshll.u32 %v10580_v48, 16  ;;  %v2264_v16 = vshll.u32 %v2167_v62, 16 }
 0x18a   : > { %14230 = vst [vmem:[#allocation32_spill] sm:$0xff] %v10628_v61  ;;  %v4149_v63 = vld [vmem:[#allocation2 + $0x24] sm:$0xf]  ;;  %v2721_v45 = vrot.slane %v10611_v40, 4  ;;  %v2726_v25 = vshll.u32 %v2662_v14, 16  ;;  %v1734_v36 = vshll.u32 %v1638_v17, 16 }
 0x18b   : > { %v8773_v11 = vpop.f32.mrf.mxu1  ;;  %4181 = vst [vmem:[#allocation3 + $0x1c] sm:$0xf] %v4149_v63  ;;  %v2736_v12 = vshrl.u32 %v10624_v38, 16  ;;  %v10636_v35 = vrot.slane %v2243_v27, 4  ;;  %v10638_v31 = vrot.slane %v3240_v7, 5  ;;  %v1723_v50 = vor.u32 %v1721_v44, %v1720_v28 }
 0x18c   : > { %v3191_v52 = vld [vmem:[#allocation2 + $0x24] sm:$0xf]  ;;  %v2728_v62 = vor.u32 %v2726_v25, %v2725_v42  ;;  %v1736_v63 = vor.u32 %v1734_v36, %v10628_v61  ;;  %v10643_v21 = vrot.slane %v2261_v20, 4  ;;  %v2739_v40 = vshll.u32 %v10624_v38, 16  ;;  %v10657_v61 = vpop.f32.mrf.mxu0 }
 0x18d   : > { %v8774_v18 = vpop.f32.mrf.mxu1  ;;  %v10646_v49 = vld [vmem:[#allocation2 + $0x24] sm:$0xf]  ;;  %v10648_v17 = vrot.slane %v2264_v16, 5  ;;  %v1441_v7 = vmax.f32 %v1323_v32, 0.0  ;;  %v1442_v19 = vmax.f32 %v1328_v13, 0.0  ;;  %v1331_v28 = vadd.f32 %v8766_v43, %v10583_v51 }
 0x18e   : > { %14231 = vst [vmem:[#allocation33_spill] sm:$0xff] %v10646_v49  ;;  %v4213_v27 = vld [vmem:[#allocation2 + $0x24] sm:$0xf]  ;;  %v10651_v44 = vrot.slane %v2736_v12, 7  ;;  %v3261_v48 = vshrl.u32 %v3191_v52, 16  ;;  %v3264_v42 = vshll.u32 %v3191_v52, 16  ;;  %v8769_v20 = vadd.f32 %v10606_v29, %v10591_v59 }
 0x18f   : > { %v8776_v14 = vpop.f32.mrf.mxu1  ;;  %v3739_v38 = vshrl.u32 %v10646_v49, 16  ;;  %v8591_v36 = vpack.c.bf16 %v1441_v7, %v1441_v7  ;;  %v8592_v15 = vpack.c.bf16 %v1442_v19, %v1442_v19  ;;  %v1443_v5 = vmax.f32 %v1331_v28, 0.0 }
 0x190   : > { %v4262_v16 = vshrl.u32 %v4213_v27, 16  ;;  %v1336_v3 = vadd.f32 %v8769_v20, %v10586_v54  ;;  %v8772_v32 = vadd.f32 %v8771_v1, %v8770_v34  ;;  %v8775_v13 = vadd.f32 %v8774_v18, %v8773_v11  ;;  %v9624_v54 = vld [vmem:[#allocation9 + $0x168] sm:$0xff]   ;;  %v8671_v18 = vpop.f32.mrf.mxu0 }
 0x191   : > { %v8777_v25 = vpop.f32.mrf.mxu1  ;;  %1602 = vst [vmem:[#allocation2 + $0x28] sm:$0xf] %v8591_v36  ;;  %1603 = vst [vmem:[#allocation2 + $0x34] sm:$0xf] %v8592_v15  ;;  %v8593_v43 = vpack.c.bf16 %v1443_v5, %v1443_v5  ;;  %v1715_v29 = vsel %vm10432_vm5, %v10529_v53, %v10617_v37  ;;  %v14232_v19 = vrot.slane %v10603_v39, 4  ;;  %v2720_v5 = vsel %vm10432_vm5, %v10535_v58, %v2719_v33 }
 0x192   : > { %v8778_v12 = vadd.f32 %v8777_v25, %v8776_v14  ;;  %v1444_v1 = vmax.f32 %v1336_v3, 0.0  ;;  %v1339_v34 = vadd.f32 %v8772_v32, %v10589_v55  ;;  %v1344_v11 = vadd.f32 %v8775_v13, %v10594_v60  ;;  %2067 = vst [vmem:[#allocation3 + $0x48] sm:$0xf] %v1715_v29  ;;  %3092 = vst [vmem:[#allocation3 + $0xc] sm:$0xf] %v2720_v5  ;;  %v8673_v36 = vpop.f32.mrf.mxu0  ;;  %v14249_v5 = vld [vmem:[#allocation23_spill] sm:$0xff] }
 0x193   : > { %v8779_v51 = vpop.f32.mrf.mxu1  ;;  %v1724_v59 = vsel %vm10432_vm5, %v14232_v19, %v1723_v50  ;;  %v2741_v15 = vor.u32 %v2739_v40, %v10651_v44  ;;  %v4265_v37 = vshll.u32 %v4213_v27, 16  ;;  %1604 = vst [vmem:[#allocation2 + $0x38] sm:$0xf] %v8593_v43  ;;  %v2729_v53 = vsel %vm10432_vm5, %v2721_v45, %v2728_v62  ;;  %9073 = vmatprep.subr.bf16.mxu0 %v9624_v54  ;;  %v3189_v58 = vld [vmem:[#allocation2 + $0x18] sm:$0xf] }
 0x194   : > { %2068 = vst [vmem:[#allocation3 + $0x6c] sm:$0xf] %v1724_v59  ;;  %v1347_v39 = vadd.f32 %v8778_v12, %v10600_v22  ;;  %v10676_v3 = vrot.slane %v3261_v48, 4  ;;  %v8594_v55 = vpack.c.bf16 %v1444_v1, %v1444_v1  ;;  %v1445_v60 = vmax.f32 %v1339_v34, 0.0  ;;  %3093 = vst [vmem:[#allocation3 + $0x30] sm:$0xf] %v2729_v53 }
 0x195   : > { %v1446_v50 = vmax.f32 %v1344_v11, 0.0  ;;  %v8780_v52 = vpop.f32.mrf.mxu1  ;;  %v3266_v33 = vrot.slane %v3264_v42, 5  ;;  %v1737_v22 = vsel %vm10432_vm5, %v10547_v6, %v1736_v63  ;;  %v2249_v45 = vsel %vm10453_vm10, %v10636_v35, %v10620_v26  ;;  %v14246_v59 = vld [vmem:[#allocation32_spill] sm:$0xff]  ;;  %v14248_v34 = vld [vmem:[#allocation21_spill] sm:$0xff]  ;;  %v14252_v53 = vld [vmem:[#allocation27_spill] sm:$0xff] }
 0x196   : > { %v1447_v40 = vmax.f32 %v1347_v39, 0.0  ;;  %v4264_v48 = vrot.slane %v4262_v16, 4  ;;  %1605 = vst [vmem:[#allocation2 + $0x44] sm:$0xf] %v8594_v55  ;;  %v8595_v62 = vpack.c.bf16 %v1445_v60, %v1445_v60  ;;  %2069 = vst [vmem:[#allocation3 + $0x90] sm:$0xf] %v1737_v22  ;;  %v14233_v27 = vor.u32 %v10622_v9, %v10620_v26 }
 0x197   : > { %v8596_v14 = vpack.c.bf16 %v1446_v50, %v1446_v50  ;;  %2630 = vst [vmem:[#allocation3 + $0x50] sm:$0xf] %v2249_v45  ;;  %v4267_v28 = vrot.slane %v4265_v37, 5  ;;  %v8781_v20 = vadd.f32 %v8780_v52, %v8779_v51  ;;  %v2742_v6 = vsel %vm10432_vm5, %v10563_v30, %v2741_v15  ;;  %v14247_v1 = vld [vmem:[#allocation20_spill] sm:$0xff]  ;;  %v14251_v39 = vld [vmem:[#allocation26_spill] sm:$0xff] }
 0x198   : > { %v2254_v7 = vrot.slane %v14233_v27, 4  ;;  %v8597_v42 = vpack.c.bf16 %v1447_v40, %v1447_v40  ;;  %v3243_v35 = vor.u32 %v10638_v31, %v10626_v57  ;;  %v3246_v63 = vshll.u32 %v3189_v58, 16  ;;  %1606 = vst [vmem:[#allocation2 + $0x48] sm:$0xf] %v8595_v62  ;;  %3094 = vst [vmem:[#allocation3 + $0x54] sm:$0xf] %v2742_v6 }
 0x199   : > { %v3250_v25 = vshrl.u32 %v3189_v58, 16  ;;  %1607 = vst [vmem:[#allocation2 + $0x54] sm:$0xf] %v8596_v14  ;;  %v1191_v9 = vadd.f32 %v10614_v10, %v10516_v47  ;;  %v14234_v30 = vshrl.u32 %v10539_v0, 16  ;;  %v14235_v57 = vshll.u32 %v10541_v4, 16  ;;  %v14250_v15 = vld [vmem:[#allocation24_spill] sm:$0xff] }
 0x19a   : > { %v2259_v26 = vsel %vm10453_vm10, %v2254_v7, %v10549_v8  ;;  %1608 = vst [vmem:[#allocation2 + $0x58] sm:$0xf] %v8597_v42  ;;  %v14236_v32 = vshrl.u32 %v10559_v23, 16  ;;  %v2267_v8 = vor.u32 %v10648_v17, %v10643_v21  ;;  %v10714_v10 = vrot.slane %v3739_v38, 7  ;;  %v2168_v55 = vld [vmem:[#allocation2 + $0x28] sm:$0xf] }
 0x19b   : > { %2631 = vst [vmem:[#allocation3 + $0x74] sm:$0xf] %v2259_v26  ;;  %v10700_v16 = vrot.slane %v14234_v30, 11  ;;  %v10704_v31 = vrot.slane %v14235_v57, 5  ;;  %v14238_v51 = vshrl.u32 %v10561_v24, 16  ;;  %v14239_v43 = vshll.u32 %v10573_v56, 16  ;;  %v8674_v56 = vpop.f32.mrf.mxu0 }
 0x19c   : > { %v10708_v13 = vrot.slane %v14236_v32, 11  ;;  %14237 = vst [vmem:[#allocation34_spill] sm:$0xff] %v10714_v10  ;;  %v3267_v12 = vor.u32 %v3266_v33, %v10676_v3  ;;  %v4268_v23 = vor.u32 %v4267_v28, %v4264_v48  ;;  %v10725_v29 = vadd.f32 %v8781_v20, %v1191_v9  ;;  %v10744_v3 = vld [vmem:[#allocation2 + $0x28] sm:$0xf]  ;;  %v2103_v60 = vld [vmem:[#allocation2 + $0x34] sm:$0xf] }
 0x19d   : > { %v10718_v0 = vrot.slane %v14238_v51, 11  ;;  %v10722_v4 = vrot.slane %v14239_v43, 5  ;;  %v14241_v19 = vshrl.u32 %v10578_v46, 16  ;;  %v10731_v17 = vrot.slane %v3243_v35, 4  ;;  %v3128_v22 = vld [vmem:[#allocation2 + $0x34] sm:$0xf]  ;;  %v8676_v42 = vpop.f32.mrf.mxu0 }
 0x19e   : > { %v10733_v38 = vrot.slane %v3246_v63, 5  ;;  %v10735_v24 = vrot.slane %v3250_v25, 4  ;;  %v8714_v11 = vadd.f32 %v14248_v34, %v14247_v1  ;;  %v8720_v37 = vadd.f32 %v14250_v15, %v14249_v5  ;;  %2135 = vst [vmem:[#allocation3 + $0xdc] sm:$0xf] %v2103_v60  ;;  %v10756_v62 = vld [vmem:[#allocation2 + $0x28] sm:$0xf] }
 0x19f   : > { %14240 = vst [vmem:[#allocation35_spill] sm:$0xff] %v10722_v4  ;;  %v10729_v21 = vrot.slane %v14241_v19, 11  ;;  %14243 = vst [vmem:[#allocation37_spill] sm:$0xff] %v10731_v17  ;;  %v8726_v46 = vadd.f32 %v14252_v53, %v14251_v39  ;;  %v8672_v50 = vadd.f32 %v8671_v18, %v10657_v61  ;;  %v10747_v52 = vrot.slane %v2267_v8, 4  ;;  %v14255_v20 = vld [vmem:[#allocation19_spill] sm:$0xff]  ;;  %v14258_v63 = vld [vmem:[#allocation22_spill] sm:$0xff]  ;;  %v8677_v60 = vpop.f32.mrf.mxu0 }
 0x1a0   : > { %14244 = vst [vmem:[#allocation38_spill] sm:$0xff] %v10733_v38  ;;  %14245 = vst [vmem:[#allocation39_spill] sm:$0xff] %v10735_v24  ;;  %v10752_v45 = vrot.slane %v3267_v12, 4  ;;  %v10754_v48 = vrot.slane %v4268_v23, 4  ;;  %v8675_v61 = vadd.f32 %v8674_v56, %v8673_v36  ;;  %v1740_v18 = vshrl.u32 %v10744_v3, 16  ;;  %v14261_v57 = vld [vmem:[#allocation25_spill] sm:$0xff] }
 0x1a1   : > { %14242 = vst [vmem:[#allocation36_spill] sm:$0xff] %v10729_v21  ;;  %3160 = vst [vmem:[#allocation3 + $0xa0] sm:$0xf] %v3128_v22  ;;  %v2270_v7 = vshll.u32 %v2168_v55, 16  ;;  %v2274_v28 = vshrl.u32 %v2168_v55, 16  ;;  %v10763_v6 = vadd.f32 %v14255_v20, %v10516_v47  ;;  %v10766_v35 = vadd.f32 %v8714_v11, %v10516_v47  ;;  %v14265_v19 = vld [vmem:[#allocation29_spill] sm:$0xff] }
 0x1a2   : > { %14253 = vst [vmem:[#allocation32_spill] sm:$0xff] %v10752_v45  ;;  %14254 = vst [vmem:[#allocation20_spill] sm:$0xff] %v10754_v48  ;;  %v10770_v25 = vadd.f32 %v14258_v63, %v10516_v47  ;;  %v3192_v26 = vld [vmem:[#allocation2 + $0x28] sm:$0xf]  ;;  %v2170_v36 = vld [vmem:[#allocation2 + $0x34] sm:$0xf]  ;;  %v10773_v30 = vadd.f32 %v8720_v37, %v10516_v47  ;;  %v10777_v32 = vadd.f32 %v14261_v57, %v10516_v47 }
 0x1a3   : > { %14256 = vst [vmem:[#allocation21_spill] sm:$0xff] %v10763_v6  ;;  %14257 = vst [vmem:[#allocation23_spill] sm:$0xff] %v10766_v35  ;;  %v4151_v9 = vld [vmem:[#allocation2 + $0x34] sm:$0xf]  ;;  %v2745_v8 = vshrl.u32 %v10756_v62, 16  ;;  %v10784_v23 = vadd.f32 %v8726_v46, %v10516_v47  ;;  %v14266_v56 = vld [vmem:[#allocation30_spill] sm:$0xff]  ;;  %v10795_v15 = vadd.f32 %v8672_v50, %v10516_v47  ;;  %v10798_v37 = vadd.f32 %v8675_v61, %v10516_v47 }
 0x1a4   : > { %14259 = vst [vmem:[#allocation24_spill] sm:$0xff] %v10770_v25  ;;  %14260 = vst [vmem:[#allocation26_spill] sm:$0xff] %v10773_v30  ;;  %v10781_v43 = vld [vmem:[#allocation2 + $0x28] sm:$0xf]  ;;  %v4216_v12 = vld [vmem:[#allocation2 + $0x34] sm:$0xf]  ;;  %v10788_v1 = vadd.f32 %v14266_v56, %v14265_v19 }
 0x1a5   : > { %14262 = vst [vmem:[#allocation27_spill] sm:$0xff] %v10777_v32  ;;  %14263 = vst [vmem:[#allocation19_spill] sm:$0xff] %v10781_v43  ;;  %v10790_v34 = vld [vmem:[#allocation2 + $0x34] sm:$0xf]  ;;  %v2285_v39 = vshrl.u32 %v2170_v36, 16  ;;  %v2288_v53 = vshll.u32 %v2170_v36, 16 }
 0x1a6   : > { %4183 = vst [vmem:[#allocation3 + $0x64] sm:$0xf] %v4151_v9  ;;  %14264 = vst [vmem:[#allocation22_spill] sm:$0xff] %v10784_v23  ;;  %v10792_v11 = vld [vmem:[#allocation2 + $0x34] sm:$0xf]  ;;  %v4286_v55 = vshrl.u32 %v4216_v12, 16 }
 0x1a7   : > { %v3194_v5 = vld [vmem:[#allocation2 + $0x34] sm:$0xf]  ;;  %v4289_v46 = vshll.u32 %v4216_v12, 16  ;;  %v10800_v22 = vrot.slane %v1740_v18, 7  ;;  %v10802_v20 = vrot.slane %v2270_v7, 5  ;;  %v3270_v63 = vshll.u32 %v3192_v26, 16 }
 0x1a8   : > { %v3274_v9 = vshrl.u32 %v3192_v26, 16  ;;  %v4214_v57 = vld [vmem:[#allocation2 + $0x28] sm:$0xf]  ;;  %v3285_v19 = vshrl.u32 %v3194_v5, 16  ;;  %v3288_v56 = vshll.u32 %v3194_v5, 16  ;;  %v4288_v40 = vrot.slane %v4286_v55, 4 }
 0x1a9   : > { %v4291_v50 = vrot.slane %v4289_v46, 5  ;;  %v3748_v33 = vshrl.u32 %v10781_v43, 16  ;;  %v1753_v61 = vshrl.u32 %v10790_v34, 16  ;;  %v2758_v36 = vshrl.u32 %v10792_v11, 16  ;;  %v10807_v58 = vld [vmem:[#allocation2 + $0x34] sm:$0xf] }
 0x1aa   : > { %14267 = vst [vmem:[#allocation25_spill] sm:$0xff] %v10807_v58  ;;  %v8678_v12 = vadd.f32 %v8677_v60, %v8676_v42  ;;  %v10809_v18 = vrot.slane %v2274_v28, 4  ;;  %v2287_v7 = vrot.slane %v2285_v39, 4  ;;  %v2290_v54 = vrot.slane %v2288_v53, 5  ;;  %v2105_v26 = vld [vmem:[#allocation2 + $0x44] sm:$0xf]  ;;  %v8782_v28 = vpop.f32.mrf.mxu1 }
 0x1ab   : > { %v4292_v14 = vor.u32 %v4291_v50, %v4288_v40  ;;  %v10811_v51 = vrot.slane %v2745_v8, 7  ;;  %v10813_v5 = vrot.slane %v3270_v63, 5  ;;  %v4271_v55 = vshll.u32 %v4214_v57, 16  ;;  %v4217_v27 = vld [vmem:[#allocation2 + $0x38] sm:$0xf]  ;;  %v9625_v40 = vld [vmem:[#allocation9 + $0x128] sm:$0xff]  }
 0x1ac   : > { %v4275_v46 = vshrl.u32 %v4214_v57, 16  ;;  %2137 = vst [vmem:[#allocation3 + $0x124] sm:$0xf] %v2105_v26  ;;  %v10815_v48 = vrot.slane %v3274_v9, 4  ;;  %v3287_v23 = vrot.slane %v3285_v19, 4  ;;  %v3290_v32 = vrot.slane %v3288_v56, 5  ;;  %9074 = vmatpush3.bf16.msra.mxu0 %v9625_v40 }
 0x1ad   : > { %14268 = vst [vmem:[#allocation29_spill] sm:$0xff] %v10813_v5  ;;  %v3761_v42 = vshrl.u32 %v10807_v58, 16  ;;  %v10818_v60 = vrot.slane %v3748_v33, 7  ;;  %v10821_v39 = vrot.slane %v1753_v61, 7  ;;  %v10823_v8 = vrot.slane %v2758_v36, 7  ;;  %v14279_v35 = vld [vmem:[#allocation31_spill] sm:$0xff] }
 0x1ae   : > { %14269 = vst [vmem:[#allocation30_spill] sm:$0xff] %v10815_v48  ;;  %v3130_v53 = vld [vmem:[#allocation2 + $0x44] sm:$0xf]  ;;  %v2291_v63 = vor.u32 %v2290_v54, %v2287_v7  ;;  %v4293_v57 = vrot.slane %v4292_v14, 4  ;;  %v10825_v50 = vld [vmem:[#allocation2 + $0x38] sm:$0xf]  ;;  %v3291_v45 = vor.u32 %v3290_v32, %v3287_v23  ;;  %v8783_v7 = vpop.f32.mrf.mxu1  ;;  %v10839_v33 = vadd.f32 %v8678_v12, %v10516_v47 }
 0x1af   : > { %14270 = vst [vmem:[#allocation40_spill] sm:$0xff] %v10818_v60  ;;  %v4295_v9 = vshll.u32 %v4217_v27, 16  ;;  %v4299_v26 = vshrl.u32 %v4217_v27, 16  ;;  %3162 = vst [vmem:[#allocation3 + $0xe8] sm:$0xf] %v3130_v53  ;;  %v10827_v19 = vrot.slane %v4271_v55, 5 }
 0x1b0   : > { %v10829_v56 = vrot.slane %v4275_v46, 4  ;;  %v4153_v61 = vld [vmem:[#allocation2 + $0x44] sm:$0xf]  ;;  %v10833_v36 = vrot.slane %v3761_v42, 7  ;;  %v1762_v46 = vshrl.u32 %v10825_v50, 16  ;;  %v10859_v30 = vrot.slane %v3291_v45, 4  ;;  %v10942_v5 = vpop.f32.mrf.mxu1 }
 0x1b1   : > { %14271 = vst [vmem:[#allocation41_spill] sm:$0xff] %v10827_v19  ;;  %v4297_v17 = vrot.slane %v4295_v9, 5  ;;  %v4301_v54 = vrot.slane %v4299_v26, 4  ;;  %v2173_v14 = vld [vmem:[#allocation2 + $0x44] sm:$0xf]  ;;  %v10857_v19 = vadd.f32 %v8783_v7, %v8782_v28  ;;  %v14280_v6 = vshll.u32 %v10756_v62, 16 }
 0x1b2   : > { %14272 = vst [vmem:[#allocation42_spill] sm:$0xff] %v10829_v56  ;;  %14273 = vst [vmem:[#allocation43_spill] sm:$0xff] %v10833_v36  ;;  %v2171_v53 = vld [vmem:[#allocation2 + $0x38] sm:$0xf]  ;;  %v10841_v56 = vrot.slane %v2291_v63, 4  ;;  %v2309_v12 = vshrl.u32 %v2173_v14, 16 }
 0x1b3   : > { %4185 = vst [vmem:[#allocation3 + $0xac] sm:$0xf] %v4153_v61  ;;  %v10844_v23 = vld [vmem:[#allocation2 + $0x38] sm:$0xf]  ;;  %v4298_v42 = vsel %vm10453_vm10, %v4293_v57, %v4297_v17  ;;  %v4302_v9 = vor.u32 %v4301_v54, %v4297_v17  ;;  %v10848_v26 = vld [vmem:[#allocation2 + $0x44] sm:$0xf] }
 0x1b4   : > { %14274 = vst [vmem:[#allocation44_spill] sm:$0xff] %v10841_v56  ;;  %v14275_v61 = vshll.u32 %v10744_v3, 16  ;;  %v3195_v47 = vld [vmem:[#allocation2 + $0x38] sm:$0xf]  ;;  %4679 = vst [vmem:[#allocation3 + $0x68] sm:$0xf] %v4298_v42 }
 0x1b5   : > { %v2312_v63 = vshll.u32 %v2173_v14, 16  ;;  %v10855_v27 = vld [vmem:[#allocation2 + $0x44] sm:$0xf]  ;;  %14276 = vst [vmem:[#allocation45_spill] sm:$0xff] %v10859_v30  ;;  %v1765_v57 = vshll.u32 %v10825_v50, 16  ;;  %v4303_v54 = vrot.slane %v4302_v9, 4 }
 0x1b6   : > { %v10853_v55 = vor.u32 %v14275_v61, %v10800_v22  ;;  %v3197_v32 = vld [vmem:[#allocation2 + $0x44] sm:$0xf]  ;;  %v1764_v22 = vrot.slane %v1762_v46, 7  ;;  %v2294_v61 = vshll.u32 %v2171_v53, 16  ;;  %v2298_v42 = vshrl.u32 %v2171_v53, 16 }
 0x1b7   : > { %v10863_v3 = vld [vmem:[#allocation2 + $0x44] sm:$0xf]  ;;  %v10865_v25 = vld [vmem:[#allocation2 + $0x38] sm:$0xf]  ;;  %v1775_v14 = vshrl.u32 %v10848_v26, 16  ;;  %v4308_v28 = vsel %vm10453_vm10, %v4303_v54, %v14279_v35  ;;  %v2780_v45 = vshrl.u32 %v10855_v27, 16  ;;  %v10879_v35 = vor.u32 %v14280_v6, %v10811_v51 }
 0x1b8   : > { %14277 = vst [vmem:[#allocation46_spill] sm:$0xff] %v10863_v3  ;;  %14278 = vst [vmem:[#allocation47_spill] sm:$0xff] %v10865_v25  ;;  %v3309_v40 = vshrl.u32 %v3197_v32, 16  ;;  %v3312_v7 = vshll.u32 %v3197_v32, 16  ;;  %v2107_v17 = vld [vmem:[#allocation2 + $0x54] sm:$0xf] }
 0x1b9   : > { %v2767_v50 = vshrl.u32 %v10844_v23, 16  ;;  %4680 = vst [vmem:[#allocation3 + $0x8c] sm:$0xf] %v4308_v28  ;;  %v2311_v9 = vrot.slane %v2309_v12, 4  ;;  %v2314_v46 = vrot.slane %v2312_v63, 5  ;;  %v3783_v53 = vshrl.u32 %v10863_v3, 16 }
 0x1ba   : > { %2139 = vst [vmem:[#allocation3 + $0x16c] sm:$0xf] %v2107_v17  ;;  %v3294_v54 = vshll.u32 %v3195_v47, 16  ;;  %v3298_v4 = vshrl.u32 %v3195_v47, 16  ;;  %v4219_v32 = vld [vmem:[#allocation2 + $0x44] sm:$0xf] }
 0x1bb   : > { %v3132_v58 = vld [vmem:[#allocation2 + $0x54] sm:$0xf]  ;;  %v10881_v36 = vrot.slane %v2294_v61, 5  ;;  %v10883_v28 = vrot.slane %v2298_v42, 4  ;;  %v2770_v12 = vshll.u32 %v10844_v23, 16  ;;  %v3770_v63 = vshrl.u32 %v10865_v25, 16 }
 0x1bc   : > { %3164 = vst [vmem:[#allocation3 + $0x130] sm:$0xf] %v3132_v58  ;;  %v10887_v17 = vrot.slane %v1775_v14, 7  ;;  %v10889_v30 = vrot.slane %v2780_v45, 7  ;;  %v3311_v62 = vrot.slane %v3309_v40, 4  ;;  %v3314_v6 = vrot.slane %v3312_v7, 5 }
 0x1bd   : > { %14281 = vst [vmem:[#allocation31_spill] sm:$0xff] %v10883_v28  ;;  %v10891_v51 = vld [vmem:[#allocation2 + $0x48] sm:$0xf]  ;;  %v2769_v47 = vrot.slane %v2767_v50, 7  ;;  %v2315_v43 = vor.u32 %v2314_v46, %v2311_v9  ;;  %v10893_v60 = vrot.slane %v3783_v53, 7  ;;  %v4310_v61 = vshrl.u32 %v4219_v32, 16 }
 0x1be   : > { %14282 = vst [vmem:[#allocation48_spill] sm:$0xff] %v10889_v30  ;;  %v4155_v42 = vld [vmem:[#allocation2 + $0x54] sm:$0xf]  ;;  %v10895_v28 = vrot.slane %v3294_v54, 5  ;;  %v10897_v23 = vrot.slane %v3298_v4, 4  ;;  %v4313_v14 = vshll.u32 %v4219_v32, 16  ;;  %v3315_v32 = vor.u32 %v3314_v6, %v3311_v62 }
 0x1bf   : > { %14283 = vst [vmem:[#allocation49_spill] sm:$0xff] %v10893_v60  ;;  %4187 = vst [vmem:[#allocation3 + $0xf4] sm:$0xf] %v4155_v42  ;;  %v10900_v45 = vrot.slane %v3770_v63, 7  ;;  %v1778_v40 = vshll.u32 %v10848_v26, 16  ;;  %v2783_v7 = vshll.u32 %v10855_v27, 16  ;;  %v10927_v4 = vor.u32 %v1765_v57, %v1764_v22 }
 0x1c0   : > { %14284 = vst [vmem:[#allocation50_spill] sm:$0xff] %v10895_v28  ;;  %14285 = vst [vmem:[#allocation51_spill] sm:$0xff] %v10897_v23  ;;  %v1784_v50 = vshrl.u32 %v10891_v51, 16  ;;  %v10905_v9 = vld [vmem:[#allocation2 + $0x48] sm:$0xf]  ;;  %v14287_v46 = vshll.u32 %v10790_v34, 16 }
 0x1c1   : > { %14286 = vst [vmem:[#allocation52_spill] sm:$0xff] %v10900_v45  ;;  %v10914_v63 = vld [vmem:[#allocation2 + $0x48] sm:$0xf]  ;;  %v2176_v42 = vld [vmem:[#allocation2 + $0x54] sm:$0xf]  ;;  %v10916_v26 = vrot.slane %v2315_v43, 4  ;;  %v10952_v10 = vor.u32 %v2783_v7, %v10889_v30 }
 0x1c2   : > { %v10910_v53 = vor.u32 %v14287_v46, %v10821_v39  ;;  %v4312_v25 = vrot.slane %v4310_v61, 4  ;;  %v10920_v45 = vld [vmem:[#allocation2 + $0x54] sm:$0xf]  ;;  %v14289_v34 = vshll.u32 %v10792_v11, 16  ;;  %v4315_v62 = vrot.slane %v4313_v14, 5  ;;  %v9638_v30 = vld [vmem:[#allocation9 + $0x160] sm:$0xff]  }
 0x1c3   : > { %14288 = vst [vmem:[#allocation53_spill] sm:$0xff] %v10916_v26  ;;  %v2318_v6 = vshll.u32 %v10905_v9, 16  ;;  %v10930_v54 = vld [vmem:[#allocation2 + $0x48] sm:$0xf]  ;;  %v10932_v43 = vld [vmem:[#allocation2 + $0x54] sm:$0xf]  ;;  %9075 = vmatprep.subr.bf16.mxu0 %v9638_v30 }
 0x1c4   : > { %v10925_v46 = vor.u32 %v14289_v34, %v10823_v8  ;;  %v3200_v27 = vld [vmem:[#allocation2 + $0x54] sm:$0xf]  ;;  %v9598_v3 = vld [vmem:[#allocation3 + $0x4c] ss:$36 sps:$4 sm:$0xff]   ;;  %v1786_v58 = vrot.slane %v1784_v50, 7  ;;  %v1787_v61 = vshll.u32 %v10891_v51, 16  ;;  %v10944_v50 = vor.u32 %v2770_v12, %v2769_v47 }
 0x1c5   : > { %v10935_v60 = vld [vmem:[#allocation2 + $0x48] sm:$0xf]  ;;  %v2333_v23 = vshrl.u32 %v2176_v42, 16  ;;  %v2336_v11 = vshll.u32 %v2176_v42, 16  ;;  %v10937_v28 = vrot.slane %v3315_v32, 4  ;;  %v2322_v57 = vshrl.u32 %v10905_v9, 16  ;;  %6228 = vmatprep.mubr.bf16.mxu0 %v9598_v3 }
 0x1c6   : > { %14290 = vst [vmem:[#allocation54_spill] sm:$0xff] %v10935_v60  ;;  %v9600_v34 = vld [vmem:[#allocation3 + $0x8] ss:$36 sps:$4 sm:$0xff]   ;;  %v2789_v22 = vshrl.u32 %v10914_v63, 16  ;;  %v2792_v14 = vshll.u32 %v10914_v63, 16  ;;  %v10947_v51 = vor.u32 %v1778_v40, %v10887_v17  ;;  %v3333_v42 = vshrl.u32 %v3200_v27, 16 }
 0x1c7   : > { %14291 = vst [vmem:[#allocation55_spill] sm:$0xff] %v10937_v28  ;;  %v4220_v26 = vld [vmem:[#allocation2 + $0x48] sm:$0xf]  ;;  %v9602_v48 = vld [vmem:[#allocation3 + $0xc] ss:$36 sps:$4 sm:$0xff]   ;;  %v3336_v49 = vshll.u32 %v3200_v27, 16  ;;  %v4316_v63 = vor.u32 %v4315_v62, %v4312_v25  ;;  %v10961_v25 = vor.u32 %v1787_v61, %v1786_v58 }
 0x1c8   : > { %v10949_v32 = vld [vmem:[#allocation2 + $0x54] sm:$0xf]  ;;  %v9603_v28 = vld [vmem:[#allocation3 + $0x48] ss:$36 sps:$4 sm:$0xff]   ;;  %14293 = vst [vmem:[#allocation57_spill] sm:$0xff] %v10952_v10  ;;  %v10954_v24 = vrot.slane %v2318_v6, 5  ;;  %6381 = vmatprep.mubr.bf16.mxu1 %v9602_v48  ;;  %v8786_v48 = vpop.f32.mrf.mxu1 }
 0x1c9   : > { %14292 = vst [vmem:[#allocation56_spill] sm:$0xff] %v10949_v32  ;;  %v2102_v9 = vld [vmem:[#allocation2 + $0x28] sm:$0xf]  ;;  %v1797_v3 = vshrl.u32 %v10920_v45, 16  ;;  %v10957_v38 = vld [vmem:[#allocation2 + $0x54] sm:$0xf]  ;;  %6229 = vmatmul.mubr.bf16.gmra.mxu0 %v9603_v28  ;;  %6382 = vmatmul.mubr.bf16.vlgmr.msra.gmra.mxu1 %v9600_v34 }
 0x1ca   : > { %14294 = vst [vmem:[#allocation58_spill] sm:$0xff] %v10954_v24  ;;  %2134 = vst [vmem:[#allocation3 + $0xb8] sm:$0xf] %v2102_v9  ;;  %v2104_v12 = vld [vmem:[#allocation2 + $0x38] sm:$0xf]  ;;  %v3318_v47 = vshll.u32 %v10930_v54, 16 }
 0x1cb   : > { %v2335_v40 = vrot.slane %v2333_v23, 4  ;;  %v2338_v27 = vrot.slane %v2336_v11, 5  ;;  %v2802_v21 = vshrl.u32 %v10932_v43, 16  ;;  %2136 = vst [vmem:[#allocation3 + $0x100] sm:$0xf] %v2104_v12  ;;  %v2791_v62 = vrot.slane %v2789_v22, 7 }
 0x1cc   : > { %v2106_v7 = vld [vmem:[#allocation2 + $0x48] sm:$0xf]  ;;  %v3322_v6 = vshrl.u32 %v10930_v54, 16  ;;  %v3792_v24 = vshrl.u32 %v10935_v60, 16  ;;  %v2108_v9 = vld [vmem:[#allocation2 + $0x58] sm:$0xf] }
 0x1cd   : > { %2138 = vst [vmem:[#allocation3 + $0x148] sm:$0xf] %v2106_v7  ;;  %v4319_v10 = vshll.u32 %v4220_v26, 16  ;;  %v4323_v23 = vshrl.u32 %v4220_v26, 16  ;;  %v3335_v11 = vrot.slane %v3333_v42, 4  ;;  %v3338_v56 = vrot.slane %v3336_v49, 5 }
 0x1ce   : > { %2140 = vst [vmem:[#allocation3 + $0x190] sm:$0xf] %v2108_v9  ;;  %v10965_v28 = vrot.slane %v4316_v63, 4  ;;  %v10967_v34 = vrot.slane %v2322_v57, 4  ;;  %v10969_v58 = vrot.slane %v1797_v3, 7  ;;  %v3805_v61 = vshrl.u32 %v10949_v32, 16  ;;  %v8788_v3 = vpop.f32.mrf.mxu1 }
 0x1cf   : > { %v9639_v54 = vld [vmem:[#allocation9 + $0x120] sm:$0xff]   ;;  %v10972_v22 = vrot.slane %v3318_v47, 5  ;;  %v2339_v12 = vor.u32 %v2338_v27, %v2335_v40  ;;  %v10974_v7 = vrot.slane %v2802_v21, 7  ;;  %v4334_v26 = vshrl.u32 %v10957_v38, 16  ;;  %v10989_v40 = vld [vmem:[#allocation2 + $0x58] sm:$0xf] }
 0x1d0   : > { %14295 = vst [vmem:[#allocation59_spill] sm:$0xff] %v10965_v28  ;;  %v10977_v42 = vor.u32 %v2792_v14, %v2791_v62  ;;  %v10979_v49 = vrot.slane %v3322_v6, 4  ;;  %v10981_v63 = vrot.slane %v3792_v24, 7  ;;  %9076 = vmatpush3.bf16.msra.mxu0 %v9639_v54  ;;  %v10984_v9 = vrot.slane %v4319_v10, 5  ;;  %v10996_v6 = vld [vmem:[#allocation2 + $0x58] sm:$0xf]  ;;  %v8789_v47 = vpop.f32.mrf.mxu1 }
 0x1d1   : > { %14296 = vst [vmem:[#allocation60_spill] sm:$0xff] %v10972_v22  ;;  %v10986_v30 = vrot.slane %v4323_v23, 4  ;;  %v3339_v21 = vor.u32 %v3338_v56, %v3335_v11  ;;  %v10993_v62 = vrot.slane %v3805_v61, 7  ;;  %v4337_v24 = vshll.u32 %v10957_v38, 16  ;;  %v11004_v56 = vpop.f32.mrf.mxu0  ;;  %v4223_v61 = vld [vmem:[#allocation2 + $0x58] sm:$0xf] }
 0x1d2   : > { %14297 = vst [vmem:[#allocation61_spill] sm:$0xff] %v10979_v49  ;;  %14298 = vst [vmem:[#allocation62_spill] sm:$0xff] %v10981_v63  ;;  %v10998_v54 = vrot.slane %v2339_v12, 4  ;;  %v11002_v57 = vrot.slane %v4334_v26, 4  ;;  %v1806_v11 = vshrl.u32 %v10989_v40, 16  ;;  %v14302_v27 = vmax.f32 %v10725_v29, 0.0 }
 0x1d3   : > { %14299 = vst [vmem:[#allocation63_spill] sm:$0xff] %v10984_v9  ;;  %14300 = vst [vmem:[#allocation64_spill] sm:$0xff] %v10986_v30  ;;  %v1355_v12 = vadd.f32 %v10857_v19, %v10795_v15  ;;  %v11013_v10 = vrot.slane %v3339_v21, 4  ;;  %v2342_v26 = vshll.u32 %v10996_v6, 16  ;;  %v14304_v23 = vrot.slane %v14246_v59, 4  ;;  %v11030_v28 = vpop.f32.mrf.mxu0 }
 0x1d4   : > { %14301 = vst [vmem:[#allocation65_spill] sm:$0xff] %v10993_v62  ;;  %v8598_v38 = vpack.c.bf16 %v14302_v27, %v14302_v27  ;;  %v14305_v14 = vrot.slane %v10651_v44, 4  ;;  %v11027_v15 = vrot.slane %v4337_v24, 5  ;;  %v8787_v21 = vadd.f32 %v8786_v48, %v10942_v5  ;;  %v11041_v24 = vld [vmem:[#allocation2 + $0x58] sm:$0xf] }
 0x1d5   : > { %14303 = vst [vmem:[#allocation66_spill] sm:$0xff] %v11013_v10  ;;  %v1746_v30 = vsel %vm10432_vm5, %v14304_v23, %v10853_v55  ;;  %v1449_v19 = vmax.f32 %v1355_v12, 0.0  ;;  %v4343_v59 = vshll.u32 %v4223_v61, 16  ;;  %v8790_v55 = vadd.f32 %v8789_v47, %v8788_v3 }
 0x1d6   : > { %v2751_v29 = vsel %vm10432_vm5, %v14305_v14, %v10879_v35  ;;  %1609 = vst [vmem:[#allocation2 + $0x64] sm:$0xf] %v8598_v38  ;;  %2070 = vst [vmem:[#allocation3 + $0xb4] sm:$0xf] %v1746_v30  ;;  %v1759_v44 = vsel %vm10432_vm5, %v10700_v16, %v10910_v53  ;;  %v14306_v35 = vrot.slane %v10821_v39, 4  ;;  %v4347_v30 = vshrl.u32 %v4223_v61, 16 }
 0x1d7   : > { %3095 = vst [vmem:[#allocation3 + $0x78] sm:$0xf] %v2751_v29  ;;  %v8599_v23 = vpack.c.bf16 %v1449_v19, %v1449_v19  ;;  %v1360_v5 = vadd.f32 %v8787_v21, %v10798_v37  ;;  %2071 = vst [vmem:[#allocation3 + $0xd8] sm:$0xf] %v1759_v44  ;;  %v2273_v48 = vsel %vm10453_vm10, %v10747_v52, %v10802_v20  ;;  %v14308_v37 = vrot.slane %v10823_v8, 4  ;;  %v14313_v19 = vld [vmem:[#allocation28_spill] sm:$0xff] }
 0x1d8   : > { %v1768_v14 = vsel %vm10432_vm5, %v14306_v35, %v10927_v4  ;;  %v1363_v16 = vadd.f32 %v8790_v55, %v10839_v33  ;;  %v14307_v39 = vor.u32 %v10809_v18, %v10802_v20  ;;  %2632 = vst [vmem:[#allocation3 + $0x98] sm:$0xf] %v2273_v48  ;;  %v2764_v4 = vsel %vm10432_vm5, %v10708_v13, %v10925_v46  ;;  %v11069_v13 = vpop.f32.mrf.mxu0 }
 0x1d9   : > { %2072 = vst [vmem:[#allocation3 + $0xfc] sm:$0xf] %v1768_v14  ;;  %v2773_v3 = vsel %vm10432_vm5, %v14308_v37, %v10944_v50  ;;  %v11061_v47 = vrot.slane %v1806_v11, 7  ;;  %v11063_v52 = vrot.slane %v2342_v26, 5  ;;  %v2346_v33 = vshrl.u32 %v10996_v6, 16  ;;  %v14317_v37 = vld [vmem:[#allocation57_spill] sm:$0xff] }
 0x1da   : > { %v2278_v53 = vrot.slane %v14307_v39, 4  ;;  %1610 = vst [vmem:[#allocation2 + $0x68] sm:$0xf] %v8599_v23  ;;  %v1450_v20 = vmax.f32 %v1360_v5, 0.0  ;;  %3096 = vst [vmem:[#allocation3 + $0x9c] sm:$0xf] %v2764_v4  ;;  %v1781_v12 = vsel %vm10432_vm5, %v10718_v0, %v10947_v51  ;;  %v4340_v35 = vor.u32 %v11027_v15, %v11002_v57  ;;  %v11109_v4 = vpop.f32.mrf.mxu1 }
 0x1db   : > { %14309 = vst [vmem:[#allocation67_spill] sm:$0xff] %v11063_v52  ;;  %3097 = vst [vmem:[#allocation3 + $0xc0] sm:$0xf] %v2773_v3  ;;  %v2811_v18 = vshrl.u32 %v11041_v24, 16  ;;  %v11067_v61 = vrot.slane %v4343_v59, 5  ;;  %v1451_v8 = vmax.f32 %v1363_v16, 0.0 }
 0x1dc   : > { %v2283_v46 = vsel %vm10453_vm10, %v2278_v53, %v10704_v31  ;;  %v3201_v50 = vld [vmem:[#allocation2 + $0x58] sm:$0xf]  ;;  %v4349_v38 = vrot.slane %v4347_v30, 4  ;;  %v8600_v6 = vpack.c.bf16 %v1450_v20, %v1450_v20  ;;  %v14312_v26 = vrot.slane %v10887_v17, 4  ;;  %v11088_v31 = vld [vmem:[%s14054_s2] ss:$0 sm:$0xff]  ;;  %v8683_v53 = vpop.f32.mrf.mxu0 }
 0x1dd   : > { %14310 = vst [vmem:[#allocation68_spill] sm:$0xff] %v11067_v61  ;;  %v11074_v11 = vld [vmem:[#allocation2 + $0x58] sm:$0xf]  ;;  %2633 = vst [vmem:[#allocation3 + $0xbc] sm:$0xf] %v2283_v46  ;;  %v11092_v21 = vadd.f32 %v11088_v31, %v14313_v19  ;;  %v11096_v59 = vadd.f32 %v11088_v31, %v10788_v1  ;;  %v8601_v55 = vpack.c.bf16 %v1451_v8, %v1451_v8  ;;  %v3342_v5 = vshll.u32 %v3201_v50, 16 }
 0x1de   : > { %14311 = vst [vmem:[#allocation69_spill] sm:$0xff] %v11074_v11  ;;  %v1790_v29 = vsel %vm10432_vm5, %v14312_v26, %v10961_v25  ;;  %v11098_v0 = vld [vmem:[#allocation2 + $0x64] sm:$0xf]  ;;  %2073 = vst [vmem:[#allocation3 + $0x120] sm:$0xf] %v1781_v12  ;;  %v14316_v25 = vld [vmem:[#allocation44_spill] sm:$0xff] }
 0x1df   : > { %14314 = vst [vmem:[#allocation28_spill] sm:$0xff] %v11092_v21  ;;  %14315 = vst [vmem:[#allocation70_spill] sm:$0xff] %v11096_v59  ;;  %v2109_v51 = vld [vmem:[#allocation2 + $0x64] sm:$0xf]  ;;  %v2297_v44 = vsel %vm10453_vm10, %v14316_v25, %v10881_v36  ;;  %v3346_v48 = vshrl.u32 %v3201_v50, 16  ;;  %v14318_v3 = vld [vmem:[#allocation36_spill] sm:$0xff]  ;;  %v4350_v50 = vor.u32 %v4349_v38, %v11067_v61 }
 0x1e0   : > { %v2179_v17 = vld [vmem:[#allocation2 + $0x64] sm:$0xf]  ;;  %2074 = vst [vmem:[#allocation3 + $0x144] sm:$0xf] %v1790_v29  ;;  %2141 = vst [vmem:[#allocation3 + $0x1b4] sm:$0xf] %v2109_v51  ;;  %v2786_v57 = vsel %vm10432_vm5, %v14318_v3, %v14317_v37 }
 0x1e1   : > { %v2357_v30 = vshrl.u32 %v2179_v17, 16  ;;  %v2360_v1 = vshll.u32 %v2179_v17, 16  ;;  %v11107_v23 = vld [vmem:[#allocation2 + $0x64] sm:$0xf]  ;;  %1611 = vst [vmem:[#allocation2 + $0x74] sm:$0xf] %v8600_v6 }
 0x1e2   : > { %2634 = vst [vmem:[#allocation3 + $0xe0] sm:$0xf] %v2297_v44  ;;  %v3134_v16 = vld [vmem:[#allocation2 + $0x64] sm:$0xf]  ;;  %1612 = vst [vmem:[#allocation2 + $0x78] sm:$0xf] %v8601_v55 }
 0x1e3   : > { %v3203_v39 = vld [vmem:[#allocation2 + $0x64] sm:$0xf]  ;;  %v14319_v15 = vld [vmem:[#allocation48_spill] sm:$0xff]  ;;  %v3814_v46 = vshrl.u32 %v11074_v11, 16  ;;  %v1819_v6 = vshrl.u32 %v11098_v0, 16  ;;  %v2824_v12 = vshrl.u32 %v11107_v23, 16 }
 0x1e4   : > { %v14320_v20 = vrot.slane %v14319_v15, 4  ;;  %v11124_v26 = vld [vmem:[#allocation2 + $0x64] sm:$0xf]  ;;  %3166 = vst [vmem:[#allocation3 + $0x178] sm:$0xf] %v3134_v16  ;;  %v11126_v29 = vrot.slane %v2346_v33, 4 }
 0x1e5   : > { %14321 = vst [vmem:[#allocation44_spill] sm:$0xff] %v11124_v26  ;;  %3098 = vst [vmem:[#allocation3 + $0xe4] sm:$0xf] %v2786_v57  ;;  %v2359_v19 = vrot.slane %v2357_v30, 4  ;;  %v2362_v51 = vrot.slane %v2360_v1, 5  ;;  %v3827_v17 = vshrl.u32 %v11124_v26, 16  ;;  %v8685_v1 = vpop.f32.mrf.mxu0 }
 0x1e6   : > { %v2795_v8 = vsel %vm10432_vm5, %v14320_v20, %v10977_v42  ;;  %v4157_v42 = vld [vmem:[#allocation2 + $0x64] sm:$0xf]  ;;  %v11129_v55 = vrot.slane %v4340_v35, 4  ;;  %v11131_v25 = vrot.slane %v2811_v18, 7  ;;  %v3357_v38 = vshrl.u32 %v3203_v39, 16  ;;  %v11140_v20 = vpop.f32.mrf.mxu1  ;;  %v14330_v61 = vld [vmem:[#allocation34_spill] sm:$0xff] }
 0x1e7   : > { %3099 = vst [vmem:[#allocation3 + $0x108] sm:$0xf] %v2795_v8  ;;  %v3360_v44 = vshll.u32 %v3203_v39, 16  ;;  %4189 = vst [vmem:[#allocation3 + $0x13c] sm:$0xf] %v4157_v42  ;;  %v11135_v16 = vrot.slane %v3342_v5, 5 }
 0x1e8   : > { %14322 = vst [vmem:[#allocation57_spill] sm:$0xff] %v11129_v55  ;;  %v11137_v57 = vrot.slane %v3346_v48, 4  ;;  %v4225_v30 = vld [vmem:[#allocation2 + $0x64] sm:$0xf]  ;;  %v11142_v35 = vrot.slane %v3814_v46, 7  ;;  %v11144_v18 = vrot.slane %v4350_v50, 4  ;;  %v2363_v48 = vor.u32 %v2362_v51, %v2359_v19  ;;  %v8686_v51 = vpop.f32.mrf.mxu0 }
 0x1e9   : > { %14325 = vst [vmem:[#allocation36_spill] sm:$0xff] %v11135_v16  ;;  %v11146_v8 = vrot.slane %v1819_v6, 7  ;;  %v11148_v39 = vrot.slane %v2824_v12, 7  ;;  %v11150_v42 = vld [vmem:[#allocation2 + $0x68] sm:$0xf]  ;;  %v11154_v15 = vrot.slane %v3827_v17, 7  ;;  %v8681_v19 = vadd.f32 %v11030_v28, %v11004_v56  ;;  %v11165_v17 = vpop.f32.mrf.mxu1 }
 0x1ea   : > { %14326 = vst [vmem:[#allocation48_spill] sm:$0xff] %v11137_v57  ;;  %14327 = vst [vmem:[#allocation71_spill] sm:$0xff] %v11142_v35  ;;  %v3359_v33 = vrot.slane %v3357_v38, 4  ;;  %v3362_v14 = vrot.slane %v3360_v44, 5  ;;  %v4358_v55 = vshrl.u32 %v4225_v30, 16  ;;  %v4361_v46 = vshll.u32 %v4225_v30, 16 }
 0x1eb   : > { %14328 = vst [vmem:[#allocation72_spill] sm:$0xff] %v11144_v18  ;;  %14329 = vst [vmem:[#allocation73_spill] sm:$0xff] %v11154_v15  ;;  %v14331_v50 = vld [vmem:[#allocation33_spill] sm:$0xff]  ;;  %v1828_v9 = vshrl.u32 %v11150_v42, 16  ;;  %v2180_v10 = vld [vmem:[#allocation2 + $0x68] sm:$0xf] }
 0x1ec   : > { %v14332_v18 = vshll.u32 %v14331_v50, 16  ;;  %v9604_v5 = vld [vmem:[#allocation3 + $0x94] ss:$36 sps:$4 sm:$0xff]   ;;  %v11170_v50 = vadd.f32 %v8686_v51, %v8685_v1  ;;  %v11179_v28 = vrot.slane %v2363_v48, 4  ;;  %v11182_v38 = vld [vmem:[#allocation2 + $0x68] sm:$0xf]  ;;  %v3363_v51 = vor.u32 %v3362_v14, %v3359_v33 }
 0x1ed   : > { %v9606_v30 = vld [vmem:[#allocation3 + $0x54] ss:$36 sps:$4 sm:$0xff]   ;;  %6236 = vmatprep.mubr.bf16.mxu0 %v9604_v5  ;;  %v4363_v27 = vrot.slane %v4361_v46, 5  ;;  %v3204_v11 = vld [vmem:[#allocation2 + $0x68] sm:$0xf]  ;;  %v2366_v48 = vshll.u32 %v2180_v10, 16 }
 0x1ee   : > { %v11159_v6 = vor.u32 %v14332_v18, %v14330_v61  ;;  %v8684_v18 = vadd.f32 %v8683_v53, %v11069_v13  ;;  %v14336_v3 = vld [vmem:[#allocation40_spill] sm:$0xff]  ;;  %v14337_v61 = vld [vmem:[#allocation19_spill] sm:$0xff]  ;;  %v14342_v13 = vld [vmem:[#allocation25_spill] sm:$0xff]  ;;  %6389 = vmatprep.mubr.bf16.mxu1 %v9606_v30  ;;  %v2370_v56 = vshrl.u32 %v2180_v10, 16  ;;  %v14346_v14 = vshll.u32 %v10920_v45, 16 }
 0x1ef   : > { %v14338_v59 = vshll.u32 %v14337_v61, 16  ;;  %14340 = vst [vmem:[#allocation19_spill] sm:$0xff] %v11179_v28  ;;  %v9608_v44 = vld [vmem:[#allocation3 + $0x90] ss:$36 sps:$4 sm:$0xff]   ;;  %v14343_v53 = vshll.u32 %v14342_v13, 16  ;;  %v14347_v33 = vshll.u32 %v10932_v43, 16  ;;  %v8688_v13 = vpop.f32.mrf.mxu0 }
 0x1f0   : > { %14333 = vst [vmem:[#allocation33_spill] sm:$0xff] %v11159_v6  ;;  %v14341_v26 = vld [vmem:[#allocation43_spill] sm:$0xff]  ;;  %v4360_v6 = vrot.slane %v4358_v55, 4  ;;  %6237 = vmatmul.mubr.bf16.gmra.mxu0 %v9608_v44  ;;  %v11197_v55 = vor.u32 %v14346_v14, %v10969_v58  ;;  %v11204_v46 = vld [vmem:[#allocation2 + $0x68] sm:$0xf]  ;;  %v1210_v43 = vadd.f32 %v11088_v31, %v8684_v18  ;;  %v2833_v35 = vshrl.u32 %v11182_v38, 16 }
 0x1f1   : > { %v11177_v21 = vor.u32 %v14338_v59, %v14336_v3  ;;  %v11187_v1 = vor.u32 %v14343_v53, %v14341_v26  ;;  %v9609_v61 = vld [vmem:[#allocation3 + $0x50] ss:$36 sps:$4 sm:$0xff]   ;;  %v11189_v59 = vrot.slane %v1828_v9, 7  ;;  %v11202_v9 = vor.u32 %v14347_v33, %v10974_v7  ;;  %v4226_v30 = vld [vmem:[#allocation2 + $0x68] sm:$0xf] }
 0x1f2   : > { %v2111_v5 = vld [vmem:[#allocation2 + $0x74] sm:$0xf]  ;;  %6390 = vmatmul.mubr.bf16.gmra.mxu1 %v9609_v61  ;;  %v1207_v53 = vadd.f32 %v11088_v31, %v8681_v19  ;;  %v8793_v33 = vadd.f32 %v11140_v20, %v11109_v4  ;;  %v11214_v26 = vrot.slane %v3363_v51, 4  ;;  %v4364_v61 = vor.u32 %v4363_v27, %v4360_v6  ;;  %v8689_v51 = vpop.f32.mrf.mxu0 }
 0x1f3   : > { %14339 = vst [vmem:[#allocation40_spill] sm:$0xff] %v11177_v21  ;;  %14344 = vst [vmem:[#allocation25_spill] sm:$0xff] %v11187_v1  ;;  %v8795_v21 = vpop.f32.mrf.mxu1  ;;  %v14345_v15 = vld [vmem:[#allocation31_spill] sm:$0xff]  ;;  %v11218_v19 = vrot.slane %v2366_v48, 5  ;;  %v3366_v57 = vshll.u32 %v3204_v11, 16  ;;  %v3370_v37 = vshrl.u32 %v3204_v11, 16 }
 0x1f4   : > { %14348 = vst [vmem:[#allocation31_spill] sm:$0xff] %v11204_v46  ;;  %v11206_v10 = vld [vmem:[#allocation2 + $0x74] sm:$0xf]  ;;  %2143 = vst [vmem:[#allocation3 + $0x1fc] sm:$0xf] %v2111_v5  ;;  %v3836_v5 = vshrl.u32 %v11204_v46, 16  ;;  %v8796_v11 = vadd.f32 %v8795_v21, %v11165_v17 }
 0x1f5   : > { %v2182_v44 = vld [vmem:[#allocation2 + $0x74] sm:$0xf]  ;;  %14349 = vst [vmem:[#allocation74_spill] sm:$0xff] %v11214_v26  ;;  %v1841_v16 = vshrl.u32 %v11206_v10, 16  ;;  %v11223_v18 = vpop.f32.mrf.mxu1  ;;  %v4367_v26 = vshll.u32 %v4226_v30, 16  ;;  %v2835_v32 = vrot.slane %v2833_v35, 7 }
 0x1f6   : > { %v2381_v3 = vshrl.u32 %v2182_v44, 16  ;;  %v2384_v45 = vshll.u32 %v2182_v44, 16  ;;  %v11209_v14 = vld [vmem:[#allocation2 + $0x74] sm:$0xf]  ;;  %v11220_v44 = vrot.slane %v2370_v56, 4  ;;  %v11227_v56 = vrot.slane %v4364_v61, 4 }
 0x1f7   : > { %v3136_v1 = vld [vmem:[#allocation2 + $0x74] sm:$0xf]  ;;  %v2846_v4 = vshrl.u32 %v11209_v14, 16  ;;  %v4371_v62 = vshrl.u32 %v4226_v30, 16  ;;  %v11232_v63 = vrot.slane %v3366_v57, 5  ;;  %v11235_v49 = vrot.slane %v1841_v16, 7  ;;  %v8798_v28 = vpop.f32.mrf.mxu1 }
 0x1f8   : > { %v3206_v12 = vld [vmem:[#allocation2 + $0x74] sm:$0xf]  ;;  %3168 = vst [vmem:[#allocation3 + $0x1c0] sm:$0xf] %v3136_v1  ;;  %14350 = vst [vmem:[#allocation75_spill] sm:$0xff] %v11220_v44  ;;  %v2383_v1 = vrot.slane %v2381_v3, 4  ;;  %v8690_v44 = vadd.f32 %v8689_v51, %v8688_v13 }
 0x1f9   : > { %v3381_v20 = vshrl.u32 %v3206_v12, 16  ;;  %v3384_v27 = vshll.u32 %v3206_v12, 16  ;;  %v4159_v6 = vld [vmem:[#allocation2 + $0x74] sm:$0xf]  ;;  %v2386_v48 = vrot.slane %v2384_v45, 5  ;;  %14351 = vst [vmem:[#allocation76_spill] sm:$0xff] %v11227_v56 }
 0x1fa   : > { %4191 = vst [vmem:[#allocation3 + $0x184] sm:$0xf] %v4159_v6  ;;  %v11229_v60 = vld [vmem:[#allocation2 + $0x74] sm:$0xf]  ;;  %14353 = vst [vmem:[#allocation78_spill] sm:$0xff] %v11232_v63  ;;  %v11237_v3 = vrot.slane %v3370_v37, 4 }
 0x1fb   : > { %14352 = vst [vmem:[#allocation77_spill] sm:$0xff] %v11229_v60  ;;  %v4228_v22 = vld [vmem:[#allocation2 + $0x74] sm:$0xf]  ;;  %v11239_v45 = vrot.slane %v2846_v4, 7  ;;  %v3383_v61 = vrot.slane %v3381_v20, 4  ;;  %v3386_v35 = vrot.slane %v3384_v27, 5  ;;  %v2387_v21 = vor.u32 %v2386_v48, %v2383_v1  ;;  %v8800_v48 = vpop.f32.mrf.mxu1 }
 0x1fc   : > { %14354 = vst [vmem:[#allocation79_spill] sm:$0xff] %v11237_v3  ;;  %v11241_v30 = vrot.slane %v3836_v5, 7  ;;  %v11243_v6 = vrot.slane %v4367_v26, 5  ;;  %v3849_v57 = vshrl.u32 %v11229_v60, 16  ;;  %v11246_v17 = vrot.slane %v4371_v62, 4 }
 0x1fd   : > { %v4382_v51 = vshrl.u32 %v4228_v22, 16  ;;  %v14358_v37 = vshll.u32 %v10989_v40, 16  ;;  %v11256_v20 = vld [vmem:[#allocation2 + $0x78] sm:$0xf]  ;;  %v9612_v26 = vld [vmem:[#allocation3 + $0xdc] ss:$36 sps:$4 sm:$0xff]   ;;  %v1368_v27 = vadd.f32 %v8793_v33, %v1207_v53  ;;  %v1371_v1 = vadd.f32 %v8796_v11, %v1210_v43 }
 0x1fe   : > { %14355 = vst [vmem:[#allocation80_spill] sm:$0xff] %v11241_v30  ;;  %14356 = vst [vmem:[#allocation81_spill] sm:$0xff] %v11243_v6  ;;  %v14359_v62 = vshll.u32 %v11041_v24, 16  ;;  %v3387_v16 = vor.u32 %v3386_v35, %v3383_v61  ;;  %v9614_v40 = vld [vmem:[#allocation3 + $0x9c] ss:$36 sps:$4 sm:$0xff]   ;;  %v11270_v5 = vrot.slane %v3849_v57, 7  ;;  %6244 = vmatprep.mubr.bf16.mxu0 %v9612_v26  ;;  %v1218_v35 = vadd.f32 %v11088_v31, %v8690_v44 }
 0x1ff   : > { %14357 = vst [vmem:[#allocation82_spill] sm:$0xff] %v11246_v17  ;;  %v11253_v4 = vor.u32 %v14358_v37, %v11061_v47  ;;  %v11264_v17 = vld [vmem:[#allocation2 + $0x78] sm:$0xf]  ;;  %v1215_v47 = vadd.f32 %v11088_v31, %v11170_v50  ;;  %v11268_v37 = vrot.slane %v2387_v21, 4  ;;  %v4385_v43 = vshll.u32 %v4228_v22, 16  ;;  %6397 = vmatprep.mubr.bf16.mxu1 %v9614_v40 }
 0x200   : > { %v11261_v12 = vor.u32 %v14359_v62, %v11131_v25  ;;  %14360 = vst [vmem:[#allocation83_spill] sm:$0xff] %v11270_v5  ;;  %v9616_v24 = vld [vmem:[#allocation3 + $0xd8] ss:$36 sps:$4 sm:$0xff]   ;;  %v14361_v25 = vshll.u32 %v11150_v42, 16  ;;  %v11278_v11 = vrot.slane %v4382_v51, 4  ;;  %v1850_v61 = vshrl.u32 %v11256_v20, 16  ;;  %v11284_v42 = vpop.f32.mrf.mxu0 }
 0x201   : > { %v9617_v50 = vld [vmem:[#allocation3 + $0x98] ss:$36 sps:$4 sm:$0xff]   ;;  %v9618_v21 = vld [vmem:[#allocation3 + $0x124] ss:$36 sps:$4 sm:$0xff]   ;;  %v1646_v57 = vld [vmem:[#allocation2 + $0x50] sm:$0x8]  ;;  %6245 = vmatmul.mubr.bf16.gmra.mxu0 %v9616_v24  ;;  %v14364_v44 = vor.u32 %v14345_v15, %v10881_v36 }
 0x202   : > { %v11276_v33 = vor.u32 %v14361_v25, %v11189_v59  ;;  %v2390_v22 = vshll.u32 %v11264_v17, 16  ;;  %v1452_v26 = vmax.f32 %v1368_v27, 0.0  ;;  %v1453_v53 = vmax.f32 %v1371_v1, 0.0  ;;  %v8801_v59 = vpop.f32.mrf.mxu1  ;;  %v427_v51 = vld [vmem:[#allocation2 + $0x4c] sm:$0x1]  ;;  %v9652_v25 = vld [vmem:[#allocation9 + $0x158] sm:$0xff]   ;;  %6398 = vmatmul.mubr.bf16.gmra.mxu1 %v9617_v50  ;;  %6252 = vmatprep.mubr.bf16.mxu0 %v9618_v21 }
 0x203   : > { %v14362_v13 = vshll.u32 %v11182_v38, 16  ;;  %v11290_v56 = vrot.slane %v3387_v16, 4  ;;  %v2302_v62 = vrot.slane %v14364_v44, 4  ;;  %v8799_v27 = vadd.f32 %v8798_v28, %v11223_v18  ;;  %v2110_v1 = vld [vmem:[#allocation2 + $0x68] sm:$0xf]  ;;  %9077 = vmatprep.subr.bf16.mxu0 %v9652_v25  ;;  %v14365_v15 = vld [vmem:[#allocation35_spill] sm:$0xff]  ;;  %v11309_v25 = vpop.f32.mrf.mxu0 }
 0x204   : > { %v2112_v24 = vld [vmem:[#allocation2 + $0x78] sm:$0xf]  ;;  %v11297_v60 = vrot.slane %v4385_v43, 5  ;;  %v8603_v38 = vpack.c.bf16 %v1453_v53, %v1453_v53  ;;  %v2672_v16 = vld [vmem:[#allocation2 + $0x50] sm:$0x8]  ;;  %v11301_v50 = vrot.slane %v1850_v61, 7  ;;  %v8802_v21 = vadd.f32 %v8801_v59, %v8800_v48 }
 0x205   : > { %v11288_v40 = vor.u32 %v14362_v13, %v2835_v32  ;;  %14363 = vst [vmem:[#allocation84_spill] sm:$0xff] %v11290_v56  ;;  %v11299_v46 = vld [vmem:[#allocation2 + $0x78] sm:$0xf]  ;;  %v8602_v32 = vpack.c.bf16 %v1452_v26, %v1452_v26  ;;  %2142 = vst [vmem:[#allocation3 + $0x1d8] sm:$0xf] %v2110_v1  ;;  %v2307_v28 = vsel %vm10453_vm10, %v2302_v62, %v14365_v15  ;;  %v11306_v44 = vrot.slane %v2390_v22, 5 }
 0x206   : > { %2144 = vst [vmem:[#allocation3 + $0x220] sm:$0xf] %v2112_v24  ;;  %v9653_v13 = vld [vmem:[#allocation9 + $0x118] sm:$0xff]   ;;  %v1376_v18 = vadd.f32 %v8799_v27, %v1215_v47  ;;  %v2394_v26 = vshrl.u32 %v11264_v17, 16  ;;  %1614 = vst [vmem:[#allocation2 + $0x88] sm:$0xf] %v8603_v38  ;;  %v1379_v22 = vadd.f32 %v8802_v21, %v1218_v35 }
 0x207   : > { %v4229_v36 = vld [vmem:[#allocation2 + $0x78] sm:$0xf]  ;;  %1613 = vst [vmem:[#allocation2 + $0x84] sm:$0xf] %v8602_v32  ;;  %2635 = vst [vmem:[#allocation3 + $0x104] sm:$0xf] %v2307_v28  ;;  %9078 = vmatpush3.bf16.msra.mxu0 %v9653_v13 }
 0x208   : > { %v3125_v43 = vld [vmem:[#allocation2 + $0x18] sm:$0xf]  ;;  %v9622_v53 = vld [vmem:[#allocation3 + $0x120] ss:$36 sps:$4 sm:$0xff]   ;;  %v1792_v61 = vshrl.u32 %v1646_v57, 16  ;;  %v14366_v1 = vrot.slane %v10969_v58, 4 }
 0x209   : > { %3157 = vst [vmem:[#allocation3 + $0x34] sm:$0xf] %v3125_v43  ;;  %v2855_v48 = vshrl.u32 %v11299_v46, 16  ;;  %v11317_v47 = vld [vmem:[#allocation2 + $0x78] sm:$0xf]  ;;  %v1454_v17 = vmax.f32 %v1376_v18, 0.0  ;;  %6253 = vmatmul.mubr.bf16.gmra.mxu0 %v9622_v53 }
 0x20a   : > { %v1812_v62 = vsel %vm10432_vm5, %v14366_v1, %v11253_v4  ;;  %v428_v27 = vsel %vm10441_vm7, 0, %v427_v51  ;;  %v4391_v24 = vshll.u32 %v4229_v36, 16  ;;  %v4395_v57 = vshrl.u32 %v4229_v36, 16  ;;  %v14368_v58 = vld [vmem:[#allocation58_spill] sm:$0xff]  ;;  %v14369_v38 = vld [vmem:[#allocation53_spill] sm:$0xff] }
 0x20b   : > { %2076 = vst [vmem:[#allocation3 + $0x18c] sm:$0xf] %v1812_v62  ;;  %v8290_v32 = vrot.slane %v1792_v61, 11  ;;  %429 = vst [vmem:[#allocation2 + $0x4c] sm:$0x1] %v428_v27  ;;  %v2321_v4 = vsel %vm10453_vm10, %v14369_v38, %v14368_v58  ;;  %v8604_v15 = vpack.c.bf16 %v1454_v17, %v1454_v17  ;;  %v1455_v28 = vmax.f32 %v1379_v22, 0.0  ;;  %v11334_v61 = vpop.f32.mrf.mxu0 }
 0x20c   : > { %v379_v13 = vld [vmem:[#allocation2 + $0x60] sm:$0x8]  ;;  %2636 = vst [vmem:[#allocation3 + $0x128] sm:$0xf] %v2321_v4  ;;  %v2797_v43 = vshrl.u32 %v2672_v16, 16  ;;  %v14370_v35 = vrot.slane %v10974_v7, 4  ;;  %v4388_v36 = vor.u32 %v11297_v60, %v11278_v11 }
 0x20d   : > { %v3390_v21 = vshll.u32 %v11317_v47, 16  ;;  %v1803_v16 = vsel %vm10432_vm5, %v8290_v32, %v11197_v55  ;;  %v3394_v7 = vshrl.u32 %v11317_v47, 16  ;;  %v11340_v1 = vld [vmem:[#allocation2 + $0x78] sm:$0xf]  ;;  %1615 = vst [vmem:[#allocation2 + $0x94] sm:$0xf] %v8604_v15 }
 0x20e   : > { %v2817_v51 = vsel %vm10432_vm5, %v14370_v35, %v11261_v12  ;;  %14371 = vst [vmem:[#allocation35_spill] sm:$0xff] %v11340_v1  ;;  %v8605_v12 = vpack.c.bf16 %v1455_v28, %v1455_v28  ;;  %2075 = vst [vmem:[#allocation3 + $0x168] sm:$0xf] %v1803_v16  ;;  %v8305_v60 = vrot.slane %v2797_v43, 11  ;;  %v380_v62 = vsel %vm10423_vm2, 0, %v379_v13 }
 0x20f   : > { %3101 = vst [vmem:[#allocation3 + $0x150] sm:$0xf] %v2817_v51  ;;  %v11344_v17 = vrot.slane %v2394_v26, 4  ;;  %v11346_v53 = vrot.slane %v4391_v24, 5  ;;  %v4397_v22 = vrot.slane %v4395_v57, 4  ;;  %v14374_v55 = vrot.slane %v11146_v8, 4 }
 0x210   : > { %381 = vst [vmem:[#allocation2 + $0x60] sm:$0x8] %v380_v62  ;;  %v11355_v4 = vld [vmem:[#allocation2 + $0x84] sm:$0xf]  ;;  %1616 = vst [vmem:[#allocation2 + $0x98] sm:$0xf] %v8605_v12  ;;  %v2808_v26 = vsel %vm10432_vm5, %v8305_v60, %v11202_v9  ;;  %v2345_v24 = vsel %vm10453_vm10, %v10998_v54, %v11063_v52  ;;  %v8695_v9 = vpop.f32.mrf.mxu0  ;;  %v11373_v12 = vpop.f32.mrf.mxu1 }
 0x211   : > { %14373 = vst [vmem:[#allocation58_spill] sm:$0xff] %v11346_v53  ;;  %v1834_v47 = vsel %vm10432_vm5, %v14374_v55, %v11276_v33  ;;  %14377 = vst [vmem:[#allocation53_spill] sm:$0xff] %v11355_v4  ;;  %v2113_v15 = vld [vmem:[#allocation2 + $0x84] sm:$0xf]  ;;  %v14378_v33 = vrot.slane %v11148_v39, 4  ;;  %v3858_v13 = vshrl.u32 %v11340_v1, 16 }
 0x212   : > { %v2185_v28 = vld [vmem:[#allocation2 + $0x84] sm:$0xf]  ;;  %2078 = vst [vmem:[#allocation3 + $0x1d4] sm:$0xf] %v1834_v47  ;;  %v1863_v43 = vshrl.u32 %v11355_v4, 16  ;;  %v14380_v54 = vld [vmem:[#allocation52_spill] sm:$0xff] }
 0x213   : > { %v2839_v57 = vsel %vm10432_vm5, %v14378_v33, %v11288_v40  ;;  %v2405_v35 = vshrl.u32 %v2185_v28, 16  ;;  %v2408_v51 = vshll.u32 %v2185_v28, 16  ;;  %v11371_v16 = vld [vmem:[#allocation2 + $0x84] sm:$0xf]  ;;  %2145 = vst [vmem:[#allocation3 + $0x244] sm:$0xf] %v2113_v15  ;;  %v2325_v40 = vor.u32 %v10967_v34, %v14368_v58 }
 0x214   : > { %14379 = vst [vmem:[#allocation85_spill] sm:$0xff] %v11371_v16  ;;  %3100 = vst [vmem:[#allocation3 + $0x12c] sm:$0xf] %v2808_v26  ;;  %v14381_v60 = vld [vmem:[#allocation47_spill] sm:$0xff]  ;;  %v2857_v47 = vrot.slane %v2855_v48, 7  ;;  %v2868_v28 = vshrl.u32 %v11371_v16, 16  ;;  %v4398_v26 = vor.u32 %v4397_v22, %v11346_v53  ;;  %v11399_v22 = vpop.f32.mrf.mxu0  ;;  %v8696_v53 = vadd.f32 %v8695_v9, %v11334_v61 }
 0x215   : > { %2638 = vst [vmem:[#allocation3 + $0x170] sm:$0xf] %v2345_v24  ;;  %3103 = vst [vmem:[#allocation3 + $0x198] sm:$0xf] %v2839_v57  ;;  %v14382_v62 = vshll.u32 %v14381_v60, 16  ;;  %v11383_v15 = vrot.slane %v4388_v36, 4 }
 0x216   : > { %v3138_v33 = vld [vmem:[#allocation2 + $0x84] sm:$0xf]  ;;  %v11385_v6 = vrot.slane %v3390_v21, 5  ;;  %v2407_v60 = vrot.slane %v2405_v35, 4  ;;  %v11392_v58 = vrot.slane %v3858_v13, 7  ;;  %v11395_v36 = vrot.slane %v1863_v43, 7 }
 0x217   : > { %v11378_v55 = vor.u32 %v14382_v62, %v14380_v54  ;;  %v3209_v38 = vld [vmem:[#allocation2 + $0x84] sm:$0xf]  ;;  %14384 = vst [vmem:[#allocation47_spill] sm:$0xff] %v11383_v15  ;;  %3170 = vst [vmem:[#allocation3 + $0x208] sm:$0xf] %v3138_v33  ;;  %v11390_v54 = vrot.slane %v3394_v7, 4  ;;  %v8804_v15 = vpop.f32.mrf.mxu1  ;;  %v8693_v43 = vadd.f32 %v11309_v25, %v11284_v42  ;;  %v8698_v25 = vpop.f32.mrf.mxu0 }
 0x218   : > { %14385 = vst [vmem:[#allocation86_spill] sm:$0xff] %v11385_v6  ;;  %v3405_v24 = vshrl.u32 %v3209_v38, 16  ;;  %v11388_v57 = vld [vmem:[#allocation2 + $0x84] sm:$0xf]  ;;  %v2410_v62 = vrot.slane %v2408_v51, 5  ;;  %v3408_v34 = vshll.u32 %v3209_v38, 16 }
 0x219   : > { %14383 = vst [vmem:[#allocation52_spill] sm:$0xff] %v11378_v55  ;;  %14386 = vst [vmem:[#allocation87_spill] sm:$0xff] %v11388_v57  ;;  %v4161_v48 = vld [vmem:[#allocation2 + $0x84] sm:$0xf]  ;;  %v11397_v21 = vrot.slane %v2868_v28, 7  ;;  %v14389_v35 = vshll.u32 %v11098_v0, 16 }
 0x21a   : > { %14387 = vst [vmem:[#allocation88_spill] sm:$0xff] %v11390_v54  ;;  %14388 = vst [vmem:[#allocation89_spill] sm:$0xff] %v11392_v58  ;;  %v3871_v13 = vshrl.u32 %v11388_v57, 16  ;;  %v4231_v51 = vld [vmem:[#allocation2 + $0x84] sm:$0xf]  ;;  %v11411_v28 = vrot.slane %v4398_v26, 4  ;;  %v2411_v32 = vor.u32 %v2410_v62, %v2407_v60  ;;  %v8806_v26 = vpop.f32.mrf.mxu1  ;;  %v8699_v54 = vadd.f32 %v8698_v25, %v11399_v22 }
 0x21b   : > { %4193 = vst [vmem:[#allocation3 + $0x1cc] sm:$0xf] %v4161_v48  ;;  %v11406_v38 = vor.u32 %v14389_v35, %v11146_v8  ;;  %v2186_v33 = vld [vmem:[#allocation2 + $0x88] sm:$0xf]  ;;  %v3407_v48 = vrot.slane %v3405_v24, 4  ;;  %v3410_v18 = vrot.slane %v3408_v34, 5 }
 0x21c   : > { %14390 = vst [vmem:[#allocation90_spill] sm:$0xff] %v11411_v28  ;;  %v11416_v8 = vld [vmem:[#allocation2 + $0x88] sm:$0xf]  ;;  %v11418_v35 = vrot.slane %v2325_v40, 4  ;;  %v4406_v55 = vshrl.u32 %v4231_v51, 16  ;;  %v4409_v27 = vshll.u32 %v4231_v51, 16 }
 0x21d   : > { %v2414_v42 = vshll.u32 %v2186_v33, 16  ;;  %v11423_v9 = vrot.slane %v3871_v13, 7  ;;  %v2418_v60 = vshrl.u32 %v2186_v33, 16  ;;  %v9620_v62 = vld [vmem:[#allocation3 + $0xe4] ss:$36 sps:$4 sm:$0xff]   ;;  %v14392_v34 = vshll.u32 %v11107_v23, 16 }
 0x21e   : > { %v3411_v0 = vor.u32 %v3410_v18, %v3407_v48  ;;  %v1872_v56 = vshrl.u32 %v11416_v8, 16  ;;  %v11433_v7 = vld [vmem:[#allocation2 + $0x88] sm:$0xf]  ;;  %v9623_v28 = vld [vmem:[#allocation3 + $0xe0] ss:$36 sps:$4 sm:$0xff]   ;;  %v14393_v61 = vshll.u32 %v11256_v20, 16  ;;  %6405 = vmatprep.mubr.bf16.mxu1 %v9620_v62  ;;  %v1223_v20 = vadd.f32 %v11088_v31, %v8693_v43 }
 0x21f   : > { %14391 = vst [vmem:[#allocation91_spill] sm:$0xff] %v11423_v9  ;;  %v11428_v40 = vor.u32 %v14392_v34, %v11148_v39  ;;  %v11431_v51 = vrot.slane %v2414_v42, 5  ;;  %v14394_v33 = vshll.u32 %v11299_v46, 16  ;;  %v11444_v23 = vrot.slane %v2411_v32, 4  ;;  %v1659_v18 = vld [vmem:[#allocation2 + $0x94] sm:$0xf]  ;;  %6406 = vmatmul.mubr.bf16.gmra.mxu1 %v9623_v28  ;;  %v8700_v46 = vpop.f32.mrf.mxu0 }
 0x220   : > { %v11438_v13 = vor.u32 %v14393_v61, %v11301_v50  ;;  %v11446_v39 = vrot.slane %v2418_v60, 4  ;;  %v2115_v48 = vld [vmem:[#allocation2 + $0x94] sm:$0xf]  ;;  %v4408_v42 = vrot.slane %v4406_v55, 4  ;;  %v4411_v34 = vrot.slane %v4409_v27, 5 }
 0x221   : > { %v11442_v24 = vor.u32 %v14394_v33, %v2857_v47  ;;  %v3210_v57 = vld [vmem:[#allocation2 + $0x88] sm:$0xf]  ;;  %v2188_v1 = vld [vmem:[#allocation2 + $0x94] sm:$0xf]  ;;  %2147 = vst [vmem:[#allocation3 + $0x28c] sm:$0xf] %v2115_v48  ;;  %v1226_v50 = vadd.f32 %v11088_v31, %v8696_v53  ;;  %v8807_v47 = vpop.f32.mrf.mxu1  ;;  %v8805_v55 = vadd.f32 %v8804_v15, %v11373_v12  ;;  %v8701_v53 = vpop.f32.mrf.mxu0 }
 0x222   : > { %14395 = vst [vmem:[#allocation92_spill] sm:$0xff] %v11446_v39  ;;  %v2877_v60 = vshrl.u32 %v11433_v7, 16  ;;  %v11454_v62 = vld [vmem:[#allocation2 + $0x88] sm:$0xf]  ;;  %v3140_v27 = vld [vmem:[#allocation2 + $0x94] sm:$0xf]  ;;  %v8808_v6 = vadd.f32 %v8807_v47, %v8806_v26  ;;  %v4412_v5 = vor.u32 %v4411_v34, %v4408_v42  ;;  %v8702_v34 = vadd.f32 %v8701_v53, %v8700_v46 }
 0x223   : > { %14396 = vst [vmem:[#allocation93_spill] sm:$0xff] %v11454_v62  ;;  %v11457_v28 = vrot.slane %v3411_v0, 4  ;;  %v11459_v33 = vrot.slane %v1872_v56, 7  ;;  %v1885_v43 = vshrl.u32 %v1659_v18, 16  ;;  %v3212_v48 = vld [vmem:[#allocation2 + $0x94] sm:$0xf]  ;;  %v8809_v26 = vpop.f32.mrf.mxu1  ;;  %v11483_v4 = vadd.f32 %v8805_v55, %v1223_v20 }
 0x224   : > { %3172 = vst [vmem:[#allocation3 + $0x250] sm:$0xf] %v3140_v27  ;;  %v2429_v9 = vshrl.u32 %v2188_v1, 16  ;;  %v11463_v61 = vld [vmem:[#allocation2 + $0x94] sm:$0xf]  ;;  %v1888_v56 = vshll.u32 %v1659_v18, 16 }
 0x225   : > { %14397 = vst [vmem:[#allocation94_spill] sm:$0xff] %v11457_v28  ;;  %v4163_v58 = vld [vmem:[#allocation2 + $0x94] sm:$0xf]  ;;  %v4232_v12 = vld [vmem:[#allocation2 + $0x88] sm:$0xf]  ;;  %v11466_v15 = vrot.slane %v1885_v43, 7 }
 0x226   : > { %v2432_v0 = vshll.u32 %v2188_v1, 16  ;;  %4195 = vst [vmem:[#allocation3 + $0x214] sm:$0xf] %v4163_v58  ;;  %v2879_v28 = vrot.slane %v2877_v60, 7  ;;  %v3414_v30 = vshll.u32 %v3210_v57, 16  ;;  %v3429_v27 = vshrl.u32 %v3212_v48, 16 }
 0x227   : > { %v3432_v3 = vshll.u32 %v3212_v48, 16  ;;  %v11468_v32 = vld [vmem:[#allocation2 + $0x94] sm:$0xf]  ;;  %v3418_v63 = vshrl.u32 %v3210_v57, 16  ;;  %v3880_v39 = vshrl.u32 %v11454_v62, 16  ;;  %v11472_v22 = vor.u32 %v1888_v56, %v11466_v15 }
 0x228   : > { %14398 = vst [vmem:[#allocation95_spill] sm:$0xff] %v11468_v32  ;;  %v2890_v25 = vshrl.u32 %v11463_v61, 16  ;;  %v4415_v42 = vshll.u32 %v4232_v12, 16  ;;  %v4419_v18 = vshrl.u32 %v4232_v12, 16  ;;  %v2431_v1 = vrot.slane %v2429_v9, 4  ;;  %v8810_v12 = vpop.f32.mrf.mxu1 }
 0x229   : > { %14399 = vst [vmem:[#allocation96_spill] sm:$0xff] %v11472_v22  ;;  %v4234_v58 = vld [vmem:[#allocation2 + $0x94] sm:$0xf]  ;;  %v2434_v47 = vrot.slane %v2432_v0, 5  ;;  %v3431_v60 = vrot.slane %v3429_v27, 4  ;;  %v3434_v43 = vrot.slane %v3432_v3, 5  ;;  %v11492_v3 = vadd.f32 %v11088_v31, %v8699_v54 }
 0x22a   : > { %v3893_v48 = vshrl.u32 %v11468_v32, 16  ;;  %v11476_v16 = vrot.slane %v4412_v5, 4  ;;  %v11478_v57 = vrot.slane %v3414_v30, 5  ;;  %v11481_v22 = vld [vmem:[#allocation2 + $0x98] sm:$0xf]  ;;  %v11485_v52 = vrot.slane %v3418_v63, 4 }
 0x22b   : > { %v11487_v9 = vrot.slane %v2890_v25, 7  ;;  %v11489_v46 = vld [vmem:[#allocation2 + $0x98] sm:$0xf]  ;;  %v9626_v53 = vld [vmem:[#allocation3 + $0x16c] ss:$36 sps:$4 sm:$0xff]   ;;  %v1387_v5 = vadd.f32 %v8808_v6, %v1226_v50  ;;  %v11494_v30 = vrot.slane %v3880_v39, 7  ;;  %v2435_v63 = vor.u32 %v2434_v47, %v2431_v1 }
 0x22c   : > { %14400 = vst [vmem:[#allocation97_spill] sm:$0xff] %v11476_v16  ;;  %14401 = vst [vmem:[#allocation98_spill] sm:$0xff] %v11478_v57  ;;  %v11496_v0 = vrot.slane %v4415_v42, 5  ;;  %v4430_v27 = vshrl.u32 %v4234_v58, 16  ;;  %v4433_v56 = vshll.u32 %v4234_v58, 16  ;;  %v11498_v20 = vrot.slane %v4419_v18, 4  ;;  %6260 = vmatprep.mubr.bf16.mxu0 %v9626_v53 }
 0x22d   : > { %14402 = vst [vmem:[#allocation99_spill] sm:$0xff] %v11485_v52  ;;  %v3435_v55 = vor.u32 %v3434_v43, %v3431_v60  ;;  %v11500_v25 = vrot.slane %v3893_v48, 7  ;;  %v9630_v16 = vld [vmem:[#allocation3 + $0x168] ss:$36 sps:$4 sm:$0xff]   ;;  %v1894_v54 = vshrl.u32 %v11481_v22, 16  ;;  %v2438_v6 = vshll.u32 %v11489_v46, 16  ;;  %v8812_v48 = vpop.f32.mrf.mxu1 }
 0x22e   : > { %14403 = vst [vmem:[#allocation100_spill] sm:$0xff] %v11496_v0  ;;  %14404 = vst [vmem:[#allocation101_spill] sm:$0xff] %v11498_v20  ;;  %v11505_v39 = vld [vmem:[#allocation2 + $0x98] sm:$0xf]  ;;  %v11508_v50 = vadd.f32 %v11088_v31, %v8702_v34  ;;  %v9666_v42 = vld [vmem:[#allocation9 + $0x150] sm:$0xff]   ;;  %6261 = vmatmul.mubr.bf16.gmra.mxu0 %v9630_v16  ;;  %v8811_v43 = vadd.f32 %v8810_v12, %v8809_v26  ;;  %v14406_v62 = vshll.u32 %v11416_v8, 16 }
 0x22f   : > { %14405 = vst [vmem:[#allocation102_spill] sm:$0xff] %v11500_v25  ;;  %v2175_v47 = vld [vmem:[#allocation2 + $0x4c] sm:$0x1]  ;;  %v430_v60 = vld [vmem:[#allocation2 + $0x5c] sm:$0x1]  ;;  %v9667_v53 = vld [vmem:[#allocation9 + $0x110] sm:$0xff]   ;;  %9079 = vmatprep.subr.bf16.mxu0 %v9666_v42 }
 0x230   : > { %v11516_v20 = vor.u32 %v14406_v62, %v11459_v33  ;;  %v14407_v31 = vshll.u32 %v11433_v7, 16  ;;  %v11522_v18 = vrot.slane %v4430_v27, 4  ;;  %v11524_v1 = vrot.slane %v4433_v56, 5  ;;  %v1649_v58 = vld [vmem:[#allocation2 + $0x60] sm:$0x8]  ;;  %9080 = vmatpush3.bf16.msra.mxu0 %v9667_v53  ;;  %v14656_v59 = vld [vmem:[#allocation94_spill] sm:$0xff] }
 0x231   : > { %v2114_v0 = vld [vmem:[#allocation2 + $0x88] sm:$0xf]  ;;  %v11526_v16 = vrot.slane %v2435_v63, 4  ;;  %v11528_v26 = vrot.slane %v3435_v55, 4  ;;  %v1897_v8 = vshll.u32 %v11481_v22, 16  ;;  %v1896_v7 = vrot.slane %v1894_v54, 7  ;;  %v8813_v22 = vpop.f32.mrf.mxu1 }
 0x232   : > { %v11520_v34 = vor.u32 %v14407_v31, %v2879_v28  ;;  %2146 = vst [vmem:[#allocation3 + $0x268] sm:$0xf] %v2114_v0  ;;  %v2116_v62 = vld [vmem:[#allocation2 + $0x98] sm:$0xf]  ;;  %v11532_v28 = vrot.slane %v2438_v6, 5  ;;  %v2328_v33 = vshll.u32 %v2175_v47, 16 }
 0x233   : > { %14408 = vst [vmem:[#allocation103_spill] sm:$0xff] %v11528_v26  ;;  %v1456_v56 = vmax.f32 %v11483_v4, 0.0  ;;  %v2675_v27 = vld [vmem:[#allocation2 + $0x60] sm:$0x8]  ;;  %2148 = vst [vmem:[#allocation3 + $0x2b0] sm:$0xf] %v2116_v62  ;;  %v11544_v26 = vpop.f32.mrf.mxu0 }
 0x234   : > { %v2442_v63 = vshrl.u32 %v11489_v46, 16  ;;  %v11537_v42 = vld [vmem:[#allocation2 + $0x98] sm:$0xf]  ;;  %v1457_v31 = vmax.f32 %v1387_v5, 0.0  ;;  %v1814_v12 = vshrl.u32 %v1649_v58, 16  ;;  %v2330_v6 = vrot.slane %v2328_v33, 5 }
 0x235   : > { %v4235_v54 = vld [vmem:[#allocation2 + $0x98] sm:$0xf]  ;;  %v8606_v53 = vpack.c.bf16 %v1456_v56, %v1456_v56  ;;  %v431_v4 = vsel %vm10441_vm7, 0, %v430_v60  ;;  %v2819_v55 = vshrl.u32 %v2675_v27, 16  ;;  %v382_v5 = vld [vmem:[#allocation2 + $0x70] sm:$0x8]  ;;  %v1392_v60 = vadd.f32 %v8811_v43, %v11492_v3 }
 0x236   : > { %v8607_v62 = vpack.c.bf16 %v1457_v31, %v1457_v31  ;;  %v8291_v46 = vrot.slane %v1814_v12, 11  ;;  %432 = vst [vmem:[#allocation2 + $0x5c] sm:$0x1] %v431_v4  ;;  %v2331_v33 = vsel %vm10453_vm10, %v11418_v35, %v2330_v6  ;;  %v433_v56 = vld [vmem:[#allocation2 + $0x6c] sm:$0x1]  ;;  %v4439_v47 = vshll.u32 %v4235_v54, 16  ;;  %v11555_v4 = vpop.f32.mrf.mxu1 }
 0x237   : > { %1617 = vst [vmem:[#allocation2 + $0xa4] sm:$0xf] %v8606_v53  ;;  %2637 = vst [vmem:[#allocation3 + $0x14c] sm:$0xf] %v2331_v33  ;;  %v8306_v27 = vrot.slane %v2819_v55, 11  ;;  %v8814_v31 = vadd.f32 %v8813_v22, %v8812_v48  ;;  %v4443_v0 = vshrl.u32 %v4235_v54, 16  ;;  %v11569_v55 = vpop.f32.mrf.mxu0 }
 0x238   : > { %1618 = vst [vmem:[#allocation2 + $0xa8] sm:$0xf] %v8607_v62  ;;  %v1825_v12 = vsel %vm10432_vm5, %v8291_v46, %v11406_v38  ;;  %v385_v32 = vld [vmem:[#allocation2 + $0x80] sm:$0x8]  ;;  %v11557_v58 = vld [vmem:[#allocation2 + $0x98] sm:$0xf]  ;;  %v1899_v38 = vor.u32 %v1897_v8, %v1896_v7  ;;  %v11588_v33 = vpop.f32.mrf.mxu1 }
 0x239   : > { %14409 = vst [vmem:[#allocation104_spill] sm:$0xff] %v11557_v58  ;;  %2077 = vst [vmem:[#allocation3 + $0x1b0] sm:$0xf] %v1825_v12  ;;  %v1458_v35 = vmax.f32 %v1392_v60, 0.0  ;;  %v383_v3 = vsel %vm10423_vm2, 0, %v382_v5  ;;  %v14410_v43 = vrot.slane %v11235_v49, 4  ;;  %v2830_v48 = vsel %vm10432_vm5, %v8306_v27, %v11428_v40 }
 0x23a   : > { %v1395_v22 = vadd.f32 %v8814_v31, %v11508_v50  ;;  %384 = vst [vmem:[#allocation2 + $0x70] sm:$0x8] %v383_v3  ;;  %v434_v54 = vsel %vm10441_vm7, 0, %v433_v56  ;;  %v436_v53 = vld [vmem:[#allocation2 + $0x7c] sm:$0x1]  ;;  %v11574_v62 = vrot.slane %v2442_v63, 4  ;;  %v2393_v27 = vsel %vm10453_vm10, %v11268_v37, %v11306_v44 }
 0x23b   : > { %v1856_v6 = vsel %vm10432_vm5, %v14410_v43, %v11438_v13  ;;  %3102 = vst [vmem:[#allocation3 + $0x174] sm:$0xf] %v2830_v48  ;;  %v8608_v46 = vpack.c.bf16 %v1458_v35, %v1458_v35  ;;  %435 = vst [vmem:[#allocation2 + $0x6c] sm:$0x1] %v434_v54  ;;  %v14411_v13 = vld [vmem:[#allocation19_spill] sm:$0xff]  ;;  %v14412_v8 = vrot.slane %v11239_v45, 4 }
 0x23c   : > { %2080 = vst [vmem:[#allocation3 + $0x21c] sm:$0xf] %v1856_v6  ;;  %v2369_v40 = vsel %vm10453_vm10, %v14411_v13, %v11218_v19  ;;  %v3902_v7 = vshrl.u32 %v11557_v58, 16  ;;  %v11586_v5 = vrot.slane %v4439_v47, 5  ;;  %v1459_v63 = vmax.f32 %v1395_v22, 0.0  ;;  %v14415_v31 = vld [vmem:[#allocation75_spill] sm:$0xff]  ;;  %v8706_v6 = vpop.f32.mrf.mxu0 }
 0x23d   : > { %v2861_v50 = vsel %vm10432_vm5, %v14412_v8, %v11442_v24  ;;  %2640 = vst [vmem:[#allocation3 + $0x1b8] sm:$0xf] %v2369_v40  ;;  %v386_v60 = vsel %vm10423_vm2, 0, %v385_v32  ;;  %v4445_v56 = vrot.slane %v4443_v0, 4  ;;  %1619 = vst [vmem:[#allocation2 + $0xb4] sm:$0xf] %v8608_v46  ;;  %v2373_v32 = vor.u32 %v14415_v31, %v11218_v19 }
 0x23e   : > { %14413 = vst [vmem:[#allocation19_spill] sm:$0xff] %v11586_v5  ;;  %3105 = vst [vmem:[#allocation3 + $0x1e0] sm:$0xf] %v2861_v50  ;;  %v14414_v12 = vrot.slane %v11395_v36, 4  ;;  %v437_v47 = vsel %vm10441_vm7, 0, %v436_v53  ;;  %v14416_v0 = vshll.u32 %v11206_v10, 16  ;;  %v8609_v48 = vpack.c.bf16 %v1459_v63, %v1459_v63 }
 0x23f   : > { %387 = vst [vmem:[#allocation2 + $0x80] sm:$0x8] %v386_v60  ;;  %v11610_v3 = vld [vmem:[#allocation2 + $0xa4] sm:$0xf]  ;;  %438 = vst [vmem:[#allocation2 + $0x7c] sm:$0x1] %v437_v47  ;;  %v2397_v22 = vor.u32 %v11344_v17, %v11306_v44  ;;  %v11637_v17 = vpop.f32.mrf.mxu1 }
 0x240   : > { %v1878_v24 = vsel %vm10432_vm5, %v14414_v12, %v11516_v20  ;;  %v11608_v35 = vor.u32 %v14416_v0, %v11235_v49  ;;  %14417 = vst [vmem:[#allocation75_spill] sm:$0xff] %v11610_v3  ;;  %v2117_v43 = vld [vmem:[#allocation2 + $0xa4] sm:$0xf]  ;;  %2642 = vst [vmem:[#allocation3 + $0x200] sm:$0xf] %v2393_v27  ;;  %v14418_v37 = vrot.slane %v11397_v21, 4  ;;  %v4446_v12 = vor.u32 %v4445_v56, %v11586_v5 }
 0x241   : > { %v2191_v20 = vld [vmem:[#allocation2 + $0xa4] sm:$0xf]  ;;  %2082 = vst [vmem:[#allocation3 + $0x264] sm:$0xf] %v1878_v24  ;;  %v14419_v10 = vshll.u32 %v11209_v14, 16  ;;  %v14420_v54 = vshrl.u32 %v11505_v39, 16  ;;  %v14422_v14 = vor.u32 %v11524_v1, %v11522_v18 }
 0x242   : > { %v2883_v19 = vsel %vm10432_vm5, %v14418_v37, %v11520_v34  ;;  %v9628_v46 = vld [vmem:[#allocation3 + $0x12c] ss:$36 sps:$4 sm:$0xff]   ;;  %2149 = vst [vmem:[#allocation3 + $0x2d4] sm:$0xf] %v2117_v43  ;;  %v14421_v40 = vrot.slane %v11466_v15, 4  ;;  %v2453_v8 = vshrl.u32 %v2191_v20, 16  ;;  %v2417_v15 = vsel %vm10453_vm10, %v11444_v23, %v11431_v51 }
 0x243   : > { %v11620_v49 = vor.u32 %v14419_v10, %v11239_v45  ;;  %v2901_v53 = vrot.slane %v14420_v54, 7  ;;  %v9631_v13 = vld [vmem:[#allocation3 + $0x128] ss:$36 sps:$4 sm:$0xff]   ;;  %3107 = vst [vmem:[#allocation3 + $0x228] sm:$0xf] %v2883_v19  ;;  %v11633_v45 = vrot.slane %v14422_v14, 4  ;;  %6413 = vmatprep.mubr.bf16.mxu1 %v9628_v46 }
 0x244   : > { %v1900_v34 = vsel %vm10432_vm5, %v14421_v40, %v1899_v38  ;;  %v2456_v50 = vshll.u32 %v2191_v20, 16  ;;  %v11635_v44 = vld [vmem:[#allocation2 + $0xa4] sm:$0xf]  ;;  %1620 = vst [vmem:[#allocation2 + $0xb8] sm:$0xf] %v8609_v48  ;;  %v14425_v38 = vshll.u32 %v11537_v42, 16  ;;  %6414 = vmatmul.mubr.bf16.gmra.mxu1 %v9631_v13  ;;  %v8707_v20 = vpop.f32.mrf.mxu0 }
 0x245   : > { %14423 = vst [vmem:[#allocation105_spill] sm:$0xff] %v11633_v45  ;;  %14424 = vst [vmem:[#allocation106_spill] sm:$0xff] %v11635_v44  ;;  %v14427_v18 = vshrl.u32 %v11537_v42, 16  ;;  %v3142_v24 = vld [vmem:[#allocation2 + $0xa4] sm:$0xf]  ;;  %v11653_v47 = vrot.slane %v3902_v7, 7 }
 0x246   : > { %2084 = vst [vmem:[#allocation3 + $0x2ac] sm:$0xf] %v1900_v34  ;;  %v11645_v63 = vrot.slane %v14425_v38, 5  ;;  %2644 = vst [vmem:[#allocation3 + $0x248] sm:$0xf] %v2417_v15  ;;  %v1907_v23 = vshrl.u32 %v11610_v3, 16 }
 0x247   : > { %v11649_v1 = vrot.slane %v14427_v18, 4  ;;  %14429 = vst [vmem:[#allocation109_spill] sm:$0xff] %v11653_v47  ;;  %v2912_v27 = vshrl.u32 %v11635_v44, 16  ;;  %v3215_v31 = vld [vmem:[#allocation2 + $0xa4] sm:$0xf]  ;;  %v14430_v42 = vld [vmem:[#allocation67_spill] sm:$0xff]  ;;  %v8819_v18 = vpop.f32.mrf.mxu1 }
 0x248   : > { %14426 = vst [vmem:[#allocation107_spill] sm:$0xff] %v11645_v63  ;;  %3174 = vst [vmem:[#allocation3 + $0x298] sm:$0xf] %v3142_v24  ;;  %v14431_v0 = vor.u32 %v11126_v29, %v14430_v42  ;;  %v14432_v56 = vld [vmem:[#allocation53_spill] sm:$0xff]  ;;  %v3453_v54 = vshrl.u32 %v3215_v31, 16  ;;  %v8705_v29 = vadd.f32 %v11569_v55, %v11544_v26  ;;  %v14437_v40 = vshll.u32 %v11505_v39, 16 }
 0x249   : > { %14428 = vst [vmem:[#allocation108_spill] sm:$0xff] %v11649_v1  ;;  %v14433_v48 = vshll.u32 %v14432_v56, 16  ;;  %v14434_v7 = vld [vmem:[#allocation85_spill] sm:$0xff]  ;;  %v2455_v14 = vrot.slane %v2453_v8, 4  ;;  %v2458_v15 = vrot.slane %v2456_v50, 5  ;;  %v11680_v24 = vrot.slane %v4446_v12, 4 }
 0x24a   : > { %v11660_v43 = vrot.slane %v14431_v0, 4  ;;  %v14435_v19 = vshll.u32 %v14434_v7, 16  ;;  %v11672_v46 = vld [vmem:[#allocation2 + $0xa4] sm:$0xf]  ;;  %v11678_v34 = vor.u32 %v14437_v40, %v2901_v53  ;;  %v2178_v42 = vld [vmem:[#allocation2 + $0x5c] sm:$0x1]  ;;  %v8708_v0 = vadd.f32 %v8707_v20, %v8706_v6  ;;  %v11697_v20 = vpop.f32.mrf.mxu1 }
 0x24b   : > { %v11665_v37 = vor.u32 %v14433_v48, %v11395_v36  ;;  %14436 = vst [vmem:[#allocation67_spill] sm:$0xff] %v11672_v46  ;;  %v4165_v13 = vld [vmem:[#allocation2 + $0xa4] sm:$0xf]  ;;  %v3456_v36 = vshll.u32 %v3215_v31, 16  ;;  %14438 = vst [vmem:[#allocation53_spill] sm:$0xff] %v11680_v24  ;;  %v11682_v56 = vrot.slane %v2373_v32, 4 }
 0x24c   : > { %v11670_v10 = vor.u32 %v14435_v19, %v11397_v21  ;;  %v4237_v38 = vld [vmem:[#allocation2 + $0xa4] sm:$0xf]  ;;  %4197 = vst [vmem:[#allocation3 + $0x25c] sm:$0xf] %v4165_v13  ;;  %v11684_v48 = vrot.slane %v1907_v23, 7  ;;  %v3915_v26 = vshrl.u32 %v11672_v46, 16  ;;  %v2459_v19 = vor.u32 %v2458_v15, %v2455_v14 }
 0x24d   : > { %v4454_v21 = vshrl.u32 %v4237_v38, 16  ;;  %v4457_v39 = vshll.u32 %v4237_v38, 16  ;;  %v2192_v55 = vld [vmem:[#allocation2 + $0xa8] sm:$0xf]  ;;  %v11687_v53 = vrot.slane %v2397_v22, 4  ;;  %v3455_v50 = vrot.slane %v3453_v54, 4 }
 0x24e   : > { %v3458_v31 = vrot.slane %v3456_v36, 5  ;;  %v11690_v7 = vld [vmem:[#allocation2 + $0xa8] sm:$0xf]  ;;  %v2462_v12 = vshll.u32 %v2192_v55, 16  ;;  %v11692_v13 = vrot.slane %v2912_v27, 7  ;;  %v2352_v23 = vshll.u32 %v2178_v42, 16 }
 0x24f   : > { %v11695_v6 = vld [vmem:[#allocation2 + $0xa8] sm:$0xf]  ;;  %v4456_v40 = vrot.slane %v4454_v21, 4  ;;  %v4459_v22 = vrot.slane %v4457_v39, 5  ;;  %v2466_v8 = vshrl.u32 %v2192_v55, 16  ;;  %v11702_v36 = vrot.slane %v3915_v26, 7 }
 0x250   : > { %v11699_v38 = vrot.slane %v2462_v12, 5  ;;  %v1916_v14 = vshrl.u32 %v11690_v7, 16  ;;  %v9632_v27 = vld [vmem:[#allocation3 + $0x1b4] ss:$36 sps:$4 sm:$0xff]   ;;  %v9890_v15 = vld [vmem:[%s14054_s2] ss:$0 sm:$0xff]  ;;  %v3459_v42 = vor.u32 %v3458_v31, %v3455_v50  ;;  %v8822_v50 = vpop.f32.mrf.mxu1  ;;  %v8820_v54 = vadd.f32 %v8819_v18, %v11637_v17 }
 0x251   : > { %14440 = vst [vmem:[#allocation110_spill] sm:$0xff] %v11702_v36  ;;  %v1239_v32 = vadd.f32 %v9890_v15, %v8705_v29  ;;  %v11708_v60 = vrot.slane %v2466_v8, 4  ;;  %v2921_v21 = vshrl.u32 %v11695_v6, 16  ;;  %v11711_v39 = vld [vmem:[#allocation2 + $0xa8] sm:$0xf]  ;;  %v11713_v12 = vadd.f32 %v9890_v15, %v8708_v0  ;;  %6268 = vmatprep.mubr.bf16.mxu0 %v9632_v27 }
 0x252   : > { %14439 = vst [vmem:[#allocation85_spill] sm:$0xff] %v11699_v38  ;;  %v9636_v55 = vld [vmem:[#allocation3 + $0x1b0] ss:$36 sps:$4 sm:$0xff]   ;;  %v11715_v26 = vrot.slane %v2459_v19, 4  ;;  %v4460_v8 = vor.u32 %v4459_v22, %v4456_v40  ;;  %v11722_v5 = vld [vmem:[#allocation2 + $0xa8] sm:$0xf]  ;;  %v8817_v19 = vadd.f32 %v11588_v33, %v11555_v4 }
 0x253   : > { %14441 = vst [vmem:[#allocation111_spill] sm:$0xff] %v11708_v60  ;;  %v1665_v29 = vld [vmem:[#allocation2 + $0xb4] sm:$0xf]  ;;  %14442 = vst [vmem:[#allocation112_spill] sm:$0xff] %v11722_v5  ;;  %6269 = vmatmul.mubr.bf16.gmra.mxu0 %v9636_v55  ;;  %v3462_v27 = vshll.u32 %v11711_v39, 16  ;;  %v2354_v45 = vrot.slane %v2352_v23, 5 }
 0x254   : > { %v2119_v0 = vld [vmem:[#allocation2 + $0xb4] sm:$0xf]  ;;  %v1929_v46 = vshrl.u32 %v1665_v29, 16  ;;  %v11729_v22 = vrot.slane %v3459_v42, 4  ;;  %v11731_v31 = vrot.slane %v1916_v14, 7  ;;  %v11733_v55 = vrot.slane %v2921_v21, 7 }
 0x255   : > { %v2194_v15 = vld [vmem:[#allocation2 + $0xb4] sm:$0xf]  ;;  %2151 = vst [vmem:[#allocation3 + $0x31c] sm:$0xf] %v2119_v0  ;;  %v2355_v4 = vsel %vm10453_vm10, %v11660_v43, %v2354_v45  ;;  %v1932_v17 = vshll.u32 %v1665_v29, 16  ;;  %v8824_v0 = vpop.f32.mrf.mxu1  ;;  %v11741_v42 = vrot.slane %v4460_v8, 4  ;;  %v11755_v3 = vadd.f32 %v8817_v19, %v1239_v32 }
 0x256   : > { %v2691_v40 = vld [vmem:[#allocation2 + $0xb4] sm:$0xf]  ;;  %14443 = vst [vmem:[#allocation113_spill] sm:$0xff] %v11729_v22  ;;  %v11739_v33 = vrot.slane %v1929_v46, 7  ;;  %v2477_v18 = vshrl.u32 %v2194_v15, 16  ;;  %v3466_v14 = vshrl.u32 %v11711_v39, 16 }
 0x257   : > { %v3144_v44 = vld [vmem:[#allocation2 + $0xb4] sm:$0xf]  ;;  %14444 = vst [vmem:[#allocation114_spill] sm:$0xff] %v11741_v42  ;;  %2639 = vst [vmem:[#allocation3 + $0x194] sm:$0xf] %v2355_v4  ;;  %v2480_v21 = vshll.u32 %v2194_v15, 16 }
 0x258   : > { %v3218_v23 = vld [vmem:[#allocation2 + $0xb4] sm:$0xf]  ;;  %3176 = vst [vmem:[#allocation3 + $0x2e0] sm:$0xf] %v3144_v44  ;;  %v2934_v24 = vshrl.u32 %v2691_v40, 16  ;;  %v11744_v22 = vrot.slane %v3462_v27, 5  ;;  %v11748_v45 = vor.u32 %v1932_v17, %v11739_v33  ;;  %v8823_v17 = vadd.f32 %v8822_v50, %v11697_v20 }
 0x259   : > { %v4167_v60 = vld [vmem:[#allocation2 + $0xb4] sm:$0xf]  ;;  %v3924_v36 = vshrl.u32 %v11722_v5, 16  ;;  %v3477_v43 = vshrl.u32 %v3218_v23, 16  ;;  %v4238_v29 = vld [vmem:[#allocation2 + $0xa8] sm:$0xf]  ;;  %v11771_v20 = vadd.f32 %v8820_v54, %v11713_v12 }
 0x25a   : > { %14445 = vst [vmem:[#allocation115_spill] sm:$0xff] %v11744_v22  ;;  %14446 = vst [vmem:[#allocation116_spill] sm:$0xff] %v11748_v45  ;;  %v11750_v46 = vld [vmem:[#allocation2 + $0xb4] sm:$0xf]  ;;  %v11753_v8 = vrot.slane %v2934_v24, 7  ;;  %v2937_v39 = vshll.u32 %v2691_v40, 16  ;;  %v8825_v45 = vpop.f32.mrf.mxu1 }
 0x25b   : > { %14447 = vst [vmem:[#allocation117_spill] sm:$0xff] %v11750_v46  ;;  %4199 = vst [vmem:[#allocation3 + $0x2a4] sm:$0xf] %v4167_v60  ;;  %v3480_v15 = vshll.u32 %v3218_v23, 16  ;;  %v2479_v4 = vrot.slane %v2477_v18, 4  ;;  %v2482_v42 = vrot.slane %v2480_v21, 5  ;;  %v8826_v50 = vadd.f32 %v8825_v45, %v8824_v0 }
 0x25c   : > { %v4240_v27 = vld [vmem:[#allocation2 + $0xb4] sm:$0xf]  ;;  %v2195_v22 = vld [vmem:[#allocation2 + $0xb8] sm:$0xf]  ;;  %v11759_v58 = vor.u32 %v2937_v39, %v11753_v8  ;;  %v3479_v60 = vrot.slane %v3477_v43, 4  ;;  %v3937_v44 = vshrl.u32 %v11750_v46, 16 }
 0x25d   : > { %v3482_v47 = vrot.slane %v3480_v15, 5  ;;  %v11762_v24 = vrot.slane %v3466_v14, 4  ;;  %v11764_v40 = vrot.slane %v3924_v36, 7  ;;  %v4463_v18 = vshll.u32 %v4238_v29, 16  ;;  %v11766_v5 = vld [vmem:[#allocation2 + $0xb8] sm:$0xf]  ;;  %v11776_v36 = vpop.f32.mrf.mxu1 }
 0x25e   : > { %14448 = vst [vmem:[#allocation118_spill] sm:$0xff] %v11759_v58  ;;  %v4467_v23 = vshrl.u32 %v4238_v29, 16  ;;  %v4478_v21 = vshrl.u32 %v4240_v27, 16  ;;  %v2486_v32 = vshll.u32 %v2195_v22, 16  ;;  %v11768_v19 = vld [vmem:[#allocation2 + $0xb8] sm:$0xf]  ;;  %v2483_v15 = vor.u32 %v2482_v42, %v2479_v4 }
 0x25f   : > { %14449 = vst [vmem:[#allocation119_spill] sm:$0xff] %v11762_v24  ;;  %14450 = vst [vmem:[#allocation120_spill] sm:$0xff] %v11764_v40  ;;  %v9634_v43 = vld [vmem:[#allocation3 + $0x174] ss:$36 sps:$4 sm:$0xff]   ;;  %v4481_v58 = vshll.u32 %v4240_v27, 16  ;;  %v14451_v14 = vld [vmem:[#allocation21_spill] sm:$0xff]  ;;  %v3483_v1 = vor.u32 %v3482_v47, %v3479_v60 }
 0x260   : > { %v9637_v39 = vld [vmem:[#allocation3 + $0x170] ss:$36 sps:$4 sm:$0xff]   ;;  %v11774_v24 = vadd.f32 %v8823_v17, %v14451_v14  ;;  %v14452_v29 = vrot.slane %v11487_v9, 4  ;;  %v11783_v63 = vrot.slane %v3937_v44, 7  ;;  %v11785_v54 = vrot.slane %v2486_v32, 5  ;;  %6421 = vmatprep.mubr.bf16.mxu1 %v9634_v43  ;;  %v11807_v14 = vpop.f32.mrf.mxu1 }
 0x261   : > { %v2490_v12 = vshrl.u32 %v2195_v22, 16  ;;  %v11787_v0 = vrot.slane %v4463_v18, 5  ;;  %v11789_v42 = vrot.slane %v4467_v23, 4  ;;  %v1652_v27 = vld [vmem:[#allocation2 + $0x70] sm:$0x8]  ;;  %6422 = vmatmul.mubr.bf16.gmra.mxu1 %v9637_v39  ;;  %v2943_v44 = vshrl.u32 %v11768_v19, 16 }
 0x262   : > { %v2905_v40 = vsel %vm10432_vm5, %v14452_v29, %v11678_v34  ;;  %14453 = vst [vmem:[#allocation21_spill] sm:$0xff] %v11783_v63  ;;  %14454 = vst [vmem:[#allocation121_spill] sm:$0xff] %v11785_v54  ;;  %v1938_v34 = vshrl.u32 %v11766_v5, 16  ;;  %v2181_v17 = vld [vmem:[#allocation2 + $0x6c] sm:$0x1]  ;;  %v14458_v22 = vld [vmem:[#allocation23_spill] sm:$0xff] }
 0x263   : > { %3109 = vst [vmem:[#allocation3 + $0x270] sm:$0xf] %v2905_v40  ;;  %14455 = vst [vmem:[#allocation122_spill] sm:$0xff] %v11787_v0  ;;  %v11794_v47 = vrot.slane %v2490_v12, 4  ;;  %v11798_v60 = vadd.f32 %v8826_v50, %v14458_v22  ;;  %v9680_v40 = vld [vmem:[#allocation9 + $0x148] sm:$0xff]   ;;  %v11800_v18 = vrot.slane %v2483_v15, 4 }
 0x264   : > { %14456 = vst [vmem:[#allocation123_spill] sm:$0xff] %v11789_v42  ;;  %v11803_v32 = vrot.slane %v4478_v21, 4  ;;  %v11805_v43 = vrot.slane %v4481_v58, 5  ;;  %v2678_v39 = vld [vmem:[#allocation2 + $0x70] sm:$0x8]  ;;  %v11809_v29 = vrot.slane %v3483_v1, 4  ;;  %9081 = vmatprep.subr.bf16.mxu0 %v9680_v40 }
 0x265   : > { %14457 = vst [vmem:[#allocation124_spill] sm:$0xff] %v11794_v47  ;;  %v1941_v4 = vshll.u32 %v11766_v5, 16  ;;  %v1655_v15 = vld [vmem:[#allocation2 + $0x80] sm:$0x8]  ;;  %v9681_v22 = vld [vmem:[#allocation9 + $0x108] sm:$0xff]   ;;  %v14460_v21 = vshll.u32 %v11690_v7, 16 }
 0x266   : > { %14459 = vst [vmem:[#allocation23_spill] sm:$0xff] %v11809_v29  ;;  %v14461_v23 = vshll.u32 %v11695_v6, 16  ;;  %v1836_v45 = vshrl.u32 %v1652_v27, 16  ;;  %v2376_v12 = vshll.u32 %v2181_v17, 16  ;;  %v2184_v42 = vld [vmem:[#allocation2 + $0x7c] sm:$0x1]  ;;  %9082 = vmatpush3.bf16.msra.mxu0 %v9681_v22  ;;  %v8830_v27 = vpop.f32.mrf.mxu1 }
 0x267   : > { %v11818_v58 = vor.u32 %v14460_v21, %v11731_v31  ;;  %v2118_v5 = vld [vmem:[#allocation2 + $0xa8] sm:$0xf]  ;;  %v1940_v0 = vrot.slane %v1938_v34, 7  ;;  %v2945_v29 = vrot.slane %v2943_v44, 7  ;;  %v2946_v50 = vshll.u32 %v11768_v19, 16 }
 0x268   : > { %v11823_v1 = vor.u32 %v14461_v23, %v11733_v55  ;;  %v2841_v40 = vshrl.u32 %v2678_v39, 16  ;;  %v388_v47 = vld [vmem:[#allocation2 + $0x90] sm:$0x8]  ;;  %2150 = vst [vmem:[#allocation3 + $0x2f8] sm:$0xf] %v2118_v5  ;;  %v8292_v7 = vrot.slane %v1836_v45, 11  ;;  %v4484_v34 = vor.u32 %v11805_v43, %v11803_v32 }
 0x269   : > { %v2120_v46 = vld [vmem:[#allocation2 + $0xb8] sm:$0xf]  ;;  %v2378_v31 = vrot.slane %v2376_v12, 5  ;;  %v1460_v21 = vmax.f32 %v11755_v3, 0.0  ;;  %v1461_v6 = vmax.f32 %v11771_v20, 0.0  ;;  %v1858_v17 = vshrl.u32 %v1655_v15, 16 }
 0x26a   : > { %v2681_v55 = vld [vmem:[#allocation2 + $0x80] sm:$0x8]  ;;  %2152 = vst [vmem:[#allocation3 + $0x340] sm:$0xf] %v2120_v46  ;;  %v8307_v44 = vrot.slane %v2841_v40, 11  ;;  %v2400_v19 = vshll.u32 %v2184_v42, 16  ;;  %v1847_v45 = vsel %vm10432_vm5, %v8292_v7, %v11608_v35  ;;  %v11836_v22 = vor.u32 %v1941_v4, %v1940_v0  ;;  %v8831_v7 = vpop.f32.mrf.mxu1 }
 0x26b   : > { %v9688_v23 = vld [vmem:[#allocation9 + $0x1f8] sm:$0xff]   ;;  %v9690_v5 = vld [vmem:[#allocation9 + $0x1f0] sm:$0xff]   ;;  %v2379_v3 = vsel %vm10453_vm10, %v11682_v56, %v2378_v31  ;;  %v8610_v20 = vpack.c.bf16 %v1460_v21, %v1460_v21  ;;  %v8611_v12 = vpack.c.bf16 %v1461_v6, %v1461_v6  ;;  %v439_v46 = vld [vmem:[#allocation2 + $0x8c] sm:$0x1]  ;;  %2079 = vst [vmem:[#allocation3 + $0x1f8] sm:$0xf] %v1847_v45 }
 0x26c   : > { %v9689_v39 = vld [vmem:[#allocation9 + $0x1b8] sm:$0xff]   ;;  %2641 = vst [vmem:[#allocation3 + $0x1dc] sm:$0xf] %v2379_v3  ;;  %v2852_v42 = vsel %vm10432_vm5, %v8307_v44, %v11620_v49  ;;  %v8293_v32 = vrot.slane %v1858_v17, 11  ;;  %v2402_v43 = vrot.slane %v2400_v19, 5  ;;  %9181 = vmatprep.subr.bf16.mxu1 %v9688_v23  ;;  %v2863_v35 = vshrl.u32 %v2681_v55, 16 }
 0x26d   : > { %v391_v15 = vld [vmem:[#allocation2 + $0xa0] sm:$0x8]  ;;  %v442_v40 = vld [vmem:[#allocation2 + $0x9c] sm:$0x1]  ;;  %3104 = vst [vmem:[#allocation3 + $0x1bc] sm:$0xf] %v2852_v42  ;;  %9182 = vmatpush3.bf16.msra.mxu1 %v9689_v39  ;;  %v11845_v49 = vor.u32 %v2946_v50, %v2945_v29 }
 0x26e   : > { %1621 = vst [vmem:[#allocation2 + $0xc4] sm:$0xf] %v8610_v20  ;;  %1622 = vst [vmem:[#allocation2 + $0xc8] sm:$0xf] %v8611_v12  ;;  %v1462_v56 = vmax.f32 %v11774_v24, 0.0  ;;  %v1463_v0 = vmax.f32 %v11798_v60, 0.0  ;;  %v1869_v21 = vsel %vm10432_vm5, %v8293_v32, %v11665_v37  ;;  %v2403_v6 = vsel %vm10453_vm10, %v11687_v53, %v2402_v43  ;;  %9183 = vmatprep.subr.bf16.mxu1 %v9690_v5 }
 0x26f   : > { %v389_v4 = vsel %vm10423_vm2, 0, %v388_v47  ;;  %v9691_v31 = vld [vmem:[#allocation9 + $0x1b0] sm:$0xff]   ;;  %v440_v24 = vsel %vm10441_vm7, 0, %v439_v46  ;;  %v3127_v60 = vld [vmem:[#allocation2 + $0x28] sm:$0xf]  ;;  %v8308_v29 = vrot.slane %v2863_v35, 11  ;;  %v8829_v37 = vadd.f32 %v11807_v14, %v11776_v36 }
 0x270   : > { %390 = vst [vmem:[#allocation2 + $0x90] sm:$0x8] %v389_v4  ;;  %v11855_v47 = vld [vmem:[#allocation2 + $0xb8] sm:$0xf]  ;;  %2081 = vst [vmem:[#allocation3 + $0x240] sm:$0xf] %v1869_v21  ;;  %v8612_v50 = vpack.c.bf16 %v1462_v56, %v1462_v56  ;;  %v8613_v55 = vpack.c.bf16 %v1463_v0, %v1463_v0  ;;  %v8832_v53 = vadd.f32 %v8831_v7, %v8830_v27 }
 0x271   : > { %2643 = vst [vmem:[#allocation3 + $0x224] sm:$0xf] %v2403_v6  ;;  %441 = vst [vmem:[#allocation2 + $0x8c] sm:$0x1] %v440_v24  ;;  %v4150_v44 = vld [vmem:[#allocation2 + $0x28] sm:$0xf]  ;;  %v2874_v14 = vsel %vm10432_vm5, %v8308_v29, %v11670_v10  ;;  %9184 = vmatpush3.bf16.msra.mxu1 %v9691_v31 }
 0x272   : > { %3159 = vst [vmem:[#allocation3 + $0x7c] sm:$0xf] %v3127_v60  ;;  %v392_v17 = vsel %vm10423_vm2, 0, %v391_v15  ;;  %v14462_v19 = vrot.slane %v11684_v48, 4  ;;  %v443_v39 = vsel %vm10441_vm7, 0, %v442_v40  ;;  %v11868_v3 = vrot.slane %v4484_v34, 4 }
 0x273   : > { %v394_v5 = vld [vmem:[#allocation2 + $0xb0] sm:$0x8]  ;;  %4182 = vst [vmem:[#allocation3 + $0x40] sm:$0xf] %v4150_v44  ;;  %v3129_v45 = vld [vmem:[#allocation2 + $0x38] sm:$0xf] }
 0x274   : > { %v1922_v23 = vsel %vm10432_vm5, %v14462_v19, %v11818_v58  ;;  %14463 = vst [vmem:[#allocation125_spill] sm:$0xff] %v11868_v3  ;;  %v11870_v36 = vld [vmem:[#allocation2 + $0xb8] sm:$0xf]  ;;  %1623 = vst [vmem:[#allocation2 + $0xd4] sm:$0xf] %v8612_v50  ;;  %v2441_v58 = vsel %vm10453_vm10, %v11526_v16, %v11532_v28  ;;  %v3486_v12 = vshll.u32 %v11855_v47, 16 }
 0x275   : > { %1624 = vst [vmem:[#allocation2 + $0xd8] sm:$0xf] %v8613_v55  ;;  %v14464_v27 = vld [vmem:[#allocation24_spill] sm:$0xff]  ;;  %393 = vst [vmem:[#allocation2 + $0xa0] sm:$0x8] %v392_v17  ;;  %v3490_v46 = vshrl.u32 %v11855_v47, 16 }
 0x276   : > { %v1416_v20 = vadd.f32 %v8829_v37, %v14464_v27  ;;  %2086 = vst [vmem:[#allocation3 + $0x2f4] sm:$0xf] %v1922_v23  ;;  %444 = vst [vmem:[#allocation2 + $0x9c] sm:$0x1] %v443_v39  ;;  %v4152_v34 = vld [vmem:[#allocation2 + $0x38] sm:$0xf] }
 0x277   : > { %3161 = vst [vmem:[#allocation3 + $0xc4] sm:$0xf] %v3129_v45  ;;  %v11882_v10 = vld [vmem:[#allocation2 + $0xb8] sm:$0xf]  ;;  %3106 = vst [vmem:[#allocation3 + $0x204] sm:$0xf] %v2874_v14 }
 0x278   : > { %v14465_v42 = vld [vmem:[#allocation26_spill] sm:$0xff]  ;;  %2646 = vst [vmem:[#allocation3 + $0x290] sm:$0xf] %v2441_v58  ;;  %v14466_v43 = vrot.slane %v11692_v13, 4  ;;  %v9698_v16 = vld [vmem:[#allocation9 + $0x140] sm:$0xff]   ;;  %v1464_v0 = vmax.f32 %v1416_v20, 0.0 }
 0x279   : > { %v1419_v32 = vadd.f32 %v8832_v53, %v14465_v42  ;;  %v9699_v40 = vld [vmem:[#allocation9 + $0x1e8] sm:$0xff]   ;;  %v9700_v35 = vld [vmem:[#allocation9 + $0x100] sm:$0xff]   ;;  %4184 = vst [vmem:[#allocation3 + $0x88] sm:$0xf] %v4152_v34  ;;  %v395_v4 = vsel %vm10423_vm2, 0, %v394_v5  ;;  %v14467_v7 = vrot.slane %v11739_v33, 4  ;;  %9083 = vmatprep.subr.bf16.mxu0 %v9698_v16 }
 0x27a   : > { %v2927_v15 = vsel %vm10432_vm5, %v14466_v43, %v11823_v1  ;;  %v9640_v56 = vld [vmem:[#allocation3 + $0x1fc] ss:$36 sps:$4 sm:$0xff]   ;;  %v2465_v1 = vsel %vm10453_vm10, %v11715_v26, %v11699_v38  ;;  %v14469_v6 = vld [vmem:[#allocation46_spill] sm:$0xff]  ;;  %396 = vst [vmem:[#allocation2 + $0xb0] sm:$0x8] %v395_v4  ;;  %v14474_v33 = vrot.slane %v11753_v8, 4  ;;  %9185 = vmatprep.subr.bf16.mxu1 %v9699_v40  ;;  %v8614_v58 = vpack.c.bf16 %v1464_v0, %v1464_v0 }
 0x27b   : > { %3111 = vst [vmem:[#allocation3 + $0x2b8] sm:$0xf] %v2927_v15  ;;  %v1944_v31 = vsel %vm10432_vm5, %v14467_v7, %v11836_v22  ;;  %v14468_v21 = vld [vmem:[#allocation49_spill] sm:$0xff]  ;;  %v14470_v24 = vshll.u32 %v14469_v6, 16  ;;  %v9644_v44 = vld [vmem:[#allocation3 + $0x1f8] ss:$36 sps:$4 sm:$0xff]   ;;  %6276 = vmatprep.mubr.bf16.mxu0 %v9640_v56  ;;  %9084 = vmatpush3.bf16.msra.mxu0 %v9700_v35 }
 0x27c   : > { %v9642_v37 = vld [vmem:[#allocation3 + $0x1bc] ss:$36 sps:$4 sm:$0xff]   ;;  %v1465_v53 = vmax.f32 %v1419_v32, 0.0  ;;  %2088 = vst [vmem:[#allocation3 + $0x33c] sm:$0xf] %v1944_v31  ;;  %v2949_v26 = vsel %vm10432_vm5, %v14474_v33, %v11845_v49  ;;  %v14475_v22 = vld [vmem:[#allocation62_spill] sm:$0xff]  ;;  %v2489_v49 = vsel %vm10453_vm10, %v11800_v18, %v11785_v54  ;;  %6277 = vmatmul.mubr.bf16.gmra.mxu0 %v9644_v44 }
 0x27d   : > { %v11904_v60 = vor.u32 %v14470_v24, %v14468_v21  ;;  %2648 = vst [vmem:[#allocation3 + $0x2d8] sm:$0xf] %v2465_v1  ;;  %v14476_v17 = vld [vmem:[#allocation54_spill] sm:$0xff]  ;;  %v14479_v39 = vld [vmem:[#allocation65_spill] sm:$0xff]  ;;  %v14480_v5 = vld [vmem:[#allocation56_spill] sm:$0xff]  ;;  %v3946_v34 = vshrl.u32 %v11870_v36, 16  ;;  %6429 = vmatprep.mubr.bf16.mxu1 %v9642_v37  ;;  %v2445_v37 = vor.u32 %v11574_v62, %v11532_v28 }
 0x27e   : > { %v14477_v19 = vshll.u32 %v14476_v17, 16  ;;  %v14481_v45 = vshll.u32 %v14480_v5, 16  ;;  %v9645_v27 = vld [vmem:[#allocation3 + $0x1b8] ss:$36 sps:$4 sm:$0xff]   ;;  %v11923_v20 = vld [vmem:[#allocation2 + $0xc4] sm:$0xf]  ;;  %v8615_v15 = vpack.c.bf16 %v1465_v53, %v1465_v53 }
 0x27f   : > { %14471 = vst [vmem:[#allocation24_spill] sm:$0xff] %v11904_v60  ;;  %v2121_v8 = vld [vmem:[#allocation2 + $0xc4] sm:$0xf]  ;;  %3113 = vst [vmem:[#allocation3 + $0x300] sm:$0xf] %v2949_v26  ;;  %v1951_v42 = vshrl.u32 %v11923_v20, 16  ;;  %6430 = vmatmul.mubr.bf16.gmra.mxu1 %v9645_v27 }
 0x280   : > { %v11916_v23 = vor.u32 %v14477_v19, %v14475_v22  ;;  %v11921_v14 = vor.u32 %v14481_v45, %v14479_v39  ;;  %v2197_v32 = vld [vmem:[#allocation2 + $0xc4] sm:$0xf]  ;;  %2153 = vst [vmem:[#allocation3 + $0x364] sm:$0xf] %v2121_v8  ;;  %2650 = vst [vmem:[#allocation3 + $0x320] sm:$0xf] %v2489_v49 }
 0x281   : > { %v11931_v43 = vld [vmem:[#allocation2 + $0xc4] sm:$0xf]  ;;  %v14483_v16 = vld [vmem:[#allocation38_spill] sm:$0xff]  ;;  %v4487_v0 = vshll.u32 %v11882_v10, 16  ;;  %v2501_v18 = vshrl.u32 %v2197_v32, 16  ;;  %v2504_v4 = vshll.u32 %v2197_v32, 16 }
 0x282   : > { %14478 = vst [vmem:[#allocation26_spill] sm:$0xff] %v11916_v23  ;;  %14482 = vst [vmem:[#allocation46_spill] sm:$0xff] %v11921_v14  ;;  %v14484_v40 = vld [vmem:[#allocation37_spill] sm:$0xff]  ;;  %v2956_v7 = vshrl.u32 %v11931_v43, 16  ;;  %v4491_v44 = vshrl.u32 %v11882_v10, 16  ;;  %v14489_v22 = vld [vmem:[#allocation32_spill] sm:$0xff] }
 0x283   : > { %v3249_v56 = vsel %vm10453_vm10, %v14484_v40, %v14483_v16  ;;  %v3146_v31 = vld [vmem:[#allocation2 + $0xc4] sm:$0xf]  ;;  %1625 = vst [vmem:[#allocation2 + $0xe4] sm:$0xf] %v8614_v58  ;;  %1626 = vst [vmem:[#allocation2 + $0xe8] sm:$0xf] %v8615_v15 }
 0x284   : > { %3652 = vst [vmem:[#allocation3 + $0x14] sm:$0xf] %v3249_v56  ;;  %v3221_v53 = vld [vmem:[#allocation2 + $0xc4] sm:$0xf]  ;;  %3178 = vst [vmem:[#allocation3 + $0x328] sm:$0xf] %v3146_v31 }
 0x285   : > { %v11944_v33 = vld [vmem:[#allocation2 + $0xc4] sm:$0xf]  ;;  %v11952_v35 = vrot.slane %v3486_v12, 5  ;;  %v2503_v19 = vrot.slane %v2501_v18, 4  ;;  %v2506_v5 = vrot.slane %v2504_v4, 5  ;;  %v3501_v45 = vshrl.u32 %v3221_v53, 16 }
 0x286   : > { %14487 = vst [vmem:[#allocation62_spill] sm:$0xff] %v11944_v33  ;;  %v14488_v26 = vld [vmem:[#allocation29_spill] sm:$0xff]  ;;  %v11955_v10 = vrot.slane %v1951_v42, 7  ;;  %v11957_v27 = vrot.slane %v2956_v7, 7  ;;  %v3504_v8 = vshll.u32 %v3221_v53, 16  ;;  %v11961_v58 = vrot.slane %v3490_v46, 4  ;;  %v8833_v53 = vpop.f32.mrf.mxu1 }
 0x287   : > { %v3273_v17 = vsel %vm10453_vm10, %v14489_v22, %v14488_v26  ;;  %v4169_v28 = vld [vmem:[#allocation2 + $0xc4] sm:$0xf]  ;;  %v11963_v49 = vrot.slane %v3946_v34, 7  ;;  %v3503_v12 = vrot.slane %v3501_v45, 4  ;;  %v3959_v32 = vshrl.u32 %v11944_v33, 16  ;;  %v14493_v46 = vld [vmem:[#allocation92_spill] sm:$0xff] }
 0x288   : > { %3654 = vst [vmem:[#allocation3 + $0x5c] sm:$0xf] %v3273_v17  ;;  %4201 = vst [vmem:[#allocation3 + $0x2ec] sm:$0xf] %v4169_v28  ;;  %v4243_v15 = vld [vmem:[#allocation2 + $0xc4] sm:$0xf]  ;;  %v2507_v42 = vor.u32 %v2506_v5, %v2503_v19  ;;  %v14494_v34 = vor.u32 %v14493_v46, %v11431_v51 }
 0x289   : > { %14490 = vst [vmem:[#allocation54_spill] sm:$0xff] %v11961_v58  ;;  %v11966_v40 = vrot.slane %v4487_v0, 5  ;;  %v11968_v56 = vrot.slane %v4491_v44, 4  ;;  %v3506_v18 = vrot.slane %v3504_v8, 5  ;;  %v11970_v4 = vld [vmem:[#allocation2 + $0xc8] sm:$0xf] }
 0x28a   : > { %v11977_v31 = vrot.slane %v14494_v34, 4  ;;  %v11979_v22 = vrot.slane %v2445_v37, 4  ;;  %v4502_v17 = vshrl.u32 %v4243_v15, 16  ;;  %v4505_v19 = vshll.u32 %v4243_v15, 16  ;;  %v2198_v5 = vld [vmem:[#allocation2 + $0xc8] sm:$0xf] }
 0x28b   : > { %14491 = vst [vmem:[#allocation56_spill] sm:$0xff] %v11966_v40  ;;  %14492 = vst [vmem:[#allocation37_spill] sm:$0xff] %v11968_v56  ;;  %v3507_v45 = vor.u32 %v3506_v18, %v3503_v12  ;;  %v11983_v28 = vrot.slane %v3959_v32, 7  ;;  %v1960_v24 = vshrl.u32 %v11970_v4, 16  ;;  %v9646_v51 = vld [vmem:[#allocation3 + $0x244] ss:$36 sps:$4 sm:$0xff]   ;;  %v8834_v40 = vpop.f32.mrf.mxu1 }
 0x28c   : > { %v14496_v46 = vld [vmem:[#allocation71_spill] sm:$0xff]  ;;  %v14497_v34 = vld [vmem:[#allocation69_spill] sm:$0xff]  ;;  %v14501_v7 = vld [vmem:[#allocation44_spill] sm:$0xff]  ;;  %v11997_v15 = vrot.slane %v2507_v42, 4  ;;  %6284 = vmatprep.mubr.bf16.mxu0 %v9646_v51  ;;  %v4504_v0 = vrot.slane %v4502_v17, 4  ;;  %v4507_v8 = vrot.slane %v4505_v19, 5 }
 0x28d   : > { %14495 = vst [vmem:[#allocation32_spill] sm:$0xff] %v11983_v28  ;;  %v14498_v55 = vshll.u32 %v14497_v34, 16  ;;  %v14500_v47 = vld [vmem:[#allocation73_spill] sm:$0xff]  ;;  %v14502_v62 = vshll.u32 %v14501_v7, 16  ;;  %v12000_v32 = vld [vmem:[#allocation2 + $0xc8] sm:$0xf] }
 0x28e   : > { %v14506_v56 = vld [vmem:[#allocation80_spill] sm:$0xff]  ;;  %v14507_v33 = vld [vmem:[#allocation31_spill] sm:$0xff]  ;;  %v9648_v7 = vld [vmem:[#allocation3 + $0x204] ss:$36 sps:$4 sm:$0xff]   ;;  %v12021_v51 = vrot.slane %v3507_v45, 4  ;;  %v12024_v18 = vrot.slane %v1960_v24, 7 }
 0x28f   : > { %v11990_v37 = vor.u32 %v14498_v55, %v14496_v46  ;;  %v11995_v44 = vor.u32 %v14502_v62, %v14500_v47  ;;  %v14508_v3 = vshll.u32 %v14507_v33, 16  ;;  %v2510_v55 = vshll.u32 %v2198_v5, 16  ;;  %v9650_v62 = vld [vmem:[#allocation3 + $0x240] ss:$36 sps:$4 sm:$0xff]   ;;  %v14510_v42 = vld [vmem:[#allocation83_spill] sm:$0xff]  ;;  %6437 = vmatprep.mubr.bf16.mxu1 %v9648_v7 }
 0x290   : > { %v2514_v46 = vshrl.u32 %v2198_v5, 16  ;;  %v3222_v54 = vld [vmem:[#allocation2 + $0xc8] sm:$0xf]  ;;  %v9651_v33 = vld [vmem:[#allocation3 + $0x200] ss:$36 sps:$4 sm:$0xff]   ;;  %14520 = vst [vmem:[#allocation31_spill] sm:$0xff] %v12021_v51  ;;  %6285 = vmatmul.mubr.bf16.gmra.mxu0 %v9650_v62 }
 0x291   : > { %14499 = vst [vmem:[#allocation92_spill] sm:$0xff] %v11990_v37  ;;  %14503 = vst [vmem:[#allocation71_spill] sm:$0xff] %v11995_v44  ;;  %v12007_v34 = vor.u32 %v14508_v3, %v14506_v56  ;;  %v14511_v44 = vld [vmem:[#allocation77_spill] sm:$0xff]  ;;  %v14517_v56 = vld [vmem:[#allocation35_spill] sm:$0xff]  ;;  %6438 = vmatmul.mubr.bf16.gmra.mxu1 %v9651_v33  ;;  %v12040_v7 = vrot.slane %v2510_v55, 5  ;;  %v4508_v33 = vor.u32 %v4507_v8, %v4504_v0  ;;  %v3514_v28 = vshrl.u32 %v3222_v54, 16 }
 0x292   : > { %v14512_v14 = vshll.u32 %v14511_v44, 16  ;;  %v14516_v3 = vld [vmem:[#allocation89_spill] sm:$0xff]  ;;  %v14518_v47 = vshll.u32 %v14517_v56, 16  ;;  %v14522_v44 = vld [vmem:[#allocation91_spill] sm:$0xff]  ;;  %v12036_v45 = vld [vmem:[#allocation2 + $0xc8] sm:$0xf] }
 0x293   : > { %14509 = vst [vmem:[#allocation69_spill] sm:$0xff] %v12007_v34  ;;  %v14523_v17 = vld [vmem:[#allocation87_spill] sm:$0xff]  ;;  %14526 = vst [vmem:[#allocation35_spill] sm:$0xff] %v12036_v45  ;;  %v8835_v34 = vadd.f32 %v8834_v40, %v8833_v53  ;;  %v12042_v62 = vrot.slane %v2514_v46, 4  ;;  %v14528_v56 = vld [vmem:[#allocation93_spill] sm:$0xff]  ;;  %v4511_v57 = vshll.u32 %v12036_v45, 16 }
 0x294   : > { %v12012_v12 = vor.u32 %v14512_v14, %v14510_v42  ;;  %v12019_v5 = vor.u32 %v14518_v47, %v14516_v3  ;;  %v12026_v14 = vld [vmem:[#allocation2 + $0xc8] sm:$0xf]  ;;  %v14524_v19 = vshll.u32 %v14523_v17, 16  ;;  %v2965_v47 = vshrl.u32 %v12000_v32, 16  ;;  %v12038_v3 = vld [vmem:[#allocation2 + $0xd4] sm:$0xf] }
 0x295   : > { %14521 = vst [vmem:[#allocation77_spill] sm:$0xff] %v12026_v14  ;;  %14527 = vst [vmem:[#allocation87_spill] sm:$0xff] %v12038_v3  ;;  %v2123_v24 = vld [vmem:[#allocation2 + $0xd4] sm:$0xf]  ;;  %v14529_v52 = vshll.u32 %v14528_v56, 16  ;;  %v3968_v53 = vshrl.u32 %v12026_v14, 16 }
 0x296   : > { %14513 = vst [vmem:[#allocation44_spill] sm:$0xff] %v12012_v12  ;;  %14519 = vst [vmem:[#allocation80_spill] sm:$0xff] %v12019_v5  ;;  %v12031_v50 = vor.u32 %v14524_v19, %v14522_v44  ;;  %v9701_v12 = vld [vmem:[#allocation9 + $0x1a8] sm:$0xff]   ;;  %v3510_v19 = vshll.u32 %v3222_v54, 16  ;;  %v12050_v44 = vld [vmem:[#allocation2 + $0xd4] sm:$0xf] }
 0x297   : > { %2155 = vst [vmem:[#allocation3 + $0x3ac] sm:$0xf] %v2123_v24  ;;  %v12048_v6 = vor.u32 %v14529_v52, %v11494_v30  ;;  %14531 = vst [vmem:[#allocation126_spill] sm:$0xff] %v12050_v44  ;;  %v3148_v40 = vld [vmem:[#allocation2 + $0xd4] sm:$0xf]  ;;  %9186 = vmatpush3.bf16.msra.mxu1 %v9701_v12  ;;  %v1973_v55 = vshrl.u32 %v12038_v3, 16 }
 0x298   : > { %14525 = vst [vmem:[#allocation89_spill] sm:$0xff] %v12031_v50  ;;  %v2200_v50 = vld [vmem:[#allocation2 + $0xd4] sm:$0xf]  ;;  %v2978_v17 = vshrl.u32 %v12050_v44, 16  ;;  %3180 = vst [vmem:[#allocation3 + $0x370] sm:$0xf] %v3148_v40 }
 0x299   : > { %14530 = vst [vmem:[#allocation93_spill] sm:$0xff] %v12048_v6  ;;  %v2525_v51 = vshrl.u32 %v2200_v50, 16  ;;  %v2528_v46 = vshll.u32 %v2200_v50, 16  ;;  %v3224_v24 = vld [vmem:[#allocation2 + $0xd4] sm:$0xf]  ;;  %v14532_v52 = vshll.u32 %v11463_v61, 16 }
 0x29a   : > { %v3525_v0 = vshrl.u32 %v3224_v24, 16  ;;  %v3528_v8 = vshll.u32 %v3224_v24, 16  ;;  %v12060_v56 = vld [vmem:[#allocation2 + $0xd4] sm:$0xf]  ;;  %v9702_v12 = vld [vmem:[#allocation9 + $0x1e0] sm:$0xff]   ;;  %v12062_v6 = vrot.slane %v2965_v47, 7 }
 0x29b   : > { %v12058_v30 = vor.u32 %v14532_v52, %v11487_v9  ;;  %v2527_v54 = vrot.slane %v2525_v51, 4  ;;  %14533 = vst [vmem:[#allocation127_spill] sm:$0xff] %v12060_v56  ;;  %v2530_v50 = vrot.slane %v2528_v46, 5  ;;  %v4171_v42 = vld [vmem:[#allocation2 + $0xd4] sm:$0xf]  ;;  %v9703_v40 = vld [vmem:[#allocation9 + $0x1a0] sm:$0xff]   ;;  %9187 = vmatprep.subr.bf16.mxu1 %v9702_v12 }
 0x29c   : > { %v14534_v5 = vld [vmem:[#allocation27_spill] sm:$0xff]  ;;  %v12068_v39 = vrot.slane %v3510_v19, 5  ;;  %v3527_v61 = vrot.slane %v3525_v0, 4  ;;  %v3530_v9 = vrot.slane %v3528_v8, 5  ;;  %v3981_v51 = vshrl.u32 %v12060_v56, 16  ;;  %9188 = vmatpush3.bf16.msra.mxu1 %v9703_v40  ;;  %v14547_v44 = vld [vmem:[#allocation104_spill] sm:$0xff] }
 0x29d   : > { %v12066_v60 = vadd.f32 %v8835_v34, %v14534_v5  ;;  %v4246_v24 = vld [vmem:[#allocation2 + $0xd4] sm:$0xf]  ;;  %4203 = vst [vmem:[#allocation3 + $0x334] sm:$0xf] %v4171_v42  ;;  %v12071_v52 = vrot.slane %v4508_v33, 4  ;;  %v12073_v47 = vrot.slane %v3514_v28, 4  ;;  %v2531_v19 = vor.u32 %v2530_v50, %v2527_v54  ;;  %v8836_v42 = vpop.f32.mrf.mxu1 }
 0x29e   : > { %14535 = vst [vmem:[#allocation27_spill] sm:$0xff] %v12068_v39  ;;  %v12076_v37 = vrot.slane %v1973_v55, 7  ;;  %v12078_v34 = vld [vmem:[#allocation2 + $0xd8] sm:$0xf]  ;;  %v12080_v5 = vrot.slane %v3968_v53, 7  ;;  %v12082_v0 = vrot.slane %v2978_v17, 7 }
 0x29f   : > { %14536 = vst [vmem:[#allocation128_spill] sm:$0xff] %v12071_v52  ;;  %14537 = vst [vmem:[#allocation129_spill] sm:$0xff] %v12073_v47  ;;  %v4526_v8 = vshrl.u32 %v4246_v24, 16  ;;  %v12084_v1 = vld [vmem:[#allocation2 + $0xd8] sm:$0xf]  ;;  %v12086_v12 = vrot.slane %v4511_v57, 5  ;;  %v3531_v52 = vor.u32 %v3530_v9, %v3527_v61  ;;  %v8837_v54 = vpop.f32.mrf.mxu1 }
 0x2a0   : > { %14538 = vst [vmem:[#allocation130_spill] sm:$0xff] %v12076_v37  ;;  %v9710_v33 = vld [vmem:[#allocation9 + $0x1d8] sm:$0xff]   ;;  %v4529_v46 = vshll.u32 %v4246_v24, 16  ;;  %v12090_v21 = vrot.slane %v3981_v51, 7  ;;  %v1982_v53 = vshrl.u32 %v12078_v34, 16  ;;  %v2534_v40 = vshll.u32 %v12084_v1, 16 }
 0x2a1   : > { %14539 = vst [vmem:[#allocation131_spill] sm:$0xff] %v12086_v12  ;;  %9189 = vmatprep.subr.bf16.mxu1 %v9710_v33  ;;  %v12098_v28 = vld [vmem:[#allocation2 + $0xd8] sm:$0xf]  ;;  %v14541_v24 = vld [vmem:[#allocation95_spill] sm:$0xff]  ;;  %v12105_v51 = vrot.slane %v2531_v19, 4  ;;  %v4528_v33 = vrot.slane %v4526_v8, 4  ;;  %v12156_v45 = vpop.f32.mrf.mxu1 }
 0x2a2   : > { %14540 = vst [vmem:[#allocation132_spill] sm:$0xff] %v12090_v21  ;;  %v14542_v61 = vshll.u32 %v14541_v24, 16  ;;  %v12108_v17 = vld [vmem:[#allocation2 + $0xd8] sm:$0xf]  ;;  %v14546_v12 = vld [vmem:[#allocation109_spill] sm:$0xff]  ;;  %v14548_v23 = vshll.u32 %v14547_v44, 16 }
 0x2a3   : > { %v9714_v50 = vld [vmem:[#allocation9 + $0x198] sm:$0xff]   ;;  %v14550_v24 = vld [vmem:[#allocation75_spill] sm:$0xff]  ;;  %v2187_v8 = vld [vmem:[#allocation2 + $0x8c] sm:$0x1]  ;;  %v12122_v26 = vrot.slane %v3531_v52, 4  ;;  %v1984_v11 = vrot.slane %v1982_v53, 7 }
 0x2a4   : > { %v12103_v9 = vor.u32 %v14542_v61, %v11500_v25  ;;  %v12115_v29 = vor.u32 %v14548_v23, %v14546_v12  ;;  %v14551_v61 = vshll.u32 %v14550_v24, 16  ;;  %v1658_v55 = vld [vmem:[#allocation2 + $0x90] sm:$0x8]  ;;  %v1985_v56 = vshll.u32 %v12078_v34, 16  ;;  %9190 = vmatpush3.bf16.msra.mxu1 %v9714_v50  ;;  %v14553_v23 = vld [vmem:[#allocation106_spill] sm:$0xff] }
 0x2a5   : > { %v9715_v25 = vld [vmem:[#allocation9 + $0x1d0] sm:$0xff]   ;;  %14552 = vst [vmem:[#allocation104_spill] sm:$0xff] %v12122_v26  ;;  %v14554_v44 = vshll.u32 %v14553_v23, 16  ;;  %v12134_v24 = vld [vmem:[#allocation2 + $0xe4] sm:$0xf]  ;;  %v14556_v34 = vshll.u32 %v11970_v4, 16 }
 0x2a6   : > { %14543 = vst [vmem:[#allocation95_spill] sm:$0xff] %v12103_v9  ;;  %14549 = vst [vmem:[#allocation109_spill] sm:$0xff] %v12115_v29  ;;  %v12120_v19 = vor.u32 %v14551_v61, %v11684_v48  ;;  %v4531_v9 = vrot.slane %v4529_v46, 5  ;;  %v2684_v57 = vld [vmem:[#allocation2 + $0x90] sm:$0x8]  ;;  %v12131_v48 = vrot.slane %v2534_v40, 5  ;;  %v12136_v61 = vadd.f32 %v8837_v54, %v8836_v42  ;;  %9191 = vmatprep.subr.bf16.mxu1 %v9715_v25 }
 0x2a7   : > { %v12129_v12 = vor.u32 %v14554_v44, %v11692_v13  ;;  %v2538_v46 = vshrl.u32 %v12084_v1, 16  ;;  %14555 = vst [vmem:[#allocation75_spill] sm:$0xff] %v12134_v24  ;;  %v2125_v52 = vld [vmem:[#allocation2 + $0xe4] sm:$0xf]  ;;  %v12141_v53 = vor.u32 %v14556_v34, %v12024_v18  ;;  %v2987_v50 = vshrl.u32 %v12098_v28, 16  ;;  %v9716_v1 = vld [vmem:[#allocation9 + $0x190] sm:$0xff]  }
 0x2a8   : > { %v12144_v23 = vld [vmem:[#allocation2 + $0xd8] sm:$0xf]  ;;  %v1880_v13 = vshrl.u32 %v1658_v55, 16  ;;  %v2424_v40 = vshll.u32 %v2187_v8, 16  ;;  %v2203_v44 = vld [vmem:[#allocation2 + $0xe4] sm:$0xf]  ;;  %v4532_v16 = vor.u32 %v4531_v9, %v4528_v33  ;;  %9192 = vmatpush3.bf16.msra.mxu1 %v9716_v1 }
 0x2a9   : > { %14557 = vst [vmem:[#allocation106_spill] sm:$0xff] %v12144_v23  ;;  %2157 = vst [vmem:[#allocation3 + $0x3f4] sm:$0xf] %v2125_v52  ;;  %v3534_v42 = vshll.u32 %v12108_v17, 16  ;;  %v12148_v25 = vld [vmem:[#allocation2 + $0xd8] sm:$0xf] }
 0x2aa   : > { %14558 = vst [vmem:[#allocation133_spill] sm:$0xff] %v12148_v25  ;;  %v2885_v54 = vshrl.u32 %v2684_v57, 16  ;;  %v9720_v4 = vld [vmem:[#allocation9 + $0x1c8] sm:$0xff]   ;;  %v3538_v18 = vshrl.u32 %v12108_v17, 16  ;;  %v8294_v34 = vrot.slane %v1880_v13, 11  ;;  %v2426_v26 = vrot.slane %v2424_v40, 5 }
 0x2ab   : > { %v1995_v29 = vshrl.u32 %v12134_v24, 16  ;;  %v3150_v55 = vld [vmem:[#allocation2 + $0xe4] sm:$0xf]  ;;  %v12152_v8 = vrot.slane %v2538_v46, 4  ;;  %v2549_v9 = vshrl.u32 %v2203_v44, 16  ;;  %v2552_v33 = vshll.u32 %v2203_v44, 16  ;;  %9193 = vmatprep.subr.bf16.mxu1 %v9720_v4 }
 0x2ac   : > { %v8309_v52 = vrot.slane %v2885_v54, 11  ;;  %v12154_v21 = vld [vmem:[#allocation2 + $0xe4] sm:$0xf]  ;;  %3182 = vst [vmem:[#allocation3 + $0x3b8] sm:$0xf] %v3150_v55  ;;  %v14560_v17 = vshll.u32 %v12000_v32, 16  ;;  %v2427_v44 = vsel %vm10453_vm10, %v11977_v31, %v2426_v26  ;;  %v1987_v4 = vor.u32 %v1985_v56, %v1984_v11 }
 0x2ad   : > { %14559 = vst [vmem:[#allocation134_spill] sm:$0xff] %v12152_v8  ;;  %v12161_v13 = vrot.slane %v2987_v50, 7  ;;  %v14561_v40 = vld [vmem:[#allocation96_spill] sm:$0xff]  ;;  %v3227_v1 = vld [vmem:[#allocation2 + $0xe4] sm:$0xf]  ;;  %v12169_v38 = vrot.slane %v4532_v16, 4 }
 0x2ae   : > { %v2970_v57 = vor.u32 %v14560_v17, %v12062_v6  ;;  %v1891_v46 = vsel %vm10432_vm5, %v8294_v34, %v14561_v40  ;;  %v4173_v54 = vld [vmem:[#allocation2 + $0xe4] sm:$0xf]  ;;  %v9721_v55 = vld [vmem:[#allocation9 + $0x238] sm:$0xff]   ;;  %v3990_v8 = vshrl.u32 %v12144_v23, 16  ;;  %2645 = vst [vmem:[#allocation3 + $0x26c] sm:$0xf] %v2427_v44  ;;  %v2896_v6 = vsel %vm10432_vm5, %v8309_v52, %v12058_v30 }
 0x2af   : > { %14562 = vst [vmem:[#allocation96_spill] sm:$0xff] %v12169_v38  ;;  %2083 = vst [vmem:[#allocation3 + $0x288] sm:$0xf] %v1891_v46  ;;  %v3722_v32 = vld [vmem:[#allocation2 + $0xe4] sm:$0xf]  ;;  %v12175_v34 = vrot.slane %v3534_v42, 5  ;;  %9317 = vmatprep.subr.bf16.mxu0 %v9721_v55  ;;  %v12181_v46 = vpop.f32.mrf.mxu1 }
 0x2b0   : > { %v4249_v50 = vld [vmem:[#allocation2 + $0xe4] sm:$0xf]  ;;  %4205 = vst [vmem:[#allocation3 + $0x37c] sm:$0xf] %v4173_v54  ;;  %v4535_v26 = vshll.u32 %v12148_v25, 16  ;;  %v12178_v31 = vrot.slane %v1995_v29, 7 }
 0x2b1   : > { %14563 = vst [vmem:[#allocation135_spill] sm:$0xff] %v12175_v34  ;;  %3108 = vst [vmem:[#allocation3 + $0x24c] sm:$0xf] %v2896_v6  ;;  %v3000_v11 = vshrl.u32 %v12154_v21, 16  ;;  %v2551_v16 = vrot.slane %v2549_v9, 4  ;;  %v2554_v56 = vrot.slane %v2552_v33, 5 }
 0x2b2   : > { %v3549_v17 = vshrl.u32 %v3227_v1, 16  ;;  %v3552_v40 = vshll.u32 %v3227_v1, 16  ;;  %v12183_v30 = vrot.slane %v3538_v18, 4  ;;  %v4003_v42 = vshrl.u32 %v3722_v32, 16  ;;  %v12188_v34 = vld [vmem:[#allocation2 + $0xe8] sm:$0xf] }
 0x2b3   : > { %v4550_v44 = vshrl.u32 %v4249_v50, 16  ;;  %v12186_v54 = vrot.slane %v3990_v8, 7  ;;  %v4553_v38 = vshll.u32 %v4249_v50, 16  ;;  %v12190_v55 = vrot.slane %v4535_v26, 5  ;;  %v12195_v1 = vld [vmem:[#allocation2 + $0xe8] sm:$0xf] }
 0x2b4   : > { %14564 = vst [vmem:[#allocation136_spill] sm:$0xff] %v12183_v30  ;;  %v3551_v6 = vrot.slane %v3549_v17, 4  ;;  %v3554_v29 = vrot.slane %v3552_v40, 5  ;;  %v2555_v52 = vor.u32 %v2554_v56, %v2551_v16  ;;  %v12197_v32 = vrot.slane %v3000_v11, 7  ;;  %v8842_v17 = vpop.f32.mrf.mxu1  ;;  %v9654_v40 = vld [vmem:[#allocation3 + $0x28c] ss:$36 sps:$4 sm:$0xff]  }
 0x2b5   : > { %14565 = vst [vmem:[#allocation137_spill] sm:$0xff] %v12186_v54  ;;  %14566 = vst [vmem:[#allocation138_spill] sm:$0xff] %v12190_v55  ;;  %v4552_v8 = vrot.slane %v4550_v44, 4  ;;  %v4555_v30 = vrot.slane %v4553_v38, 5  ;;  %v12199_v50 = vrot.slane %v4003_v42, 7  ;;  %v2004_v26 = vshrl.u32 %v12188_v34, 16  ;;  %6292 = vmatprep.mubr.bf16.mxu0 %v9654_v40 }
 0x2b6   : > { %v14568_v55 = vmax.f32 %v12066_v60, 0.0  ;;  %v14569_v33 = vrot.slane %v11955_v10, 4  ;;  %v9656_v11 = vld [vmem:[#allocation3 + $0x248] ss:$36 sps:$4 sm:$0xff]   ;;  %v3555_v44 = vor.u32 %v3554_v29, %v3551_v6  ;;  %v2558_v38 = vshll.u32 %v12195_v1, 16  ;;  %v14573_v24 = vld [vmem:[#allocation67_spill] sm:$0xff]  ;;  %v8843_v29 = vpop.f32.mrf.mxu1 }
 0x2b7   : > { %14567 = vst [vmem:[#allocation139_spill] sm:$0xff] %v12199_v50  ;;  %v14570_v42 = vrot.slane %v11957_v27, 4  ;;  %v14571_v60 = vrot.slane %v12076_v37, 4  ;;  %v14572_v25 = vld [vmem:[#allocation110_spill] sm:$0xff]  ;;  %v14574_v23 = vshll.u32 %v14573_v24, 16  ;;  %v14578_v54 = vld [vmem:[#allocation120_spill] sm:$0xff] }
 0x2b8   : > { %v8616_v9 = vpack.c.bf16 %v14568_v55, %v14568_v55  ;;  %v1966_v16 = vsel %vm10432_vm5, %v14569_v33, %v12141_v53  ;;  %v9658_v56 = vld [vmem:[#allocation3 + $0x24c] ss:$36 sps:$4 sm:$0xff]   ;;  %v12232_v37 = vld [vmem:[#allocation2 + $0xe8] sm:$0xf]  ;;  %v14581_v24 = vld [vmem:[#allocation117_spill] sm:$0xff] }
 0x2b9   : > { %2090 = vst [vmem:[#allocation3 + $0x384] sm:$0xf] %v1966_v16  ;;  %v2971_v18 = vsel %vm10432_vm5, %v14570_v42, %v2970_v57  ;;  %v1988_v55 = vsel %vm10432_vm5, %v14571_v60, %v1987_v4  ;;  %v12222_v53 = vor.u32 %v14574_v23, %v14572_v25  ;;  %v14576_v33 = vld [vmem:[#allocation115_spill] sm:$0xff]  ;;  %v14579_v16 = vld [vmem:[#allocation112_spill] sm:$0xff]  ;;  %v9659_v57 = vld [vmem:[#allocation3 + $0x288] ss:$36 sps:$4 sm:$0xff]   ;;  %6445 = vmatprep.mubr.bf16.mxu1 %v9658_v56 }
 0x2ba   : > { %v14580_v3 = vshll.u32 %v14579_v16, 16  ;;  %1627 = vst [vmem:[#allocation2 + $0xf4] sm:$0xf] %v8616_v9  ;;  %3115 = vst [vmem:[#allocation3 + $0x348] sm:$0xf] %v2971_v18  ;;  %v14582_v23 = vshll.u32 %v14581_v24, 16  ;;  %6293 = vmatmul.mubr.bf16.gmra.mxu0 %v9659_v57  ;;  %6446 = vmatmul.mubr.bf16.gmra.mxu1 %v9656_v11  ;;  %v8841_v18 = vadd.f32 %v12181_v46, %v12156_v45 }
 0x2bb   : > { %14575 = vst [vmem:[#allocation110_spill] sm:$0xff] %v12222_v53  ;;  %2092 = vst [vmem:[#allocation3 + $0x3cc] sm:$0xf] %v1988_v55  ;;  %v12239_v60 = vrot.slane %v2555_v52, 4  ;;  %v12242_v40 = vld [vmem:[#allocation2 + $0xe8] sm:$0xf]  ;;  %v8844_v55 = vadd.f32 %v8843_v29, %v8842_v17 }
 0x2bc   : > { %v12229_v14 = vor.u32 %v14580_v3, %v14578_v54  ;;  %v12237_v4 = vor.u32 %v14582_v23, %v11783_v63  ;;  %v4556_v54 = vor.u32 %v4555_v30, %v4552_v8  ;;  %14584 = vst [vmem:[#allocation115_spill] sm:$0xff] %v12242_v40  ;;  %v1661_v16 = vld [vmem:[#allocation2 + $0xa0] sm:$0x8]  ;;  %v2190_v24 = vld [vmem:[#allocation2 + $0x9c] sm:$0x1]  ;;  %v14585_v52 = vld [vmem:[#allocation22_spill] sm:$0xff] }
 0x2bd   : > { %v2687_v56 = vld [vmem:[#allocation2 + $0xa0] sm:$0x8]  ;;  %v1427_v23 = vadd.f32 %v12136_v61, %v14585_v52  ;;  %v12250_v42 = vrot.slane %v3555_v44, 4  ;;  %v12252_v30 = vrot.slane %v2004_v26, 7  ;;  %v12254_v8 = vrot.slane %v2558_v38, 5  ;;  %v9725_v52 = vld [vmem:[#allocation9 + $0x188] sm:$0xff]  }
 0x2be   : > { %14583 = vst [vmem:[#allocation67_spill] sm:$0xff] %v12237_v4  ;;  %v2562_v3 = vshrl.u32 %v12195_v1, 16  ;;  %v2122_v9 = vld [vmem:[#allocation2 + $0xc8] sm:$0xf]  ;;  %v3009_v11 = vshrl.u32 %v12232_v37, 16  ;;  %v1902_v57 = vshrl.u32 %v1661_v16, 16  ;;  %9194 = vmatpush3.bf16.msra.mxu1 %v9725_v52 }
 0x2bf   : > { %14586 = vst [vmem:[#allocation120_spill] sm:$0xff] %v12250_v42  ;;  %2154 = vst [vmem:[#allocation3 + $0x388] sm:$0xf] %v2122_v9  ;;  %v2124_v4 = vld [vmem:[#allocation2 + $0xd8] sm:$0xf]  ;;  %v12260_v61 = vrot.slane %v4556_v54, 4 }
 0x2c0   : > { %v2126_v58 = vld [vmem:[#allocation2 + $0xe8] sm:$0xf]  ;;  %v3558_v44 = vshll.u32 %v12242_v40, 16  ;;  %v2448_v1 = vshll.u32 %v2190_v24, 16  ;;  %2156 = vst [vmem:[#allocation3 + $0x3d0] sm:$0xf] %v2124_v4 }
 0x2c1   : > { %14587 = vst [vmem:[#allocation112_spill] sm:$0xff] %v12260_v61  ;;  %v12264_v38 = vld [vmem:[#allocation2 + $0xe8] sm:$0xf]  ;;  %2158 = vst [vmem:[#allocation3 + $0x418] sm:$0xf] %v2126_v58  ;;  %v8295_v53 = vrot.slane %v1902_v57, 11  ;;  %v2513_v58 = vsel %vm10453_vm10, %v11997_v15, %v12040_v7 }
 0x2c2   : > { %v2907_v45 = vshrl.u32 %v2687_v56, 16  ;;  %v1467_v46 = vmax.f32 %v1427_v23, 0.0  ;;  %v9729_v17 = vld [vmem:[#allocation9 + $0x1c0] sm:$0xff]   ;;  %v14588_v29 = vshll.u32 %v11870_v36, 16  ;;  %v12272_v9 = vrot.slane %v2562_v3, 4  ;;  %v14590_v23 = vld [vmem:[#allocation70_spill] sm:$0xff] }
 0x2c3   : > { %v2450_v26 = vrot.slane %v2448_v1, 5  ;;  %v2127_v6 = vld [vmem:[#allocation2 + $0xf4] sm:$0xf]  ;;  %v1664_v61 = vld [vmem:[#allocation2 + $0xb0] sm:$0x8]  ;;  %v1913_v4 = vsel %vm10432_vm5, %v8295_v53, %v12120_v19  ;;  %v12287_v57 = vadd.f32 %v8844_v55, %v14590_v23  ;;  %9195 = vmatprep.subr.bf16.mxu1 %v9729_v17  ;;  %v9730_v1 = vld [vmem:[#allocation9 + $0x180] sm:$0xff]  }
 0x2c4   : > { %v12270_v54 = vor.u32 %v14588_v29, %v11963_v49  ;;  %v8310_v24 = vrot.slane %v2907_v45, 11  ;;  %v12281_v56 = vld [vmem:[#allocation2 + $0xf4] sm:$0xf]  ;;  %2159 = vst [vmem:[#allocation3 + $0x43c] sm:$0xf] %v2127_v6  ;;  %v14589_v49 = vld [vmem:[#allocation28_spill] sm:$0xff]  ;;  %v8617_v45 = vpack.c.bf16 %v1467_v46, %v1467_v46  ;;  %9196 = vmatpush3.bf16.msra.mxu1 %v9730_v1 }
 0x2c5   : > { %v2206_v36 = vld [vmem:[#allocation2 + $0xf4] sm:$0xf]  ;;  %v12284_v3 = vadd.f32 %v8841_v18, %v14589_v49  ;;  %2652 = vst [vmem:[#allocation3 + $0x368] sm:$0xf] %v2513_v58  ;;  %2085 = vst [vmem:[#allocation3 + $0x2d0] sm:$0xf] %v1913_v4  ;;  %v2451_v15 = vsel %vm10453_vm10, %v11979_v22, %v2450_v26 }
 0x2c6   : > { %v2573_v19 = vshrl.u32 %v2206_v36, 16  ;;  %v2576_v53 = vshll.u32 %v2206_v36, 16  ;;  %v3152_v52 = vld [vmem:[#allocation2 + $0xf4] sm:$0xf]  ;;  %v14591_v6 = vshll.u32 %v11923_v20, 16  ;;  %v3011_v29 = vrot.slane %v3009_v11, 7 }
 0x2c7   : > { %v4012_v55 = vshrl.u32 %v12264_v38, 16  ;;  %2647 = vst [vmem:[#allocation3 + $0x2b4] sm:$0xf] %v2451_v15  ;;  %v2918_v17 = vsel %vm10432_vm5, %v8310_v24, %v12129_v12  ;;  %v12301_v58 = vld [vmem:[#allocation2 + $0xf4] sm:$0xf]  ;;  %v2017_v20 = vshrl.u32 %v12281_v56, 16 }
 0x2c8   : > { %v12295_v18 = vor.u32 %v14591_v6, %v11955_v10  ;;  %v3230_v22 = vld [vmem:[#allocation2 + $0xf4] sm:$0xf]  ;;  %3184 = vst [vmem:[#allocation3 + $0x400] sm:$0xf] %v3152_v52  ;;  %v4250_v46 = vld [vmem:[#allocation2 + $0xe8] sm:$0xf] }
 0x2c9   : > { %3110 = vst [vmem:[#allocation3 + $0x294] sm:$0xf] %v2918_v17  ;;  %v3573_v10 = vshrl.u32 %v3230_v22, 16  ;;  %1628 = vst [vmem:[#allocation2 + $0xf8] sm:$0xf] %v8617_v45  ;;  %v1924_v11 = vshrl.u32 %v1664_v61, 16 }
 0x2ca   : > { %v14592_v4 = vshll.u32 %v11931_v43, 16  ;;  %v14593_v12 = vshll.u32 %v12098_v28, 16  ;;  %v14594_v49 = vshll.u32 %v12188_v34, 16  ;;  %v3576_v15 = vshll.u32 %v3230_v22, 16  ;;  %v3725_v52 = vld [vmem:[#allocation2 + $0xf4] sm:$0xf] }
 0x2cb   : > { %v4175_v6 = vld [vmem:[#allocation2 + $0xf4] sm:$0xf]  ;;  %v12316_v17 = vrot.slane %v3558_v44, 5  ;;  %v2575_v61 = vrot.slane %v2573_v19, 4  ;;  %v2578_v1 = vrot.slane %v2576_v53, 5  ;;  %v3022_v45 = vshrl.u32 %v12301_v58, 16 }
 0x2cc   : > { %v12308_v36 = vor.u32 %v14592_v4, %v11957_v27  ;;  %v2992_v24 = vor.u32 %v14593_v12, %v12161_v13  ;;  %v2009_v23 = vor.u32 %v14594_v49, %v12252_v30  ;;  %4207 = vst [vmem:[#allocation3 + $0x3c4] sm:$0xf] %v4175_v6  ;;  %v14596_v27 = vshll.u32 %v12232_v37, 16  ;;  %v4252_v30 = vld [vmem:[#allocation2 + $0xf4] sm:$0xf] }
 0x2cd   : > { %14595 = vst [vmem:[#allocation117_spill] sm:$0xff] %v12316_v17  ;;  %v12323_v13 = vrot.slane %v4012_v55, 7  ;;  %v4559_v34 = vshll.u32 %v4250_v46, 16  ;;  %v3131_v22 = vld [vmem:[#allocation2 + $0x48] sm:$0xf]  ;;  %v12325_v4 = vrot.slane %v2017_v20, 7 }
 0x2ce   : > { %v3014_v28 = vor.u32 %v14596_v27, %v3011_v29  ;;  %v12327_v44 = vrot.slane %v3573_v10, 4  ;;  %v4025_v19 = vshrl.u32 %v3725_v52, 16  ;;  %v8296_v53 = vrot.slane %v1924_v11, 11  ;;  %v445_v12 = vld [vmem:[#allocation2 + $0xac] sm:$0x1]  ;;  %v14599_v27 = vld [vmem:[#allocation116_spill] sm:$0xff] }
 0x2cf   : > { %3163 = vst [vmem:[#allocation3 + $0x10c] sm:$0xf] %v3131_v22  ;;  %v9660_v6 = vld [vmem:[#allocation3 + $0x2d4] ss:$36 sps:$4 sm:$0xff]   ;;  %v3578_v37 = vrot.slane %v3576_v15, 5  ;;  %v14597_v29 = vrot.slane %v12082_v0, 4  ;;  %v2579_v10 = vor.u32 %v2578_v1, %v2575_v61 }
 0x2d0   : > { %v9665_v16 = vld [vmem:[#allocation3 + $0x2d0] ss:$36 sps:$4 sm:$0xff]   ;;  %v14598_v46 = vrot.slane %v12178_v31, 4  ;;  %v12339_v11 = vrot.slane %v3022_v45, 7  ;;  %v4574_v52 = vshrl.u32 %v4252_v30, 16  ;;  %v1935_v22 = vsel %vm10432_vm5, %v8296_v53, %v14599_v27  ;;  %6300 = vmatprep.mubr.bf16.mxu0 %v9660_v6 }
 0x2d1   : > { %v2993_v55 = vsel %vm10432_vm5, %v14597_v29, %v2992_v24  ;;  %v9662_v15 = vld [vmem:[#allocation3 + $0x290] ss:$36 sps:$4 sm:$0xff]   ;;  %2087 = vst [vmem:[#allocation3 + $0x318] sm:$0xf] %v1935_v22  ;;  %v446_v24 = vsel %vm10441_vm7, 0, %v445_v12  ;;  %v14600_v61 = vrot.slane %v12197_v32, 4  ;;  %v2561_v45 = vsel %vm10453_vm10, %v12239_v60, %v12254_v8  ;;  %6301 = vmatmul.mubr.bf16.gmra.mxu0 %v9665_v16 }
 0x2d2   : > { %v2010_v20 = vsel %vm10432_vm5, %v14598_v46, %v2009_v23  ;;  %3117 = vst [vmem:[#allocation3 + $0x390] sm:$0xf] %v2993_v55  ;;  %v9664_v49 = vld [vmem:[#allocation3 + $0x294] ss:$36 sps:$4 sm:$0xff]   ;;  %v2537_v23 = vsel %vm10453_vm10, %v12105_v51, %v12131_v48  ;;  %v4577_v53 = vshll.u32 %v4252_v30, 16  ;;  %v14602_v12 = vld [vmem:[#allocation34_spill] sm:$0xff] }
 0x2d3   : > { %2094 = vst [vmem:[#allocation3 + $0x414] sm:$0xf] %v2010_v20  ;;  %v3015_v1 = vsel %vm10432_vm5, %v14600_v61, %v3014_v28  ;;  %v1678_v6 = vld [vmem:[#allocation2 + $0xf8] sm:$0xf]  ;;  %447 = vst [vmem:[#allocation2 + $0xac] sm:$0x1] %v446_v24  ;;  %6453 = vmatprep.mubr.bf16.mxu1 %v9664_v49 }
 0x2d4   : > { %v12358_v29 = vld [vmem:[#allocation2 + $0xf8] sm:$0xf]  ;;  %2654 = vst [vmem:[#allocation3 + $0x3b0] sm:$0xf] %v2537_v23  ;;  %3119 = vst [vmem:[#allocation3 + $0x3d8] sm:$0xf] %v3015_v1  ;;  %v3579_v23 = vor.u32 %v3578_v37, %v12327_v44  ;;  %6454 = vmatmul.mubr.bf16.gmra.mxu1 %v9662_v15 }
 0x2d5   : > { %2656 = vst [vmem:[#allocation3 + $0x3f8] sm:$0xf] %v2561_v45  ;;  %v14601_v51 = vld [vmem:[#allocation40_spill] sm:$0xff]  ;;  %v14603_v55 = vrot.slane %v14602_v12, 4  ;;  %v14604_v46 = vld [vmem:[#allocation50_spill] sm:$0xff]  ;;  %v14605_v20 = vld [vmem:[#allocation45_spill] sm:$0xff] }
 0x2d6   : > { %v3297_v60 = vsel %vm10453_vm10, %v14605_v20, %v14604_v46  ;;  %v14606_v16 = vld [vmem:[#allocation52_spill] sm:$0xff]  ;;  %v14607_v30 = vld [vmem:[#allocation43_spill] sm:$0xff]  ;;  %v12374_v24 = vrot.slane %v4559_v34, 5  ;;  %v12377_v61 = vrot.slane %v4025_v19, 7  ;;  %v2026_v1 = vshrl.u32 %v1678_v6, 16  ;;  %v14611_v20 = vld [vmem:[#allocation77_spill] sm:$0xff] }
 0x2d7   : > { %v3754_v28 = vsel %vm10432_vm5, %v14603_v55, %v14601_v51  ;;  %v14608_v27 = vrot.slane %v14607_v30, 4  ;;  %3656 = vst [vmem:[#allocation3 + $0xa4] sm:$0xf] %v3297_v60  ;;  %v2024_v51 = vrot.slane %v12325_v4, 4  ;;  %v12382_v55 = vld [vmem:[#allocation2 + $0xf8] sm:$0xf] }
 0x2d8   : > { %14609 = vst [vmem:[#allocation22_spill] sm:$0xff] %v12374_v24  ;;  %14610 = vst [vmem:[#allocation28_spill] sm:$0xff] %v12377_v61  ;;  %v3031_v34 = vshrl.u32 %v12358_v29, 16  ;;  %v12385_v49 = vrot.slane %v2579_v10, 4  ;;  %v2028_v19 = vrot.slane %v2026_v1, 7  ;;  %v2029_v37 = vshll.u32 %v1678_v6, 16 }
 0x2d9   : > { %v3776_v22 = vsel %vm10432_vm5, %v14608_v27, %v14606_v16  ;;  %4118 = vst [vmem:[#allocation3 + $0x3c] sm:$0xf] %v3754_v28  ;;  %v2690_v28 = vld [vmem:[#allocation2 + $0xb0] sm:$0x8]  ;;  %v14612_v15 = vshll.u32 %v14611_v20, 16  ;;  %v14614_v16 = vld [vmem:[#allocation130_spill] sm:$0xff] }
 0x2da   : > { %4120 = vst [vmem:[#allocation3 + $0x84] sm:$0xf] %v3776_v22  ;;  %v14615_v30 = vld [vmem:[#allocation87_spill] sm:$0xff]  ;;  %v4576_v12 = vrot.slane %v4574_v52, 4  ;;  %v4579_v45 = vrot.slane %v4577_v53, 5  ;;  %v12400_v1 = vrot.slane %v3579_v23, 4  ;;  %v2031_v40 = vor.u32 %v2029_v37, %v2028_v19  ;;  %v12408_v23 = vpop.f32.mrf.mxu0 }
 0x2db   : > { %v12391_v60 = vor.u32 %v14612_v15, %v12080_v5  ;;  %v14616_v27 = vshll.u32 %v14615_v30, 16  ;;  %v12398_v26 = vld [vmem:[#allocation2 + $0xf8] sm:$0xf]  ;;  %v397_v10 = vld [vmem:[#allocation2 + $0xc0] sm:$0x8]  ;;  %v2582_v5 = vshll.u32 %v12382_v55, 16 }
 0x2dc   : > { %v448_v43 = vld [vmem:[#allocation2 + $0xbc] sm:$0x1]  ;;  %v2128_v44 = vld [vmem:[#allocation2 + $0xf8] sm:$0xf]  ;;  %14617 = vst [vmem:[#allocation116_spill] sm:$0xff] %v12400_v1  ;;  %v14618_v15 = vld [vmem:[#allocation134_spill] sm:$0xff]  ;;  %v12419_v39 = vpop.f32.mrf.mxu0 }
 0x2dd   : > { %14613 = vst [vmem:[#allocation70_spill] sm:$0xff] %v12391_v60  ;;  %v12396_v22 = vor.u32 %v14616_v27, %v14614_v16  ;;  %2160 = vst [vmem:[#allocation3 + $0x460] sm:$0xf] %v2128_v44  ;;  %v4154_v20 = vld [vmem:[#allocation2 + $0x48] sm:$0xf]  ;;  %v2586_v52 = vshrl.u32 %v12382_v55, 16  ;;  %v2032_v55 = vsel %vm10432_vm5, %v2024_v51, %v2031_v40 }
 0x2de   : > { %v3033_v53 = vrot.slane %v3031_v34, 7  ;;  %v3034_v30 = vshll.u32 %v12358_v29, 16  ;;  %v9668_v27 = vld [vmem:[#allocation3 + $0x31c] ss:$36 sps:$4 sm:$0xff]   ;;  %v400_v47 = vld [vmem:[#allocation2 + $0xd0] sm:$0x8]  ;;  %v4580_v34 = vor.u32 %v4579_v45, %v4576_v12 }
 0x2df   : > { %v451_v24 = vld [vmem:[#allocation2 + $0xcc] sm:$0x1]  ;;  %4186 = vst [vmem:[#allocation3 + $0xd0] sm:$0xf] %v4154_v20  ;;  %v3582_v44 = vshll.u32 %v12398_v26, 16  ;;  %v2929_v6 = vshrl.u32 %v2690_v28, 16  ;;  %6308 = vmatprep.mubr.bf16.mxu0 %v9668_v27 }
 0x2e0   : > { %v2193_v37 = vld [vmem:[#allocation2 + $0xac] sm:$0x1]  ;;  %v9673_v61 = vld [vmem:[#allocation3 + $0x318] ss:$36 sps:$4 sm:$0xff]   ;;  %v403_v16 = vld [vmem:[#allocation2 + $0xe0] sm:$0x8] }
 0x2e1   : > { %v14619_v29 = vld [vmem:[#allocation111_spill] sm:$0xff]  ;;  %v14620_v1 = vld [vmem:[#allocation85_spill] sm:$0xff]  ;;  %v2472_v42 = vshll.u32 %v2193_v37, 16  ;;  %v1468_v17 = vmax.f32 %v12284_v3, 0.0  ;;  %v454_v60 = vld [vmem:[#allocation2 + $0xdc] sm:$0x1]  ;;  %6309 = vmatmul.mubr.bf16.gmra.mxu0 %v9673_v61  ;;  %v3036_v3 = vor.u32 %v3034_v30, %v3033_v53 }
 0x2e2   : > { %v14621_v50 = vor.u32 %v14619_v29, %v14620_v1  ;;  %v406_v19 = vld [vmem:[#allocation2 + $0xf0] sm:$0x8]  ;;  %2096 = vst [vmem:[#allocation3 + $0x45c] sm:$0xf] %v2032_v55  ;;  %v457_v26 = vld [vmem:[#allocation2 + $0xec] sm:$0x1] }
 0x2e3   : > { %v8311_v28 = vrot.slane %v2929_v6, 11  ;;  %v1469_v63 = vmax.f32 %v12287_v57, 0.0  ;;  %v398_v45 = vsel %vm10423_vm2, 0, %v397_v10  ;;  %v449_v51 = vsel %vm10441_vm7, 0, %v448_v43  ;;  %v3133_v12 = vld [vmem:[#allocation2 + $0x58] sm:$0xf] }
 0x2e4   : > { %v2470_v20 = vrot.slane %v14621_v50, 4  ;;  %v3190_v50 = vld [vmem:[#allocation2 + $0x1c] sm:$0x1]  ;;  %v12426_v1 = vrot.slane %v2582_v5, 5  ;;  %v12428_v27 = vld [vmem:[#allocation2 + $0xf8] sm:$0xf]  ;;  %v8618_v55 = vpack.c.bf16 %v1468_v17, %v1468_v17 }
 0x2e5   : > { %v2474_v37 = vrot.slane %v2472_v42, 5  ;;  %399 = vst [vmem:[#allocation2 + $0xc0] sm:$0x8] %v398_v45  ;;  %450 = vst [vmem:[#allocation2 + $0xbc] sm:$0x1] %v449_v51  ;;  %v14623_v57 = vld [vmem:[#allocation118_spill] sm:$0xff]  ;;  %v8619_v6 = vpack.c.bf16 %v1469_v63, %v1469_v63 }
 0x2e6   : > { %v409_v61 = vld [vmem:[#allocation2 + $0x100] sm:$0x8]  ;;  %3165 = vst [vmem:[#allocation3 + $0x154] sm:$0xf] %v3133_v12  ;;  %v2940_v10 = vsel %vm10432_vm5, %v8311_v28, %v14623_v57  ;;  %v401_v43 = vsel %vm10423_vm2, 0, %v400_v47  ;;  %v452_v5 = vsel %vm10441_vm7, 0, %v451_v24  ;;  %v12447_v24 = vpop.f32.mrf.mxu0 }
 0x2e7   : > { %v12437_v53 = vld [vmem:[#allocation2 + $0x2c] sm:$0x1]  ;;  %v4156_v30 = vld [vmem:[#allocation2 + $0x58] sm:$0xf]  ;;  %v3135_v42 = vld [vmem:[#allocation2 + $0x68] sm:$0xf]  ;;  %v2475_v45 = vsel %vm10453_vm10, %v2470_v20, %v2474_v37 }
 0x2e8   : > { %v12439_v17 = vrot.slane %v4580_v34, 4  ;;  %v12441_v29 = vrot.slane %v2586_v52, 4  ;;  %3112 = vst [vmem:[#allocation3 + $0x2dc] sm:$0xf] %v2940_v10  ;;  %1629 = vst [vmem:[#allocation2 + $0x104] sm:$0xf] %v8618_v55 }
 0x2e9   : > { %402 = vst [vmem:[#allocation2 + $0xd0] sm:$0x8] %v401_v43  ;;  %453 = vst [vmem:[#allocation2 + $0xcc] sm:$0x1] %v452_v5  ;;  %v404_v63 = vsel %vm10423_vm2, 0, %v403_v16  ;;  %v12449_v28 = vrot.slane %v3582_v44, 5 }
 0x2ea   : > { %14624 = vst [vmem:[#allocation40_spill] sm:$0xff] %v12439_v17  ;;  %v460_v47 = vld [vmem:[#allocation2 + $0xfc] sm:$0x1]  ;;  %4188 = vst [vmem:[#allocation3 + $0x118] sm:$0xf] %v4156_v30  ;;  %v455_v52 = vsel %vm10441_vm7, 0, %v454_v60 }
 0x2eb   : > { %3167 = vst [vmem:[#allocation3 + $0x19c] sm:$0xf] %v3135_v42  ;;  %14625 = vst [vmem:[#allocation34_spill] sm:$0xff] %v12447_v24  ;;  %v12451_v34 = vld [vmem:[#allocation2 + $0xf8] sm:$0xf]  ;;  %v407_v20 = vsel %vm10423_vm2, 0, %v406_v19 }
 0x2ec   : > { %14626 = vst [vmem:[#allocation50_spill] sm:$0xff] %v12449_v28  ;;  %2649 = vst [vmem:[#allocation3 + $0x2fc] sm:$0xf] %v2475_v45  ;;  %v458_v16 = vsel %vm10441_vm7, 0, %v457_v26  ;;  %v4034_v51 = vshrl.u32 %v12428_v27, 16  ;;  %v14627_v44 = vrot.slane %v12339_v11, 4 }
 0x2ed   : > { %1630 = vst [vmem:[#allocation2 + $0x108] sm:$0xf] %v8619_v6  ;;  %405 = vst [vmem:[#allocation2 + $0xe0] sm:$0x8] %v404_v63  ;;  %v14628_v37 = vld [vmem:[#allocation39_spill] sm:$0xff]  ;;  %v14629_v55 = vld [vmem:[#allocation38_spill] sm:$0xff] }
 0x2ee   : > { %456 = vst [vmem:[#allocation2 + $0xdc] sm:$0x1] %v455_v52  ;;  %408 = vst [vmem:[#allocation2 + $0xf0] sm:$0x8] %v407_v20  ;;  %v3037_v12 = vsel %vm10432_vm5, %v14627_v44, %v3036_v3  ;;  %v14630_v57 = vor.u32 %v14628_v37, %v14629_v55  ;;  %v3256_v10 = vshll.u32 %v3190_v50, 16  ;;  %v410_v26 = vsel %vm10423_vm2, 0, %v409_v61 }
 0x2ef   : > { %459 = vst [vmem:[#allocation2 + $0xec] sm:$0x1] %v458_v16  ;;  %v4158_v6 = vld [vmem:[#allocation2 + $0x68] sm:$0xf]  ;;  %3121 = vst [vmem:[#allocation3 + $0x420] sm:$0xf] %v3037_v12  ;;  %v2585_v3 = vsel %vm10453_vm10, %v12385_v49, %v12426_v1 }
 0x2f0   : > { %v3254_v60 = vrot.slane %v14630_v57, 4  ;;  %v461_v43 = vsel %vm10441_vm7, 0, %v460_v47  ;;  %4190 = vst [vmem:[#allocation3 + $0x160] sm:$0xf] %v4158_v6  ;;  %v3137_v5 = vld [vmem:[#allocation2 + $0x78] sm:$0xf]  ;;  %v12481_v47 = vpop.f32.mrf.mxu0 }
 0x2f1   : > { %v4583_v30 = vshll.u32 %v12451_v34, 16  ;;  %v3258_v50 = vrot.slane %v3256_v10, 5  ;;  %411 = vst [vmem:[#allocation2 + $0x100] sm:$0x8] %v410_v26  ;;  %462 = vst [vmem:[#allocation2 + $0xfc] sm:$0x1] %v461_v43 }
 0x2f2   : > { %2658 = vst [vmem:[#allocation3 + $0x440] sm:$0xf] %v2585_v3  ;;  %v14631_v42 = vld [vmem:[#allocation30_spill] sm:$0xff]  ;;  %v14632_v45 = vld [vmem:[#allocation29_spill] sm:$0xff]  ;;  %v3280_v52 = vshll.u32 %v12437_v53, 16  ;;  %14634 = vst [vmem:[#allocation45_spill] sm:$0xff] %v12481_v47 }
 0x2f3   : > { %v14633_v63 = vor.u32 %v14631_v42, %v14632_v45  ;;  %3169 = vst [vmem:[#allocation3 + $0x1e4] sm:$0xf] %v3137_v5  ;;  %v1667_v20 = vld [vmem:[#allocation2 + $0xc0] sm:$0x8]  ;;  %v14635_v16 = vld [vmem:[#allocation60_spill] sm:$0xff]  ;;  %v14636_v49 = vld [vmem:[#allocation55_spill] sm:$0xff] }
 0x2f4   : > { %v3321_v44 = vsel %vm10453_vm10, %v14636_v49, %v14635_v16  ;;  %v14637_v34 = vld [vmem:[#allocation26_spill] sm:$0xff]  ;;  %v14638_v12 = vld [vmem:[#allocation49_spill] sm:$0xff]  ;;  %v14640_v57 = vld [vmem:[#allocation36_spill] sm:$0xff]  ;;  %v12503_v42 = vrot.slane %v4034_v51, 7  ;;  %v1946_v45 = vshrl.u32 %v1667_v20, 16  ;;  %v3259_v49 = vsel %vm10453_vm10, %v3254_v60, %v3258_v50 }
 0x2f5   : > { %v3278_v61 = vrot.slane %v14633_v63, 4  ;;  %v14639_v37 = vrot.slane %v14638_v12, 4  ;;  %v14641_v10 = vld [vmem:[#allocation66_spill] sm:$0xff]  ;;  %v14642_v6 = vld [vmem:[#allocation92_spill] sm:$0xff]  ;;  %v14643_v26 = vld [vmem:[#allocation65_spill] sm:$0xff]  ;;  %v12511_v12 = vpop.f32.mrf.mxu1  ;;  %v3282_v51 = vrot.slane %v3280_v52, 5 }
 0x2f6   : > { %v3345_v53 = vsel %vm10453_vm10, %v14641_v10, %v14640_v57  ;;  %v14644_v43 = vrot.slane %v14643_v26, 4  ;;  %v12505_v63 = vld [vmem:[#allocation2 + $0xbc] sm:$0x1]  ;;  %3658 = vst [vmem:[#allocation3 + $0xec] sm:$0xf] %v3321_v44  ;;  %v14646_v20 = vld [vmem:[#allocation74_spill] sm:$0xff] }
 0x2f7   : > { %v3798_v55 = vsel %vm10432_vm5, %v14639_v37, %v14637_v34  ;;  %3660 = vst [vmem:[#allocation3 + $0x134] sm:$0xf] %v3345_v53  ;;  %v12509_v34 = vpop.f32.mrf.mxu0  ;;  %v12513_v37 = vld [vmem:[#allocation2 + $0x104] sm:$0xf]  ;;  %3653 = vst [vmem:[#allocation3 + $0x38] sm:$0xf] %v3259_v49 }
 0x2f8   : > { %v3820_v3 = vsel %vm10432_vm5, %v14644_v43, %v14642_v6  ;;  %4122 = vst [vmem:[#allocation3 + $0xcc] sm:$0xf] %v3798_v55  ;;  %v3154_v10 = vld [vmem:[#allocation2 + $0x104] sm:$0xf]  ;;  %v14645_v6 = vld [vmem:[#allocation78_spill] sm:$0xff]  ;;  %v14651_v53 = vld [vmem:[#allocation84_spill] sm:$0xff] }
 0x2f9   : > { %4124 = vst [vmem:[#allocation3 + $0x114] sm:$0xf] %v3820_v3  ;;  %v3369_v26 = vsel %vm10453_vm10, %v14646_v20, %v14645_v6  ;;  %v14647_v43 = vld [vmem:[#allocation69_spill] sm:$0xff]  ;;  %v14650_v55 = vld [vmem:[#allocation86_spill] sm:$0xff]  ;;  %v9670_v19 = vld [vmem:[#allocation3 + $0x2d8] ss:$36 sps:$4 sm:$0xff]  }
 0x2fa   : > { %v14648_v60 = vld [vmem:[#allocation73_spill] sm:$0xff]  ;;  %v3393_v3 = vsel %vm10453_vm10, %v14651_v53, %v14650_v55  ;;  %v3044_v52 = vshrl.u32 %v12513_v37, 16  ;;  %3186 = vst [vmem:[#allocation3 + $0x448] sm:$0xf] %v3154_v10  ;;  %3662 = vst [vmem:[#allocation3 + $0x17c] sm:$0xf] %v3369_v26 }
 0x2fb   : > { %v14649_v50 = vrot.slane %v14648_v60, 4  ;;  %v9672_v5 = vld [vmem:[#allocation3 + $0x2dc] ss:$36 sps:$4 sm:$0xff]   ;;  %3664 = vst [vmem:[#allocation3 + $0x1c4] sm:$0xf] %v3393_v3  ;;  %v14653_v60 = vld [vmem:[#allocation83_spill] sm:$0xff] }
 0x2fc   : > { %v12529_v49 = vld [vmem:[#allocation2 + $0x20] sm:$0x8]  ;;  %v14652_v20 = vld [vmem:[#allocation80_spill] sm:$0xff]  ;;  %v14654_v40 = vrot.slane %v14653_v60, 4  ;;  %v14658_v28 = vld [vmem:[#allocation91_spill] sm:$0xff]  ;;  %v12545_v26 = vrot.slane %v4583_v30, 5  ;;  %v3283_v60 = vsel %vm10453_vm10, %v3278_v61, %v3282_v51  ;;  %6461 = vmatprep.mubr.bf16.mxu1 %v9672_v5 }
 0x2fd   : > { %v3842_v44 = vsel %vm10432_vm5, %v14649_v50, %v14647_v43  ;;  %v14655_v50 = vld [vmem:[#allocation98_spill] sm:$0xff]  ;;  %v14657_v17 = vld [vmem:[#allocation93_spill] sm:$0xff]  ;;  %v14659_v55 = vrot.slane %v14658_v28, 4  ;;  %v8297_v47 = vrot.slane %v1946_v45, 11  ;;  %v14669_v51 = vld [vmem:[#allocation124_spill] sm:$0xff]  ;;  %v2496_v24 = vshll.u32 %v12505_v63, 16  ;;  %6462 = vmatmul.mubr.bf16.gmra.mxu1 %v9670_v19 }
 0x2fe   : > { %4126 = vst [vmem:[#allocation3 + $0x15c] sm:$0xf] %v3842_v44  ;;  %v3864_v43 = vsel %vm10432_vm5, %v14654_v40, %v14652_v20  ;;  %v3417_v53 = vsel %vm10453_vm10, %v14656_v59, %v14655_v50  ;;  %14660 = vst [vmem:[#allocation52_spill] sm:$0xff] %v12545_v26  ;;  %v3233_v44 = vld [vmem:[#allocation2 + $0x104] sm:$0xf]  ;;  %v14661_v40 = vld [vmem:[#allocation107_spill] sm:$0xff]  ;;  %v14675_v19 = vor.u32 %v12042_v62, %v12040_v7 }
 0x2ff   : > { %v3886_v10 = vsel %vm10432_vm5, %v14659_v55, %v14657_v17  ;;  %v3728_v3 = vld [vmem:[#allocation2 + $0x104] sm:$0xf]  ;;  %4128 = vst [vmem:[#allocation3 + $0x1a4] sm:$0xf] %v3864_v43  ;;  %3666 = vst [vmem:[#allocation3 + $0x20c] sm:$0xf] %v3417_v53  ;;  %v14680_v62 = vor.u32 %v12441_v29, %v12426_v1 }
 0x300   : > { %4130 = vst [vmem:[#allocation3 + $0x1ec] sm:$0xf] %v3886_v10  ;;  %v14662_v20 = vld [vmem:[#allocation103_spill] sm:$0xff]  ;;  %v14663_v28 = vld [vmem:[#allocation126_spill] sm:$0xff]  ;;  %v14665_v30 = vld [vmem:[#allocation137_spill] sm:$0xff]  ;;  %v4047_v5 = vshrl.u32 %v3728_v3, 16  ;;  %v14676_v3 = vor.u32 %v14618_v15, %v12131_v48 }
 0x301   : > { %v3441_v59 = vsel %vm10453_vm10, %v14662_v20, %v14661_v40  ;;  %v14664_v50 = vshll.u32 %v14663_v28, 16  ;;  %v14666_v55 = vld [vmem:[#allocation106_spill] sm:$0xff]  ;;  %v4177_v61 = vld [vmem:[#allocation2 + $0x104] sm:$0xf]  ;;  %v12569_v20 = vld [vmem:[#allocation2 + $0xc0] sm:$0x8] }
 0x302   : > { %v14667_v26 = vshll.u32 %v14666_v55, 16  ;;  %v14670_v43 = vld [vmem:[#allocation121_spill] sm:$0xff]  ;;  %3655 = vst [vmem:[#allocation3 + $0x80] sm:$0xf] %v3283_v60  ;;  %3668 = vst [vmem:[#allocation3 + $0x254] sm:$0xf] %v3441_v59 }
 0x303   : > { %v12556_v17 = vor.u32 %v14664_v50, %v12082_v0  ;;  %v14671_v53 = vor.u32 %v14669_v51, %v14670_v43  ;;  %v12571_v0 = vpop.f32.mrf.mxu0  ;;  %v12573_v50 = vpop.f32.mrf.mxu1  ;;  %4209 = vst [vmem:[#allocation3 + $0x40c] sm:$0xf] %v4177_v61  ;;  %v12577_v28 = vld [vmem:[#allocation2 + $0x108] sm:$0xf]  ;;  %v14672_v63 = vld [vmem:[#allocation109_spill] sm:$0xff]  ;;  %v3597_v59 = vshrl.u32 %v3233_v44, 16 }
 0x304   : > { %v12561_v45 = vor.u32 %v14667_v26, %v14665_v30  ;;  %v12575_v26 = vrot.slane %v3044_v52, 7  ;;  %v1957_v30 = vsel %vm10432_vm5, %v8297_v47, %v12295_v18  ;;  %v14673_v55 = vld [vmem:[#allocation102_spill] sm:$0xff]  ;;  %v3600_v43 = vshll.u32 %v3233_v44, 16 }
 0x305   : > { %v12566_v10 = vrot.slane %v14671_v53, 4  ;;  %v14674_v51 = vrot.slane %v14673_v55, 4  ;;  %v4255_v53 = vld [vmem:[#allocation2 + $0x104] sm:$0xf]  ;;  %2089 = vst [vmem:[#allocation3 + $0x360] sm:$0xf] %v1957_v30  ;;  %v12597_v18 = vpop.f32.mrf.mxu0  ;;  %v12599_v47 = vpop.f32.mrf.mxu1  ;;  %v14679_v30 = vor.u32 %v12272_v9, %v12254_v8 }
 0x306   : > { %14668 = vst [vmem:[#allocation43_spill] sm:$0xff] %v12561_v45  ;;  %v12590_v52 = vrot.slane %v14675_v19, 4  ;;  %v12595_v61 = vrot.slane %v14676_v3, 4  ;;  %14677 = vst [vmem:[#allocation77_spill] sm:$0xff] %v12597_v18  ;;  %v2951_v44 = vshrl.u32 %v12569_v20, 16  ;;  %v12612_v48 = vrot.slane %v14680_v62, 4 }
 0x307   : > { %v3908_v60 = vsel %vm10432_vm5, %v14674_v51, %v14672_v63  ;;  %14678 = vst [vmem:[#allocation130_spill] sm:$0xff] %v12599_v47  ;;  %v12601_v63 = vld [vmem:[#allocation2 + $0x108] sm:$0xf]  ;;  %v12607_v7 = vrot.slane %v14679_v30, 4  ;;  %v14681_v55 = vld [vmem:[#allocation75_spill] sm:$0xff]  ;;  %v3047_v19 = vshll.u32 %v12513_v37, 16  ;;  %v12624_v9 = vpop.f32.mrf.mxu0  ;;  %v12626_v30 = vpop.f32.mrf.mxu1 }
 0x308   : > { %4132 = vst [vmem:[#allocation3 + $0x234] sm:$0xf] %v3908_v60  ;;  %v14682_v51 = vshll.u32 %v14681_v55, 16  ;;  %v3053_v20 = vshrl.u32 %v12577_v28, 16  ;;  %v12622_v3 = vld [vmem:[#allocation2 + $0x108] sm:$0xf] }
 0x309   : > { %v2498_v8 = vrot.slane %v2496_v24, 5  ;;  %14683 = vst [vmem:[#allocation87_spill] sm:$0xff] %v12624_v9  ;;  %14684 = vst [vmem:[#allocation134_spill] sm:$0xff] %v12626_v30  ;;  %v12629_v29 = vrot.slane %v4047_v5, 7  ;;  %v4598_v62 = vshrl.u32 %v4255_v53, 16  ;;  %v4601_v15 = vshll.u32 %v4255_v53, 16  ;;  %v12637_v24 = vpop.f32.mrf.mxu0  ;;  %v12639_v40 = vpop.f32.mrf.mxu1 }
 0x30a   : > { %v12618_v60 = vor.u32 %v14682_v51, %v12178_v31  ;;  %v12631_v55 = vrot.slane %v3597_v59, 4  ;;  %v12633_v31 = vrot.slane %v3600_v43, 5  ;;  %v3056_v37 = vshll.u32 %v12577_v28, 16  ;;  %v1670_v47 = vld [vmem:[#allocation2 + $0xd0] sm:$0x8] }
 0x30b   : > { %14685 = vst [vmem:[#allocation111_spill] sm:$0xff] %v12629_v29  ;;  %v14686_v1 = vshll.u32 %v12154_v21, 16  ;;  %v14687_v59 = vshll.u32 %v12264_v38, 16  ;;  %v14689_v28 = vshll.u32 %v12281_v56, 16  ;;  %v4056_v51 = vshrl.u32 %v12622_v3, 16 }
 0x30c   : > { %v2199_v30 = vld [vmem:[#allocation2 + $0xcc] sm:$0x1]  ;;  %v2696_v9 = vld [vmem:[#allocation2 + $0xd0] sm:$0x8]  ;;  %v14690_v18 = vshll.u32 %v12301_v58, 16  ;;  %v2499_v56 = vsel %vm10453_vm10, %v12566_v10, %v2498_v8  ;;  %v8312_v10 = vrot.slane %v2951_v44, 11 }
 0x30d   : > { %v12644_v5 = vor.u32 %v14686_v1, %v12197_v32  ;;  %v12649_v53 = vor.u32 %v14687_v59, %v12323_v13  ;;  %v12654_v43 = vor.u32 %v14689_v28, %v12325_v4  ;;  %v14691_v32 = vshll.u32 %v12428_v27, 16  ;;  %v1673_v4 = vld [vmem:[#allocation2 + $0xe0] sm:$0x8]  ;;  %v2202_v1 = vld [vmem:[#allocation2 + $0xdc] sm:$0x1]  ;;  %v12670_v59 = vpop.f32.mrf.mxu0  ;;  %v12672_v28 = vpop.f32.mrf.mxu1 }
 0x30e   : > { %v12660_v21 = vor.u32 %v14690_v18, %v12339_v11  ;;  %v3055_v13 = vrot.slane %v3053_v20, 7  ;;  %v12675_v11 = vrot.slane %v4598_v62, 4  ;;  %v12677_v18 = vrot.slane %v4601_v15, 5  ;;  %v9674_v27 = vld [vmem:[#allocation3 + $0x364] ss:$36 sps:$4 sm:$0xff]  }
 0x30f   : > { %14688 = vst [vmem:[#allocation85_spill] sm:$0xff] %v12649_v53  ;;  %v12665_v38 = vor.u32 %v14691_v32, %v12503_v42  ;;  %2651 = vst [vmem:[#allocation3 + $0x344] sm:$0xf] %v2499_v56  ;;  %v12681_v42 = vadd.f32 %v12419_v39, %v12408_v23  ;;  %v12683_v20 = vrot.slane %v4056_v51, 7  ;;  %v9679_v8 = vld [vmem:[#allocation3 + $0x360] ss:$36 sps:$4 sm:$0xff]   ;;  %v12685_v53 = vpop.f32.mrf.mxu0  ;;  %v12687_v45 = vpop.f32.mrf.mxu1  ;;  %v12690_v62 = vor.u32 %v3047_v19, %v12575_v26 }
 0x310   : > { %v1968_v32 = vshrl.u32 %v1670_v47, 16  ;;  %14694 = vst [vmem:[#allocation38_spill] sm:$0xff] %v12687_v45  ;;  %6316 = vmatprep.mubr.bf16.mxu0 %v9674_v27  ;;  %v2973_v15 = vshrl.u32 %v2696_v9, 16  ;;  %v1990_v56 = vshrl.u32 %v1673_v4, 16  ;;  %v2544_v58 = vshll.u32 %v2202_v1, 16 }
 0x311   : > { %14692 = vst [vmem:[#allocation118_spill] sm:$0xff] %v12665_v38  ;;  %14693 = vst [vmem:[#allocation39_spill] sm:$0xff] %v12681_v42  ;;  %v2520_v38 = vshll.u32 %v2199_v30, 16  ;;  %v2699_v29 = vld [vmem:[#allocation2 + $0xe0] sm:$0x8]  ;;  %v3058_v39 = vor.u32 %v3056_v37, %v3055_v13  ;;  %v2962_v23 = vsel %vm10432_vm5, %v8312_v10, %v12308_v36  ;;  %6317 = vmatmul.mubr.bf16.gmra.mxu0 %v9679_v8  ;;  %v12695_v42 = vpop.f32.mrf.mxu0  ;;  %v12697_v45 = vpop.f32.mrf.mxu1 }
 0x312   : > { %v8298_v47 = vrot.slane %v1968_v32, 11  ;;  %v1676_v30 = vld [vmem:[#allocation2 + $0xf0] sm:$0x8]  ;;  %v2205_v51 = vld [vmem:[#allocation2 + $0xec] sm:$0x1]  ;;  %v8313_v19 = vrot.slane %v2973_v15, 11 }
 0x313   : > { %v2522_v44 = vrot.slane %v2520_v38, 5  ;;  %3114 = vst [vmem:[#allocation3 + $0x324] sm:$0xf] %v2962_v23  ;;  %v8299_v9 = vrot.slane %v1990_v56, 11  ;;  %v2546_v4 = vrot.slane %v2544_v58, 5  ;;  %v2995_v1 = vshrl.u32 %v2699_v29, 16  ;;  %v12705_v8 = vpop.f32.mrf.mxu0 }
 0x314   : > { %v2702_v27 = vld [vmem:[#allocation2 + $0xf0] sm:$0x8]  ;;  %v1979_v37 = vsel %vm10432_vm5, %v8298_v47, %v12396_v22  ;;  %v2012_v38 = vshrl.u32 %v1676_v30, 16  ;;  %v2568_v13 = vshll.u32 %v2205_v51, 16  ;;  %v3196_v10 = vld [vmem:[#allocation2 + $0x3c] sm:$0x1]  ;;  %v2984_v29 = vsel %vm10432_vm5, %v8313_v19, %v12556_v17  ;;  %v12716_v17 = vpop.f32.mrf.mxu1 }
 0x315   : > { %v2523_v36 = vsel %vm10453_vm10, %v12590_v52, %v2522_v44  ;;  %2091 = vst [vmem:[#allocation3 + $0x3a8] sm:$0xf] %v1979_v37  ;;  %v2001_v58 = vsel %vm10432_vm5, %v8299_v9, %v12618_v60  ;;  %v2547_v22 = vsel %vm10453_vm10, %v12595_v61, %v2546_v4  ;;  %v8314_v52 = vrot.slane %v2995_v1, 11  ;;  %v2208_v32 = vld [vmem:[#allocation2 + $0xfc] sm:$0x1]  ;;  %v12718_v51 = vpop.f32.mrf.mxu0 }
 0x316   : > { %2653 = vst [vmem:[#allocation3 + $0x38c] sm:$0xf] %v2523_v36  ;;  %v2705_v15 = vld [vmem:[#allocation2 + $0x100] sm:$0x8]  ;;  %v3688_v56 = vld [vmem:[#allocation2 + $0x30] sm:$0x8] }
 0x317   : > { %3116 = vst [vmem:[#allocation3 + $0x36c] sm:$0xf] %v2984_v29  ;;  %2093 = vst [vmem:[#allocation3 + $0x3f0] sm:$0xf] %v2001_v58  ;;  %v8300_v23 = vrot.slane %v2012_v38, 11  ;;  %v2570_v47 = vrot.slane %v2568_v13, 5  ;;  %v3006_v60 = vsel %vm10432_vm5, %v8314_v52, %v12644_v5  ;;  %v12735_v29 = vpop.f32.mrf.mxu0 }
 0x318   : > { %2655 = vst [vmem:[#allocation3 + $0x3d4] sm:$0xf] %v2547_v22  ;;  %v3017_v44 = vshrl.u32 %v2702_v27, 16  ;;  %v2592_v30 = vshll.u32 %v2208_v32, 16  ;;  %v3039_v61 = vshrl.u32 %v2705_v15, 16  ;;  %v14695_v19 = vrot.slane %v12575_v26, 4 }
 0x319   : > { %v14696_v4 = vshrl.u32 %v12529_v49, 16  ;;  %v3199_v37 = vld [vmem:[#allocation2 + $0x4c] sm:$0x1]  ;;  %v3691_v27 = vld [vmem:[#allocation2 + $0x40] sm:$0x8]  ;;  %v2023_v36 = vsel %vm10432_vm5, %v8300_v23, %v12654_v43  ;;  %v2571_v5 = vsel %vm10453_vm10, %v12607_v7, %v2570_v47  ;;  %v14698_v22 = vld [vmem:[#allocation51_spill] sm:$0xff]  ;;  %v3603_v15 = vor.u32 %v12633_v31, %v12631_v55 }
 0x31a   : > { %v3059_v9 = vsel %vm10432_vm5, %v14695_v19, %v3058_v39  ;;  %3118 = vst [vmem:[#allocation3 + $0x3b4] sm:$0xf] %v3006_v60  ;;  %v8315_v38 = vrot.slane %v3017_v44, 11  ;;  %v2594_v13 = vrot.slane %v2592_v30, 5  ;;  %v4160_v26 = vld [vmem:[#allocation2 + $0x78] sm:$0xf]  ;;  %v14699_v43 = vor.u32 %v14698_v22, %v14604_v46  ;;  %v12751_v46 = vpop.f32.mrf.mxu1 }
 0x31b   : > { %v8317_v1 = vrot.slane %v14696_v4, 11  ;;  %3123 = vst [vmem:[#allocation3 + $0x468] sm:$0xf] %v3059_v9  ;;  %2095 = vst [vmem:[#allocation3 + $0x438] sm:$0xf] %v2023_v36  ;;  %v8316_v49 = vrot.slane %v3039_v61, 11  ;;  %v12759_v4 = vpop.f32.mrf.mxu0 }
 0x31c   : > { %2657 = vst [vmem:[#allocation3 + $0x41c] sm:$0xf] %v2571_v5  ;;  %v14697_v39 = vld [vmem:[#allocation33_spill] sm:$0xff]  ;;  %v3302_v52 = vrot.slane %v14699_v43, 4  ;;  %v3304_v32 = vshll.u32 %v3196_v10, 16  ;;  %v3028_v44 = vsel %vm10432_vm5, %v8315_v38, %v12660_v21  ;;  %v2595_v30 = vsel %vm10453_vm10, %v12612_v48, %v2594_v13 }
 0x31d   : > { %v3745_v58 = vsel %vm10432_vm5, %v8317_v1, %v14697_v39  ;;  %4192 = vst [vmem:[#allocation3 + $0x1a8] sm:$0xf] %v4160_v26  ;;  %v3139_v7 = vld [vmem:[#allocation2 + $0x88] sm:$0xf]  ;;  %v9676_v23 = vld [vmem:[#allocation3 + $0x320] ss:$36 sps:$4 sm:$0xff]   ;;  %v3050_v55 = vsel %vm10432_vm5, %v8316_v49, %v12690_v62 }
 0x31e   : > { %v9678_v47 = vld [vmem:[#allocation3 + $0x324] ss:$36 sps:$4 sm:$0xff]   ;;  %4117 = vst [vmem:[#allocation3 + $0x18] sm:$0xf] %v3745_v58  ;;  %v3756_v60 = vshrl.u32 %v3688_v56, 16  ;;  %v3306_v31 = vrot.slane %v3304_v32, 5 }
 0x31f   : > { %3171 = vst [vmem:[#allocation3 + $0x22c] sm:$0xf] %v3139_v7  ;;  %3120 = vst [vmem:[#allocation3 + $0x3fc] sm:$0xf] %v3028_v44  ;;  %v14700_v10 = vld [vmem:[#allocation61_spill] sm:$0xff]  ;;  %v3328_v19 = vshll.u32 %v3199_v37, 16  ;;  %6469 = vmatprep.mubr.bf16.mxu1 %v9678_v47  ;;  %v12790_v47 = vadd.f32 %v12573_v50, %v12511_v12 }
 0x320   : > { %2659 = vst [vmem:[#allocation3 + $0x464] sm:$0xf] %v2595_v30  ;;  %v14701_v61 = vor.u32 %v14700_v10, %v14635_v16  ;;  %v3202_v9 = vld [vmem:[#allocation2 + $0x5c] sm:$0x1]  ;;  %v9682_v48 = vld [vmem:[#allocation3 + $0x3ac] ss:$36 sps:$4 sm:$0xff]   ;;  %6470 = vmatmul.mubr.bf16.gmra.mxu1 %v9676_v23  ;;  %v3307_v38 = vsel %vm10453_vm10, %v3302_v52, %v3306_v31  ;;  %v12786_v23 = vadd.f32 %v12571_v0, %v12509_v34  ;;  %v8885_v34 = vpop.f32.mrf.mxu0 }
 0x321   : > { %3122 = vst [vmem:[#allocation3 + $0x444] sm:$0xf] %v3050_v55  ;;  %v8318_v56 = vrot.slane %v3756_v60, 11  ;;  %v3778_v1 = vshrl.u32 %v3691_v27, 16  ;;  %v14702_v36 = vld [vmem:[#allocation113_spill] sm:$0xff]  ;;  %v14703_v62 = vrot.slane %v14572_v25, 4  ;;  %6324 = vmatprep.mubr.bf16.mxu0 %v9682_v48 }
 0x322   : > { %v3326_v21 = vrot.slane %v14701_v61, 4  ;;  %v3465_v5 = vsel %vm10453_vm10, %v14702_v36, %v14576_v33  ;;  %v9686_v37 = vld [vmem:[#allocation3 + $0x36c] ss:$36 sps:$4 sm:$0xff]   ;;  %v3330_v13 = vrot.slane %v3328_v19, 5  ;;  %v14705_v39 = vld [vmem:[#allocation21_spill] sm:$0xff]  ;;  %v12794_v44 = vrot.slane %v3603_v15, 4 }
 0x323   : > { %v3930_v16 = vsel %vm10432_vm5, %v14703_v62, %v12229_v14  ;;  %v3694_v26 = vld [vmem:[#allocation2 + $0x50] sm:$0x8]  ;;  %3670 = vst [vmem:[#allocation3 + $0x29c] sm:$0xf] %v3465_v5  ;;  %v14706_v25 = vrot.slane %v14705_v39, 4  ;;  %v14707_v43 = vld [vmem:[#allocation25_spill] sm:$0xff]  ;;  %6477 = vmatprep.mubr.bf16.mxu1 %v9686_v37  ;;  %v12818_v62 = vadd.f32 %v12670_v59, %v12637_v24 }
 0x324   : > { %4134 = vst [vmem:[#allocation3 + $0x27c] sm:$0xf] %v3930_v16  ;;  %v14704_v27 = vld [vmem:[#allocation23_spill] sm:$0xff]  ;;  %v9687_v58 = vld [vmem:[#allocation3 + $0x3a8] ss:$36 sps:$4 sm:$0xff]   ;;  %v3767_v52 = vsel %vm10432_vm5, %v8318_v56, %v14707_v43  ;;  %v8319_v32 = vrot.slane %v3778_v1, 11  ;;  %v3331_v30 = vsel %vm10453_vm10, %v3326_v21, %v3330_v13  ;;  %v12822_v16 = vadd.f32 %v12672_v28, %v12639_v40 }
 0x325   : > { %v3489_v49 = vsel %vm10453_vm10, %v14704_v27, %v11952_v35  ;;  %v3952_v14 = vsel %vm10432_vm5, %v14706_v25, %v12270_v54  ;;  %v9692_v22 = vld [vmem:[#allocation3 + $0x3f4] ss:$36 sps:$4 sm:$0xff]   ;;  %3657 = vst [vmem:[#allocation3 + $0xc8] sm:$0xf] %v3307_v38  ;;  %v3205_v7 = vld [vmem:[#allocation2 + $0x6c] sm:$0x1]  ;;  %v12792_v54 = vpop.f32.mrf.mxu1  ;;  %6325 = vmatmul.mubr.bf16.gmra.mxu0 %v9687_v58 }
 0x326   : > { %3672 = vst [vmem:[#allocation3 + $0x2e4] sm:$0xf] %v3489_v49  ;;  %4136 = vst [vmem:[#allocation3 + $0x2c4] sm:$0xf] %v3952_v14  ;;  %v14708_v60 = vld [vmem:[#allocation48_spill] sm:$0xff]  ;;  %v3352_v10 = vshll.u32 %v3202_v9, 16  ;;  %6332 = vmatprep.mubr.bf16.mxu0 %v9692_v22 }
 0x327   : > { %4119 = vst [vmem:[#allocation3 + $0x60] sm:$0xf] %v3767_v52  ;;  %v14709_v55 = vor.u32 %v14708_v60, %v14640_v57  ;;  %v4059_v0 = vshll.u32 %v12622_v3, 16  ;;  %3659 = vst [vmem:[#allocation3 + $0x110] sm:$0xf] %v3331_v30  ;;  %v14710_v12 = vld [vmem:[#allocation24_spill] sm:$0xff]  ;;  %v12833_v24 = vpop.f32.mrf.mxu1  ;;  %v8886_v52 = vpop.f32.mrf.mxu0 }
 0x328   : > { %v3789_v50 = vsel %vm10432_vm5, %v8319_v32, %v14710_v12  ;;  %v3800_v15 = vshrl.u32 %v3694_v26, 16  ;;  %v3697_v61 = vld [vmem:[#allocation2 + $0x60] sm:$0x8]  ;;  %v14711_v19 = vld [vmem:[#allocation27_spill] sm:$0xff]  ;;  %v12809_v56 = vld [vmem:[#allocation2 + $0x108] sm:$0xf] }
 0x329   : > { %v3350_v31 = vrot.slane %v14709_v55, 4  ;;  %v14712_v48 = vld [vmem:[#allocation31_spill] sm:$0xff]  ;;  %v9684_v57 = vld [vmem:[#allocation3 + $0x368] ss:$36 sps:$4 sm:$0xff]   ;;  %4121 = vst [vmem:[#allocation3 + $0xa8] sm:$0xf] %v3789_v50  ;;  %v4061_v13 = vor.u32 %v4059_v0, %v12683_v20 }
 0x32a   : > { %v3513_v21 = vsel %vm10453_vm10, %v14712_v48, %v14711_v19  ;;  %v3354_v9 = vrot.slane %v3352_v10, 5  ;;  %v14713_v3 = vld [vmem:[#allocation70_spill] sm:$0xff]  ;;  %v14714_v1 = vld [vmem:[#allocation32_spill] sm:$0xff]  ;;  %v14716_v37 = vshll.u32 %v12601_v63, 16  ;;  %v8320_v27 = vrot.slane %v3800_v15, 11  ;;  %v14717_v49 = vld [vmem:[#allocation135_spill] sm:$0xff]  ;;  %6478 = vmatmul.mubr.bf16.gmra.mxu1 %v9684_v57 }
 0x32b   : > { %3674 = vst [vmem:[#allocation3 + $0x32c] sm:$0xf] %v3513_v21  ;;  %v14715_v36 = vrot.slane %v14714_v1, 4  ;;  %v9696_v26 = vld [vmem:[#allocation3 + $0x3b4] ss:$36 sps:$4 sm:$0xff]   ;;  %v3376_v14 = vshll.u32 %v3205_v7, 16  ;;  %v12854_v7 = vadd.f32 %v12751_v46, %v12716_v17 }
 0x32c   : > { %v12826_v38 = vrot.slane %v14716_v37, 5  ;;  %v14718_v39 = vld [vmem:[#allocation104_spill] sm:$0xff]  ;;  %v3355_v40 = vsel %vm10453_vm10, %v3350_v31, %v3354_v9  ;;  %v14719_v59 = vld [vmem:[#allocation79_spill] sm:$0xff]  ;;  %v14724_v30 = vld [vmem:[#allocation46_spill] sm:$0xff]  ;;  %v3822_v55 = vshrl.u32 %v3697_v61, 16  ;;  %6485 = vmatprep.mubr.bf16.mxu1 %v9696_v26 }
 0x32d   : > { %v3974_v5 = vsel %vm10432_vm5, %v14715_v36, %v14713_v3  ;;  %v3537_v25 = vsel %vm10453_vm10, %v14718_v39, %v14717_v49  ;;  %v14720_v63 = vor.u32 %v14719_v59, %v14645_v6  ;;  %v14721_v20 = vld [vmem:[#allocation43_spill] sm:$0xff]  ;;  %v14722_v58 = vld [vmem:[#allocation132_spill] sm:$0xff]  ;;  %3661 = vst [vmem:[#allocation3 + $0x158] sm:$0xf] %v3355_v40  ;;  %v3811_v60 = vsel %vm10432_vm5, %v8320_v27, %v14724_v30  ;;  %v14725_v15 = vld [vmem:[#allocation117_spill] sm:$0xff]  ;;  %v8991_v3 = vpop.f32.mrf.mxu1 }
 0x32e   : > { %4138 = vst [vmem:[#allocation3 + $0x30c] sm:$0xf] %v3974_v5  ;;  %3676 = vst [vmem:[#allocation3 + $0x374] sm:$0xf] %v3537_v25  ;;  %v14723_v22 = vrot.slane %v14722_v58, 4  ;;  %v12850_v6 = vadd.f32 %v12718_v51, %v12705_v8  ;;  %v3378_v50 = vrot.slane %v3376_v14, 5  ;;  %v12872_v27 = vadd.f32 %v8886_v52, %v8885_v34 }
 0x32f   : > { %v3374_v28 = vrot.slane %v14720_v63, 4  ;;  %v9697_v32 = vld [vmem:[#allocation3 + $0x3f0] ss:$36 sps:$4 sm:$0xff]   ;;  %v3208_v31 = vld [vmem:[#allocation2 + $0x7c] sm:$0x1]  ;;  %v8321_v8 = vrot.slane %v3822_v55, 11 }
 0x330   : > { %v3996_v43 = vsel %vm10432_vm5, %v14723_v22, %v14721_v20  ;;  %v9704_v12 = vld [vmem:[#allocation3 + $0x43c] ss:$36 sps:$4 sm:$0xff]   ;;  %4123 = vst [vmem:[#allocation3 + $0xf0] sm:$0xf] %v3811_v60  ;;  %v3700_v51 = vld [vmem:[#allocation2 + $0x70] sm:$0x8]  ;;  %6333 = vmatmul.mubr.bf16.gmra.mxu0 %v9697_v32 }
 0x331   : > { %4140 = vst [vmem:[#allocation3 + $0x354] sm:$0xf] %v3996_v43  ;;  %v14726_v61 = vld [vmem:[#allocation120_spill] sm:$0xff]  ;;  %v3211_v21 = vld [vmem:[#allocation2 + $0x8c] sm:$0x1]  ;;  %v14728_v46 = vld [vmem:[#allocation45_spill] sm:$0xff]  ;;  %v3379_v26 = vsel %vm10453_vm10, %v3374_v28, %v3378_v50  ;;  %v8992_v50 = vpop.f32.mrf.mxu1  ;;  %6340 = vmatprep.mubr.bf16.mxu0 %v9704_v12 }
 0x332   : > { %v3561_v48 = vsel %vm10453_vm10, %v14726_v61, %v14725_v15  ;;  %v14727_v17 = vld [vmem:[#allocation34_spill] sm:$0xff]  ;;  %v14729_v36 = vld [vmem:[#allocation85_spill] sm:$0xff]  ;;  %v14730_v57 = vld [vmem:[#allocation139_spill] sm:$0xff]  ;;  %3663 = vst [vmem:[#allocation3 + $0x1a0] sm:$0xf] %v3379_v26  ;;  %v3400_v55 = vshll.u32 %v3208_v31, 16  ;;  %v3609_v61 = vsel %vm10453_vm10, %v12794_v44, %v12826_v38  ;;  %v12903_v26 = vadd.f32 %v8992_v50, %v8991_v3 }
 0x333   : > { %v12865_v9 = vadd.f32 %v14728_v46, %v14727_v17  ;;  %3678 = vst [vmem:[#allocation3 + $0x3bc] sm:$0xf] %v3561_v48  ;;  %v14731_v5 = vrot.slane %v14730_v57, 4  ;;  %v14732_v39 = vld [vmem:[#allocation88_spill] sm:$0xff]  ;;  %v14733_v25 = vld [vmem:[#allocation86_spill] sm:$0xff]  ;;  %v14740_v28 = vld [vmem:[#allocation71_spill] sm:$0xff] }
 0x334   : > { %v14734_v40 = vor.u32 %v14732_v39, %v14733_v25  ;;  %v14735_v63 = vld [vmem:[#allocation50_spill] sm:$0xff]  ;;  %v14736_v14 = vld [vmem:[#allocation116_spill] sm:$0xff]  ;;  %v9694_v52 = vld [vmem:[#allocation3 + $0x3b0] ss:$36 sps:$4 sm:$0xff]   ;;  %v3833_v60 = vsel %vm10432_vm5, %v8321_v8, %v14740_v28  ;;  %3682 = vst [vmem:[#allocation3 + $0x44c] sm:$0xf] %v3609_v61  ;;  %v12916_v28 = vpop.f32.mrf.mxu1 }
 0x335   : > { %v4018_v37 = vsel %vm10432_vm5, %v14731_v5, %v14729_v36  ;;  %v3585_v20 = vsel %vm10453_vm10, %v14736_v14, %v14735_v63  ;;  %v14737_v22 = vld [vmem:[#allocation118_spill] sm:$0xff]  ;;  %v14738_v43 = vld [vmem:[#allocation28_spill] sm:$0xff]  ;;  %v14741_v48 = vld [vmem:[#allocation111_spill] sm:$0xff]  ;;  %4125 = vst [vmem:[#allocation3 + $0x138] sm:$0xf] %v3833_v60  ;;  %v3844_v36 = vshrl.u32 %v3700_v51, 16  ;;  %6486 = vmatmul.mubr.bf16.gmra.mxu1 %v9694_v52 }
 0x336   : > { %v3398_v59 = vrot.slane %v14734_v40, 4  ;;  %4142 = vst [vmem:[#allocation3 + $0x39c] sm:$0xf] %v4018_v37  ;;  %v14739_v30 = vrot.slane %v14738_v43, 4  ;;  %3680 = vst [vmem:[#allocation3 + $0x404] sm:$0xf] %v3585_v20 }
 0x337   : > { %v14742_v17 = vrot.slane %v14741_v48, 4  ;;  %v9708_v32 = vld [vmem:[#allocation3 + $0x3fc] ss:$36 sps:$4 sm:$0xff]   ;;  %v3424_v5 = vshll.u32 %v3211_v21, 16  ;;  %v14744_v31 = vld [vmem:[#allocation87_spill] sm:$0xff]  ;;  %v3402_v39 = vrot.slane %v3400_v55, 5 }
 0x338   : > { %v4040_v34 = vsel %vm10432_vm5, %v14739_v30, %v14737_v22  ;;  %v14743_v8 = vld [vmem:[#allocation77_spill] sm:$0xff]  ;;  %v14745_v44 = vld [vmem:[#allocation99_spill] sm:$0xff]  ;;  %v14746_v25 = vld [vmem:[#allocation98_spill] sm:$0xff]  ;;  %6493 = vmatprep.mubr.bf16.mxu1 %v9708_v32 }
 0x339   : > { %4144 = vst [vmem:[#allocation3 + $0x3e4] sm:$0xf] %v4040_v34  ;;  %v4062_v46 = vsel %vm10432_vm5, %v14742_v17, %v4061_v13  ;;  %v12901_v37 = vadd.f32 %v14744_v31, %v14743_v8  ;;  %v14747_v40 = vor.u32 %v14745_v44, %v14746_v25  ;;  %v3703_v20 = vld [vmem:[#allocation2 + $0x80] sm:$0x8]  ;;  %v4162_v13 = vld [vmem:[#allocation2 + $0x88] sm:$0xf]  ;;  %v3403_v25 = vsel %vm10453_vm10, %v3398_v59, %v3402_v39 }
 0x33a   : > { %4146 = vst [vmem:[#allocation3 + $0x42c] sm:$0xf] %v4062_v46  ;;  %v14748_v12 = vld [vmem:[#allocation41_spill] sm:$0xff]  ;;  %v14749_v22 = vld [vmem:[#allocation20_spill] sm:$0xff]  ;;  %v14750_v21 = vld [vmem:[#allocation63_spill] sm:$0xff]  ;;  %v8322_v34 = vrot.slane %v3844_v36, 11 }
 0x33b   : > { %v3422_v14 = vrot.slane %v14747_v40, 4  ;;  %v4274_v51 = vsel %vm10453_vm10, %v14749_v22, %v14748_v12  ;;  %v14751_v30 = vld [vmem:[#allocation59_spill] sm:$0xff]  ;;  %4194 = vst [vmem:[#allocation3 + $0x1f0] sm:$0xf] %v4162_v13  ;;  %v14752_v60 = vld [vmem:[#allocation68_spill] sm:$0xff]  ;;  %v14753_v55 = vld [vmem:[#allocation57_spill] sm:$0xff]  ;;  %v12932_v13 = vpop.f32.mrf.mxu0 }
 0x33c   : > { %v4322_v3 = vsel %vm10453_vm10, %v14751_v30, %v14750_v21  ;;  %4677 = vst [vmem:[#allocation3 + $0x20] sm:$0xf] %v4274_v51  ;;  %v4346_v50 = vsel %vm10453_vm10, %v14753_v55, %v14752_v60  ;;  %v14754_v61 = vld [vmem:[#allocation81_spill] sm:$0xff]  ;;  %v14755_v17 = vld [vmem:[#allocation76_spill] sm:$0xff]  ;;  %v14756_v8 = vld [vmem:[#allocation58_spill] sm:$0xff]  ;;  %v3426_v40 = vrot.slane %v3424_v5, 5 }
 0x33d   : > { %4681 = vst [vmem:[#allocation3 + $0xb0] sm:$0xf] %v4322_v3  ;;  %v4370_v46 = vsel %vm10453_vm10, %v14755_v17, %v14754_v61  ;;  %v14757_v31 = vld [vmem:[#allocation47_spill] sm:$0xff]  ;;  %v9709_v44 = vld [vmem:[#allocation3 + $0x438] ss:$36 sps:$4 sm:$0xff]   ;;  %v14759_v51 = vld [vmem:[#allocation97_spill] sm:$0xff] }
 0x33e   : > { %v4394_v36 = vsel %vm10453_vm10, %v14757_v31, %v14756_v8  ;;  %4683 = vst [vmem:[#allocation3 + $0xf8] sm:$0xf] %v4346_v50  ;;  %4685 = vst [vmem:[#allocation3 + $0x140] sm:$0xf] %v4370_v46  ;;  %v14758_v22 = vld [vmem:[#allocation100_spill] sm:$0xff]  ;;  %v14760_v3 = vld [vmem:[#allocation19_spill] sm:$0xff]  ;;  %v3427_v52 = vsel %vm10453_vm10, %v3422_v14, %v3426_v40  ;;  %v8878_v14 = vadd.f32 %v12695_v42, %v12685_v53  ;;  %v8995_v40 = vpop.f32.mrf.mxu1  ;;  %6341 = vmatmul.mubr.bf16.gmra.mxu0 %v9709_v44 }
 0x33f   : > { %4687 = vst [vmem:[#allocation3 + $0x188] sm:$0xf] %v4394_v36  ;;  %v4418_v30 = vsel %vm10453_vm10, %v14759_v51, %v14758_v22  ;;  %v14761_v60 = vld [vmem:[#allocation105_spill] sm:$0xff]  ;;  %3665 = vst [vmem:[#allocation3 + $0x1e8] sm:$0xf] %v3403_v25  ;;  %v14762_v17 = vld [vmem:[#allocation44_spill] sm:$0xff]  ;;  %v8884_v42 = vadd.f32 %v12759_v4, %v12735_v29 }
 0x340   : > { %v4442_v55 = vsel %vm10453_vm10, %v14761_v60, %v14760_v3  ;;  %v3855_v59 = vsel %vm10432_vm5, %v8322_v34, %v14762_v17  ;;  %v3866_v5 = vshrl.u32 %v3703_v20, 16  ;;  %v3141_v39 = vld [vmem:[#allocation2 + $0x98] sm:$0xf]  ;;  %v3214_v50 = vld [vmem:[#allocation2 + $0x9c] sm:$0x1]  ;;  %v14764_v8 = vld [vmem:[#allocation107_spill] sm:$0xff] }
 0x341   : > { %v14763_v46 = vld [vmem:[#allocation108_spill] sm:$0xff]  ;;  %v14766_v0 = vld [vmem:[#allocation130_spill] sm:$0xff]  ;;  %4689 = vst [vmem:[#allocation3 + $0x1d0] sm:$0xf] %v4418_v30  ;;  %4691 = vst [vmem:[#allocation3 + $0x218] sm:$0xf] %v4442_v55 }
 0x342   : > { %v14765_v31 = vor.u32 %v14763_v46, %v14764_v8  ;;  %v14767_v51 = vld [vmem:[#allocation134_spill] sm:$0xff]  ;;  %4127 = vst [vmem:[#allocation3 + $0x180] sm:$0xf] %v3855_v59  ;;  %3173 = vst [vmem:[#allocation3 + $0x274] sm:$0xf] %v3141_v39  ;;  %v3448_v25 = vshll.u32 %v3214_v50, 16 }
 0x343   : > { %v8978_v10 = vadd.f32 %v14767_v51, %v14766_v0  ;;  %v3706_v34 = vld [vmem:[#allocation2 + $0x90] sm:$0x8]  ;;  %v4164_v20 = vld [vmem:[#allocation2 + $0x98] sm:$0xf]  ;;  %v14768_v3 = vld [vmem:[#allocation122_spill] sm:$0xff]  ;;  %v8323_v32 = vrot.slane %v3866_v5, 11 }
 0x344   : > { %v3446_v36 = vrot.slane %v14765_v31, 4  ;;  %v14769_v60 = vld [vmem:[#allocation114_spill] sm:$0xff]  ;;  %v14770_v46 = vld [vmem:[#allocation56_spill] sm:$0xff]  ;;  %v14771_v8 = vld [vmem:[#allocation125_spill] sm:$0xff]  ;;  %3667 = vst [vmem:[#allocation3 + $0x230] sm:$0xf] %v3427_v52 }
 0x345   : > { %v4466_v17 = vsel %vm10453_vm10, %v14769_v60, %v14768_v3  ;;  %v4490_v0 = vsel %vm10453_vm10, %v14771_v8, %v14770_v46  ;;  %v9713_v30 = vld [vmem:[#allocation3 + $0x14] ss:$36 sps:$4 sm:$0xff]   ;;  %4196 = vst [vmem:[#allocation3 + $0x238] sm:$0xf] %v4164_v20  ;;  %v14774_v50 = vld [vmem:[#allocation138_spill] sm:$0xff]  ;;  %v3450_v52 = vrot.slane %v3448_v25, 5 }
 0x346   : > { %4693 = vst [vmem:[#allocation3 + $0x260] sm:$0xf] %v4466_v17  ;;  %4695 = vst [vmem:[#allocation3 + $0x2a8] sm:$0xf] %v4490_v0  ;;  %v14772_v55 = vld [vmem:[#allocation131_spill] sm:$0xff]  ;;  %v14773_v59 = vld [vmem:[#allocation128_spill] sm:$0xff]  ;;  %v12974_v17 = vpop.f32.mrf.mxu0  ;;  %6542 = vmatprep.mubr.bf16.mxu0 %v9713_v30 }
 0x347   : > { %v4514_v39 = vsel %vm10453_vm10, %v14773_v59, %v14772_v55  ;;  %v14775_v31 = vld [vmem:[#allocation96_spill] sm:$0xff]  ;;  %v9719_v5 = vld [vmem:[#allocation3 + $0x444] ss:$36 sps:$4 sm:$0xff]   ;;  %v3888_v25 = vshrl.u32 %v3706_v34, 16  ;;  %v14780_v4 = vld [vmem:[#allocation119_spill] sm:$0xff]  ;;  %v3451_v30 = vsel %vm10453_vm10, %v3446_v36, %v3450_v52 }
 0x348   : > { %v4538_v51 = vsel %vm10453_vm10, %v14775_v31, %v14774_v50  ;;  %v9706_v60 = vld [vmem:[#allocation3 + $0x3f8] ss:$36 sps:$4 sm:$0xff]   ;;  %v14776_v20 = vld [vmem:[#allocation38_spill] sm:$0xff]  ;;  %4697 = vst [vmem:[#allocation3 + $0x2f0] sm:$0xf] %v4514_v39  ;;  %v14779_v31 = vld [vmem:[#allocation89_spill] sm:$0xff]  ;;  %v14781_v39 = vor.u32 %v14780_v4, %v14576_v33  ;;  %v8996_v33 = vadd.f32 %v8995_v40, %v12916_v28  ;;  %v8891_v40 = vpop.f32.mrf.mxu0 }
 0x349   : > { %v8984_v53 = vadd.f32 %v12697_v45, %v14776_v20  ;;  %4699 = vst [vmem:[#allocation3 + $0x338] sm:$0xf] %v4538_v51  ;;  %v14777_v8 = vld [vmem:[#allocation22_spill] sm:$0xff]  ;;  %v14778_v0 = vld [vmem:[#allocation112_spill] sm:$0xff]  ;;  %v3877_v44 = vsel %vm10432_vm5, %v8323_v32, %v14779_v31  ;;  %v12986_v45 = vld [vmem:[%s14056_s4] ss:$0 sm:$0xff]  ;;  %v8990_v20 = vadd.f32 %v12833_v24, %v12792_v54  ;;  %6494 = vmatmul.mubr.bf16.gmra.mxu1 %v9706_v60 }
 0x34a   : > { %v4562_v59 = vsel %vm10453_vm10, %v14778_v0, %v14777_v8  ;;  %v3143_v29 = vld [vmem:[#allocation2 + $0xa8] sm:$0xf]  ;;  %v3470_v51 = vrot.slane %v14781_v39, 4  ;;  %4129 = vst [vmem:[#allocation3 + $0x1c8] sm:$0xf] %v3877_v44  ;;  %v14782_v34 = vld [vmem:[#allocation39_spill] sm:$0xff]  ;;  %v6226_v0 = vadd.f32 %v12865_v9, %v12986_v45  ;;  %v6234_v9 = vadd.f32 %v12901_v37, %v12986_v45  ;;  %6501 = vmatprep.mubr.bf16.mxu1 %v9719_v5 }
 0x34b   : > { %4701 = vst [vmem:[#allocation3 + $0x380] sm:$0xf] %v4562_v59  ;;  %v6223_v32 = vadd.f32 %v14782_v34, %v12986_v45  ;;  %3175 = vst [vmem:[#allocation3 + $0x2bc] sm:$0xf] %v3143_v29  ;;  %v3217_v31 = vld [vmem:[#allocation2 + $0xac] sm:$0x1]  ;;  %v6231_v59 = vadd.f32 %v12786_v23, %v12986_v45  ;;  %v6239_v28 = vadd.f32 %v12818_v62, %v12986_v45 }
 0x34c   : > { %v3709_v8 = vld [vmem:[#allocation2 + $0xa0] sm:$0x8]  ;;  %3669 = vst [vmem:[#allocation3 + $0x278] sm:$0xf] %v3451_v30  ;;  %v8324_v4 = vrot.slane %v3888_v25, 11  ;;  %v3472_v39 = vshll.u32 %v3217_v31, 16  ;;  %v13007_v52 = vadd.f32 %v8978_v10, %v6226_v0  ;;  %v13018_v34 = vadd.f32 %v8984_v53, %v6234_v9 }
 0x34d   : > { %v3910_v54 = vshrl.u32 %v3709_v8, 16  ;;  %v4166_v24 = vld [vmem:[#allocation2 + $0xa8] sm:$0xf]  ;;  %v13003_v36 = vadd.f32 %v12790_v47, %v6223_v32  ;;  %v9737_v44 = vld [vmem:[#allocation9 + $0x230] sm:$0xff]   ;;  %v13015_v29 = vadd.f32 %v12822_v16, %v6231_v59  ;;  %v6242_v47 = vadd.f32 %v8878_v14, %v12986_v45  ;;  %v9724_v10 = vld [vmem:[#allocation3 + $0x5c] ss:$36 sps:$4 sm:$0xff]   ;;  %v8892_v32 = vpop.f32.mrf.mxu0 }
 0x34e   : > { %4198 = vst [vmem:[#allocation3 + $0x280] sm:$0xf] %v4166_v24  ;;  %v14783_v8 = vld [vmem:[#allocation95_spill] sm:$0xff]  ;;  %v3474_v23 = vrot.slane %v3472_v39, 5  ;;  %v6247_v62 = vadd.f32 %v12850_v6, %v12986_v45  ;;  %v13023_v60 = vadd.f32 %v12854_v7, %v6239_v28  ;;  %v9891_v0 = vld [vmem:[#allocation2 + $0xf8] sm:$0xf]  ;;  %v6250_v5 = vadd.f32 %v8884_v42, %v12986_v45 }
 0x34f   : > { %v3899_v25 = vsel %vm10432_vm5, %v8324_v4, %v14783_v8  ;;  %v9711_v30 = vld [vmem:[#allocation3 + $0x10] ss:$36 sps:$4 sm:$0xff]   ;;  %v8325_v37 = vrot.slane %v3910_v54, 11  ;;  %v3586_v31 = vshrl.u32 %v9891_v0, 16  ;;  %v3145_v14 = vld [vmem:[#allocation2 + $0xb8] sm:$0xf]  ;;  %v13028_v39 = vadd.f32 %v8990_v20, %v6242_v47 }
 0x350   : > { %4131 = vst [vmem:[#allocation3 + $0x210] sm:$0xf] %v3899_v25  ;;  %v3475_v16 = vsel %vm10453_vm10, %v3470_v51, %v3474_v23  ;;  %v3220_v4 = vld [vmem:[#allocation2 + $0xbc] sm:$0x1]  ;;  %6543 = vmatmul.mubr.bf16.vlgmr.msra.gmra.mxu0 %v9711_v30  ;;  %v14784_v53 = vld [vmem:[#allocation110_spill] sm:$0xff]  ;;  %v13037_v28 = vadd.f32 %v12903_v26, %v6247_v62  ;;  %v14787_v42 = vor.u32 %v12677_v18, %v12675_v11  ;;  %v14788_v26 = vshll.u32 %v12809_v56, 16 }
 0x351   : > { %3671 = vst [vmem:[#allocation3 + $0x2c0] sm:$0xf] %v3475_v16  ;;  %v3921_v6 = vsel %vm10432_vm5, %v8325_v37, %v14784_v53  ;;  %3177 = vst [vmem:[#allocation3 + $0x304] sm:$0xf] %v3145_v14  ;;  %v14785_v7 = vld [vmem:[#allocation54_spill] sm:$0xff]  ;;  %v3496_v59 = vshll.u32 %v3220_v4, 16  ;;  %6550 = vmatprep.mubr.bf16.mxu0 %v9724_v10  ;;  %v13046_v30 = vadd.f32 %v8892_v32, %v8891_v40 }
 0x352   : > { %v14786_v54 = vor.u32 %v14785_v7, %v11952_v35  ;;  %v3712_v9 = vld [vmem:[#allocation2 + $0xb0] sm:$0x8]  ;;  %v4168_v51 = vld [vmem:[#allocation2 + $0xb8] sm:$0xf]  ;;  %v13042_v20 = vrot.slane %v14787_v42, 4  ;;  %v9750_v23 = vld [vmem:[#allocation9 + $0x228] sm:$0xff]   ;;  %v13044_v35 = vadd.f32 %v8996_v33, %v6250_v5 }
 0x353   : > { %v9717_v8 = vld [vmem:[#allocation3 + $0x440] ss:$36 sps:$4 sm:$0xff]   ;;  %v9892_v25 = vld [vmem:[#allocation9 + $0x238] sm:$0xff]   ;;  %4133 = vst [vmem:[#allocation3 + $0x258] sm:$0xf] %v3921_v6  ;;  %v3932_v47 = vshrl.u32 %v3712_v9, 16 }
 0x354   : > { %v3494_v24 = vrot.slane %v14786_v54, 4  ;;  %9318 = vmatpush3.bf16.msra.mxu0 %v9892_v25  ;;  %4200 = vst [vmem:[#allocation3 + $0x2c8] sm:$0xf] %v4168_v51  ;;  %v13050_v37 = vrot.slane %v14788_v26, 5  ;;  %v9728_v62 = vld [vmem:[#allocation3 + $0x1c] ss:$36 sps:$4 sm:$0xff]   ;;  %6502 = vmatmul.mubr.bf16.gmra.mxu1 %v9717_v8 }
 0x355   : > { %9319 = vmatprep.subr.bf16.mxu0 %v9737_v44  ;;  %v3498_v11 = vrot.slane %v3496_v59, 5  ;;  %v14789_v18 = vld [vmem:[#allocation129_spill] sm:$0xff]  ;;  %v14791_v16 = vld [vmem:[#allocation52_spill] sm:$0xff]  ;;  %v8326_v33 = vrot.slane %v3932_v47, 11  ;;  %v3147_v5 = vld [vmem:[#allocation2 + $0xc8] sm:$0xf]  ;;  %6703 = vmatprep.mubr.bf16.mxu1 %v9728_v62 }
 0x356   : > { %v14790_v10 = vor.u32 %v14789_v18, %v14711_v19  ;;  %v14792_v14 = vld [vmem:[#allocation40_spill] sm:$0xff]  ;;  %v3223_v40 = vld [vmem:[#allocation2 + $0xcc] sm:$0x1]  ;;  %3179 = vst [vmem:[#allocation3 + $0x34c] sm:$0xf] %v3147_v5  ;;  %v14796_v42 = vld [vmem:[#allocation115_spill] sm:$0xff]  ;;  %v4610_v62 = vsel %vm10453_vm10, %v13042_v20, %v13050_v37 }
 0x357   : > { %v4586_v4 = vsel %vm10453_vm10, %v14792_v14, %v14791_v16  ;;  %v14793_v32 = vld [vmem:[#allocation136_spill] sm:$0xff]  ;;  %v3499_v6 = vsel %vm10453_vm10, %v3494_v24, %v3498_v11  ;;  %v3520_v7 = vshll.u32 %v3223_v40, 16  ;;  %v3715_v54 = vld [vmem:[#allocation2 + $0xc0] sm:$0x8]  ;;  %v4170_v19 = vld [vmem:[#allocation2 + $0xc8] sm:$0xf] }
 0x358   : > { %v3518_v0 = vrot.slane %v14790_v10, 4  ;;  %4703 = vst [vmem:[#allocation3 + $0x3c8] sm:$0xf] %v4586_v4  ;;  %v3541_v53 = vor.u32 %v14793_v32, %v14717_v49  ;;  %v14794_v59 = vld [vmem:[#allocation62_spill] sm:$0xff]  ;;  %v14797_v25 = vshrl.u32 %v14796_v42, 16  ;;  %9320 = vmatpush3.bf16.msra.mxu0 %v9737_v44  ;;  %v9763_v18 = vld [vmem:[#allocation9 + $0x220] sm:$0xff]  }
 0x359   : > { %v14795_v9 = vshll.u32 %v14794_v59, 16  ;;  %v9722_v26 = vld [vmem:[#allocation3 + $0x58] ss:$36 sps:$4 sm:$0xff]   ;;  %3673 = vst [vmem:[#allocation3 + $0x308] sm:$0xf] %v3499_v6  ;;  %v14798_v49 = vld [vmem:[#allocation67_spill] sm:$0xff]  ;;  %9321 = vmatprep.subr.bf16.mxu0 %v9750_v23 }
 0x35a   : > { %v3564_v47 = vrot.slane %v14797_v25, 4  ;;  %v3943_v24 = vsel %vm10432_vm5, %v8326_v33, %v14798_v49  ;;  %v3954_v11 = vshrl.u32 %v3715_v54, 16  ;;  %4202 = vst [vmem:[#allocation3 + $0x310] sm:$0xf] %v4170_v19  ;;  %v3522_v10 = vrot.slane %v3520_v7, 5  ;;  %6551 = vmatmul.mubr.bf16.gmra.mxu0 %v9722_v26 }
 0x35b   : > { %v3964_v51 = vor.u32 %v14795_v9, %v14714_v1  ;;  %4135 = vst [vmem:[#allocation3 + $0x2a0] sm:$0xf] %v3943_v24  ;;  %v3149_v14 = vld [vmem:[#allocation2 + $0xd8] sm:$0xf]  ;;  %v3226_v1 = vld [vmem:[#allocation2 + $0xdc] sm:$0x1] }
 0x35c   : > { %v9893_v4 = vld [vmem:[#allocation2 + $0xe4] sm:$0xf]  ;;  %v3588_v40 = vrot.slane %v3586_v31, 4  ;;  %v8327_v32 = vrot.slane %v3954_v11, 11  ;;  %3181 = vst [vmem:[#allocation3 + $0x394] sm:$0xf] %v3149_v14  ;;  %v3523_v44 = vsel %vm10453_vm10, %v3518_v0, %v3522_v10  ;;  %v3565_v7 = vor.u32 %v3564_v47, %v14725_v15  ;;  %9322 = vmatpush3.bf16.msra.mxu0 %v9750_v23 }
 0x35d   : > { %v4006_v5 = vshll.u32 %v9893_v4, 16  ;;  %v9733_v8 = vld [vmem:[#allocation3 + $0xa4] ss:$36 sps:$4 sm:$0xff]   ;;  %v3542_v6 = vrot.slane %v3541_v53, 4  ;;  %v3544_v33 = vshll.u32 %v3226_v1, 16  ;;  %v14799_v9 = vld [vmem:[#allocation127_spill] sm:$0xff]  ;;  %9323 = vmatprep.subr.bf16.mxu0 %v9763_v18 }
 0x35e   : > { %v13078_v54 = vld [vmem:[#allocation2 + $0xe8] sm:$0xf]  ;;  %v9726_v19 = vld [vmem:[#allocation3 + $0x18] ss:$36 sps:$4 sm:$0xff]   ;;  %6558 = vmatprep.mubr.bf16.mxu0 %v9733_v8  ;;  %3675 = vst [vmem:[#allocation3 + $0x350] sm:$0xf] %v3523_v44  ;;  %v3965_v0 = vsel %vm10432_vm5, %v8327_v32, %v3964_v51  ;;  %v3589_v23 = vor.u32 %v3588_v40, %v14735_v63 }
 0x35f   : > { %v4563_v31 = vshrl.u32 %v13078_v54, 16  ;;  %v3718_v53 = vld [vmem:[#allocation2 + $0xd0] sm:$0x8]  ;;  %v4172_v59 = vld [vmem:[#allocation2 + $0xd8] sm:$0xf]  ;;  %v14800_v42 = vshll.u32 %v14799_v9, 16  ;;  %6704 = vmatmul.mubr.bf16.vlgmr.msra.gmra.mxu1 %v9726_v19  ;;  %v4008_v63 = vor.u32 %v4006_v5, %v14730_v57 }
 0x360   : > { %4705 = vst [vmem:[#allocation3 + $0x410] sm:$0xf] %v4610_v62  ;;  %v9776_v15 = vld [vmem:[#allocation9 + $0x218] sm:$0xff]   ;;  %4137 = vst [vmem:[#allocation3 + $0x2e8] sm:$0xf] %v3965_v0  ;;  %v3546_v25 = vrot.slane %v3544_v33, 5  ;;  %9324 = vmatpush3.bf16.msra.mxu0 %v9763_v18  ;;  %v8997_v33 = vpop.f32.mrf.mxu1 }
 0x361   : > { %v3986_v20 = vor.u32 %v14800_v42, %v14722_v58  ;;  %v3976_v47 = vshrl.u32 %v3718_v53, 16  ;;  %4204 = vst [vmem:[#allocation3 + $0x358] sm:$0xf] %v4172_v59  ;;  %v3151_v26 = vld [vmem:[#allocation2 + $0xe8] sm:$0xf]  ;;  %v9789_v4 = vld [vmem:[#allocation9 + $0x210] sm:$0xff]   ;;  %9325 = vmatprep.subr.bf16.mxu0 %v9776_v15  ;;  %v8890_v42 = vadd.f32 %v12974_v17, %v12932_v13 }
 0x362   : > { %3183 = vst [vmem:[#allocation3 + $0x3dc] sm:$0xf] %v3151_v26  ;;  %v3229_v49 = vld [vmem:[#allocation2 + $0xec] sm:$0x1]  ;;  %v3721_v24 = vld [vmem:[#allocation2 + $0xe0] sm:$0x8]  ;;  %v3547_v14 = vsel %vm10453_vm10, %v3542_v6, %v3546_v25  ;;  %v6255_v26 = vadd.f32 %v12872_v27, %v12986_v45 }
 0x363   : > { %v4174_v51 = vld [vmem:[#allocation2 + $0xe8] sm:$0xf]  ;;  %v9731_v11 = vld [vmem:[#allocation3 + $0xa0] ss:$36 sps:$4 sm:$0xff]   ;;  %v8328_v1 = vrot.slane %v3976_v47, 11  ;;  %v3566_v8 = vrot.slane %v3565_v7, 4 }
 0x364   : > { %v9736_v10 = vld [vmem:[#allocation3 + $0x64] ss:$36 sps:$4 sm:$0xff]   ;;  %4206 = vst [vmem:[#allocation3 + $0x3a0] sm:$0xf] %v4174_v51  ;;  %v9740_v58 = vld [vmem:[#allocation3 + $0xec] ss:$36 sps:$4 sm:$0xff]   ;;  %6559 = vmatmul.mubr.bf16.gmra.mxu0 %v9731_v11 }
 0x365   : > { %3677 = vst [vmem:[#allocation3 + $0x398] sm:$0xf] %v3547_v14  ;;  %v3568_v32 = vshll.u32 %v3229_v49, 16  ;;  %6711 = vmatprep.mubr.bf16.mxu1 %v9736_v10  ;;  %v3987_v40 = vsel %vm10432_vm5, %v8328_v1, %v3986_v20  ;;  %v3998_v44 = vshrl.u32 %v3721_v24, 16  ;;  %v3153_v62 = vld [vmem:[#allocation2 + $0xf8] sm:$0xf]  ;;  %v8998_v20 = vpop.f32.mrf.mxu1  ;;  %6566 = vmatprep.mubr.bf16.mxu0 %v9740_v58  ;;  %v13101_v24 = vpop.f32.mrf.mxu0 }
 0x366   : > { %v3232_v6 = vld [vmem:[#allocation2 + $0xfc] sm:$0x1]  ;;  %4139 = vst [vmem:[#allocation3 + $0x330] sm:$0xf] %v3987_v40  ;;  %3185 = vst [vmem:[#allocation3 + $0x424] sm:$0xf] %v3153_v62  ;;  %9326 = vmatpush3.bf16.msra.mxu0 %v9776_v15  ;;  %v8999_v49 = vadd.f32 %v8998_v20, %v8997_v33 }
 0x367   : > { %v3570_v0 = vrot.slane %v3568_v32, 5  ;;  %v3590_v19 = vrot.slane %v3589_v23, 4  ;;  %v3592_v18 = vshll.u32 %v3232_v6, 16  ;;  %v3724_v53 = vld [vmem:[#allocation2 + $0xf0] sm:$0x8]  ;;  %v8329_v5 = vrot.slane %v3998_v44, 11  ;;  %9327 = vmatprep.subr.bf16.mxu0 %v9789_v4  ;;  %v9000_v1 = vpop.f32.mrf.mxu1 }
 0x368   : > { %v9895_v59 = vld [vmem:[#allocation2 + $0xf4] sm:$0xf]  ;;  %v13092_v9 = vld [vmem:[#allocation2 + $0xf8] sm:$0xf]  ;;  %v9734_v25 = vld [vmem:[#allocation3 + $0x60] ss:$36 sps:$4 sm:$0xff]   ;;  %v13108_v32 = vadd.f32 %v8999_v49, %v6255_v26 }
 0x369   : > { %v4028_v7 = vshll.u32 %v9895_v59, 16  ;;  %v4587_v57 = vshrl.u32 %v13092_v9, 16  ;;  %v3571_v47 = vsel %vm10453_vm10, %v3566_v8, %v3570_v0  ;;  %v3594_v23 = vrot.slane %v3592_v18, 5  ;;  %v9897_v11 = vld [vmem:[#allocation2 + $0x108] sm:$0xf]  ;;  %v9001_v0 = vpop.f32.mrf.mxu1  ;;  %v14802_v18 = vld [vmem:[#allocation37_spill] sm:$0xff]  ;;  %6712 = vmatmul.mubr.bf16.gmra.mxu1 %v9734_v25  ;;  %v13115_v59 = vpop.f32.mrf.mxu0 }
 0x36a   : > { %v3610_v10 = vshrl.u32 %v9897_v11, 16  ;;  %v9802_v13 = vld [vmem:[#allocation9 + $0x208] sm:$0xff]   ;;  %3679 = vst [vmem:[#allocation3 + $0x3e0] sm:$0xf] %v3571_v47  ;;  %v4009_v17 = vsel %vm10432_vm5, %v8329_v5, %v4008_v63  ;;  %v4020_v15 = vshrl.u32 %v3724_v53, 16  ;;  %v4494_v53 = vor.u32 %v14802_v18, %v14770_v46  ;;  %9328 = vmatpush3.bf16.msra.mxu0 %v9789_v4  ;;  %v9815_v4 = vld [vmem:[#allocation9 + $0x200] sm:$0xff]  }
 0x36b   : > { %v4030_v51 = vor.u32 %v4028_v7, %v14738_v43  ;;  %v4176_v14 = vld [vmem:[#allocation2 + $0xf8] sm:$0xf]  ;;  %v9898_v58 = vld [vmem:[#allocation2 + $0x104] sm:$0xf]  ;;  %4141 = vst [vmem:[#allocation3 + $0x378] sm:$0xf] %v4009_v17  ;;  %v3595_v27 = vsel %vm10453_vm10, %v3590_v19, %v3594_v23  ;;  %v6258_v19 = vadd.f32 %v8890_v42, %v12986_v45  ;;  %v9002_v7 = vadd.f32 %v9001_v0, %v9000_v1 }
 0x36c   : > { %v4050_v8 = vshll.u32 %v9898_v58, 16  ;;  %4208 = vst [vmem:[#allocation3 + $0x3e8] sm:$0xf] %v4176_v14  ;;  %v463_v43 = vld [vmem:[#allocation2 + $0x10c] sm:$0x1]  ;;  %v8330_v63 = vrot.slane %v4020_v15, 11  ;;  %9329 = vmatprep.subr.bf16.mxu0 %v9802_v13 }
 0x36d   : > { %v3155_v40 = vld [vmem:[#allocation2 + $0x108] sm:$0xf]  ;;  %v9743_v6 = vld [vmem:[#allocation3 + $0xac] ss:$36 sps:$4 sm:$0xff]   ;;  %3681 = vst [vmem:[#allocation3 + $0x428] sm:$0xf] %v3595_v27  ;;  %v13122_v25 = vadd.f32 %v9002_v7, %v6258_v19 }
 0x36e   : > { %v14801_v44 = vld [vmem:[#allocation42_spill] sm:$0xff]  ;;  %3187 = vst [vmem:[#allocation3 + $0x46c] sm:$0xf] %v3155_v40  ;;  %v464_v20 = vsel %vm10441_vm7, 0, %v463_v43  ;;  %v4052_v26 = vor.u32 %v4050_v8, %v14741_v48  ;;  %v3612_v23 = vrot.slane %v3610_v10, 4  ;;  %6719 = vmatprep.mubr.bf16.mxu1 %v9743_v6  ;;  %v4031_v46 = vsel %vm10432_vm5, %v8330_v63, %v4030_v51  ;;  %v14805_v51 = vld [vmem:[#allocation35_spill] sm:$0xff]  ;;  %9330 = vmatpush3.bf16.msra.mxu0 %v9802_v13 }
 0x36f   : > { %v4278_v33 = vor.u32 %v14801_v44, %v14748_v12  ;;  %v9738_v62 = vld [vmem:[#allocation3 + $0xe8] ss:$36 sps:$4 sm:$0xff]   ;;  %v3727_v12 = vld [vmem:[#allocation2 + $0x100] sm:$0x8]  ;;  %v9746_v49 = vld [vmem:[#allocation3 + $0x134] ss:$36 sps:$4 sm:$0xff]   ;;  %9331 = vmatprep.subr.bf16.mxu0 %v9815_v4 }
 0x370   : > { %v4178_v47 = vld [vmem:[#allocation2 + $0x108] sm:$0xf]  ;;  %465 = vst [vmem:[#allocation2 + $0x10c] sm:$0x1] %v464_v20  ;;  %v4042_v42 = vshrl.u32 %v3727_v12, 16  ;;  %6567 = vmatmul.mubr.bf16.gmra.mxu0 %v9738_v62  ;;  %v13126_v8 = vrot.slane %v4494_v53, 4  ;;  %v8897_v62 = vpop.f32.mrf.mxu0  ;;  %v3613_v0 = vor.u32 %v3612_v23, %v12826_v38 }
 0x371   : > { %4210 = vst [vmem:[#allocation3 + $0x430] sm:$0xf] %v4178_v47  ;;  %4143 = vst [vmem:[#allocation3 + $0x3c0] sm:$0xf] %v4031_v46  ;;  %v4215_v11 = vld [vmem:[#allocation2 + $0x2c] sm:$0x1]  ;;  %6574 = vmatprep.mubr.bf16.mxu0 %v9746_v49 }
 0x372   : > { %v412_v17 = vld [vmem:[#allocation2 + $0x110] sm:$0x8]  ;;  %v8331_v15 = vrot.slane %v4042_v42, 11  ;;  %v4279_v14 = vrot.slane %v4278_v33, 4  ;;  %v4281_v48 = vshll.u32 %v4215_v11, 16  ;;  %v14806_v27 = vshrl.u32 %v14805_v51, 16  ;;  %v8898_v20 = vpop.f32.mrf.mxu0  ;;  %9332 = vmatpush3.bf16.msra.mxu0 %v9815_v4 }
 0x373   : > { %v413_v1 = vsel %vm10423_vm2, 0, %v412_v17  ;;  %v3731_v58 = vld [vmem:[#allocation2 + $0x114] sm:$0xf]  ;;  %v14807_v40 = vld [vmem:[#allocation133_spill] sm:$0xff]  ;;  %v13138_v63 = vrot.slane %v4563_v31, 4  ;;  %v14809_v13 = vld [vmem:[#allocation64_spill] sm:$0xff]  ;;  %v13149_v31 = vadd.f32 %v8898_v20, %v8897_v62 }
 0x374   : > { %v13130_v43 = vrot.slane %v14806_v27, 4  ;;  %v14808_v44 = vshrl.u32 %v14807_v40, 16  ;;  %414 = vst [vmem:[#allocation2 + $0x110] sm:$0x8] %v413_v1  ;;  %v4069_v33 = vshrl.u32 %v3731_v58, 16  ;;  %v4053_v18 = vsel %vm10432_vm5, %v8331_v15, %v4052_v26  ;;  %v14810_v1 = vld [vmem:[#allocation82_spill] sm:$0xff] }
 0x375   : > { %v4283_v53 = vrot.slane %v4281_v48, 5  ;;  %v9741_v19 = vld [vmem:[#allocation3 + $0xa8] ss:$36 sps:$4 sm:$0xff]   ;;  %v9749_v7 = vld [vmem:[#allocation3 + $0xf4] ss:$36 sps:$4 sm:$0xff]   ;;  %v4326_v47 = vor.u32 %v14809_v13, %v14750_v21  ;;  %v13147_v54 = vrot.slane %v4587_v57, 4  ;;  %v4374_v51 = vor.u32 %v14810_v1, %v14754_v61 }
 0x376   : > { %v13134_v6 = vrot.slane %v14808_v44, 4  ;;  %4145 = vst [vmem:[#allocation3 + $0x408] sm:$0xf] %v4053_v18  ;;  %v4071_v12 = vrot.slane %v4069_v33, 7  ;;  %v3732_v23 = vld [vmem:[#allocation2 + $0x118] sm:$0xf]  ;;  %6720 = vmatmul.mubr.bf16.gmra.mxu1 %v9741_v19 }
 0x377   : > { %v4284_v38 = vsel %vm10453_vm10, %v4279_v14, %v4283_v53  ;;  %v4179_v26 = vld [vmem:[#allocation2 + $0x114] sm:$0xf]  ;;  %v3235_v49 = vld [vmem:[#allocation2 + $0x10c] sm:$0x1]  ;;  %v4072_v46 = vshll.u32 %v3731_v58, 16  ;;  %v4078_v42 = vshrl.u32 %v3732_v23, 16  ;;  %6727 = vmatprep.mubr.bf16.mxu1 %v9749_v7 }
 0x378   : > { %4678 = vst [vmem:[#allocation3 + $0x44] sm:$0xf] %v4284_v38  ;;  %v4081_v11 = vshll.u32 %v3732_v23, 16  ;;  %4211 = vst [vmem:[#allocation3 + $0x454] sm:$0xf] %v4179_v26  ;;  %v4611_v21 = vshrl.u32 %v12809_v56, 16 }
 0x379   : > { %v9744_v9 = vld [vmem:[#allocation3 + $0x130] ss:$36 sps:$4 sm:$0xff]   ;;  %v3614_v57 = vrot.slane %v3613_v0, 4  ;;  %v3616_v17 = vshll.u32 %v3235_v49, 16  ;;  %v9753_v15 = vld [vmem:[#allocation3 + $0x17c] ss:$36 sps:$4 sm:$0xff]   ;;  %v4074_v0 = vor.u32 %v4072_v46, %v4071_v12 }
 0x37a   : > { %v4076_v48 = vrot.slane %v4071_v12, 4  ;;  %v4080_v10 = vrot.slane %v4078_v42, 7  ;;  %v4180_v14 = vld [vmem:[#allocation2 + $0x118] sm:$0xf]  ;;  %v14811_v4 = vld [vmem:[#allocation101_spill] sm:$0xff]  ;;  %6575 = vmatmul.mubr.bf16.gmra.mxu0 %v9744_v9  ;;  %v4327_v62 = vrot.slane %v4326_v47, 4 }
 0x37b   : > { %v4422_v27 = vor.u32 %v14811_v4, %v14758_v22  ;;  %v3618_v58 = vrot.slane %v3616_v17, 5  ;;  %v3730_v40 = vld [vmem:[#allocation2 + $0x110] sm:$0x8]  ;;  %4212 = vst [vmem:[#allocation3 + $0x478] sm:$0xf] %v4180_v14  ;;  %6582 = vmatprep.mubr.bf16.mxu0 %v9753_v15  ;;  %v4375_v42 = vrot.slane %v4374_v51, 4  ;;  %v4542_v4 = vor.u32 %v13134_v6, %v14774_v50 }
 0x37c   : > { %v4221_v44 = vld [vmem:[#allocation2 + $0x4c] sm:$0x1]  ;;  %v4064_v33 = vshrl.u32 %v3730_v40, 16  ;;  %v4083_v18 = vor.u32 %v4081_v11, %v4080_v10  ;;  %v4224_v19 = vld [vmem:[#allocation2 + $0x5c] sm:$0x1]  ;;  %v14812_v22 = vld [vmem:[#allocation123_spill] sm:$0xff] }
 0x37d   : > { %v4329_v53 = vshll.u32 %v4221_v44, 16  ;;  %v9747_v7 = vld [vmem:[#allocation3 + $0xf0] ss:$36 sps:$4 sm:$0xff]   ;;  %v9756_v20 = vld [vmem:[#allocation3 + $0x13c] ss:$36 sps:$4 sm:$0xff]   ;;  %v3619_v61 = vsel %vm10453_vm10, %v3614_v57, %v3618_v58  ;;  %v4353_v13 = vshll.u32 %v4224_v19, 16  ;;  %v4470_v38 = vor.u32 %v14812_v22, %v14768_v3 }
 0x37e   : > { %3683 = vst [vmem:[#allocation3 + $0x470] sm:$0xf] %v3619_v61  ;;  %v8332_v23 = vrot.slane %v4064_v33, 11  ;;  %v4084_v47 = vsel %vm10432_vm5, %v4076_v48, %v4083_v18  ;;  %v4227_v49 = vld [vmem:[#allocation2 + $0x6c] sm:$0x1]  ;;  %v4423_v9 = vrot.slane %v4422_v27, 4  ;;  %6728 = vmatmul.mubr.bf16.gmra.mxu1 %v9747_v7  ;;  %v9003_v27 = vpop.f32.mrf.mxu1  ;;  %v4518_v18 = vor.u32 %v13130_v43, %v14772_v55 }
 0x37f   : > { %v4331_v26 = vrot.slane %v4329_v53, 5  ;;  %v9751_v12 = vld [vmem:[#allocation3 + $0x178] ss:$36 sps:$4 sm:$0xff]   ;;  %4148 = vst [vmem:[#allocation3 + $0x474] sm:$0xf] %v4084_v47  ;;  %v4355_v46 = vrot.slane %v4353_v13, 5  ;;  %6735 = vmatprep.mubr.bf16.mxu1 %v9756_v20  ;;  %v6263_v53 = vadd.f32 %v13046_v30, %v12986_v45  ;;  %v8896_v13 = vadd.f32 %v13115_v59, %v13101_v24 }
 0x380   : > { %v4377_v11 = vshll.u32 %v4227_v49, 16  ;;  %v9759_v17 = vld [vmem:[#allocation3 + $0x1c4] ss:$36 sps:$4 sm:$0xff]   ;;  %v4075_v57 = vsel %vm10432_vm5, %v8332_v23, %v4074_v0  ;;  %v4230_v15 = vld [vmem:[#allocation2 + $0x7c] sm:$0x1]  ;;  %v4471_v40 = vrot.slane %v4470_v38, 4  ;;  %v9004_v50 = vpop.f32.mrf.mxu1 }
 0x381   : > { %v4332_v3 = vsel %vm10453_vm10, %v4327_v62, %v4331_v26  ;;  %4147 = vst [vmem:[#allocation3 + $0x450] sm:$0xf] %v4075_v57  ;;  %v14813_v48 = vld [vmem:[#allocation72_spill] sm:$0xff]  ;;  %v4401_v1 = vshll.u32 %v4230_v15, 16  ;;  %v4233_v51 = vld [vmem:[#allocation2 + $0x8c] sm:$0x1]  ;;  %v9005_v22 = vadd.f32 %v9004_v50, %v9003_v27 }
 0x382   : > { %4682 = vst [vmem:[#allocation3 + $0xd4] sm:$0xf] %v4332_v3  ;;  %v4356_v10 = vsel %vm10453_vm10, %v14813_v48, %v4355_v46  ;;  %v4379_v14 = vrot.slane %v4377_v11, 5  ;;  %v4425_v2 = vshll.u32 %v4233_v51, 16  ;;  %v4236_v58 = vld [vmem:[#allocation2 + $0x9c] sm:$0x1]  ;;  %6583 = vmatmul.mubr.bf16.gmra.mxu0 %v9751_v12  ;;  %v9006_v47 = vpop.f32.mrf.mxu1 }
 0x383   : > { %4684 = vst [vmem:[#allocation3 + $0x11c] sm:$0xf] %v4356_v10  ;;  %v4403_v62 = vrot.slane %v4401_v1, 5  ;;  %v4449_v33 = vshll.u32 %v4236_v58, 16  ;;  %v4239_v0 = vld [vmem:[#allocation2 + $0xac] sm:$0x1]  ;;  %6590 = vmatprep.mubr.bf16.mxu0 %v9759_v17  ;;  %v13188_v11 = vadd.f32 %v9005_v22, %v6263_v53  ;;  %v4590_v10 = vor.u32 %v13147_v54, %v14791_v16  ;;  %v8900_v16 = vpop.f32.mrf.mxu0 }
 0x384   : > { %v4380_v44 = vsel %vm10453_vm10, %v4375_v42, %v4379_v14  ;;  %v4427_v6 = vrot.slane %v4425_v2, 5  ;;  %v4473_v19 = vshll.u32 %v4239_v0, 16  ;;  %v4242_v7 = vld [vmem:[#allocation2 + $0xbc] sm:$0x1]  ;;  %v9762_v61 = vld [vmem:[#allocation3 + $0x184] ss:$36 sps:$4 sm:$0xff]   ;;  %v6266_v1 = vadd.f32 %v8896_v13, %v12986_v45 }
 0x385   : > { %4686 = vst [vmem:[#allocation3 + $0x164] sm:$0xf] %v4380_v44  ;;  %v9754_v20 = vld [vmem:[#allocation3 + $0x138] ss:$36 sps:$4 sm:$0xff]   ;;  %v14814_v38 = vld [vmem:[#allocation90_spill] sm:$0xff]  ;;  %v4451_v55 = vrot.slane %v4449_v33, 5 }
 0x386   : > { %v4404_v23 = vsel %vm10453_vm10, %v14814_v38, %v4403_v62  ;;  %v4543_v43 = vrot.slane %v4542_v4, 4  ;;  %v4428_v30 = vsel %vm10453_vm10, %v4423_v9, %v4427_v6  ;;  %v4475_v26 = vrot.slane %v4473_v19, 5  ;;  %v4245_v12 = vld [vmem:[#allocation2 + $0xcc] sm:$0x1]  ;;  %v14816_v24 = vld [vmem:[#allocation53_spill] sm:$0xff]  ;;  %6736 = vmatmul.mubr.bf16.gmra.mxu1 %v9754_v20  ;;  %v9007_v9 = vpop.f32.mrf.mxu1  ;;  %v8901_v20 = vpop.f32.mrf.mxu0 }
 0x387   : > { %4688 = vst [vmem:[#allocation3 + $0x1ac] sm:$0xf] %v4404_v23  ;;  %v4497_v49 = vshll.u32 %v4242_v7, 16  ;;  %v14815_v46 = vld [vmem:[#allocation22_spill] sm:$0xff]  ;;  %4690 = vst [vmem:[#allocation3 + $0x1f4] sm:$0xf] %v4428_v30  ;;  %v4452_v59 = vsel %vm10453_vm10, %v14816_v24, %v4451_v55  ;;  %6743 = vmatprep.mubr.bf16.mxu1 %v9762_v61  ;;  %v9008_v51 = vadd.f32 %v9007_v9, %v9006_v47 }
 0x388   : > { %v4566_v42 = vor.u32 %v13138_v63, %v14815_v46  ;;  %v4521_v17 = vshll.u32 %v4245_v12, 16  ;;  %v4248_v57 = vld [vmem:[#allocation2 + $0xdc] sm:$0x1]  ;;  %v4613_v3 = vrot.slane %v4611_v21, 4  ;;  %4692 = vst [vmem:[#allocation3 + $0x23c] sm:$0xf] %v4452_v59  ;;  %v4476_v15 = vsel %vm10453_vm10, %v4471_v40, %v4475_v26  ;;  %v9009_v30 = vpop.f32.mrf.mxu1 }
 0x389   : > { %v4499_v48 = vrot.slane %v4497_v49, 5  ;;  %v4519_v63 = vrot.slane %v4518_v18, 4  ;;  %v9757_v14 = vld [vmem:[#allocation3 + $0x1c0] ss:$36 sps:$4 sm:$0xff]   ;;  %4694 = vst [vmem:[#allocation3 + $0x284] sm:$0xf] %v4476_v15  ;;  %v13203_v2 = vadd.f32 %v9008_v51, %v6266_v1 }
 0x38a   : > { %v9766_v4 = vld [vmem:[#allocation3 + $0x20c] ss:$36 sps:$4 sm:$0xff]   ;;  %v4523_v21 = vrot.slane %v4521_v17, 5  ;;  %v4545_v27 = vshll.u32 %v4248_v57, 16  ;;  %6591 = vmatmul.mubr.bf16.gmra.mxu0 %v9757_v14  ;;  %v4567_v40 = vrot.slane %v4566_v42, 4  ;;  %v4591_v0 = vrot.slane %v4590_v10, 4  ;;  %v9010_v24 = vpop.f32.mrf.mxu1 }
 0x38b   : > { %v4500_v56 = vsel %vm10453_vm10, %v13126_v8, %v4499_v48  ;;  %v4251_v58 = vld [vmem:[#allocation2 + $0xec] sm:$0x1]  ;;  %6598 = vmatprep.mubr.bf16.mxu0 %v9766_v4  ;;  %v4254_v33 = vld [vmem:[#allocation2 + $0xfc] sm:$0x1]  ;;  %v4614_v8 = vor.u32 %v4613_v3, %v13050_v37  ;;  %v9760_v53 = vld [vmem:[#allocation3 + $0x180] ss:$36 sps:$4 sm:$0xff]   ;;  %v6271_v17 = vadd.f32 %v13149_v31, %v12986_v45  ;;  %v8902_v57 = vadd.f32 %v8901_v20, %v8900_v16 }
 0x38c   : > { %4696 = vst [vmem:[#allocation3 + $0x2cc] sm:$0xf] %v4500_v56  ;;  %v4524_v54 = vsel %vm10453_vm10, %v4519_v63, %v4523_v21  ;;  %v4547_v44 = vrot.slane %v4545_v27, 5  ;;  %v4569_v62 = vshll.u32 %v4251_v58, 16  ;;  %v4593_v18 = vshll.u32 %v4254_v33, 16  ;;  %v9012_v48 = vpop.f32.mrf.mxu1 }
 0x38d   : > { %4698 = vst [vmem:[#allocation3 + $0x314] sm:$0xf] %v4524_v54  ;;  %v9769_v19 = vld [vmem:[#allocation3 + $0x1cc] ss:$36 sps:$4 sm:$0xff]   ;;  %v9772_v38 = vld [vmem:[#allocation3 + $0x254] ss:$36 sps:$4 sm:$0xff]   ;;  %v9011_v3 = vadd.f32 %v9010_v24, %v9009_v30  ;;  %v6274_v31 = vadd.f32 %v8902_v57, %v12986_v45 }
 0x38e   : > { %v4548_v50 = vsel %vm10453_vm10, %v4543_v43, %v4547_v44  ;;  %v4571_v6 = vrot.slane %v4569_v62, 5  ;;  %v4595_v7 = vrot.slane %v4593_v18, 5  ;;  %6744 = vmatmul.mubr.bf16.gmra.mxu1 %v9760_v53  ;;  %v9764_v13 = vld [vmem:[#allocation3 + $0x208] ss:$36 sps:$4 sm:$0xff]   ;;  %v4615_v23 = vrot.slane %v4614_v8, 4  ;;  %v8903_v43 = vpop.f32.mrf.mxu0  ;;  %v9013_v4 = vpop.f32.mrf.mxu1 }
 0x38f   : > { %4700 = vst [vmem:[#allocation3 + $0x35c] sm:$0xf] %v4548_v50  ;;  %6751 = vmatprep.mubr.bf16.mxu1 %v9769_v19  ;;  %v4257_v37 = vld [vmem:[#allocation2 + $0x10c] sm:$0x1]  ;;  %v9775_v46 = vld [vmem:[#allocation3 + $0x214] ss:$36 sps:$4 sm:$0xff]   ;;  %v13218_v10 = vadd.f32 %v9011_v3, %v6271_v17  ;;  %v9014_v27 = vadd.f32 %v9013_v4, %v9012_v48 }
 0x390   : > { %v4572_v61 = vsel %vm10453_vm10, %v4567_v40, %v4571_v6  ;;  %v4596_v22 = vsel %vm10453_vm10, %v4591_v0, %v4595_v7  ;;  %v4617_v55 = vshll.u32 %v4257_v37, 16  ;;  %v9767_v26 = vld [vmem:[#allocation3 + $0x1c8] ss:$36 sps:$4 sm:$0xff]   ;;  %v8904_v49 = vpop.f32.mrf.mxu0  ;;  %v9770_v59 = vld [vmem:[#allocation3 + $0x250] ss:$36 sps:$4 sm:$0xff]   ;;  %v9015_v7 = vpop.f32.mrf.mxu1 }
 0x391   : > { %4702 = vst [vmem:[#allocation3 + $0x3a4] sm:$0xf] %v4572_v61  ;;  %4704 = vst [vmem:[#allocation3 + $0x3ec] sm:$0xf] %v4596_v22  ;;  %v8905_v42 = vadd.f32 %v8904_v49, %v8903_v43  ;;  %v9779_v9 = vld [vmem:[#allocation3 + $0x29c] ss:$36 sps:$4 sm:$0xff]   ;;  %v13223_v62 = vadd.f32 %v9014_v27, %v6274_v31 }
 0x392   : > { %6599 = vmatmul.mubr.bf16.gmra.mxu0 %v9764_v13  ;;  %v4619_v47 = vrot.slane %v4617_v55, 5  ;;  %v8906_v15 = vpop.f32.mrf.mxu0  ;;  %v355_v63 = vld [vmem:[#allocation2 + $0x11c] sm:$0x1]  ;;  %v4258_v1 = vld [vmem:[#allocation2 + $0x114] sm:$0xf]  ;;  %v9016_v37 = vpop.f32.mrf.mxu1 }
 0x393   : > { %6606 = vmatprep.mubr.bf16.mxu0 %v9772_v38  ;;  %v356_v14 = vsel %vm10441_vm7, 0, %v355_v63  ;;  %v4259_v51 = vld [vmem:[#allocation2 + $0x118] sm:$0xf]  ;;  %v4622_v56 = vshrl.u32 %v4258_v1, 16  ;;  %v4625_v21 = vshll.u32 %v4258_v1, 16  ;;  %v9017_v5 = vadd.f32 %v9016_v37, %v9015_v7 }
 0x394   : > { %v4620_v12 = vsel %vm10453_vm10, %v4615_v23, %v4619_v47  ;;  %357 = vst [vmem:[#allocation2 + $0x11c] sm:$0x1] %v356_v14  ;;  %v8907_v58 = vpop.f32.mrf.mxu0  ;;  %v4631_v54 = vshll.u32 %v4259_v51, 16  ;;  %v9773_v44 = vld [vmem:[#allocation3 + $0x210] ss:$36 sps:$4 sm:$0xff]   ;;  %v4635_v18 = vshrl.u32 %v4259_v51, 16  ;;  %v9018_v30 = vpop.f32.mrf.mxu1 }
 0x395   : > { %4706 = vst [vmem:[#allocation3 + $0x434] sm:$0xf] %v4620_v12  ;;  %v4624_v40 = vrot.slane %v4622_v56, 4  ;;  %v4627_v16 = vrot.slane %v4625_v21, 5  ;;  %v9782_v33 = vld [vmem:[#allocation3 + $0x25c] ss:$36 sps:$4 sm:$0xff]   ;;  %v8908_v43 = vadd.f32 %v8907_v58, %v8906_v15 }
 0x396   : > { %6752 = vmatmul.mubr.bf16.gmra.mxu1 %v9767_v26  ;;  %v9777_v8 = vld [vmem:[#allocation3 + $0x298] ss:$36 sps:$4 sm:$0xff]   ;;  %v8909_v53 = vpop.f32.mrf.mxu0  ;;  %v4633_v6 = vrot.slane %v4631_v54, 5  ;;  %v9785_v19 = vld [vmem:[#allocation3 + $0x2e4] ss:$36 sps:$4 sm:$0xff]   ;;  %v4637_v38 = vrot.slane %v4635_v18, 4  ;;  %v9019_v12 = vpop.f32.mrf.mxu1 }
 0x397   : > { %6759 = vmatprep.mubr.bf16.mxu1 %v9775_v46  ;;  %v4628_v0 = vor.u32 %v4627_v16, %v4624_v40  ;;  %v13234_v23 = vld [vmem:[%s14056_s4] ss:$0 sm:$0xff]  ;;  %v9780_v47 = vld [vmem:[#allocation3 + $0x258] ss:$36 sps:$4 sm:$0xff]   ;;  %v9788_v26 = vld [vmem:[#allocation3 + $0x2a4] ss:$36 sps:$4 sm:$0xff]   ;;  %v9020_v17 = vadd.f32 %v9019_v12, %v9018_v30 }
 0x398   : > { %v8910_v20 = vpop.f32.mrf.mxu0  ;;  %v6279_v55 = vadd.f32 %v13234_v23, %v8905_v42  ;;  %v4638_v46 = vor.u32 %v4637_v38, %v4633_v6  ;;  %v9783_v24 = vld [vmem:[#allocation3 + $0x2e0] ss:$36 sps:$4 sm:$0xff]   ;;  %v9792_v57 = vld [vmem:[#allocation3 + $0x32c] ss:$36 sps:$4 sm:$0xff]   ;;  %v9798_v21 = vld [vmem:[#allocation3 + $0x374] ss:$36 sps:$4 sm:$0xff]  }
 0x399   : > { %v4629_v50 = vrot.slane %v4628_v0, 4  ;;  %v13229_v22 = vadd.f32 %v8910_v20, %v8909_v53  ;;  %v9841_v48 = vld [vmem:[#allocation10 + $0xe0] ss:$16 sps:$4 sm:$0xff]   ;;  %v9843_v63 = vld [vmem:[#allocation10 + $0xe4] ss:$16 sps:$4 sm:$0xff]  }
 0x39a   : > { %6607 = vmatmul.mubr.bf16.gmra.mxu0 %v9770_v59  ;;  %v13237_v49 = vadd.f32 %v9017_v5, %v6279_v55  ;;  %v6282_v59 = vadd.f32 %v13234_v23, %v8908_v43  ;;  %v9786_v14 = vld [vmem:[#allocation3 + $0x2a0] ss:$36 sps:$4 sm:$0xff]   ;;  %7255 = vmatprep.subr.bf16.mxu1 %v9843_v63  ;;  %v9795_v51 = vld [vmem:[#allocation3 + $0x2ec] ss:$36 sps:$4 sm:$0xff]   ;;  %v9801_v27 = vld [vmem:[#allocation3 + $0x334] ss:$36 sps:$4 sm:$0xff]   ;;  %v8912_v16 = vpop.f32.mrf.mxu0 }
 0x39b   : > { %6614 = vmatprep.mubr.bf16.mxu0 %v9779_v9  ;;  %v466_v45 = vld [vmem:[#allocation2 + $0x11c] sm:$0x1]  ;;  %v4634_v13 = vsel %vm10453_vm10, %v4629_v50, %v4633_v6  ;;  %v4639_v9 = vrot.slane %v4638_v46, 4  ;;  %7256 = vmatpush1.bf16.msra.mxu1 %v9841_v48  ;;  %v9790_v56 = vld [vmem:[#allocation3 + $0x328] ss:$36 sps:$4 sm:$0xff]   ;;  %v9021_v50 = vpop.f32.mrf.mxu1  ;;  %v6287_v7 = vadd.f32 %v13234_v23, %v13229_v22 }
 0x39c   : > { %v467_v61 = vsel %vm10441_vm7, 0, %v466_v45  ;;  %4707 = vst [vmem:[#allocation3 + $0x458] sm:$0xf] %v4634_v13  ;;  %v13240_v3 = vadd.f32 %v9020_v17, %v6282_v59  ;;  %v9793_v31 = vld [vmem:[#allocation3 + $0x2e8] ss:$36 sps:$4 sm:$0xff]   ;;  %v8913_v41 = vpop.f32.mrf.mxu0 }
 0x39d   : > { %468 = vst [vmem:[#allocation2 + $0x11c] sm:$0x1] %v467_v61  ;;  %v9796_v58 = vld [vmem:[#allocation3 + $0x370] ss:$36 sps:$4 sm:$0xff]   ;;  %v9805_v40 = vld [vmem:[#allocation3 + $0x3bc] ss:$36 sps:$4 sm:$0xff]   ;;  %v8914_v45 = vadd.f32 %v8913_v41, %v8912_v16 }
 0x39e   : > { %6760 = vmatmul.mubr.bf16.gmra.mxu1 %v9773_v44  ;;  %v9844_v54 = vld [vmem:[#allocation10 + $0xc0] ss:$16 sps:$4 sm:$0xff]   ;;  %v9846_v44 = vld [vmem:[#allocation10 + $0xc4] ss:$16 sps:$4 sm:$0xff]   ;;  %v9803_v18 = vld [vmem:[#allocation3 + $0x3b8] ss:$36 sps:$4 sm:$0xff]   ;;  %v8915_v53 = vpop.f32.mrf.mxu0 }
 0x39f   : > { %6767 = vmatprep.mubr.bf16.mxu1 %v9782_v33  ;;  %v9799_v33 = vld [vmem:[#allocation3 + $0x330] ss:$36 sps:$4 sm:$0xff]   ;;  %7257 = vmatprep.subr.bf16.mxu1 %v9846_v44  ;;  %v9808_v0 = vld [vmem:[#allocation3 + $0x37c] ss:$36 sps:$4 sm:$0xff]   ;;  %v9814_v55 = vld [vmem:[#allocation3 + $0x3c4] ss:$36 sps:$4 sm:$0xff]  }
 0x3a0   : > { %7258 = vmatpush1.bf16.msra.mxu1 %v9844_v54  ;;  %v8916_v6 = vpop.f32.mrf.mxu0  ;;  %v9806_v13 = vld [vmem:[#allocation3 + $0x378] ss:$36 sps:$4 sm:$0xff]   ;;  %v9809_v30 = vld [vmem:[#allocation3 + $0x400] ss:$36 sps:$4 sm:$0xff]   ;;  %v9827_v54 = vld [vmem:[#allocation3 + $0xb0] ss:$36 sps:$4 sm:$0xff]  }
 0x3a1   : > { %v8917_v20 = vadd.f32 %v8916_v6, %v8915_v53  ;;  %v9847_v59 = vld [vmem:[#allocation10 + $0xa0] ss:$16 sps:$4 sm:$0xff]   ;;  %v9849_v17 = vld [vmem:[#allocation10 + $0xa4] ss:$16 sps:$4 sm:$0xff]  }
 0x3a2   : > { %6615 = vmatmul.mubr.bf16.gmra.mxu0 %v9777_v8  ;;  %v9811_v8 = vld [vmem:[#allocation3 + $0x404] ss:$36 sps:$4 sm:$0xff]   ;;  %v8918_v37 = vpop.f32.mrf.mxu0  ;;  %7259 = vmatprep.subr.bf16.mxu1 %v9849_v17  ;;  %v9825_v63 = vld [vmem:[#allocation3 + $0x454] ss:$36 sps:$4 sm:$0xff]  }
 0x3a3   : > { %6622 = vmatprep.mubr.bf16.mxu0 %v9785_v19  ;;  %v9022_v19 = vpop.f32.mrf.mxu1  ;;  %v9852_v6 = vld [vmem:[#allocation10 + $0x84] ss:$16 sps:$4 sm:$0xff]  }
 0x3a4   : > { %v4260_v42 = vld [vmem:[#allocation2 + $0x11c] sm:$0x1]  ;;  %v9023_v61 = vadd.f32 %v9022_v19, %v9021_v50  ;;  %v8919_v5 = vpop.f32.mrf.mxu0  ;;  %7260 = vmatpush1.bf16.msra.mxu1 %v9847_v59  ;;  %v9850_v50 = vld [vmem:[#allocation10 + $0x80] ss:$16 sps:$4 sm:$0xff]  }
 0x3a5   : > { %v4641_v15 = vshll.u32 %v4260_v42, 16  ;;  %v9024_v38 = vpop.f32.mrf.mxu1  ;;  %v8920_v12 = vadd.f32 %v8919_v5, %v8918_v37  ;;  %v9821_v42 = vld [vmem:[#allocation3 + $0x40c] ss:$36 sps:$4 sm:$0xff]   ;;  %7261 = vmatprep.subr.bf16.mxu1 %v9852_v6  ;;  %v9829_v37 = vld [vmem:[#allocation3 + $0x140] ss:$36 sps:$4 sm:$0xff]  }
 0x3a6   : > { %6768 = vmatmul.mubr.bf16.gmra.mxu1 %v9780_v47  ;;  %v13246_v43 = vadd.f32 %v9023_v61, %v6287_v7  ;;  %v8921_v48 = vpop.f32.mrf.mxu0  ;;  %v9828_v61 = vld [vmem:[#allocation3 + $0xf8] ss:$36 sps:$4 sm:$0xff]   ;;  %v9830_v5 = vld [vmem:[#allocation3 + $0x188] ss:$36 sps:$4 sm:$0xff]   ;;  %v9837_v6 = vld [vmem:[#allocation3 + $0x380] ss:$36 sps:$4 sm:$0xff]  }
 0x3a7   : > { %6775 = vmatprep.mubr.bf16.mxu1 %v9788_v26  ;;  %v4643_v1 = vrot.slane %v4641_v15, 5  ;;  %v9025_v47 = vpop.f32.mrf.mxu1  ;;  %v6290_v26 = vadd.f32 %v13234_v23, %v8914_v45  ;;  %v9822_v15 = vld [vmem:[#allocation3 + $0x20] ss:$36 sps:$4 sm:$0xff]  }
 0x3a8   : > { %v9026_v46 = vadd.f32 %v9025_v47, %v9024_v38  ;;  %7262 = vmatpush1.bf16.msra.mxu1 %v9850_v50  ;;  %v9831_v47 = vld [vmem:[#allocation3 + $0x1d0] ss:$36 sps:$4 sm:$0xff]  }
 0x3a9   : > { %v4644_v4 = vsel %vm10453_vm10, %v4639_v9, %v4643_v1  ;;  %v9816_v9 = vld [vmem:[#allocation3 + $0x448] ss:$36 sps:$4 sm:$0xff]   ;;  %v8922_v1 = vpop.f32.mrf.mxu0 }
 0x3aa   : > { %6623 = vmatmul.mubr.bf16.gmra.mxu0 %v9783_v24  ;;  %4708 = vst [vmem:[#allocation3 + $0x47c] sm:$0xf] %v4644_v4  ;;  %v9818_v24 = vld [vmem:[#allocation3 + $0x44c] ss:$36 sps:$4 sm:$0xff]   ;;  %v13249_v22 = vadd.f32 %v9026_v46, %v6290_v26  ;;  %v8923_v4 = vadd.f32 %v8922_v1, %v8921_v48  ;;  %v9855_v46 = vld [vmem:[#allocation10 + $0x64] ss:$16 sps:$4 sm:$0xff]  }
 0x3ab   : > { %6630 = vmatprep.mubr.bf16.mxu0 %v9792_v57  ;;  %v9812_v57 = vld [vmem:[#allocation3 + $0x3c0] ss:$36 sps:$4 sm:$0xff]   ;;  %7263 = vmatprep.subr.bf16.mxu1 %v9855_v46 }
 0x3ac   : > { %v6303_v59 = vadd.f32 %v13234_v23, %v8923_v4  ;;  %v9833_v1 = vld [vmem:[#allocation3 + $0x260] ss:$36 sps:$4 sm:$0xff]   ;;  %v9859_v4 = vld [vmem:[#allocation10 + $0xc8] ss:$16 sps:$4 sm:$0xff]  }
 0x3ae   : > { %6776 = vmatmul.mubr.bf16.gmra.mxu1 %v9786_v14  ;;  %v9027_v14 = vpop.f32.mrf.mxu1 }
 0x3af   : > { %6783 = vmatprep.mubr.bf16.mxu1 %v9795_v51  ;;  %v9819_v51 = vld [vmem:[#allocation3 + $0x408] ss:$36 sps:$4 sm:$0xff]  }
 0x3b2   : > { %6631 = vmatmul.mubr.bf16.gmra.mxu0 %v9790_v56  ;;  %v9028_v56 = vpop.f32.mrf.mxu1 }
 0x3b3   : > { %6638 = vmatprep.mubr.bf16.mxu0 %v9798_v21  ;;  %v8924_v21 = vpop.f32.mrf.mxu0 }
 0x3b5   : > { %v8925_v16 = vpop.f32.mrf.mxu0 }
 0x3b6   : > { %6784 = vmatmul.mubr.bf16.gmra.mxu1 %v9793_v31  ;;  %v6295_v31 = vadd.f32 %v13234_v23, %v8917_v20 }
 0x3b7   : > { %6791 = vmatprep.mubr.bf16.mxu1 %v9801_v27  ;;  %v9029_v27 = vadd.f32 %v9028_v56, %v9027_v14  ;;  %v8927_v53 = vpop.f32.mrf.mxu0  ;;  %v9861_v56 = vld [vmem:[#allocation10 + $0xcc] ss:$16 sps:$4 sm:$0xff]  }
 0x3b9   : > { %v13252_v44 = vadd.f32 %v9029_v27, %v6295_v31  ;;  %v8928_v7 = vpop.f32.mrf.mxu0 }
 0x3ba   : > { %6639 = vmatmul.mubr.bf16.gmra.mxu0 %v9796_v58  ;;  %v9826_v58 = vld [vmem:[#allocation3 + $0x68] ss:$36 sps:$4 sm:$0xff]   ;;  %v8929_v45 = vadd.f32 %v8928_v7, %v8927_v53  ;;  %v9836_v53 = vld [vmem:[#allocation3 + $0x338] ss:$36 sps:$4 sm:$0xff]  }
 0x3bb   : > { %6646 = vmatprep.mubr.bf16.mxu0 %v9805_v40  ;;  %v9030_v40 = vpop.f32.mrf.mxu1  ;;  %v8930_v20 = vpop.f32.mrf.mxu0 }
 0x3bc   : > { %v6311_v7 = vadd.f32 %v13234_v23, %v8929_v45 }
 0x3bd   : > { %v9031_v41 = vpop.f32.mrf.mxu1  ;;  %v8931_v38 = vpop.f32.mrf.mxu0 }
 0x3be   : > { %6792 = vmatmul.mubr.bf16.gmra.mxu1 %v9799_v33  ;;  %v8926_v33 = vadd.f32 %v8925_v16, %v8924_v21 }
 0x3bf   : > { %6799 = vmatprep.mubr.bf16.mxu1 %v9808_v0  ;;  %v9823_v0 = vld [vmem:[#allocation3 + $0x450] ss:$36 sps:$4 sm:$0xff]  }
 0x3c0   : > { %v6306_v48 = vadd.f32 %v13234_v23, %v8926_v33  ;;  %v9864_v33 = vld [vmem:[#allocation10 + $0x44] ss:$16 sps:$4 sm:$0xff]  }
 0x3c2   : > { %6647 = vmatmul.mubr.bf16.gmra.mxu0 %v9803_v18  ;;  %v6298_v18 = vadd.f32 %v13234_v23, %v8920_v12  ;;  %v9853_v12 = vld [vmem:[#allocation10 + $0x60] ss:$16 sps:$4 sm:$0xff]  }
 0x3c3   : > { %6654 = vmatprep.mubr.bf16.mxu0 %v9811_v8  ;;  %v9032_v8 = vadd.f32 %v9031_v41, %v9030_v40  ;;  %7264 = vmatpush1.bf16.msra.mxu1 %v9853_v12  ;;  %v9835_v40 = vld [vmem:[#allocation3 + $0x2f0] ss:$36 sps:$4 sm:$0xff]   ;;  %v9865_v41 = vld [vmem:[#allocation10 + $0xa8] ss:$16 sps:$4 sm:$0xff]  }
 0x3c4   : > { %7265 = vmatprep.subr.bf16.mxu1 %v9864_v33 }
 0x3c5   : > { %v13255_v19 = vadd.f32 %v9032_v8, %v6298_v18 }
 0x3c6   : > { %6800 = vmatmul.mubr.bf16.gmra.mxu1 %v9806_v13  ;;  %v14817_v13 = vmov 0  }
 0x3c7   : > { %6807 = vmatprep.mubr.bf16.mxu1 %v9814_v55  ;;  %v13258_v55 = vadd.f32 %v8931_v38, %v8930_v20  ;;  %v9868_v38 = vld [vmem:[#allocation10 + $0x88] ss:$16 sps:$4 sm:$0xff]  }
 0x3c9   : > { %v6314_v46 = vadd.f32 %v13234_v23, %v13258_v55  ;;  %v9873_v55 = vld [vmem:[#allocation10 + $0x24] ss:$16 sps:$4 sm:$0xff]  }
 0x3ca   : > { %6655 = vmatmul.mubr.bf16.gmra.mxu0 %v9809_v30  ;;  %v9033_v30 = vpop.f32.mrf.mxu1 }
 0x3cb   : > { %6662 = vmatprep.mubr.bf16.mxu0 %v9818_v24  ;;  %v9856_v24 = vld [vmem:[#allocation10 + $0xe8] ss:$16 sps:$4 sm:$0xff]  }
 0x3cc   : > { %v9034_v26 = vpop.f32.mrf.mxu1 }
 0x3cd   : > { %v9035_v17 = vadd.f32 %v9034_v26, %v9033_v30 }
 0x3ce   : > { %6808 = vmatmul.mubr.bf16.gmra.mxu1 %v9812_v57  ;;  %v9858_v57 = vld [vmem:[#allocation10 + $0xec] ss:$16 sps:$4 sm:$0xff]  }
 0x3cf   : > { %6815 = vmatprep.mubr.bf16.mxu1 %v9821_v42  ;;  %v9036_v42 = vpop.f32.mrf.mxu1  ;;  %7448 = vmatprep.subr.bf16.mxu0 %v9858_v57 }
 0x3d1   : > { %v8933_v21 = vpop.f32.mrf.mxu0 }
 0x3d2   : > { %6663 = vmatmul.mubr.bf16.gmra.mxu0 %v9816_v9  ;;  %v13261_v9 = vadd.f32 %v9035_v17, %v6303_v59 }
 0x3d3   : > { %9333 = vmatprep.mubr.bf16.mxu0 %v9822_v15  ;;  %v9037_v15 = vpop.f32.mrf.mxu1  ;;  %v8934_v31 = vpop.f32.mrf.mxu0 }
 0x3d4   : > { %v9038_v14 = vadd.f32 %v9037_v15, %v9036_v42  ;;  %v8935_v27 = vadd.f32 %v8934_v31, %v8933_v21  ;;  %v9838_v42 = vld [vmem:[#allocation3 + $0x3c8] ss:$36 sps:$4 sm:$0xff]   ;;  %v9871_v21 = vld [vmem:[#allocation10 + $0x20] ss:$16 sps:$4 sm:$0xff]  }
 0x3d5   : > { %v8936_v16 = vpop.f32.mrf.mxu0  ;;  %v9874_v31 = vld [vmem:[#allocation10 + $0x68] ss:$16 sps:$4 sm:$0xff]  }
 0x3d6   : > { %6816 = vmatmul.mubr.bf16.gmra.mxu1 %v9819_v51  ;;  %v13264_v51 = vadd.f32 %v9038_v14, %v6306_v48  ;;  %v9839_v48 = vld [vmem:[#allocation3 + $0x410] ss:$36 sps:$4 sm:$0xff]  }
 0x3d7   : > { %6823 = vmatprep.mubr.bf16.mxu1 %v9825_v63  ;;  %v9832_v63 = vld [vmem:[#allocation3 + $0x218] ss:$36 sps:$4 sm:$0xff]   ;;  %v8937_v18 = vpop.f32.mrf.mxu0 }
 0x3d8   : > { %v8938_v14 = vadd.f32 %v8937_v18, %v8936_v16  ;;  %v9840_v16 = vld [vmem:[#allocation3 + $0x458] ss:$36 sps:$4 sm:$0xff]  }
 0x3da   : > { %9334 = vmatmul.mubr.bf16.vlgmr.msra.gmra.mxu0 %v9826_v58  ;;  %v9834_v58 = vld [vmem:[#allocation3 + $0x2a8] ss:$36 sps:$4 sm:$0xff]  }
 0x3db   : > { %9337 = vmatprep.mubr.bf16.mxu0 %v9827_v54  ;;  %7449 = vmatpush1.bf16.msra.mxu0 %v9856_v24  ;;  %v9862_v54 = vld [vmem:[#allocation10 + $0x40] ss:$16 sps:$4 sm:$0xff]  }
 0x3dc   : > { %7450 = vmatprep.subr.bf16.mxu0 %v9861_v56  ;;  %7266 = vmatpush1.bf16.msra.mxu1 %v9862_v54  ;;  %v9876_v54 = vld [vmem:[#allocation10 + $0x6c] ss:$16 sps:$4 sm:$0xff]  }
 0x3dd   : > { %7267 = vmatprep.subr.bf16.mxu1 %v9873_v55  ;;  %v9880_v55 = vld [vmem:[#allocation10] ss:$16 sps:$4 sm:$0xff]  }
 0x3de   : > { %6824 = vmatmul.mubr.bf16.gmra.mxu1 %v9823_v0  ;;  %v9867_v0 = vld [vmem:[#allocation10 + $0xac] ss:$16 sps:$4 sm:$0xff]  }
 0x3df   : > { %7287 = vmatprep.mubr.bf16.mxu1 %v14817_v13  ;;  %7451 = vmatpush1.bf16.msra.mxu0 %v9859_v4 }
 0x3e0   : > { %7452 = vmatprep.subr.bf16.mxu0 %v9867_v0  ;;  %v9039_v8 = vpop.f32.mrf.mxu1  ;;  %v6322_v0 = vadd.f32 %v13234_v23, %v8938_v14  ;;  %7268 = vmatpush1.bf16.msra.mxu1 %v9871_v21 }
 0x3e2   : > { %9338 = vmatmul.mubr.bf16.gmra.mxu0 %v9828_v61  ;;  %v9040_v50 = vpop.f32.mrf.mxu1 }
 0x3e3   : > { %9341 = vmatprep.mubr.bf16.mxu0 %v9829_v37  ;;  %7453 = vmatpush1.bf16.msra.mxu0 %v9865_v41  ;;  %v9041_v20 = vadd.f32 %v9040_v50, %v9039_v8 }
 0x3e4   : > { %v9042_v37 = vpop.f32.mrf.mxu1 }
 0x3e5   : > { %v8939_v61 = vpop.f32.mrf.mxu0 }
 0x3e6   : > { %v9043_v26 = vpop.f32.mrf.mxu1 }
 0x3e7   : > { %v8940_v30 = vpop.f32.mrf.mxu0  ;;  %v9044_v24 = vadd.f32 %v9043_v26, %v9042_v37 }
 0x3e8   : > { %v8941_v12 = vadd.f32 %v8940_v30, %v8939_v61  ;;  %v9879_v30 = vld [vmem:[#allocation10 + $0x4c] ss:$16 sps:$4 sm:$0xff]  }
 0x3e9   : > { %v8942_v59 = vpop.f32.mrf.mxu0  ;;  %v13271_v17 = vadd.f32 %v9044_v24, %v6314_v46 }
 0x3ea   : > { %9342 = vmatmul.mubr.bf16.gmra.mxu0 %v9830_v5  ;;  %v9870_v5 = vld [vmem:[#allocation10 + $0x8c] ss:$16 sps:$4 sm:$0xff]   ;;  %v9045_v45 = vpop.f32.mrf.mxu1 }
 0x3eb   : > { %9345 = vmatprep.mubr.bf16.mxu0 %v9831_v47  ;;  %v13267_v47 = vadd.f32 %v9041_v20, %v6311_v7  ;;  %7454 = vmatprep.subr.bf16.mxu0 %v9870_v5  ;;  %v8943_v57 = vpop.f32.mrf.mxu0  ;;  %v6327_v7 = vadd.f32 %v13234_v23, %v8941_v12  ;;  %v9877_v5 = vld [vmem:[#allocation10 + $0x48] ss:$16 sps:$4 sm:$0xff]  }
 0x3ec   : > { %7455 = vmatpush1.bf16.msra.mxu0 %v9868_v38  ;;  %v9046_v15 = vpop.f32.mrf.mxu1  ;;  %v8944_v20 = vadd.f32 %v8943_v57, %v8942_v59 }
 0x3ed   : > { %7456 = vmatprep.subr.bf16.mxu0 %v9876_v54 }
 0x3ee   : > { %v9048_v56 = vpop.f32.mrf.mxu1 }
 0x3f0   : > { %v8945_v4 = vpop.f32.mrf.mxu0  ;;  %v9049_v33 = vpop.f32.mrf.mxu1  ;;  %7457 = vmatpush1.bf16.msra.mxu0 %v9874_v31  ;;  %v9882_v31 = vld [vmem:[#allocation10 + $0x4] ss:$16 sps:$4 sm:$0xff]  }
 0x3f1   : > { %v9050_v8 = vadd.f32 %v9049_v33, %v9048_v56  ;;  %7458 = vmatprep.subr.bf16.mxu0 %v9879_v30  ;;  %7269 = vmatprep.subr.bf16.mxu1 %v9882_v31 }
 0x3f2   : > { %9346 = vmatmul.mubr.bf16.gmra.mxu0 %v9832_v63  ;;  %v6319_v63 = vadd.f32 %v13234_v23, %v8935_v27  ;;  %7270 = vmatpush1.bf16.msra.mxu1 %v9880_v55 }
 0x3f3   : > { %9349 = vmatprep.mubr.bf16.mxu0 %v9833_v1  ;;  %v9047_v1 = vadd.f32 %v9046_v15, %v9045_v45 }
 0x3f4   : > { %7459 = vmatpush1.bf16.msra.mxu0 %v9877_v5 }
 0x3f5   : > { %v9051_v18 = vpop.f32.mrf.mxu1 }
 0x3fa   : > { %9350 = vmatmul.mubr.bf16.gmra.mxu0 %v9834_v58  ;;  %v13274_v58 = vadd.f32 %v9047_v1, %v6319_v63 }
 0x3fb   : > { %9353 = vmatprep.mubr.bf16.mxu0 %v9835_v40  ;;  %v8946_v40 = vpop.f32.mrf.mxu0 }
 0x3fc   : > { %v8947_v41 = vadd.f32 %v8946_v40, %v8945_v4  ;;  %v9883_v40 = vld [vmem:[#allocation10 + $0x28] ss:$16 sps:$4 sm:$0xff]  }
 0x3fd   : > { %v8948_v27 = vpop.f32.mrf.mxu0 }
 0x3fe   : > { %v6335_v14 = vadd.f32 %v13234_v23, %v8947_v41 }
 0x3ff   : > { %v8949_v50 = vpop.f32.mrf.mxu0 }
 0x400   : > { %v8950_v1 = vadd.f32 %v8949_v50, %v8948_v27 }
 0x401   : > { %v8951_v37 = vpop.f32.mrf.mxu0 }
 0x402   : > { %9354 = vmatmul.mubr.bf16.gmra.mxu0 %v9836_v53  ;;  %v13277_v53 = vadd.f32 %v9050_v8, %v6322_v0  ;;  %v9885_v0 = vld [vmem:[#allocation10 + $0x2c] ss:$16 sps:$4 sm:$0xff]  }
 0x403   : > { %9357 = vmatprep.mubr.bf16.mxu0 %v9837_v6  ;;  %v9052_v6 = vpop.f32.mrf.mxu1  ;;  %v8952_v46 = vpop.f32.mrf.mxu0  ;;  %7460 = vmatprep.subr.bf16.mxu0 %v9885_v0 }
 0x404   : > { %v9053_v61 = vadd.f32 %v9052_v6, %v9051_v18  ;;  %v8953_v45 = vadd.f32 %v8952_v46, %v8951_v37  ;;  %v6338_v18 = vadd.f32 %v13234_v23, %v8950_v1  ;;  %7461 = vmatpush1.bf16.msra.mxu0 %v9883_v40 }
 0x405   : > { %v9054_v38 = vpop.f32.mrf.mxu1 }
 0x406   : > { %v13281_v26 = vadd.f32 %v9053_v61, %v6327_v7 }
 0x407   : > { %v9055_v24 = vpop.f32.mrf.mxu1 }
 0x408   : > { %v9056_v15 = vadd.f32 %v9055_v24, %v9054_v38  ;;  %v6343_v38 = vadd.f32 %v13234_v23, %v8953_v45 }
 0x409   : > { %v9057_v12 = vpop.f32.mrf.mxu1 }
 0x40a   : > { %9358 = vmatmul.mubr.bf16.gmra.mxu0 %v9838_v42  ;;  %v6330_v42 = vadd.f32 %v13234_v23, %v8944_v20 }
 0x40b   : > { %9361 = vmatprep.mubr.bf16.mxu0 %v9839_v48  ;;  %v8954_v48 = vpop.f32.mrf.mxu0  ;;  %v9058_v63 = vpop.f32.mrf.mxu1 }
 0x40c   : > { %v13284_v59 = vadd.f32 %v9056_v15, %v6330_v42  ;;  %v9059_v4 = vadd.f32 %v9058_v63, %v9057_v12  ;;  %v9886_v15 = vld [vmem:[#allocation10 + $0x8] ss:$16 sps:$4 sm:$0xff]   ;;  %v9888_v12 = vld [vmem:[#allocation10 + $0xc] ss:$16 sps:$4 sm:$0xff]  }
 0x40d   : > { %v8955_v57 = vpop.f32.mrf.mxu0  ;;  %v9060_v21 = vpop.f32.mrf.mxu1  ;;  %7462 = vmatprep.subr.bf16.mxu0 %v9888_v12 }
 0x40e   : > { %v13287_v54 = vadd.f32 %v9059_v4, %v6335_v14  ;;  %v8956_v5 = vadd.f32 %v8955_v57, %v8954_v48  ;;  %7463 = vmatpush1.bf16.msra.mxu0 %v9886_v15 }
 0x40f   : > { %v9061_v8 = vpop.f32.mrf.mxu1 }
 0x410   : > { %v9085_v56 = vpop.f32.mrf.mxu0  ;;  %v9062_v6 = vadd.f32 %v9061_v8, %v9060_v21  ;;  %v6346_v4 = vadd.f32 %v13234_v23, %v8956_v5 }
 0x412   : > { %9362 = vmatmul.mubr.bf16.gmra.mxu0 %v9840_v16  ;;  %v9086_v33 = vpop.f32.mrf.mxu0  ;;  %v13293_v50 = vadd.f32 %v9062_v6, %v6338_v18 }
 0x413   : > { %7480 = vmatprep.mubr.bf16.mxu0 %v14817_v13  ;;  %v9087_v16 = vadd.f32 %v9086_v33, %v9085_v56 }
 0x414   : > { %v9088_v7 = vpop.f32.mrf.mxu0  ;;  %v9063_v41 = vpop.f32.mrf.mxu1 }
 0x415   : > { %v13291_v27 = vadd.f32 %v9087_v16, %v13003_v36 }
 0x416   : > { %v9089_v20 = vpop.f32.mrf.mxu0  ;;  %v9064_v61 = vpop.f32.mrf.mxu1 }
 0x417   : > { %v9090_v37 = vadd.f32 %v9089_v20, %v9088_v7  ;;  %v9065_v30 = vadd.f32 %v9064_v61, %v9063_v41 }
 0x418   : > { %v9066_v24 = vpop.f32.mrf.mxu1 }
 0x419   : > { %v13297_v42 = vadd.f32 %v9090_v37, %v13007_v52  ;;  %v13299_v63 = vadd.f32 %v9065_v30, %v6343_v38 }
 0x41a   : > { %v9091_v46 = vpop.f32.mrf.mxu0  ;;  %v9067_v14 = vpop.f32.mrf.mxu1 }
 0x41b   : > { %v9068_v56 = vadd.f32 %v9067_v14, %v9066_v24 }
 0x41c   : > { %v9092_v36 = vpop.f32.mrf.mxu0 }
 0x41d   : > { %v9093_v1 = vadd.f32 %v9092_v36, %v9091_v46  ;;  %v13307_v52 = vadd.f32 %v9068_v56, %v6346_v4 }
 0x41e   : > { %v9094_v21 = vpop.f32.mrf.mxu0 }
 0x41f   : > { %v13302_v45 = vpop.f32.mrf.mxu1  ;;  %v13305_v48 = vadd.f32 %v9093_v1, %v13015_v29 }
 0x420   : > { %v9095_v57 = vpop.f32.mrf.mxu0 }
 0x421   : > { %v13309_v55 = vpop.f32.mrf.mxu1  ;;  %v9096_v31 = vadd.f32 %v9095_v57, %v9094_v21 }
 0x423   : > { %v13311_v33 = vpop.f32.mrf.mxu1  ;;  %v13314_v0 = vadd.f32 %v9096_v31, %v13018_v34 }
 0x424   : > { %v9097_v40 = vpop.f32.mrf.mxu0 }
 0x425   : > { %v13316_v8 = vpop.f32.mrf.mxu1 }
 0x426   : > { %v9098_v23 = vpop.f32.mrf.mxu0 }
 0x427   : > { %v9099_v16 = vadd.f32 %v9098_v23, %v9097_v40 }
 0x428   : > { %v9100_v18 = vpop.f32.mrf.mxu0 }
 0x429   : > { %v13318_v6 = vpop.f32.mrf.mxu1  ;;  %v13321_v29 = vadd.f32 %v9099_v16, %v13023_v60 }
 0x42a   : > { %v9101_v7 = vpop.f32.mrf.mxu0 }
 0x42b   : > { %v13323_v41 = vpop.f32.mrf.mxu1  ;;  %v9102_v20 = vadd.f32 %v9101_v7, %v9100_v18 }
 0x42d   : > { %v13325_v37 = vpop.f32.mrf.mxu1  ;;  %v13328_v34 = vadd.f32 %v9102_v20, %v13028_v39 }
 0x42f   : > { %v13330_v5 = vpop.f32.mrf.mxu1 }
 0x430   : > { %v9103_v61 = vpop.f32.mrf.mxu0 }
 0x432   : > { %v9104_v38 = vpop.f32.mrf.mxu0 }
 0x433   : > { %v9105_v30 = vadd.f32 %v9104_v38, %v9103_v61 }
 0x434   : > { %v9106_v46 = vpop.f32.mrf.mxu0 }
 0x435   : > { %v13335_v60 = vadd.f32 %v9105_v30, %v13037_v28 }
 0x436   : > { %v13332_v24 = vpop.f32.mrf.mxu1  ;;  %v9107_v15 = vpop.f32.mrf.mxu0 }
 0x437   : > { %v9108_v36 = vadd.f32 %v9107_v15, %v9106_v46 }
 0x438   : > { %v13337_v12 = vpop.f32.mrf.mxu1 }
 0x439   : > { %v13342_v39 = vadd.f32 %v9108_v36, %v13044_v35 }
 0x43a   : > { %v9109_v14 = vpop.f32.mrf.mxu0  ;;  %v13339_v1 = vpop.f32.mrf.mxu1 }
 0x43c   : > { %v9110_v4 = vpop.f32.mrf.mxu0  ;;  %v13344_v56 = vpop.f32.mrf.mxu1 }
 0x43d   : > { %v9111_v21 = vadd.f32 %v9110_v4, %v9109_v14 }
 0x43e   : > { %v9112_v57 = vpop.f32.mrf.mxu0  ;;  %v13346_v31 = vpop.f32.mrf.mxu1 }
 0x43f   : > { %v13349_v28 = vadd.f32 %v9111_v21, %v13108_v32 }
 0x440   : > { %v9113_v40 = vpop.f32.mrf.mxu0  ;;  %v13351_v23 = vpop.f32.mrf.mxu1 }
 0x441   : > { %14818 = vst [vmem:[#allocation30_spill] sm:$0xff] %v13349_v28  ;;  %v9114_v16 = vadd.f32 %v9113_v40, %v9112_v57 }
 0x442   : > { %v9115_v18 = vpop.f32.mrf.mxu0  ;;  %v13353_v7 = vpop.f32.mrf.mxu1 }
 0x443   : > { %v13356_v35 = vadd.f32 %v9114_v16, %v13122_v25 }
 0x444   : > { %v9116_v20 = vpop.f32.mrf.mxu0  ;;  %v13358_v61 = vpop.f32.mrf.mxu1 }
 0x445   : > { %14819 = vst [vmem:[#allocation29_spill] sm:$0xff] %v13356_v35  ;;  %v9117_v38 = vadd.f32 %v9116_v20, %v9115_v18 }
 0x446   : > { %v9118_v30 = vpop.f32.mrf.mxu0  ;;  %v13360_v46 = vpop.f32.mrf.mxu1 }
 0x447   : > { %v13363_v32 = vadd.f32 %v9117_v38, %v13188_v11 }
 0x448   : > { %v9119_v15 = vpop.f32.mrf.mxu0  ;;  %v13365_v36 = vpop.f32.mrf.mxu1 }
 0x449   : > { %14820 = vst [vmem:[#allocation60_spill] sm:$0xff] %v13363_v32  ;;  %v9120_v14 = vadd.f32 %v9119_v15, %v9118_v30 }
 0x44a   : > { %v9121_v4 = vpop.f32.mrf.mxu0  ;;  %v13367_v21 = vpop.f32.mrf.mxu1 }
 0x44b   : > { %14821 = vst [vmem:[#allocation55_spill] sm:$0xff] %v13367_v21  ;;  %v13370_v25 = vadd.f32 %v9120_v14, %v13203_v2 }
 0x44c   : > { %v9122_v57 = vpop.f32.mrf.mxu0  ;;  %v13372_v40 = vpop.f32.mrf.mxu1 }
 0x44d   : > { %14822 = vst [vmem:[#allocation26_spill] sm:$0xff] %v13370_v25  ;;  %14823 = vst [vmem:[#allocation49_spill] sm:$0xff] %v13372_v40  ;;  %v9123_v16 = vadd.f32 %v9122_v57, %v9121_v4 }
 0x44e   : > { %v9124_v18 = vpop.f32.mrf.mxu0  ;;  %v13374_v20 = vpop.f32.mrf.mxu1 }
 0x44f   : > { %v13377_v11 = vadd.f32 %v9123_v16, %v13218_v10 }
 0x450   : > { %v9125_v38 = vpop.f32.mrf.mxu0  ;;  %v13379_v35 = vpop.f32.mrf.mxu1 }
 0x451   : > { %14824 = vst [vmem:[#allocation36_spill] sm:$0xff] %v13377_v11  ;;  %v9126_v30 = vadd.f32 %v9125_v38, %v9124_v18 }
 0x452   : > { %v9127_v15 = vpop.f32.mrf.mxu0  ;;  %v13381_v28 = vpop.f32.mrf.mxu1 }
 0x453   : > { %v13384_v2 = vadd.f32 %v9126_v30, %v13223_v62 }
 0x454   : > { %v9128_v14 = vpop.f32.mrf.mxu0  ;;  %v13386_v25 = vpop.f32.mrf.mxu1 }
 0x455   : > { %14825 = vst [vmem:[#allocation66_spill] sm:$0xff] %v13384_v2  ;;  %v9129_v4 = vadd.f32 %v9128_v14, %v9127_v15 }
 0x456   : > { %v9130_v57 = vpop.f32.mrf.mxu0  ;;  %v13388_v32 = vpop.f32.mrf.mxu1 }
 0x457   : > { %v13391_v10 = vadd.f32 %v9129_v4, %v13237_v49 }
 0x458   : > { %v9131_v16 = vpop.f32.mrf.mxu0  ;;  %v13393_v11 = vpop.f32.mrf.mxu1 }
 0x459   : > { %14826 = vst [vmem:[#allocation92_spill] sm:$0xff] %v13391_v10  ;;  %14827 = vst [vmem:[#allocation65_spill] sm:$0xff] %v13393_v11  ;;  %v9132_v18 = vadd.f32 %v9131_v16, %v9130_v57 }
 0x45a   : > { %v9133_v38 = vpop.f32.mrf.mxu0  ;;  %v13395_v40 = vpop.f32.mrf.mxu1 }
 0x45b   : > { %14828 = vst [vmem:[#allocation78_spill] sm:$0xff] %v13395_v40  ;;  %v13398_v62 = vadd.f32 %v9132_v18, %v13240_v3 }
 0x45c   : > { %v9134_v30 = vpop.f32.mrf.mxu0  ;;  %v13400_v2 = vpop.f32.mrf.mxu1 }
 0x45d   : > { %14829 = vst [vmem:[#allocation74_spill] sm:$0xff] %v13398_v62  ;;  %14830 = vst [vmem:[#allocation69_spill] sm:$0xff] %v13400_v2  ;;  %v9135_v15 = vadd.f32 %v9134_v30, %v9133_v38 }
 0x45e   : > { %v9136_v14 = vpop.f32.mrf.mxu0  ;;  %v13402_v21 = vpop.f32.mrf.mxu1 }
 0x45f   : > { %v13405_v49 = vadd.f32 %v9135_v15, %v13246_v43 }
 0x460   : > { %v9137_v4 = vpop.f32.mrf.mxu0  ;;  %v13407_v10 = vpop.f32.mrf.mxu1 }
 0x461   : > { %14831 = vst [vmem:[#allocation73_spill] sm:$0xff] %v13405_v49  ;;  %v9138_v57 = vadd.f32 %v9137_v4, %v9136_v14 }
 0x462   : > { %v9139_v16 = vpop.f32.mrf.mxu0  ;;  %v13409_v11 = vpop.f32.mrf.mxu1 }
 0x463   : > { %v13412_v3 = vadd.f32 %v9138_v57, %v13249_v22 }
 0x464   : > { %v9140_v18 = vpop.f32.mrf.mxu0  ;;  %v13414_v62 = vpop.f32.mrf.mxu1 }
 0x465   : > { %14832 = vst [vmem:[#allocation84_spill] sm:$0xff] %v13412_v3  ;;  %14833 = vst [vmem:[#allocation80_spill] sm:$0xff] %v13414_v62  ;;  %v9141_v38 = vadd.f32 %v9140_v18, %v9139_v16 }
 0x466   : > { %v9142_v30 = vpop.f32.mrf.mxu0  ;;  %v13416_v2 = vpop.f32.mrf.mxu1 }
 0x467   : > { %v13419_v43 = vadd.f32 %v9141_v38, %v13252_v44 }
 0x468   : > { %v9143_v15 = vpop.f32.mrf.mxu0  ;;  %v13421_v49 = vpop.f32.mrf.mxu1 }
 0x469   : > { %14834 = vst [vmem:[#allocation83_spill] sm:$0xff] %v13419_v43  ;;  %14835 = vst [vmem:[#allocation94_spill] sm:$0xff] %v13421_v49  ;;  %v9144_v14 = vadd.f32 %v9143_v15, %v9142_v30 }
 0x46a   : > { %v9145_v4 = vpop.f32.mrf.mxu0  ;;  %v13423_v40 = vpop.f32.mrf.mxu1 }
 0x46b   : > { %14836 = vst [vmem:[#allocation93_spill] sm:$0xff] %v13423_v40  ;;  %v13426_v22 = vadd.f32 %v9144_v14, %v13255_v19 }
 0x46c   : > { %v9146_v57 = vpop.f32.mrf.mxu0  ;;  %v13428_v3 = vpop.f32.mrf.mxu1 }
 0x46d   : > { %14837 = vst [vmem:[#allocation91_spill] sm:$0xff] %v13426_v22  ;;  %14838 = vst [vmem:[#allocation103_spill] sm:$0xff] %v13428_v3  ;;  %v9147_v16 = vadd.f32 %v9146_v57, %v9145_v4 }
 0x46e   : > { %v9148_v18 = vpop.f32.mrf.mxu0  ;;  %v13430_v62 = vpop.f32.mrf.mxu1 }
 0x46f   : > { %v13433_v44 = vadd.f32 %v9147_v16, %v13261_v9 }
 0x470   : > { %v9149_v38 = vpop.f32.mrf.mxu0  ;;  %v13435_v43 = vpop.f32.mrf.mxu1 }
 0x471   : > { %14839 = vst [vmem:[#allocation126_spill] sm:$0xff] %v13433_v44  ;;  %v9150_v30 = vadd.f32 %v9149_v38, %v9148_v18 }
 0x472   : > { %v9151_v15 = vpop.f32.mrf.mxu0  ;;  %v13437_v49 = vpop.f32.mrf.mxu1 }
 0x473   : > { %v13440_v19 = vadd.f32 %v9150_v30, %v13264_v51 }
 0x474   : > { %v9152_v14 = vpop.f32.mrf.mxu0  ;;  %v13442_v22 = vpop.f32.mrf.mxu1 }
 0x475   : > { %14840 = vst [vmem:[#allocation137_spill] sm:$0xff] %v13440_v19  ;;  %14841 = vst [vmem:[#allocation106_spill] sm:$0xff] %v13442_v22  ;;  %v9153_v4 = vadd.f32 %v9152_v14, %v9151_v15 }
 0x476   : > { %v9154_v57 = vpop.f32.mrf.mxu0  ;;  %v13444_v3 = vpop.f32.mrf.mxu1 }
 0x477   : > { %v13447_v9 = vadd.f32 %v9153_v4, %v13267_v47 }
 0x478   : > { %v9155_v16 = vpop.f32.mrf.mxu0  ;;  %v13449_v44 = vpop.f32.mrf.mxu1 }
 0x479   : > { %14842 = vst [vmem:[#allocation124_spill] sm:$0xff] %v13447_v9  ;;  %14843 = vst [vmem:[#allocation121_spill] sm:$0xff] %v13449_v44  ;;  %v9156_v18 = vadd.f32 %v9155_v16, %v9154_v57 }
 0x47a   : > { %v9157_v38 = vpop.f32.mrf.mxu0  ;;  %v13451_v40 = vpop.f32.mrf.mxu1 }
 0x47b   : > { %14844 = vst [vmem:[#allocation109_spill] sm:$0xff] %v13451_v40  ;;  %v13454_v51 = vadd.f32 %v9156_v18, %v13271_v17 }
 0x47c   : > { %v9158_v30 = vpop.f32.mrf.mxu0  ;;  %v13456_v22 = vpop.f32.mrf.mxu1 }
 0x47d   : > { %14845 = vst [vmem:[#allocation102_spill] sm:$0xff] %v13454_v51  ;;  %v9159_v19 = vadd.f32 %v9158_v30, %v9157_v38 }
 0x47e   : > { %v9160_v15 = vpop.f32.mrf.mxu0  ;;  %v13461_v9 = vpop.f32.mrf.mxu1 }
 0x47f   : > { %v13459_v14 = vadd.f32 %v9159_v19, %v13274_v58 }
 0x480   : > { %v9161_v47 = vpop.f32.mrf.mxu0  ;;  %v13466_v17 = vpop.f32.mrf.mxu1 }
 0x481   : > { %14846 = vst [vmem:[#allocation75_spill] sm:$0xff] %v13459_v14  ;;  %v9162_v4 = vadd.f32 %v9161_v47, %v9160_v15 }
 0x482   : > { %v9163_v44 = vpop.f32.mrf.mxu0  ;;  %v13471_v58 = vpop.f32.mrf.mxu1 }
 0x483   : > { %v13464_v57 = vadd.f32 %v9162_v4, %v13277_v53 }
 0x484   : > { %v9164_v16 = vpop.f32.mrf.mxu0  ;;  %v13476_v53 = vpop.f32.mrf.mxu1 }
 0x485   : > { %14847 = vst [vmem:[#allocation33_spill] sm:$0xff] %v13464_v57  ;;  %v9165_v40 = vadd.f32 %v9164_v16, %v9163_v44 }
 0x486   : > { %v9166_v18 = vpop.f32.mrf.mxu0 }
 0x487   : > { %v13469_v38 = vadd.f32 %v9165_v40, %v13281_v26  ;;  %v13481_v26 = vpop.f32.mrf.mxu1 }
 0x488   : > { %v9167_v30 = vpop.f32.mrf.mxu0 }
 0x489   : > { %14848 = vst [vmem:[#allocation51_spill] sm:$0xff] %v13469_v38  ;;  %v9168_v51 = vadd.f32 %v9167_v30, %v9166_v18 }
 0x48a   : > { %v9169_v19 = vpop.f32.mrf.mxu0 }
 0x48b   : > { %v13474_v15 = vadd.f32 %v9168_v51, %v13284_v59  ;;  %v13486_v59 = vpop.f32.mrf.mxu1 }
 0x48c   : > { %v9170_v47 = vpop.f32.mrf.mxu0 }
 0x48d   : > { %v9171_v14 = vadd.f32 %v9170_v47, %v9169_v19  ;;  %v9205_v19 = vadd.f32 %v13323_v41, %v13318_v6 }
 0x48e   : > { %v9172_v4 = vpop.f32.mrf.mxu0 }
 0x48f   : > { %v13479_v44 = vadd.f32 %v9171_v14, %v13287_v54  ;;  %v9199_v14 = vadd.f32 %v13309_v55, %v13302_v45 }
 0x490   : > { %v9173_v16 = vpop.f32.mrf.mxu0 }
 0x491   : > { %v9174_v57 = vadd.f32 %v9173_v16, %v9172_v4  ;;  %v9208_v4 = vadd.f32 %v13330_v5, %v13325_v37  ;;  %v9217_v5 = vadd.f32 %v13351_v23, %v13346_v31 }
 0x492   : > { %v9175_v40 = vpop.f32.mrf.mxu0 }
 0x493   : > { %v13484_v18 = vadd.f32 %v9174_v57, %v13293_v50  ;;  %v13497_v57 = vpop.f32.mrf.mxu1  ;;  %v6717_v45 = vadd.f32 %v9208_v4, %v13314_v0 }
 0x494   : > { %v9176_v30 = vpop.f32.mrf.mxu0 }
 0x495   : > { %v9177_v38 = vadd.f32 %v9176_v30, %v9175_v40  ;;  %v9202_v40 = vadd.f32 %v13316_v8, %v13311_v33  ;;  %v13507_v55 = vpop.f32.mrf.mxu1  ;;  %v9220_v8 = vadd.f32 %v13358_v61, %v13353_v7 }
 0x496   : > { %v9178_v51 = vpop.f32.mrf.mxu0 }
 0x497   : > { %v13491_v47 = vadd.f32 %v9177_v38, %v13299_v63  ;;  %v6714_v63 = vadd.f32 %v9205_v19, %v13305_v48  ;;  %v6706_v38 = vadd.f32 %v9199_v14, %v13291_v27  ;;  %v6709_v33 = vadd.f32 %v9202_v40, %v13297_v42  ;;  %v13518_v4 = vpop.f32.mrf.mxu1 }
 0x498   : > { %v9179_v54 = vpop.f32.mrf.mxu0  ;;  %v9214_v14 = vadd.f32 %v13344_v56, %v13339_v1  ;;  %v6730_v42 = vadd.f32 %v9217_v5, %v13335_v60  ;;  %v6733_v7 = vadd.f32 %v9220_v8, %v13342_v39  ;;  %v9229_v56 = vadd.f32 %v13379_v35, %v13374_v20  ;;  %v14849_v5 = vld [vmem:[#allocation55_spill] sm:$0xff]  ;;  %v14850_v35 = vld [vmem:[#allocation49_spill] sm:$0xff] }
 0x499   : > { %v9180_v50 = vadd.f32 %v9179_v54, %v9178_v51  ;;  %v13523_v61 = vpop.f32.mrf.mxu1  ;;  %v9223_v60 = vadd.f32 %v13365_v36, %v13360_v46  ;;  %v9226_v20 = vadd.f32 %v14850_v35, %v14849_v5  ;;  %v14851_v36 = vld [vmem:[#allocation60_spill] sm:$0xff] }
 0x49a   : > { %v9335_v16 = vpop.f32.mrf.mxu0  ;;  %v6725_v1 = vadd.f32 %v9214_v14, %v13328_v34 }
 0x49b   : > { %v13502_v30 = vadd.f32 %v9180_v50, %v13307_v52  ;;  %v6875_v41 = vadd.f32 %v9335_v16, %v6714_v63  ;;  %v9211_v52 = vadd.f32 %v13337_v12, %v13332_v24 }
 0x49c   : > { %v6866_v6 = vpop.f32.mrf.mxu0 }
 0x49d   : > { %v6867_v51 = vadd.f32 %v6866_v6, %v6706_v38  ;;  %v6995_v27 = vmax.f32 %v6875_v41, 0.0  ;;  %v6722_v63 = vadd.f32 %v9211_v52, %v13321_v29  ;;  %v9232_v29 = vadd.f32 %v13386_v25, %v13381_v28  ;;  %v14853_v25 = vld [vmem:[#allocation26_spill] sm:$0xff] }
 0x49e   : > { %v9336_v37 = vpop.f32.mrf.mxu0 }
 0x49f   : > { %v6878_v54 = vadd.f32 %v9336_v37, %v6717_v45  ;;  %v6993_v23 = vmax.f32 %v6867_v51, 0.0  ;;  %v13536_v51 = vpop.f32.mrf.mxu1  ;;  %v6749_v14 = vadd.f32 %v9232_v29, %v14853_v25 }
 0x4a0   : > { %v6869_v48 = vpop.f32.mrf.mxu0 }
 0x4a1   : > { %v6996_v19 = vmax.f32 %v6878_v54, 0.0  ;;  %v6870_v0 = vadd.f32 %v6869_v48, %v6709_v33  ;;  %v6746_v48 = vadd.f32 %v9229_v56, %v14851_v36 }
 0x4a2   : > { %v9339_v31 = vpop.f32.mrf.mxu0 }
 0x4a3   : > { %v7026_v50 = vpack.c.bf16 %v6996_v19, %v6995_v27  ;;  %v6994_v16 = vmax.f32 %v6870_v0, 0.0  ;;  %v6891_v12 = vadd.f32 %v9339_v31, %v6730_v42  ;;  %v14852_v0 = vld [vmem:[#allocation30_spill] sm:$0xff]  ;;  %v13543_v31 = vpop.f32.mrf.mxu1 }
 0x4a4   : > { %v6882_v40 = vpop.f32.mrf.mxu0  ;;  %v6738_v28 = vadd.f32 %v9223_v60, %v14852_v0 }
 0x4a5   : > { %v7025_v24 = vpack.c.bf16 %v6994_v16, %v6993_v23  ;;  %v6883_v41 = vadd.f32 %v6882_v40, %v6722_v63  ;;  %v6999_v39 = vmax.f32 %v6891_v12, 0.0  ;;  %v14854_v16 = vld [vmem:[#allocation29_spill] sm:$0xff]  ;;  %v9241_v40 = vadd.f32 %v13407_v10, %v13402_v21  ;;  %v13556_v29 = vpop.f32.mrf.mxu1 }
 0x4a6   : > { %v9340_v6 = vpop.f32.mrf.mxu0  ;;  %v6741_v42 = vadd.f32 %v9226_v20, %v14854_v16  ;;  %v14855_v63 = vld [vmem:[#allocation65_spill] sm:$0xff] }
 0x4a7   : > { %v6894_v38 = vadd.f32 %v9340_v6, %v6733_v7  ;;  %7288 = vmatmul.mubr.bf16.vlgmr.msra.gmra.mxu1 %v7025_v24  ;;  %7481 = vmatmul.mubr.bf16.vlgmr.msra.gmra.mxu0 %v7025_v24  ;;  %v6997_v33 = vmax.f32 %v6883_v41, 0.0  ;;  %v9235_v7 = vadd.f32 %v14855_v63, %v13388_v32  ;;  %v14858_v21 = vld [vmem:[#allocation69_spill] sm:$0xff] }
 0x4a8   : > { %v6885_v45 = vpop.f32.mrf.mxu0  ;;  %7297 = vmatprep.mubr.bf16.mxu1 %v14817_v13  ;;  %7490 = vmatprep.mubr.bf16.mxu0 %v14817_v13 }
 0x4a9   : > { %v7000_v34 = vmax.f32 %v6894_v38, 0.0  ;;  %v6886_v37 = vadd.f32 %v6885_v45, %v6725_v1  ;;  %v14856_v1 = vld [vmem:[#allocation80_spill] sm:$0xff]  ;;  %v14857_v45 = vld [vmem:[#allocation78_spill] sm:$0xff] }
 0x4aa   : > { %v9343_v54 = vpop.f32.mrf.mxu0  ;;  %v9244_v56 = vadd.f32 %v14856_v1, %v13409_v11  ;;  %v9238_v10 = vadd.f32 %v14858_v21, %v14857_v45  ;;  %v14860_v11 = vld [vmem:[#allocation36_spill] sm:$0xff] }
 0x4ab   : > { %v13538_v52 = vpack.c.bf16 %v7000_v34, %v6999_v39  ;;  %v6998_v46 = vmax.f32 %v6886_v37, 0.0  ;;  %v6907_v19 = vadd.f32 %v9343_v54, %v6746_v48  ;;  %v14859_v37 = vld [vmem:[#allocation92_spill] sm:$0xff]  ;;  %v13565_v48 = vpop.f32.mrf.mxu1 }
 0x4ac   : > { %v6898_v8 = vpop.f32.mrf.mxu0  ;;  %v6762_v5 = vadd.f32 %v9241_v40, %v14859_v37  ;;  %v14864_v40 = vld [vmem:[#allocation106_spill] sm:$0xff] }
 0x4ad   : > { %v7027_v27 = vpack.c.bf16 %v6998_v46, %v6997_v33  ;;  %v6899_v24 = vadd.f32 %v6898_v8, %v6738_v28  ;;  %v7003_v41 = vmax.f32 %v6907_v19, 0.0  ;;  %v6754_v33 = vadd.f32 %v9235_v7, %v14860_v11  ;;  %v14861_v46 = vld [vmem:[#allocation74_spill] sm:$0xff]  ;;  %v13578_v1 = vpop.f32.mrf.mxu1 }
 0x4ae   : > { %v9344_v23 = vpop.f32.mrf.mxu0  ;;  %v6765_v36 = vadd.f32 %v9244_v56, %v14861_v46  ;;  %v14862_v19 = vld [vmem:[#allocation66_spill] sm:$0xff]  ;;  %v9253_v28 = vadd.f32 %v13435_v43, %v13430_v62  ;;  %v14866_v62 = vld [vmem:[#allocation103_spill] sm:$0xff]  ;;  %v9265_v11 = vadd.f32 %v13466_v17, %v13461_v9  ;;  %v14872_v17 = vld [vmem:[#allocation109_spill] sm:$0xff] }
 0x4af   : > { %v6910_v12 = vadd.f32 %v9344_v23, %v6749_v14  ;;  %7298 = vmatmul.mubr.bf16.gmra.mxu1 %v7026_v50  ;;  %7491 = vmatmul.mubr.bf16.gmra.mxu0 %v7026_v50  ;;  %v7001_v39 = vmax.f32 %v6899_v24, 0.0  ;;  %v6757_v0 = vadd.f32 %v9238_v10, %v14862_v19  ;;  %v14863_v23 = vld [vmem:[#allocation94_spill] sm:$0xff]  ;;  %v9256_v24 = vadd.f32 %v14864_v40, %v13437_v49  ;;  %v14868_v49 = vld [vmem:[#allocation73_spill] sm:$0xff]  ;;  %v13587_v37 = vpop.f32.mrf.mxu1  ;;  %v14873_v40 = vld [vmem:[#allocation124_spill] sm:$0xff] }
 0x4b0   : > { %v6901_v6 = vpop.f32.mrf.mxu0  ;;  %7307 = vmatprep.mubr.bf16.mxu1 %v14817_v13  ;;  %7500 = vmatprep.mubr.bf16.mxu0 %v14817_v13  ;;  %v9247_v16 = vadd.f32 %v14863_v23, %v13416_v2 }
 0x4b1   : > { %v7004_v38 = vmax.f32 %v6910_v12, 0.0  ;;  %v6902_v60 = vadd.f32 %v6901_v6, %v6741_v42  ;;  %v14865_v6 = vld [vmem:[#allocation93_spill] sm:$0xff]  ;;  %v9287_v23 = vpop.f32.mrf.mxu1 }
 0x4b2   : > { %v9347_v50 = vpop.f32.mrf.mxu0  ;;  %v9250_v43 = vadd.f32 %v14866_v62, %v14865_v6  ;;  %v14874_v6 = vld [vmem:[#allocation126_spill] sm:$0xff] }
 0x4b3   : > { %v13558_v34 = vpack.c.bf16 %v7004_v38, %v7003_v41  ;;  %v7002_v32 = vmax.f32 %v6902_v60, 0.0  ;;  %v6923_v54 = vadd.f32 %v9347_v50, %v6762_v5  ;;  %v14867_v38 = vld [vmem:[#allocation83_spill] sm:$0xff]  ;;  %v6770_v50 = vadd.f32 %v9247_v16, %v14868_v49 }
 0x4b4   : > { %v6914_v35 = vpop.f32.mrf.mxu0  ;;  %v6778_v60 = vadd.f32 %v9253_v28, %v14867_v38  ;;  %v9280_v49 = vadd.f32 %v13543_v31, %v13536_v51 }
 0x4b5   : > { %v13561_v20 = vpack.c.bf16 %v7002_v32, %v7001_v39  ;;  %v6915_v25 = vadd.f32 %v6914_v35, %v6754_v33  ;;  %v7007_v12 = vmax.f32 %v6923_v54, 0.0  ;;  %v14869_v39 = vld [vmem:[#allocation91_spill] sm:$0xff]  ;;  %v14870_v35 = vld [vmem:[#allocation84_spill] sm:$0xff] }
 0x4b6   : > { %v9348_v8 = vpop.f32.mrf.mxu0  ;;  %v6781_v32 = vadd.f32 %v9256_v24, %v14869_v39  ;;  %v6773_v54 = vadd.f32 %v9250_v43, %v14870_v35  ;;  %v6794_v24 = vadd.f32 %v9265_v11, %v14873_v40  ;;  %v9288_v43 = vpop.f32.mrf.mxu1  ;;  %v6813_v51 = vadd.f32 %v9280_v49, %v13474_v15  ;;  %v9900_v49 = vld [vmem:[%s10341_s29] sm:$0xff] }
 0x4b7   : > { %v6926_v14 = vadd.f32 %v9348_v8, %v6765_v36  ;;  %7308 = vmatmul.mubr.bf16.gmra.mxu1 %v7027_v27  ;;  %7501 = vmatmul.mubr.bf16.gmra.mxu0 %v7027_v27  ;;  %v7005_v56 = vmax.f32 %v6915_v25, 0.0  ;;  %v14871_v36 = vld [vmem:[#allocation121_spill] sm:$0xff] }
 0x4b8   : > { %v6917_v42 = vpop.f32.mrf.mxu0  ;;  %7317 = vmatprep.mubr.bf16.mxu1 %v14817_v13  ;;  %7510 = vmatprep.mubr.bf16.mxu0 %v14817_v13  ;;  %v9259_v8 = vadd.f32 %v14871_v36, %v13444_v3  ;;  %v14878_v36 = vld [vmem:[#allocation75_spill] sm:$0xff] }
 0x4b9   : > { %v7008_v63 = vmax.f32 %v6926_v14, 0.0  ;;  %v6918_v7 = vadd.f32 %v6917_v42, %v6757_v0  ;;  %v9268_v0 = vadd.f32 %v13476_v53, %v13471_v58  ;;  %v9262_v14 = vadd.f32 %v13456_v22, %v14872_v17  ;;  %v14875_v53 = vld [vmem:[#allocation102_spill] sm:$0xff] }
 0x4ba   : > { %v9351_v27 = vpop.f32.mrf.mxu0  ;;  %v6786_v58 = vadd.f32 %v9259_v8, %v14874_v6 }
 0x4bb   : > { %v13580_v41 = vpack.c.bf16 %v7008_v63, %v7007_v12  ;;  %v7006_v2 = vmax.f32 %v6918_v7, 0.0  ;;  %v6939_v10 = vadd.f32 %v9351_v27, %v6778_v60  ;;  %v6797_v62 = vadd.f32 %v9268_v0, %v14875_v53  ;;  %v14879_v0 = vld [vmem:[#allocation33_spill] sm:$0xff] }
 0x4bc   : > { %v6930_v45 = vpop.f32.mrf.mxu0 }
 0x4bd   : > { %v13583_v21 = vpack.c.bf16 %v7006_v2, %v7005_v56  ;;  %v6931_v33 = vadd.f32 %v6930_v45, %v6770_v50  ;;  %v7011_v28 = vmax.f32 %v6939_v10, 0.0  ;;  %v14876_v56 = vld [vmem:[#allocation137_spill] sm:$0xff]  ;;  %v9277_v2 = vadd.f32 %v13523_v61, %v13518_v4 }
 0x4be   : > { %v9352_v5 = vpop.f32.mrf.mxu0  ;;  %v6789_v22 = vadd.f32 %v9262_v14, %v14876_v56  ;;  %v9271_v45 = vadd.f32 %v13486_v59, %v13481_v26  ;;  %v9274_v61 = vadd.f32 %v13507_v55, %v13497_v57  ;;  %v14877_v59 = vld [vmem:[#allocation51_spill] sm:$0xff]  ;;  %v9289_v57 = vadd.f32 %v9288_v43, %v9287_v23 }
 0x4bf   : > { %v6942_v46 = vadd.f32 %v9352_v5, %v6781_v32  ;;  %7318 = vmatmul.mubr.bf16.gmra.mxu1 %v13538_v52  ;;  %7511 = vmatmul.mubr.bf16.gmra.mxu0 %v13538_v52  ;;  %v7009_v52 = vmax.f32 %v6931_v33, 0.0  ;;  %v9290_v32 = vpop.f32.mrf.mxu1  ;;  %v9286_v23 = vadd.f32 %v13587_v37, %v13578_v1 }
 0x4c0   : > { %v6933_v19 = vpop.f32.mrf.mxu0  ;;  %7327 = vmatprep.mubr.bf16.mxu1 %v14817_v13  ;;  %7520 = vmatprep.mubr.bf16.mxu0 %v14817_v13  ;;  %v6802_v8 = vadd.f32 %v9271_v45, %v14878_v36  ;;  %v9903_v36 = vld [vmem:[%s10341_s29 + $0x18] sm:$0xff] }
 0x4c1   : > { %v7012_v25 = vmax.f32 %v6942_v46, 0.0  ;;  %v6934_v9 = vadd.f32 %v6933_v19, %v6773_v54  ;;  %v6810_v54 = vadd.f32 %v9277_v2, %v14877_v59  ;;  %v9291_v31 = vpop.f32.mrf.mxu1  ;;  %v6821_v1 = vadd.f32 %v9286_v23, %v13484_v18  ;;  %v9904_v23 = vld [vmem:[%s10341_s29 + $0x20] sm:$0xff] }
 0x4c2   : > { %v9355_v16 = vpop.f32.mrf.mxu0  ;;  %v9292_v15 = vadd.f32 %v9291_v31, %v9290_v32  ;;  %v7075_v18 = vlaneseq }
 0x4c3   : > { %v13602_v42 = vpack.c.bf16 %v7012_v25, %v7011_v28  ;;  %v7010_v3 = vmax.f32 %v6934_v9, 0.0  ;;  %v6955_v7 = vadd.f32 %v9355_v16, %v6794_v24  ;;  %v6805_v28 = vadd.f32 %v9274_v61, %v14879_v0 }
 0x4c4   : > { %v6946_v12 = vpop.f32.mrf.mxu0  ;;  %v9283_v9 = vadd.f32 %v13565_v48, %v13556_v29 }
 0x4c5   : > { %v13605_v63 = vpack.c.bf16 %v7010_v3, %v7009_v52  ;;  %v6947_v38 = vadd.f32 %v6946_v12, %v6786_v58  ;;  %v7015_v50 = vmax.f32 %v6955_v7, 0.0  ;;  %v6829_v58 = vadd.f32 %v9292_v15, %v13502_v30 }
 0x4c6   : > { %v9356_v27 = vpop.f32.mrf.mxu0  ;;  %v6818_v6 = vadd.f32 %v9283_v9, %v13479_v44 }
 0x4c7   : > { %v6958_v60 = vadd.f32 %v9356_v27, %v6797_v62  ;;  %7328 = vmatmul.mubr.bf16.gmra.mxu1 %v13561_v20  ;;  %7521 = vmatmul.mubr.bf16.gmra.mxu0 %v13561_v20  ;;  %v7013_v20 = vmax.f32 %v6947_v38, 0.0 }
 0x4c8   : > { %v6949_v10 = vpop.f32.mrf.mxu0  ;;  %7337 = vmatprep.mubr.bf16.mxu1 %v14817_v13  ;;  %7530 = vmatprep.mubr.bf16.mxu0 %v14817_v13 }
 0x4c9   : > { %v7016_v39 = vmax.f32 %v6958_v60, 0.0  ;;  %v6950_v4 = vadd.f32 %v6949_v10, %v6789_v22 }
 0x4ca   : > { %v9359_v5 = vpop.f32.mrf.mxu0 }
 0x4cb   : > { %v13622_v35 = vpack.c.bf16 %v7016_v39, %v7015_v50  ;;  %v7014_v26 = vmax.f32 %v6950_v4, 0.0  ;;  %v6971_v46 = vadd.f32 %v9359_v5, %v6810_v54  ;;  %v9901_v50 = vld [vmem:[%s10341_s29 + $0x8] sm:$0xff] }
 0x4cc   : > { %v6962_v11 = vpop.f32.mrf.mxu0  ;;  %v7643_v39 = vunpack.c.l.bf16 %v9901_v50  ;;  %v7644_v59 = vunpack.c.h.bf16 %v9901_v50 }
 0x4cd   : > { %v7035_v33 = vpack.c.bf16 %v7014_v26, %v7013_v20  ;;  %v6963_v55 = vadd.f32 %v6962_v11, %v6802_v8  ;;  %v7019_v14 = vmax.f32 %v6971_v46, 0.0  ;;  %v7642_v26 = vunpack.c.h.bf16 %v9900_v49 }
 0x4ce   : > { %v9360_v19 = vpop.f32.mrf.mxu0  ;;  %v7647_v8 = vunpack.c.l.bf16 %v9903_v36 }
 0x4cf   : > { %v6974_v25 = vadd.f32 %v9360_v19, %v6813_v51  ;;  %7338 = vmatmul.mubr.bf16.gmra.mxu1 %v13558_v34  ;;  %7531 = vmatmul.mubr.bf16.gmra.mxu0 %v13558_v34  ;;  %v7017_v40 = vmax.f32 %v6963_v55, 0.0  ;;  %v6826_v34 = vadd.f32 %v9289_v57, %v13491_v47 }
 0x4d0   : > { %v6965_v17 = vpop.f32.mrf.mxu0  ;;  %7347 = vmatprep.mubr.bf16.mxu1 %v14817_v13  ;;  %7540 = vmatprep.mubr.bf16.mxu0 %v14817_v13 }
 0x4d1   : > { %v7020_v16 = vmax.f32 %v6974_v25, 0.0  ;;  %v6966_v52 = vadd.f32 %v6965_v17, %v6805_v28  ;;  %v7648_v25 = vunpack.c.h.bf16 %v9903_v36 }
 0x4d2   : > { %v9363_v3 = vpop.f32.mrf.mxu0 }
 0x4d3   : > { %v7038_v24 = vpack.c.bf16 %v7020_v16, %v7019_v14  ;;  %v7018_v12 = vmax.f32 %v6966_v52, 0.0  ;;  %v6987_v48 = vadd.f32 %v9363_v3, %v6826_v34  ;;  %v7649_v3 = vunpack.c.l.bf16 %v9904_v23 }
 0x4d4   : > { %v6978_v7 = vpop.f32.mrf.mxu0 }
 0x4d5   : > { %v7037_v29 = vpack.c.bf16 %v7018_v12, %v7017_v40  ;;  %v6979_v62 = vadd.f32 %v6978_v7, %v6818_v6  ;;  %v7023_v47 = vmax.f32 %v6987_v48, 0.0  ;;  %v9905_v40 = vld [vmem:[%s10341_s29 + $0x28] sm:$0xff] }
 0x4d6   : > { %v9364_v53 = vpop.f32.mrf.mxu0 }
 0x4d7   : > { %v6990_v43 = vadd.f32 %v9364_v53, %v6829_v58  ;;  %7348 = vmatmul.mubr.bf16.gmra.mxu1 %v13583_v21  ;;  %7541 = vmatmul.mubr.bf16.gmra.mxu0 %v13583_v21  ;;  %v7021_v44 = vmax.f32 %v6979_v62, 0.0  ;;  %v7650_v58 = vunpack.c.h.bf16 %v9904_v23  ;;  %v7652_v53 = vunpack.c.h.bf16 %v9905_v40 }
 0x4d8   : > { %v6981_v37 = vpop.f32.mrf.mxu0  ;;  %7357 = vmatprep.mubr.bf16.mxu1 %v14817_v13  ;;  %7550 = vmatprep.mubr.bf16.mxu0 %v14817_v13 }
 0x4d9   : > { %v7024_v27 = vmax.f32 %v6990_v43, 0.0  ;;  %v6982_v56 = vadd.f32 %v6981_v37, %v6821_v1 }
 0x4db   : > { %v7040_v22 = vpack.c.bf16 %v7024_v27, %v7023_v47  ;;  %v7022_v30 = vmax.f32 %v6982_v56, 0.0  ;;  %v9906_v56 = vld [vmem:[%s10341_s29 + $0x30] sm:$0xff] }
 0x4dd   : > { %v7039_v2 = vpack.c.bf16 %v7022_v30, %v7021_v44  ;;  %v7653_v44 = vunpack.c.l.bf16 %v9906_v56 }
 0x4df   : > { %7358 = vmatmul.mubr.bf16.gmra.mxu1 %v13580_v41  ;;  %7551 = vmatmul.mubr.bf16.gmra.mxu0 %v13580_v41  ;;  %v7076_v41 = vshrl.u32 %v7075_v18, 7 }
 0x4e0   : > { %7367 = vmatprep.mubr.bf16.mxu1 %v14817_v13  ;;  %7560 = vmatprep.mubr.bf16.mxu0 %v14817_v13 }
 0x4e1   : > { %v7077_v21 = vsub.s32 0, %v7076_v41  ;;  %v7081_v38 = vsub.s32 1, %v7076_v41  ;;  %v7089_v60 = vsub.s32 3, %v7076_v41 }
 0x4e7   : > { %7368 = vmatmul.mubr.bf16.gmra.mxu1 %v13605_v63  ;;  %7561 = vmatmul.mubr.bf16.gmra.mxu0 %v13605_v63  ;;  %v7073_v63 = vld [vmem:[%s14058_s6] sm:$0xf] }
 0x4e8   : > { %7377 = vmatprep.mubr.bf16.mxu1 %v14817_v13  ;;  %7570 = vmatprep.mubr.bf16.mxu0 %v14817_v13  ;;  %v13671_v45 = vrot.slane %v7073_v63, %v7077_v21  ;;  %v13678_v4 = vrot.slane %v7073_v63, %v7081_v38  ;;  %v13680_v61 = vrot.slane %v7073_v63, %v7089_v60  ;;  %v7654_v38 = vunpack.c.h.bf16 %v9906_v56 }
 0x4ef   : > { %7378 = vmatmul.mubr.bf16.gmra.mxu1 %v13602_v42  ;;  %7571 = vmatmul.mubr.bf16.gmra.mxu0 %v13602_v42  ;;  %v7085_v42 = vsub.s32 2, %v7076_v41 }
 0x4f0   : > { %7387 = vmatprep.mubr.bf16.mxu1 %v14817_v13  ;;  %7580 = vmatprep.mubr.bf16.mxu0 %v14817_v13 }
 0x4f1   : > { %v13673_v10 = vrot.slane %v7073_v63, %v7085_v42 }
 0x4f7   : > { %7388 = vmatmul.mubr.bf16.gmra.mxu1 %v7035_v33  ;;  %7581 = vmatmul.mubr.bf16.gmra.mxu0 %v7035_v33  ;;  %v9902_v33 = vld [vmem:[%s10341_s29 + $0x10] sm:$0xff] }
 0x4f8   : > { %7397 = vmatprep.mubr.bf16.mxu1 %v14817_v13  ;;  %7590 = vmatprep.mubr.bf16.mxu0 %v14817_v13  ;;  %v7645_v46 = vunpack.c.l.bf16 %v9902_v33  ;;  %v7646_v55 = vunpack.c.h.bf16 %v9902_v33 }
 0x4ff   : > { %7398 = vmatmul.mubr.bf16.gmra.mxu1 %v13622_v35  ;;  %7591 = vmatmul.mubr.bf16.gmra.mxu0 %v13622_v35 }
 0x500   : > { %7407 = vmatprep.mubr.bf16.mxu1 %v14817_v13  ;;  %7600 = vmatprep.mubr.bf16.mxu0 %v14817_v13 }
 0x507   : > { %7408 = vmatmul.mubr.bf16.gmra.mxu1 %v7037_v29  ;;  %7601 = vmatmul.mubr.bf16.gmra.mxu0 %v7037_v29 }
 0x508   : > { %7417 = vmatprep.mubr.bf16.mxu1 %v14817_v13  ;;  %7610 = vmatprep.mubr.bf16.mxu0 %v14817_v13 }
 0x50f   : > { %7418 = vmatmul.mubr.bf16.gmra.mxu1 %v7038_v24  ;;  %7611 = vmatmul.mubr.bf16.gmra.mxu0 %v7038_v24  ;;  %v7651_v24 = vunpack.c.l.bf16 %v9905_v40 }
 0x510   : > { %7427 = vmatprep.mubr.bf16.mxu1 %v14817_v13  ;;  %7620 = vmatprep.mubr.bf16.mxu0 %v14817_v13 }
 0x517   : > { %7428 = vmatmul.mubr.bf16.gmra.mxu1 %v7039_v2  ;;  %7621 = vmatmul.mubr.bf16.gmra.mxu0 %v7039_v2 }
 0x518   : > { %7437 = vmatprep.mubr.bf16.mxu1 %v14817_v13  ;;  %7630 = vmatprep.mubr.bf16.mxu0 %v14817_v13  ;;  %v7641_v13 = vunpack.c.l.bf16 %v9900_v49 }
 0x51f   : > { %7438 = vmatmul.mubr.bf16.gmra.mxu1 %v7040_v22  ;;  %7631 = vmatmul.mubr.bf16.gmra.mxu0 %v7040_v22  ;;  %v9907_v22 = vld [vmem:[%s10341_s29 + $0x38] sm:$0xff] }
 0x520   : > { %v7655_v30 = vunpack.c.l.bf16 %v9907_v22  ;;  %v7656_v60 = vunpack.c.h.bf16 %v9907_v22 }
 0x567   : > { %v7289_v32 = vpop.f32.mrf.mxu1  ;;  %v7482_v5 = vpop.f32.mrf.mxu0 }
 0x568   : > { %v7290_v20 = vadd.f32 %v7289_v32, %v13671_v45  ;;  %v7483_v35 = vadd.f32 %v7482_v5, %v13673_v10 }
 0x569   : > { %v7291_v54 = vpop.f32.mrf.mxu1  ;;  %v7484_v11 = vpop.f32.mrf.mxu0 }
 0x56a   : > { %v7769_v51 = vadd.f32 %v7641_v13, %v7290_v20  ;;  %v7771_v31 = vadd.f32 %v7643_v39, %v7483_v35  ;;  %v7292_v19 = vadd.f32 %v7291_v54, %v13678_v4  ;;  %v7485_v0 = vadd.f32 %v7484_v11, %v13680_v61  ;;  %v9908_v20 = vld [vmem:[%s10341_s29 + $0x40] sm:$0xff] }
 0x56b   : > { %v7293_v28 = vpop.f32.mrf.mxu1  ;;  %v7486_v57 = vpop.f32.mrf.mxu0  ;;  %v7657_v35 = vunpack.c.l.bf16 %v9908_v20 }
 0x56c   : > { %7897 = vst [vmem:[%s13688_s30] sm:$0xff] %v7769_v51  ;;  %7899 = vst [vmem:[%s13688_s30 + $0x10] sm:$0xff] %v7771_v31  ;;  %v7770_v9 = vadd.f32 %v7642_v26, %v7292_v19  ;;  %v7772_v17 = vadd.f32 %v7644_v59, %v7485_v0  ;;  %v7294_v15 = vadd.f32 %v7293_v28, %v13671_v45  ;;  %v9909_v26 = vld [vmem:[%s10341_s29 + $0x48] sm:$0xff]  ;;  %v7658_v51 = vunpack.c.h.bf16 %v9908_v20 }
 0x56d   : > { %v7487_v14 = vadd.f32 %v7486_v57, %v13673_v10  ;;  %v7295_v16 = vpop.f32.mrf.mxu1  ;;  %v7488_v52 = vpop.f32.mrf.mxu0  ;;  %v7659_v59 = vunpack.c.l.bf16 %v9909_v26  ;;  %v7660_v31 = vunpack.c.h.bf16 %v9909_v26 }
 0x56e   : > { %7898 = vst [vmem:[%s13688_s30 + $0x8] sm:$0xff] %v7770_v9  ;;  %7900 = vst [vmem:[%s13688_s30 + $0x18] sm:$0xff] %v7772_v17  ;;  %v7773_v12 = vadd.f32 %v7645_v46, %v7294_v15  ;;  %v7296_v7 = vadd.f32 %v7295_v16, %v13678_v4  ;;  %v7489_v29 = vadd.f32 %v7488_v52, %v13680_v61  ;;  %v9910_v9 = vld [vmem:[%s10341_s29 + $0x50] sm:$0xff]  ;;  %v9911_v15 = vld [vmem:[%s10341_s29 + $0x58] sm:$0xff] }
 0x56f   : > { %v7775_v34 = vadd.f32 %v7647_v8, %v7487_v14  ;;  %v7299_v48 = vpop.f32.mrf.mxu1  ;;  %v7492_v6 = vpop.f32.mrf.mxu0  ;;  %v7661_v17 = vunpack.c.l.bf16 %v9910_v9  ;;  %v7663_v14 = vunpack.c.l.bf16 %v9911_v15 }
 0x570   : > { %7901 = vst [vmem:[%s13688_s30 + $0x20] sm:$0xff] %v7773_v12  ;;  %v7774_v62 = vadd.f32 %v7646_v55, %v7296_v7  ;;  %v7776_v43 = vadd.f32 %v7648_v25, %v7489_v29  ;;  %v7300_v1 = vadd.f32 %v7299_v48, %v13671_v45  ;;  %v7493_v37 = vadd.f32 %v7492_v6, %v13673_v10 }
 0x571   : > { %7903 = vst [vmem:[%s13688_s30 + $0x30] sm:$0xff] %v7775_v34  ;;  %v7301_v47 = vpop.f32.mrf.mxu1  ;;  %v7494_v27 = vpop.f32.mrf.mxu0  ;;  %v7662_v12 = vunpack.c.h.bf16 %v9910_v9  ;;  %v7664_v34 = vunpack.c.h.bf16 %v9911_v15 }
 0x572   : > { %7902 = vst [vmem:[%s13688_s30 + $0x28] sm:$0xff] %v7774_v62  ;;  %7904 = vst [vmem:[%s13688_s30 + $0x38] sm:$0xff] %v7776_v43  ;;  %v7777_v2 = vadd.f32 %v7649_v3, %v7300_v1  ;;  %v7779_v18 = vadd.f32 %v7651_v24, %v7493_v37  ;;  %v7302_v41 = vadd.f32 %v7301_v47, %v13678_v4  ;;  %v9912_v62 = vld [vmem:[%s10341_s29 + $0x60] sm:$0xff]  ;;  %v9913_v1 = vld [vmem:[%s10341_s29 + $0x68] sm:$0xff] }
 0x573   : > { %v7495_v21 = vadd.f32 %v7494_v27, %v13680_v61  ;;  %v7303_v42 = vpop.f32.mrf.mxu1  ;;  %v7496_v63 = vpop.f32.mrf.mxu0  ;;  %v7665_v43 = vunpack.c.l.bf16 %v9912_v62  ;;  %v7667_v37 = vunpack.c.l.bf16 %v9913_v1 }
 0x574   : > { %7905 = vst [vmem:[%s13688_s30 + $0x40] sm:$0xff] %v7777_v2  ;;  %7907 = vst [vmem:[%s13688_s30 + $0x50] sm:$0xff] %v7779_v18  ;;  %v7778_v49 = vadd.f32 %v7650_v58, %v7302_v41  ;;  %v7304_v50 = vadd.f32 %v7303_v42, %v13671_v45  ;;  %v7497_v39 = vadd.f32 %v7496_v63, %v13673_v10  ;;  %v7666_v2 = vunpack.c.h.bf16 %v9912_v62 }
 0x575   : > { %v7780_v13 = vadd.f32 %v7652_v53, %v7495_v21  ;;  %v7305_v32 = vpop.f32.mrf.mxu1  ;;  %v7498_v5 = vpop.f32.mrf.mxu0  ;;  %v7668_v18 = vunpack.c.h.bf16 %v9913_v1 }
 0x576   : > { %7906 = vst [vmem:[%s13688_s30 + $0x48] sm:$0xff] %v7778_v49  ;;  %v7781_v54 = vadd.f32 %v7653_v44, %v7304_v50  ;;  %v7783_v11 = vadd.f32 %v7655_v30, %v7497_v39  ;;  %v7306_v33 = vadd.f32 %v7305_v32, %v13678_v4  ;;  %v7499_v46 = vadd.f32 %v7498_v5, %v13680_v61  ;;  %v9914_v49 = vld [vmem:[%s10341_s29 + $0x70] sm:$0xff]  ;;  %v9915_v50 = vld [vmem:[%s10341_s29 + $0x78] sm:$0xff] }
 0x577   : > { %7908 = vst [vmem:[%s13688_s30 + $0x58] sm:$0xff] %v7780_v13  ;;  %v7309_v36 = vpop.f32.mrf.mxu1  ;;  %v7502_v8 = vpop.f32.mrf.mxu0  ;;  %v7669_v13 = vunpack.c.l.bf16 %v9914_v49  ;;  %v7671_v39 = vunpack.c.l.bf16 %v9915_v50 }
 0x578   : > { %7909 = vst [vmem:[%s13688_s30 + $0x60] sm:$0xff] %v7781_v54  ;;  %7911 = vst [vmem:[%s13688_s30 + $0x70] sm:$0xff] %v7783_v11  ;;  %v7782_v19 = vadd.f32 %v7654_v38, %v7306_v33  ;;  %v7784_v0 = vadd.f32 %v7656_v60, %v7499_v46  ;;  %v7310_v28 = vadd.f32 %v7309_v36, %v13671_v45  ;;  %v7670_v54 = vunpack.c.h.bf16 %v9914_v49 }
 0x579   : > { %v7503_v57 = vadd.f32 %v7502_v8, %v13673_v10  ;;  %v7311_v55 = vpop.f32.mrf.mxu1  ;;  %v7504_v25 = vpop.f32.mrf.mxu0  ;;  %v7672_v11 = vunpack.c.h.bf16 %v9915_v50 }
 0x57a   : > { %7910 = vst [vmem:[%s13688_s30 + $0x68] sm:$0xff] %v7782_v19  ;;  %7912 = vst [vmem:[%s13688_s30 + $0x78] sm:$0xff] %v7784_v0  ;;  %v7785_v16 = vadd.f32 %v7657_v35, %v7310_v28  ;;  %v7312_v23 = vadd.f32 %v7311_v55, %v13678_v4  ;;  %v7505_v3 = vadd.f32 %v7504_v25, %v13680_v61  ;;  %v9916_v19 = vld [vmem:[%s10341_s29 + $0x80] sm:$0xff]  ;;  %v9917_v28 = vld [vmem:[%s10341_s29 + $0x88] sm:$0xff] }
 0x57b   : > { %v7787_v52 = vadd.f32 %v7659_v59, %v7503_v57  ;;  %v7313_v40 = vpop.f32.mrf.mxu1  ;;  %v7506_v24 = vpop.f32.mrf.mxu0  ;;  %v7673_v0 = vunpack.c.l.bf16 %v9916_v19  ;;  %v7675_v57 = vunpack.c.l.bf16 %v9917_v28 }
 0x57c   : > { %7913 = vst [vmem:[%s13688_s30 + $0x80] sm:$0xff] %v7785_v16  ;;  %v7786_v7 = vadd.f32 %v7658_v51, %v7312_v23  ;;  %v7788_v29 = vadd.f32 %v7660_v31, %v7505_v3  ;;  %v7314_v48 = vadd.f32 %v7313_v40, %v13671_v45  ;;  %v7507_v6 = vadd.f32 %v7506_v24, %v13673_v10 }
 0x57d   : > { %7915 = vst [vmem:[%s13688_s30 + $0x90] sm:$0xff] %v7787_v52  ;;  %v7315_v58 = vpop.f32.mrf.mxu1  ;;  %v7508_v53 = vpop.f32.mrf.mxu0  ;;  %v7674_v16 = vunpack.c.h.bf16 %v9916_v19  ;;  %v7676_v52 = vunpack.c.h.bf16 %v9917_v28 }
 0x57e   : > { %7914 = vst [vmem:[%s13688_s30 + $0x88] sm:$0xff] %v7786_v7  ;;  %7916 = vst [vmem:[%s13688_s30 + $0x98] sm:$0xff] %v7788_v29  ;;  %v7789_v47 = vadd.f32 %v7661_v17, %v7314_v48  ;;  %v7791_v27 = vadd.f32 %v7663_v14, %v7507_v6  ;;  %v7316_v56 = vadd.f32 %v7315_v58, %v13678_v4  ;;  %v9918_v7 = vld [vmem:[%s10341_s29 + $0x90] sm:$0xff]  ;;  %v9919_v48 = vld [vmem:[%s10341_s29 + $0x98] sm:$0xff] }
 0x57f   : > { %v7509_v44 = vadd.f32 %v7508_v53, %v13680_v61  ;;  %v7319_v22 = vpop.f32.mrf.mxu1  ;;  %v7512_v30 = vpop.f32.mrf.mxu0  ;;  %v7677_v29 = vunpack.c.l.bf16 %v9918_v7  ;;  %v7679_v6 = vunpack.c.l.bf16 %v9919_v48 }
 0x580   : > { %7917 = vst [vmem:[%s13688_s30 + $0xa0] sm:$0xff] %v7789_v47  ;;  %7919 = vst [vmem:[%s13688_s30 + $0xb0] sm:$0xff] %v7791_v27  ;;  %v7790_v41 = vadd.f32 %v7662_v12, %v7316_v56  ;;  %v7320_v42 = vadd.f32 %v7319_v22, %v13671_v45  ;;  %v7513_v63 = vadd.f32 %v7512_v30, %v13673_v10  ;;  %v7678_v47 = vunpack.c.h.bf16 %v9918_v7 }
 0x581   : > { %v7792_v21 = vadd.f32 %v7664_v34, %v7509_v44  ;;  %v7321_v38 = vpop.f32.mrf.mxu1  ;;  %v7514_v60 = vpop.f32.mrf.mxu0  ;;  %v7680_v27 = vunpack.c.h.bf16 %v9919_v48 }
 0x582   : > { %7918 = vst [vmem:[%s13688_s30 + $0xa8] sm:$0xff] %v7790_v41  ;;  %v7793_v32 = vadd.f32 %v7665_v43, %v7320_v42  ;;  %v7795_v5 = vadd.f32 %v7667_v37, %v7513_v63  ;;  %v7322_v20 = vadd.f32 %v7321_v38, %v13678_v4  ;;  %v7515_v35 = vadd.f32 %v7514_v60, %v13680_v61  ;;  %v9920_v41 = vld [vmem:[%s10341_s29 + $0xa0] sm:$0xff]  ;;  %v9921_v42 = vld [vmem:[%s10341_s29 + $0xa8] sm:$0xff] }
 0x583   : > { %7920 = vst [vmem:[%s13688_s30 + $0xb8] sm:$0xff] %v7792_v21  ;;  %v7323_v26 = vpop.f32.mrf.mxu1  ;;  %v7516_v59 = vpop.f32.mrf.mxu0  ;;  %v7681_v21 = vunpack.c.l.bf16 %v9920_v41  ;;  %v7683_v63 = vunpack.c.l.bf16 %v9921_v42 }
 0x584   : > { %7921 = vst [vmem:[%s13688_s30 + $0xc0] sm:$0xff] %v7793_v32  ;;  %7923 = vst [vmem:[%s13688_s30 + $0xd0] sm:$0xff] %v7795_v5  ;;  %v7794_v33 = vadd.f32 %v7666_v2, %v7322_v20  ;;  %v7796_v46 = vadd.f32 %v7668_v18, %v7515_v35  ;;  %v7324_v36 = vadd.f32 %v7323_v26, %v13671_v45  ;;  %v7682_v32 = vunpack.c.h.bf16 %v9920_v41 }
 0x585   : > { %v7517_v8 = vadd.f32 %v7516_v59, %v13673_v10  ;;  %v7325_v51 = vpop.f32.mrf.mxu1  ;;  %v7518_v31 = vpop.f32.mrf.mxu0  ;;  %v7684_v5 = vunpack.c.h.bf16 %v9921_v42 }
 0x586   : > { %7922 = vst [vmem:[%s13688_s30 + $0xc8] sm:$0xff] %v7794_v33  ;;  %7924 = vst [vmem:[%s13688_s30 + $0xd8] sm:$0xff] %v7796_v46  ;;  %v7797_v55 = vadd.f32 %v7669_v13, %v7324_v36  ;;  %v7326_v9 = vadd.f32 %v7325_v51, %v13678_v4  ;;  %v7519_v17 = vadd.f32 %v7518_v31, %v13680_v61  ;;  %v9922_v33 = vld [vmem:[%s10341_s29 + $0xb0] sm:$0xff]  ;;  %v9923_v36 = vld [vmem:[%s10341_s29 + $0xb8] sm:$0xff] }
 0x587   : > { %v7799_v25 = vadd.f32 %v7671_v39, %v7517_v8  ;;  %v7329_v15 = vpop.f32.mrf.mxu1  ;;  %v7522_v14 = vpop.f32.mrf.mxu0  ;;  %v7685_v46 = vunpack.c.l.bf16 %v9922_v33  ;;  %v7687_v8 = vunpack.c.l.bf16 %v9923_v36 }
 0x588   : > { %7925 = vst [vmem:[%s13688_s30 + $0xe0] sm:$0xff] %v7797_v55  ;;  %v7798_v23 = vadd.f32 %v7670_v54, %v7326_v9  ;;  %v7800_v3 = vadd.f32 %v7672_v11, %v7519_v17  ;;  %v7330_v40 = vadd.f32 %v7329_v15, %v13671_v45  ;;  %v7523_v24 = vadd.f32 %v7522_v14, %v13673_v10 }
 0x589   : > { %7927 = vst [vmem:[%s13688_s30 + $0xf0] sm:$0xff] %v7799_v25  ;;  %v7331_v12 = vpop.f32.mrf.mxu1  ;;  %v7524_v34 = vpop.f32.mrf.mxu0  ;;  %v7686_v55 = vunpack.c.h.bf16 %v9922_v33  ;;  %v7688_v25 = vunpack.c.h.bf16 %v9923_v36 }
 0x58a   : > { %7926 = vst [vmem:[%s13688_s30 + $0xe8] sm:$0xff] %v7798_v23  ;;  %7928 = vst [vmem:[%s13688_s30 + $0xf8] sm:$0xff] %v7800_v3  ;;  %v7801_v58 = vadd.f32 %v7673_v0, %v7330_v40  ;;  %v7803_v53 = vadd.f32 %v7675_v57, %v7523_v24  ;;  %v7332_v62 = vadd.f32 %v7331_v12, %v13678_v4  ;;  %v9924_v23 = vld [vmem:[%s10341_s29 + $0xc0] sm:$0xff]  ;;  %v9925_v40 = vld [vmem:[%s10341_s29 + $0xc8] sm:$0xff] }
 0x58b   : > { %v7525_v43 = vadd.f32 %v7524_v34, %v13680_v61  ;;  %v7333_v1 = vpop.f32.mrf.mxu1  ;;  %v7526_v37 = vpop.f32.mrf.mxu0  ;;  %v7689_v3 = vunpack.c.l.bf16 %v9924_v23  ;;  %v7691_v24 = vunpack.c.l.bf16 %v9925_v40 }
 0x58c   : > { %7929 = vst [vmem:[%s13688_s30 + $0x100] sm:$0xff] %v7801_v58  ;;  %7931 = vst [vmem:[%s13688_s30 + $0x110] sm:$0xff] %v7803_v53  ;;  %v7802_v56 = vadd.f32 %v7674_v16, %v7332_v62  ;;  %v7334_v22 = vadd.f32 %v7333_v1, %v13671_v45  ;;  %v7527_v30 = vadd.f32 %v7526_v37, %v13673_v10  ;;  %v7690_v58 = vunpack.c.h.bf16 %v9924_v23 }
 0x58d   : > { %v7804_v44 = vadd.f32 %v7676_v52, %v7525_v43  ;;  %v7335_v2 = vpop.f32.mrf.mxu1  ;;  %v7528_v18 = vpop.f32.mrf.mxu0  ;;  %v7692_v53 = vunpack.c.h.bf16 %v9925_v40 }
 0x58e   : > { %7930 = vst [vmem:[%s13688_s30 + $0x108] sm:$0xff] %v7802_v56  ;;  %v7805_v38 = vadd.f32 %v7677_v29, %v7334_v22  ;;  %v7807_v60 = vadd.f32 %v7679_v6, %v7527_v30  ;;  %v7336_v49 = vadd.f32 %v7335_v2, %v13678_v4  ;;  %v7529_v13 = vadd.f32 %v7528_v18, %v13680_v61  ;;  %v9926_v56 = vld [vmem:[%s10341_s29 + $0xd0] sm:$0xff]  ;;  %v9927_v22 = vld [vmem:[%s10341_s29 + $0xd8] sm:$0xff] }
 0x58f   : > { %7932 = vst [vmem:[%s13688_s30 + $0x118] sm:$0xff] %v7804_v44  ;;  %v7339_v50 = vpop.f32.mrf.mxu1  ;;  %v7532_v39 = vpop.f32.mrf.mxu0  ;;  %v7693_v44 = vunpack.c.l.bf16 %v9926_v56  ;;  %v7695_v30 = vunpack.c.l.bf16 %v9927_v22 }
 0x590   : > { %7933 = vst [vmem:[%s13688_s30 + $0x120] sm:$0xff] %v7805_v38  ;;  %7935 = vst [vmem:[%s13688_s30 + $0x130] sm:$0xff] %v7807_v60  ;;  %v7806_v20 = vadd.f32 %v7678_v47, %v7336_v49  ;;  %v7808_v35 = vadd.f32 %v7680_v27, %v7529_v13  ;;  %v7340_v26 = vadd.f32 %v7339_v50, %v13671_v45  ;;  %v7694_v38 = vunpack.c.h.bf16 %v9926_v56 }
 0x591   : > { %v7533_v59 = vadd.f32 %v7532_v39, %v13673_v10  ;;  %v7341_v54 = vpop.f32.mrf.mxu1  ;;  %v7534_v11 = vpop.f32.mrf.mxu0  ;;  %v7696_v60 = vunpack.c.h.bf16 %v9927_v22 }
 0x592   : > { %7934 = vst [vmem:[%s13688_s30 + $0x128] sm:$0xff] %v7806_v20  ;;  %7936 = vst [vmem:[%s13688_s30 + $0x138] sm:$0xff] %v7808_v35  ;;  %v7809_v51 = vadd.f32 %v7681_v21, %v7340_v26  ;;  %v7342_v19 = vadd.f32 %v7341_v54, %v13678_v4  ;;  %v7535_v0 = vadd.f32 %v7534_v11, %v13680_v61  ;;  %v9928_v20 = vld [vmem:[%s10341_s29 + $0xe0] sm:$0xff]  ;;  %v9929_v26 = vld [vmem:[%s10341_s29 + $0xe8] sm:$0xff] }
 0x593   : > { %v7811_v31 = vadd.f32 %v7683_v63, %v7533_v59  ;;  %v7343_v28 = vpop.f32.mrf.mxu1  ;;  %v7536_v57 = vpop.f32.mrf.mxu0  ;;  %v7697_v35 = vunpack.c.l.bf16 %v9928_v20  ;;  %v7699_v59 = vunpack.c.l.bf16 %v9929_v26 }
 0x594   : > { %7937 = vst [vmem:[%s13688_s30 + $0x140] sm:$0xff] %v7809_v51  ;;  %v7810_v9 = vadd.f32 %v7682_v32, %v7342_v19  ;;  %v7812_v17 = vadd.f32 %v7684_v5, %v7535_v0  ;;  %v7344_v15 = vadd.f32 %v7343_v28, %v13671_v45  ;;  %v7537_v14 = vadd.f32 %v7536_v57, %v13673_v10 }
 0x595   : > { %7939 = vst [vmem:[%s13688_s30 + $0x150] sm:$0xff] %v7811_v31  ;;  %v7345_v16 = vpop.f32.mrf.mxu1  ;;  %v7538_v52 = vpop.f32.mrf.mxu0  ;;  %v7698_v51 = vunpack.c.h.bf16 %v9928_v20  ;;  %v7700_v31 = vunpack.c.h.bf16 %v9929_v26 }
 0x596   : > { %7938 = vst [vmem:[%s13688_s30 + $0x148] sm:$0xff] %v7810_v9  ;;  %7940 = vst [vmem:[%s13688_s30 + $0x158] sm:$0xff] %v7812_v17  ;;  %v7813_v12 = vadd.f32 %v7685_v46, %v7344_v15  ;;  %v7815_v34 = vadd.f32 %v7687_v8, %v7537_v14  ;;  %v7346_v7 = vadd.f32 %v7345_v16, %v13678_v4  ;;  %v9930_v9 = vld [vmem:[%s10341_s29 + $0xf0] sm:$0xff]  ;;  %v9931_v15 = vld [vmem:[%s10341_s29 + $0xf8] sm:$0xff] }
 0x597   : > { %v7539_v29 = vadd.f32 %v7538_v52, %v13680_v61  ;;  %v7349_v48 = vpop.f32.mrf.mxu1  ;;  %v7542_v6 = vpop.f32.mrf.mxu0  ;;  %v7701_v17 = vunpack.c.l.bf16 %v9930_v9  ;;  %v7703_v14 = vunpack.c.l.bf16 %v9931_v15 }
 0x598   : > { %7941 = vst [vmem:[%s13688_s30 + $0x160] sm:$0xff] %v7813_v12  ;;  %7943 = vst [vmem:[%s13688_s30 + $0x170] sm:$0xff] %v7815_v34  ;;  %v7814_v62 = vadd.f32 %v7686_v55, %v7346_v7  ;;  %v7350_v1 = vadd.f32 %v7349_v48, %v13671_v45  ;;  %v7543_v37 = vadd.f32 %v7542_v6, %v13673_v10  ;;  %v7702_v12 = vunpack.c.h.bf16 %v9930_v9 }
 0x599   : > { %v7816_v43 = vadd.f32 %v7688_v25, %v7539_v29  ;;  %v7351_v47 = vpop.f32.mrf.mxu1  ;;  %v7544_v27 = vpop.f32.mrf.mxu0  ;;  %v7704_v34 = vunpack.c.h.bf16 %v9931_v15 }
 0x59a   : > { %7942 = vst [vmem:[%s13688_s30 + $0x168] sm:$0xff] %v7814_v62  ;;  %v7817_v2 = vadd.f32 %v7689_v3, %v7350_v1  ;;  %v7819_v18 = vadd.f32 %v7691_v24, %v7543_v37  ;;  %v7352_v41 = vadd.f32 %v7351_v47, %v13678_v4  ;;  %v7545_v21 = vadd.f32 %v7544_v27, %v13680_v61  ;;  %v9932_v62 = vld [vmem:[%s10341_s29 + $0x100] sm:$0xff]  ;;  %v9933_v1 = vld [vmem:[%s10341_s29 + $0x108] sm:$0xff] }
 0x59b   : > { %7944 = vst [vmem:[%s13688_s30 + $0x178] sm:$0xff] %v7816_v43  ;;  %v7353_v42 = vpop.f32.mrf.mxu1  ;;  %v7546_v63 = vpop.f32.mrf.mxu0  ;;  %v7705_v43 = vunpack.c.l.bf16 %v9932_v62  ;;  %v7707_v37 = vunpack.c.l.bf16 %v9933_v1 }
 0x59c   : > { %7945 = vst [vmem:[%s13688_s30 + $0x180] sm:$0xff] %v7817_v2  ;;  %7947 = vst [vmem:[%s13688_s30 + $0x190] sm:$0xff] %v7819_v18  ;;  %v7818_v49 = vadd.f32 %v7690_v58, %v7352_v41  ;;  %v7820_v13 = vadd.f32 %v7692_v53, %v7545_v21  ;;  %v7354_v50 = vadd.f32 %v7353_v42, %v13671_v45  ;;  %v7706_v2 = vunpack.c.h.bf16 %v9932_v62 }
 0x59d   : > { %v7547_v39 = vadd.f32 %v7546_v63, %v13673_v10  ;;  %v7355_v32 = vpop.f32.mrf.mxu1  ;;  %v7548_v5 = vpop.f32.mrf.mxu0  ;;  %v7708_v18 = vunpack.c.h.bf16 %v9933_v1 }
 0x59e   : > { %7946 = vst [vmem:[%s13688_s30 + $0x188] sm:$0xff] %v7818_v49  ;;  %7948 = vst [vmem:[%s13688_s30 + $0x198] sm:$0xff] %v7820_v13  ;;  %v7821_v54 = vadd.f32 %v7693_v44, %v7354_v50  ;;  %v7356_v33 = vadd.f32 %v7355_v32, %v13678_v4  ;;  %v7549_v46 = vadd.f32 %v7548_v5, %v13680_v61  ;;  %v9934_v49 = vld [vmem:[%s10341_s29 + $0x110] sm:$0xff]  ;;  %v9935_v50 = vld [vmem:[%s10341_s29 + $0x118] sm:$0xff] }
 0x59f   : > { %v7823_v11 = vadd.f32 %v7695_v30, %v7547_v39  ;;  %v7359_v36 = vpop.f32.mrf.mxu1  ;;  %v7552_v8 = vpop.f32.mrf.mxu0  ;;  %v7709_v13 = vunpack.c.l.bf16 %v9934_v49  ;;  %v7711_v39 = vunpack.c.l.bf16 %v9935_v50 }
 0x5a0   : > { %7949 = vst [vmem:[%s13688_s30 + $0x1a0] sm:$0xff] %v7821_v54  ;;  %v7822_v19 = vadd.f32 %v7694_v38, %v7356_v33  ;;  %v7824_v0 = vadd.f32 %v7696_v60, %v7549_v46  ;;  %v7360_v28 = vadd.f32 %v7359_v36, %v13671_v45  ;;  %v7553_v57 = vadd.f32 %v7552_v8, %v13673_v10 }
 0x5a1   : > { %7951 = vst [vmem:[%s13688_s30 + $0x1b0] sm:$0xff] %v7823_v11  ;;  %v7361_v55 = vpop.f32.mrf.mxu1  ;;  %v7554_v25 = vpop.f32.mrf.mxu0  ;;  %v7710_v54 = vunpack.c.h.bf16 %v9934_v49  ;;  %v7712_v11 = vunpack.c.h.bf16 %v9935_v50 }
 0x5a2   : > { %7950 = vst [vmem:[%s13688_s30 + $0x1a8] sm:$0xff] %v7822_v19  ;;  %7952 = vst [vmem:[%s13688_s30 + $0x1b8] sm:$0xff] %v7824_v0  ;;  %v7825_v16 = vadd.f32 %v7697_v35, %v7360_v28  ;;  %v7827_v52 = vadd.f32 %v7699_v59, %v7553_v57  ;;  %v7362_v23 = vadd.f32 %v7361_v55, %v13678_v4  ;;  %v9936_v19 = vld [vmem:[%s10341_s29 + $0x120] sm:$0xff]  ;;  %v9937_v28 = vld [vmem:[%s10341_s29 + $0x128] sm:$0xff] }
 0x5a3   : > { %v7555_v3 = vadd.f32 %v7554_v25, %v13680_v61  ;;  %v7363_v40 = vpop.f32.mrf.mxu1  ;;  %v7556_v24 = vpop.f32.mrf.mxu0  ;;  %v7713_v0 = vunpack.c.l.bf16 %v9936_v19  ;;  %v7715_v57 = vunpack.c.l.bf16 %v9937_v28 }
 0x5a4   : > { %7953 = vst [vmem:[%s13688_s30 + $0x1c0] sm:$0xff] %v7825_v16  ;;  %7955 = vst [vmem:[%s13688_s30 + $0x1d0] sm:$0xff] %v7827_v52  ;;  %v7826_v7 = vadd.f32 %v7698_v51, %v7362_v23  ;;  %v7364_v48 = vadd.f32 %v7363_v40, %v13671_v45  ;;  %v7557_v6 = vadd.f32 %v7556_v24, %v13673_v10  ;;  %v7714_v16 = vunpack.c.h.bf16 %v9936_v19 }
 0x5a5   : > { %v7828_v29 = vadd.f32 %v7700_v31, %v7555_v3  ;;  %v7365_v58 = vpop.f32.mrf.mxu1  ;;  %v7558_v53 = vpop.f32.mrf.mxu0  ;;  %v7716_v52 = vunpack.c.h.bf16 %v9937_v28 }
 0x5a6   : > { %7954 = vst [vmem:[%s13688_s30 + $0x1c8] sm:$0xff] %v7826_v7  ;;  %v7829_v47 = vadd.f32 %v7701_v17, %v7364_v48  ;;  %v7831_v27 = vadd.f32 %v7703_v14, %v7557_v6  ;;  %v7366_v56 = vadd.f32 %v7365_v58, %v13678_v4  ;;  %v7559_v44 = vadd.f32 %v7558_v53, %v13680_v61  ;;  %v9938_v7 = vld [vmem:[%s10341_s29 + $0x130] sm:$0xff]  ;;  %v9939_v48 = vld [vmem:[%s10341_s29 + $0x138] sm:$0xff] }
 0x5a7   : > { %7956 = vst [vmem:[%s13688_s30 + $0x1d8] sm:$0xff] %v7828_v29  ;;  %v7369_v22 = vpop.f32.mrf.mxu1  ;;  %v7562_v30 = vpop.f32.mrf.mxu0  ;;  %v7717_v29 = vunpack.c.l.bf16 %v9938_v7  ;;  %v7719_v6 = vunpack.c.l.bf16 %v9939_v48 }
 0x5a8   : > { %7957 = vst [vmem:[%s13688_s30 + $0x1e0] sm:$0xff] %v7829_v47  ;;  %7959 = vst [vmem:[%s13688_s30 + $0x1f0] sm:$0xff] %v7831_v27  ;;  %v7830_v41 = vadd.f32 %v7702_v12, %v7366_v56  ;;  %v7832_v21 = vadd.f32 %v7704_v34, %v7559_v44  ;;  %v7370_v42 = vadd.f32 %v7369_v22, %v13671_v45  ;;  %v7718_v47 = vunpack.c.h.bf16 %v9938_v7 }
 0x5a9   : > { %v7563_v63 = vadd.f32 %v7562_v30, %v13673_v10  ;;  %v7371_v38 = vpop.f32.mrf.mxu1  ;;  %v7564_v60 = vpop.f32.mrf.mxu0  ;;  %v7720_v27 = vunpack.c.h.bf16 %v9939_v48 }
 0x5aa   : > { %7958 = vst [vmem:[%s13688_s30 + $0x1e8] sm:$0xff] %v7830_v41  ;;  %7960 = vst [vmem:[%s13688_s30 + $0x1f8] sm:$0xff] %v7832_v21  ;;  %v7833_v32 = vadd.f32 %v7705_v43, %v7370_v42  ;;  %v7372_v20 = vadd.f32 %v7371_v38, %v13678_v4  ;;  %v7565_v35 = vadd.f32 %v7564_v60, %v13680_v61  ;;  %v9940_v41 = vld [vmem:[%s10341_s29 + $0x140] sm:$0xff]  ;;  %v9941_v42 = vld [vmem:[%s10341_s29 + $0x148] sm:$0xff] }
 0x5ab   : > { %v7835_v5 = vadd.f32 %v7707_v37, %v7563_v63  ;;  %v7373_v26 = vpop.f32.mrf.mxu1  ;;  %v7566_v59 = vpop.f32.mrf.mxu0  ;;  %v7721_v21 = vunpack.c.l.bf16 %v9940_v41  ;;  %v7723_v63 = vunpack.c.l.bf16 %v9941_v42 }
 0x5ac   : > { %7961 = vst [vmem:[%s13688_s30 + $0x200] sm:$0xff] %v7833_v32  ;;  %v7834_v33 = vadd.f32 %v7706_v2, %v7372_v20  ;;  %v7836_v46 = vadd.f32 %v7708_v18, %v7565_v35  ;;  %v7374_v36 = vadd.f32 %v7373_v26, %v13671_v45  ;;  %v7567_v8 = vadd.f32 %v7566_v59, %v13673_v10 }
 0x5ad   : > { %7963 = vst [vmem:[%s13688_s30 + $0x210] sm:$0xff] %v7835_v5  ;;  %v7375_v51 = vpop.f32.mrf.mxu1  ;;  %v7568_v31 = vpop.f32.mrf.mxu0  ;;  %v7722_v32 = vunpack.c.h.bf16 %v9940_v41  ;;  %v7724_v5 = vunpack.c.h.bf16 %v9941_v42 }
 0x5ae   : > { %7962 = vst [vmem:[%s13688_s30 + $0x208] sm:$0xff] %v7834_v33  ;;  %7964 = vst [vmem:[%s13688_s30 + $0x218] sm:$0xff] %v7836_v46  ;;  %v7837_v55 = vadd.f32 %v7709_v13, %v7374_v36  ;;  %v7839_v25 = vadd.f32 %v7711_v39, %v7567_v8  ;;  %v7376_v9 = vadd.f32 %v7375_v51, %v13678_v4  ;;  %v9942_v33 = vld [vmem:[%s10341_s29 + $0x150] sm:$0xff]  ;;  %v9943_v36 = vld [vmem:[%s10341_s29 + $0x158] sm:$0xff] }
 0x5af   : > { %v7569_v17 = vadd.f32 %v7568_v31, %v13680_v61  ;;  %v7379_v15 = vpop.f32.mrf.mxu1  ;;  %v7572_v14 = vpop.f32.mrf.mxu0  ;;  %v7725_v46 = vunpack.c.l.bf16 %v9942_v33  ;;  %v7727_v8 = vunpack.c.l.bf16 %v9943_v36 }
 0x5b0   : > { %7965 = vst [vmem:[%s13688_s30 + $0x220] sm:$0xff] %v7837_v55  ;;  %7967 = vst [vmem:[%s13688_s30 + $0x230] sm:$0xff] %v7839_v25  ;;  %v7838_v23 = vadd.f32 %v7710_v54, %v7376_v9  ;;  %v7380_v40 = vadd.f32 %v7379_v15, %v13671_v45  ;;  %v7573_v24 = vadd.f32 %v7572_v14, %v13673_v10  ;;  %v7726_v55 = vunpack.c.h.bf16 %v9942_v33 }
 0x5b1   : > { %v7840_v3 = vadd.f32 %v7712_v11, %v7569_v17  ;;  %v7381_v12 = vpop.f32.mrf.mxu1  ;;  %v7574_v34 = vpop.f32.mrf.mxu0  ;;  %v7728_v25 = vunpack.c.h.bf16 %v9943_v36 }
 0x5b2   : > { %7966 = vst [vmem:[%s13688_s30 + $0x228] sm:$0xff] %v7838_v23  ;;  %v7841_v58 = vadd.f32 %v7713_v0, %v7380_v40  ;;  %v7843_v53 = vadd.f32 %v7715_v57, %v7573_v24  ;;  %v7382_v62 = vadd.f32 %v7381_v12, %v13678_v4  ;;  %v7575_v43 = vadd.f32 %v7574_v34, %v13680_v61  ;;  %v9944_v23 = vld [vmem:[%s10341_s29 + $0x160] sm:$0xff]  ;;  %v9945_v40 = vld [vmem:[%s10341_s29 + $0x168] sm:$0xff] }
 0x5b3   : > { %7968 = vst [vmem:[%s13688_s30 + $0x238] sm:$0xff] %v7840_v3  ;;  %v7383_v1 = vpop.f32.mrf.mxu1  ;;  %v7576_v37 = vpop.f32.mrf.mxu0  ;;  %v7729_v3 = vunpack.c.l.bf16 %v9944_v23  ;;  %v7731_v24 = vunpack.c.l.bf16 %v9945_v40 }
 0x5b4   : > { %7969 = vst [vmem:[%s13688_s30 + $0x240] sm:$0xff] %v7841_v58  ;;  %7971 = vst [vmem:[%s13688_s30 + $0x250] sm:$0xff] %v7843_v53  ;;  %v7842_v56 = vadd.f32 %v7714_v16, %v7382_v62  ;;  %v7844_v44 = vadd.f32 %v7716_v52, %v7575_v43  ;;  %v7384_v22 = vadd.f32 %v7383_v1, %v13671_v45  ;;  %v7730_v58 = vunpack.c.h.bf16 %v9944_v23 }
 0x5b5   : > { %v7577_v30 = vadd.f32 %v7576_v37, %v13673_v10  ;;  %v7385_v2 = vpop.f32.mrf.mxu1  ;;  %v7578_v18 = vpop.f32.mrf.mxu0  ;;  %v7732_v53 = vunpack.c.h.bf16 %v9945_v40 }
 0x5b6   : > { %7970 = vst [vmem:[%s13688_s30 + $0x248] sm:$0xff] %v7842_v56  ;;  %7972 = vst [vmem:[%s13688_s30 + $0x258] sm:$0xff] %v7844_v44  ;;  %v7845_v38 = vadd.f32 %v7717_v29, %v7384_v22  ;;  %v7386_v49 = vadd.f32 %v7385_v2, %v13678_v4  ;;  %v7579_v13 = vadd.f32 %v7578_v18, %v13680_v61  ;;  %v9946_v56 = vld [vmem:[%s10341_s29 + $0x170] sm:$0xff]  ;;  %v9947_v22 = vld [vmem:[%s10341_s29 + $0x178] sm:$0xff] }
 0x5b7   : > { %v7847_v60 = vadd.f32 %v7719_v6, %v7577_v30  ;;  %v7389_v50 = vpop.f32.mrf.mxu1  ;;  %v7582_v39 = vpop.f32.mrf.mxu0  ;;  %v7733_v44 = vunpack.c.l.bf16 %v9946_v56  ;;  %v7735_v30 = vunpack.c.l.bf16 %v9947_v22 }
 0x5b8   : > { %7973 = vst [vmem:[%s13688_s30 + $0x260] sm:$0xff] %v7845_v38  ;;  %v7846_v20 = vadd.f32 %v7718_v47, %v7386_v49  ;;  %v7848_v35 = vadd.f32 %v7720_v27, %v7579_v13  ;;  %v7390_v26 = vadd.f32 %v7389_v50, %v13671_v45  ;;  %v7583_v59 = vadd.f32 %v7582_v39, %v13673_v10 }
 0x5b9   : > { %7975 = vst [vmem:[%s13688_s30 + $0x270] sm:$0xff] %v7847_v60  ;;  %v7391_v54 = vpop.f32.mrf.mxu1  ;;  %v7584_v11 = vpop.f32.mrf.mxu0  ;;  %v7734_v38 = vunpack.c.h.bf16 %v9946_v56  ;;  %v7736_v60 = vunpack.c.h.bf16 %v9947_v22 }
 0x5ba   : > { %7974 = vst [vmem:[%s13688_s30 + $0x268] sm:$0xff] %v7846_v20  ;;  %7976 = vst [vmem:[%s13688_s30 + $0x278] sm:$0xff] %v7848_v35  ;;  %v7849_v51 = vadd.f32 %v7721_v21, %v7390_v26  ;;  %v7851_v31 = vadd.f32 %v7723_v63, %v7583_v59  ;;  %v7392_v19 = vadd.f32 %v7391_v54, %v13678_v4  ;;  %v9948_v20 = vld [vmem:[%s10341_s29 + $0x180] sm:$0xff]  ;;  %v9949_v26 = vld [vmem:[%s10341_s29 + $0x188] sm:$0xff] }
 0x5bb   : > { %v7585_v0 = vadd.f32 %v7584_v11, %v13680_v61  ;;  %v7393_v28 = vpop.f32.mrf.mxu1  ;;  %v7586_v57 = vpop.f32.mrf.mxu0  ;;  %v7737_v35 = vunpack.c.l.bf16 %v9948_v20  ;;  %v7739_v59 = vunpack.c.l.bf16 %v9949_v26 }
 0x5bc   : > { %7977 = vst [vmem:[%s13688_s30 + $0x280] sm:$0xff] %v7849_v51  ;;  %7979 = vst [vmem:[%s13688_s30 + $0x290] sm:$0xff] %v7851_v31  ;;  %v7850_v9 = vadd.f32 %v7722_v32, %v7392_v19  ;;  %v7394_v15 = vadd.f32 %v7393_v28, %v13671_v45  ;;  %v7587_v14 = vadd.f32 %v7586_v57, %v13673_v10  ;;  %v7738_v51 = vunpack.c.h.bf16 %v9948_v20 }
 0x5bd   : > { %v7852_v17 = vadd.f32 %v7724_v5, %v7585_v0  ;;  %v7395_v16 = vpop.f32.mrf.mxu1  ;;  %v7588_v52 = vpop.f32.mrf.mxu0  ;;  %v7740_v31 = vunpack.c.h.bf16 %v9949_v26 }
 0x5be   : > { %7978 = vst [vmem:[%s13688_s30 + $0x288] sm:$0xff] %v7850_v9  ;;  %v7853_v12 = vadd.f32 %v7725_v46, %v7394_v15  ;;  %v7855_v34 = vadd.f32 %v7727_v8, %v7587_v14  ;;  %v7396_v7 = vadd.f32 %v7395_v16, %v13678_v4  ;;  %v7589_v29 = vadd.f32 %v7588_v52, %v13680_v61  ;;  %v9950_v9 = vld [vmem:[%s10341_s29 + $0x190] sm:$0xff]  ;;  %v9951_v15 = vld [vmem:[%s10341_s29 + $0x198] sm:$0xff] }
 0x5bf   : > { %7980 = vst [vmem:[%s13688_s30 + $0x298] sm:$0xff] %v7852_v17  ;;  %v7399_v48 = vpop.f32.mrf.mxu1  ;;  %v7592_v6 = vpop.f32.mrf.mxu0  ;;  %v7741_v17 = vunpack.c.l.bf16 %v9950_v9  ;;  %v7743_v14 = vunpack.c.l.bf16 %v9951_v15 }
 0x5c0   : > { %7981 = vst [vmem:[%s13688_s30 + $0x2a0] sm:$0xff] %v7853_v12  ;;  %7983 = vst [vmem:[%s13688_s30 + $0x2b0] sm:$0xff] %v7855_v34  ;;  %v7854_v62 = vadd.f32 %v7726_v55, %v7396_v7  ;;  %v7856_v43 = vadd.f32 %v7728_v25, %v7589_v29  ;;  %v7400_v1 = vadd.f32 %v7399_v48, %v13671_v45  ;;  %v7742_v12 = vunpack.c.h.bf16 %v9950_v9 }
 0x5c1   : > { %v7593_v37 = vadd.f32 %v7592_v6, %v13673_v10  ;;  %v7401_v47 = vpop.f32.mrf.mxu1  ;;  %v7594_v27 = vpop.f32.mrf.mxu0  ;;  %v7744_v34 = vunpack.c.h.bf16 %v9951_v15 }
 0x5c2   : > { %7982 = vst [vmem:[%s13688_s30 + $0x2a8] sm:$0xff] %v7854_v62  ;;  %7984 = vst [vmem:[%s13688_s30 + $0x2b8] sm:$0xff] %v7856_v43  ;;  %v7857_v2 = vadd.f32 %v7729_v3, %v7400_v1  ;;  %v7402_v41 = vadd.f32 %v7401_v47, %v13678_v4  ;;  %v7595_v21 = vadd.f32 %v7594_v27, %v13680_v61  ;;  %v9952_v62 = vld [vmem:[%s10341_s29 + $0x1a0] sm:$0xff]  ;;  %v9953_v1 = vld [vmem:[%s10341_s29 + $0x1a8] sm:$0xff] }
 0x5c3   : > { %v7859_v18 = vadd.f32 %v7731_v24, %v7593_v37  ;;  %v7403_v42 = vpop.f32.mrf.mxu1  ;;  %v7596_v63 = vpop.f32.mrf.mxu0  ;;  %v7745_v43 = vunpack.c.l.bf16 %v9952_v62  ;;  %v7747_v37 = vunpack.c.l.bf16 %v9953_v1 }
 0x5c4   : > { %7985 = vst [vmem:[%s13688_s30 + $0x2c0] sm:$0xff] %v7857_v2  ;;  %v7858_v49 = vadd.f32 %v7730_v58, %v7402_v41  ;;  %v7860_v13 = vadd.f32 %v7732_v53, %v7595_v21  ;;  %v7404_v50 = vadd.f32 %v7403_v42, %v13671_v45  ;;  %v7597_v39 = vadd.f32 %v7596_v63, %v13673_v10 }
 0x5c5   : > { %7987 = vst [vmem:[%s13688_s30 + $0x2d0] sm:$0xff] %v7859_v18  ;;  %v7405_v32 = vpop.f32.mrf.mxu1  ;;  %v7598_v5 = vpop.f32.mrf.mxu0  ;;  %v7746_v2 = vunpack.c.h.bf16 %v9952_v62  ;;  %v7748_v18 = vunpack.c.h.bf16 %v9953_v1 }
 0x5c6   : > { %7986 = vst [vmem:[%s13688_s30 + $0x2c8] sm:$0xff] %v7858_v49  ;;  %7988 = vst [vmem:[%s13688_s30 + $0x2d8] sm:$0xff] %v7860_v13  ;;  %v7861_v54 = vadd.f32 %v7733_v44, %v7404_v50  ;;  %v7863_v11 = vadd.f32 %v7735_v30, %v7597_v39  ;;  %v7406_v33 = vadd.f32 %v7405_v32, %v13678_v4  ;;  %v9954_v49 = vld [vmem:[%s10341_s29 + $0x1b0] sm:$0xff]  ;;  %v9955_v50 = vld [vmem:[%s10341_s29 + $0x1b8] sm:$0xff] }
 0x5c7   : > { %v7599_v46 = vadd.f32 %v7598_v5, %v13680_v61  ;;  %v7409_v36 = vpop.f32.mrf.mxu1  ;;  %v7602_v8 = vpop.f32.mrf.mxu0  ;;  %v7749_v13 = vunpack.c.l.bf16 %v9954_v49  ;;  %v7751_v39 = vunpack.c.l.bf16 %v9955_v50 }
 0x5c8   : > { %7989 = vst [vmem:[%s13688_s30 + $0x2e0] sm:$0xff] %v7861_v54  ;;  %7991 = vst [vmem:[%s13688_s30 + $0x2f0] sm:$0xff] %v7863_v11  ;;  %v7862_v19 = vadd.f32 %v7734_v38, %v7406_v33  ;;  %v7410_v28 = vadd.f32 %v7409_v36, %v13671_v45  ;;  %v7603_v57 = vadd.f32 %v7602_v8, %v13673_v10  ;;  %v7750_v54 = vunpack.c.h.bf16 %v9954_v49 }
 0x5c9   : > { %v7864_v0 = vadd.f32 %v7736_v60, %v7599_v46  ;;  %v7411_v55 = vpop.f32.mrf.mxu1  ;;  %v7604_v25 = vpop.f32.mrf.mxu0  ;;  %v7752_v11 = vunpack.c.h.bf16 %v9955_v50 }
 0x5ca   : > { %7990 = vst [vmem:[%s13688_s30 + $0x2e8] sm:$0xff] %v7862_v19  ;;  %v7865_v16 = vadd.f32 %v7737_v35, %v7410_v28  ;;  %v7867_v52 = vadd.f32 %v7739_v59, %v7603_v57  ;;  %v7412_v23 = vadd.f32 %v7411_v55, %v13678_v4  ;;  %v7605_v3 = vadd.f32 %v7604_v25, %v13680_v61  ;;  %v9956_v19 = vld [vmem:[%s10341_s29 + $0x1c0] sm:$0xff]  ;;  %v9957_v28 = vld [vmem:[%s10341_s29 + $0x1c8] sm:$0xff] }
 0x5cb   : > { %7992 = vst [vmem:[%s13688_s30 + $0x2f8] sm:$0xff] %v7864_v0  ;;  %v7413_v40 = vpop.f32.mrf.mxu1  ;;  %v7606_v24 = vpop.f32.mrf.mxu0  ;;  %v7753_v0 = vunpack.c.l.bf16 %v9956_v19  ;;  %v7755_v57 = vunpack.c.l.bf16 %v9957_v28 }
 0x5cc   : > { %7993 = vst [vmem:[%s13688_s30 + $0x300] sm:$0xff] %v7865_v16  ;;  %7995 = vst [vmem:[%s13688_s30 + $0x310] sm:$0xff] %v7867_v52  ;;  %v7866_v7 = vadd.f32 %v7738_v51, %v7412_v23  ;;  %v7868_v29 = vadd.f32 %v7740_v31, %v7605_v3  ;;  %v7414_v48 = vadd.f32 %v7413_v40, %v13671_v45  ;;  %v7754_v16 = vunpack.c.h.bf16 %v9956_v19 }
 0x5cd   : > { %v7607_v6 = vadd.f32 %v7606_v24, %v13673_v10  ;;  %v7415_v58 = vpop.f32.mrf.mxu1  ;;  %v7608_v53 = vpop.f32.mrf.mxu0  ;;  %v7756_v52 = vunpack.c.h.bf16 %v9957_v28 }
 0x5ce   : > { %7994 = vst [vmem:[%s13688_s30 + $0x308] sm:$0xff] %v7866_v7  ;;  %7996 = vst [vmem:[%s13688_s30 + $0x318] sm:$0xff] %v7868_v29  ;;  %v7869_v47 = vadd.f32 %v7741_v17, %v7414_v48  ;;  %v7416_v56 = vadd.f32 %v7415_v58, %v13678_v4  ;;  %v7609_v44 = vadd.f32 %v7608_v53, %v13680_v61  ;;  %v9958_v7 = vld [vmem:[%s10341_s29 + $0x1d0] sm:$0xff]  ;;  %v9959_v48 = vld [vmem:[%s10341_s29 + $0x1d8] sm:$0xff] }
 0x5cf   : > { %v7871_v27 = vadd.f32 %v7743_v14, %v7607_v6  ;;  %v7419_v22 = vpop.f32.mrf.mxu1  ;;  %v7612_v30 = vpop.f32.mrf.mxu0  ;;  %v7757_v29 = vunpack.c.l.bf16 %v9958_v7  ;;  %v7759_v6 = vunpack.c.l.bf16 %v9959_v48 }
 0x5d0   : > { %7997 = vst [vmem:[%s13688_s30 + $0x320] sm:$0xff] %v7869_v47  ;;  %v7870_v41 = vadd.f32 %v7742_v12, %v7416_v56  ;;  %v7872_v21 = vadd.f32 %v7744_v34, %v7609_v44  ;;  %v7420_v42 = vadd.f32 %v7419_v22, %v13671_v45  ;;  %v7613_v63 = vadd.f32 %v7612_v30, %v13673_v10 }
 0x5d1   : > { %7999 = vst [vmem:[%s13688_s30 + $0x330] sm:$0xff] %v7871_v27  ;;  %v7421_v38 = vpop.f32.mrf.mxu1  ;;  %v7614_v60 = vpop.f32.mrf.mxu0  ;;  %v7758_v47 = vunpack.c.h.bf16 %v9958_v7  ;;  %v7760_v27 = vunpack.c.h.bf16 %v9959_v48 }
 0x5d2   : > { %7998 = vst [vmem:[%s13688_s30 + $0x328] sm:$0xff] %v7870_v41  ;;  %8000 = vst [vmem:[%s13688_s30 + $0x338] sm:$0xff] %v7872_v21  ;;  %v7873_v32 = vadd.f32 %v7745_v43, %v7420_v42  ;;  %v7875_v5 = vadd.f32 %v7747_v37, %v7613_v63  ;;  %v7422_v20 = vadd.f32 %v7421_v38, %v13678_v4  ;;  %v9960_v41 = vld [vmem:[%s10341_s29 + $0x1e0] sm:$0xff]  ;;  %v9961_v42 = vld [vmem:[%s10341_s29 + $0x1e8] sm:$0xff] }
 0x5d3   : > { %v7615_v35 = vadd.f32 %v7614_v60, %v13680_v61  ;;  %v7423_v26 = vpop.f32.mrf.mxu1  ;;  %v7616_v59 = vpop.f32.mrf.mxu0  ;;  %v7761_v21 = vunpack.c.l.bf16 %v9960_v41  ;;  %v7763_v63 = vunpack.c.l.bf16 %v9961_v42 }
 0x5d4   : > { %8001 = vst [vmem:[%s13688_s30 + $0x340] sm:$0xff] %v7873_v32  ;;  %8003 = vst [vmem:[%s13688_s30 + $0x350] sm:$0xff] %v7875_v5  ;;  %v7874_v33 = vadd.f32 %v7746_v2, %v7422_v20  ;;  %v7424_v36 = vadd.f32 %v7423_v26, %v13671_v45  ;;  %v7617_v8 = vadd.f32 %v7616_v59, %v13673_v10  ;;  %v7762_v32 = vunpack.c.h.bf16 %v9960_v41 }
 0x5d5   : > { %v7876_v46 = vadd.f32 %v7748_v18, %v7615_v35  ;;  %v7425_v51 = vpop.f32.mrf.mxu1  ;;  %v7618_v31 = vpop.f32.mrf.mxu0  ;;  %v7764_v5 = vunpack.c.h.bf16 %v9961_v42 }
 0x5d6   : > { %8002 = vst [vmem:[%s13688_s30 + $0x348] sm:$0xff] %v7874_v33  ;;  %v7877_v55 = vadd.f32 %v7749_v13, %v7424_v36  ;;  %v7879_v25 = vadd.f32 %v7751_v39, %v7617_v8  ;;  %v7426_v9 = vadd.f32 %v7425_v51, %v13678_v4  ;;  %v7619_v17 = vadd.f32 %v7618_v31, %v13680_v61  ;;  %v9962_v33 = vld [vmem:[%s10341_s29 + $0x1f0] sm:$0xff]  ;;  %v9963_v36 = vld [vmem:[%s10341_s29 + $0x1f8] sm:$0xff]  ;;  %s8620_s29 = sshll.u32 %s10217_s28, 14  ;;  %s8026_s28 = scalar_lea.sflag [#allocation6], %s10337_s13 }
 0x5d7   : > { %8004 = vst [vmem:[%s13688_s30 + $0x358] sm:$0xff] %v7876_v46  ;;  %v7429_v15 = vpop.f32.mrf.mxu1  ;;  %v7622_v14 = vpop.f32.mrf.mxu0  ;;  %v7765_v46 = vunpack.c.l.bf16 %v9962_v33  ;;  %v7767_v8 = vunpack.c.l.bf16 %v9963_v36  ;;  %s14003_s18 = scalar_lea.hbm %s14059_s7, %s8620_s29 }
 0x5d8   : > { %8005 = vst [vmem:[%s13688_s30 + $0x360] sm:$0xff] %v7877_v55  ;;  %8007 = vst [vmem:[%s13688_s30 + $0x370] sm:$0xff] %v7879_v25  ;;  %v7878_v23 = vadd.f32 %v7750_v54, %v7426_v9  ;;  %v7880_v3 = vadd.f32 %v7752_v11, %v7619_v17  ;;  %v7430_v40 = vadd.f32 %v7429_v15, %v13671_v45  ;;  %v7766_v55 = vunpack.c.h.bf16 %v9962_v33 }
 0x5d9   : > { %v7623_v24 = vadd.f32 %v7622_v14, %v13673_v10  ;;  %v7431_v12 = vpop.f32.mrf.mxu1  ;;  %v7624_v34 = vpop.f32.mrf.mxu0  ;;  %v7768_v25 = vunpack.c.h.bf16 %v9963_v36 }
 0x5da   : > { %8006 = vst [vmem:[%s13688_s30 + $0x368] sm:$0xff] %v7878_v23  ;;  %8008 = vst [vmem:[%s13688_s30 + $0x378] sm:$0xff] %v7880_v3  ;;  %v7881_v58 = vadd.f32 %v7753_v0, %v7430_v40  ;;  %v7432_v62 = vadd.f32 %v7431_v12, %v13678_v4  ;;  %v7625_v43 = vadd.f32 %v7624_v34, %v13680_v61 }
 0x5db   : > { %v7883_v53 = vadd.f32 %v7755_v57, %v7623_v24  ;;  %v7433_v1 = vpop.f32.mrf.mxu1  ;;  %v7626_v37 = vpop.f32.mrf.mxu0 }
 0x5dc   : > { %8009 = vst [vmem:[%s13688_s30 + $0x380] sm:$0xff] %v7881_v58  ;;  %v7882_v56 = vadd.f32 %v7754_v16, %v7432_v62  ;;  %v7884_v44 = vadd.f32 %v7756_v52, %v7625_v43  ;;  %v7434_v22 = vadd.f32 %v7433_v1, %v13671_v45  ;;  %v7627_v30 = vadd.f32 %v7626_v37, %v13673_v10 }
 0x5dd   : > { %8011 = vst [vmem:[%s13688_s30 + $0x390] sm:$0xff] %v7883_v53  ;;  %v7435_v2 = vpop.f32.mrf.mxu1  ;;  %v7628_v18 = vpop.f32.mrf.mxu0 }
 0x5de   : > { %8010 = vst [vmem:[%s13688_s30 + $0x388] sm:$0xff] %v7882_v56  ;;  %8012 = vst [vmem:[%s13688_s30 + $0x398] sm:$0xff] %v7884_v44  ;;  %v7885_v38 = vadd.f32 %v7757_v29, %v7434_v22  ;;  %v7887_v60 = vadd.f32 %v7759_v6, %v7627_v30  ;;  %v7436_v49 = vadd.f32 %v7435_v2, %v13678_v4 }
 0x5df   : > { %v7629_v13 = vadd.f32 %v7628_v18, %v13680_v61  ;;  %v7439_v50 = vpop.f32.mrf.mxu1  ;;  %v7632_v39 = vpop.f32.mrf.mxu0 }
 0x5e0   : > { %8013 = vst [vmem:[%s13688_s30 + $0x3a0] sm:$0xff] %v7885_v38  ;;  %8015 = vst [vmem:[%s13688_s30 + $0x3b0] sm:$0xff] %v7887_v60  ;;  %v7886_v20 = vadd.f32 %v7758_v47, %v7436_v49  ;;  %v7440_v26 = vadd.f32 %v7439_v50, %v13671_v45  ;;  %v7633_v59 = vadd.f32 %v7632_v39, %v13673_v10 }
 0x5e1   : > { %v7888_v35 = vadd.f32 %v7760_v27, %v7629_v13  ;;  %v7441_v54 = vpop.f32.mrf.mxu1  ;;  %v7634_v11 = vpop.f32.mrf.mxu0 }
 0x5e2   : > { %8014 = vst [vmem:[%s13688_s30 + $0x3a8] sm:$0xff] %v7886_v20  ;;  %v7889_v51 = vadd.f32 %v7761_v21, %v7440_v26  ;;  %v7891_v31 = vadd.f32 %v7763_v63, %v7633_v59  ;;  %v7442_v19 = vadd.f32 %v7441_v54, %v13678_v4  ;;  %v7635_v0 = vadd.f32 %v7634_v11, %v13680_v61 }
 0x5e3   : > { %8016 = vst [vmem:[%s13688_s30 + $0x3b8] sm:$0xff] %v7888_v35  ;;  %v7443_v28 = vpop.f32.mrf.mxu1  ;;  %v7636_v57 = vpop.f32.mrf.mxu0 }
 0x5e4   : > { %8017 = vst [vmem:[%s13688_s30 + $0x3c0] sm:$0xff] %v7889_v51  ;;  %8019 = vst [vmem:[%s13688_s30 + $0x3d0] sm:$0xff] %v7891_v31  ;;  %v7890_v9 = vadd.f32 %v7762_v32, %v7442_v19  ;;  %v7892_v17 = vadd.f32 %v7764_v5, %v7635_v0  ;;  %v7444_v15 = vadd.f32 %v7443_v28, %v13671_v45 }
 0x5e5   : > { %v7637_v14 = vadd.f32 %v7636_v57, %v13673_v10  ;;  %v7445_v16 = vpop.f32.mrf.mxu1  ;;  %v7638_v52 = vpop.f32.mrf.mxu0 }
 0x5e6   : > { %8018 = vst [vmem:[%s13688_s30 + $0x3c8] sm:$0xff] %v7890_v9  ;;  %8020 = vst [vmem:[%s13688_s30 + $0x3d8] sm:$0xff] %v7892_v17  ;;  %v7893_v23 = vadd.f32 %v7765_v46, %v7444_v15  ;;  %v7446_v40 = vadd.f32 %v7445_v16, %v13678_v4  ;;  %v7639_v24 = vadd.f32 %v7638_v52, %v13680_v61 }
 0x5e7   : > { %v7895_v3 = vadd.f32 %v7767_v8, %v7637_v14 }
 0x5e8   : > { %8021 = vst [vmem:[%s13688_s30 + $0x3e0] sm:$0xff] %v7893_v23  ;;  %v7894_v45 = vadd.f32 %v7766_v55, %v7446_v40  ;;  %v7896_v10 = vadd.f32 %v7768_v25, %v7639_v24 }
 0x5e9   : > { %8023 = vst [vmem:[%s13688_s30 + $0x3f0] sm:$0xff] %v7895_v3 }
 0x5ea   : > { %8022 = vst [vmem:[%s13688_s30 + $0x3e8] sm:$0xff] %v7894_v45  ;;  %8024 = vst [vmem:[%s13688_s30 + $0x3f8] sm:$0xff] %v7896_v10 }
 0x5eb   : > { %10083 = shalt.err (!%p10080_p9)
}
 0x5ec   : > { %s10084_s11 = scalar_lea.hbm %s14003_s18, 16384  ;;  %s10088_s16 = scalar_lea.hbm %s14059_s7, 32768 }
 0x5ed   : > { %p10085_p1 = scmp.ne.s32.totalorder %s14003_s18, %s10084_s11  ;;  %p10089_p11 = scmp.lt.s32.totalorder %s14003_s18, %s14059_s7 }
 0x5ee   : > { %p10090_p13 = scmp.lt.s32.totalorder %s10088_s16, %s10084_s11 }
 0x5ef   : > { %p10086_p8 = pnand %p10085_p1, %p14880_p6 }
 0x5f0   : > { %p10091_p2 = por %p10090_p13, %p10089_p11 }
 0x5f1   : > { %p10087_p10 = pneg %p10086_p8 }
 0x5f3   : > { %p10092_p4 = pnand %p10091_p2, %p10087_p10 }
 0x5f5   : > { %10095 = shalt.err (!%p10092_p4)
}
 0x5f6   : > { %s10154_s10 = smov 512   ;;  %s10155_s15 = smov 32  }
 0x5f7   : > { %9395 = dma.vmem_to_hbm [thread:$0]  (%p14880_p6), %s14005_s9, 16384, %s14003_s18, %s8026_s28, %s10154_s10, %s10154_s10, %s10155_s15  }
 0x5f8 PF: > { %s8054_s19 = sand.u32 1, %s10130_s24   ;;  %p14881_p12 = scmp.ne.s32.totalorder %s14192_s8, 0 }
 0x5f9   : > { %p14882_p0 = scmp.ge.s32.totalorder %s10142_s27, 2  ;;  %s8055_s14 = scalar_lea.sflag [#allocation6], %s8054_s19 }
 0x5fb   : > { %p9412_p5 = pnand %p14882_p0, %p14881_p12 }
 0x5fd   : > { %p9413_p3 = pneg %p9412_p5 }
 0x5ff   : > { %10125 = dma.done.wait (%p9413_p3), %s8055_s14, 16384  }
 0x600   : > { %10127 = vsyncadd (%p9413_p3), %s8055_s14, 4294950912  ;;  %p22_p7 = scmp.ge.s32.totalorder %s10279_s17, 4   ;;  %s14883_s24 = smov %s10134_s25 }
 0x601   : > { %s14884_s25 = smov %s10138_s26  ;;  %s14885_s26 = smov %s10289_s20 }
 0x602   : > { %s14886_s27 = smov %s10279_s17  ;;  %24 = sbr.rel (!%p22_p7) target bundleno = 9 (0x9), region = 108 }
 0x607   :  { %8060 = vsyncpa [#allocation5], 1 }
 0x608   :  { %8062 = vsyncpa [#allocation5 + $0x1], 1 }
 0x609   :  { %8063 = vsyncpa [#allocation8], 1 }
 0x60a   :  { %8064 = vsyncpa [#allocation11], 1 }
 0x60b   :  { %8065 = vsyncpa [#allocation6], 1 }
 0x60c   :  { %8067 = vsyncpa [#allocation6 + $0x1], 1 }

</bundles_post_ra>
